<compile_context>
chip_gen: v7x
topology: tpu7x:2x2x1
jax: 0.10.0
libtpu: 0.0.40
codegen_flags: <defaults>
</compile_context>

<pallas_src>
import functools

import jax
import jax.numpy as jnp
from jax import lax
from jax.experimental import pallas as pl
from jax.experimental.pallas import tpu as pltpu


# ----------------------------- Pallas kernel ------------------------------ #

def _matmul_bias_kernel(x_ref, w_ref, b_ref, o_ref, acc_ref, *, apply_relu):
    """One (tm x N) output slab, accumulated over the K grid axis."""
    k = pl.program_id(1)

    @pl.when(k == 0)
    def _():
        acc_ref[...] = jnp.zeros_like(acc_ref)

    acc_ref[...] += jnp.dot(x_ref[...], w_ref[...],
                            preferred_element_type=jnp.float32)

    @pl.when(k == pl.num_programs(1) - 1)
    def _():
        out = acc_ref[...] + b_ref[...]          # bias broadcast (1, N), f32
        if apply_relu:
            out = jnp.maximum(out, 0.0)
        o_ref[...] = out.astype(o_ref.dtype)


def _round_up(x, m):
    return (x + m - 1) // m * m


def _pick_tm(M):
    """>=2 M blocks when feasible (feeds both v7x TensorCores); cap at 128 rows."""
    m8 = _round_up(M, 8)
    if m8 <= 256:
        return max(8, _round_up((m8 + 1) // 2, 8))
    return 128


def _pick_tk(K, N, itemsize, max_w_block_bytes=4 * 1024 * 1024):
    """Largest K slab that divides K exactly with a weight block <= ~4 MiB."""
    tk = K
    while (tk * N * itemsize > max_w_block_bytes
           and tk % 2 == 0 and (tk // 2) % 128 == 0):
        tk //= 2
    return tk


def pallas_matmul_bias(x, w, b, *, apply_relu):
    """out = relu?(x @ w + b); x:(M,K), w:(K,N), b:(N,); f32 accumulation/output."""
    M, K = x.shape
    Kw, N = w.shape
    assert K == Kw and b.shape == (N,)
    assert K % 128 == 0 and N % 128 == 0, (K, N)

    tm = _pick_tm(M)
    tk = _pick_tk(K, N, w.dtype.itemsize)
    Mp = _round_up(M, tm)
    xp = jnp.pad(x, ((0, Mp - M), (0, 0))) if Mp != M else x
    b2 = b.astype(jnp.float32).reshape(1, N)

    grid = (Mp // tm, K // tk)
    out = pl.pallas_call(
        functools.partial(_matmul_bias_kernel, apply_relu=apply_relu),
        out_shape=jax.ShapeDtypeStruct((Mp, N), jnp.float32),
        grid_spec=pltpu.PrefetchScalarGridSpec(
            num_scalar_prefetch=0,
            grid=grid,
            in_specs=[
                pl.BlockSpec((tm, tk), lambda i, k: (i, k)),   # activations
                pl.BlockSpec((tk, N), lambda i, k: (k, 0)),    # weights (full N)
                pl.BlockSpec((1, N), lambda i, k: (0, 0)),     # bias (resident)
            ],
            out_specs=pl.BlockSpec((tm, N), lambda i, k: (i, 0)),
            scratch_shapes=[pltpu.VMEM((tm, N), jnp.float32)],
        ),
        compiler_params=pltpu.CompilerParams(
            dimension_semantics=("parallel", "arbitrary"),
            vmem_limit_bytes=32 * 1024 * 1024),
    )(xp, w, b2)
    return out if Mp == M else out[:M]


# ---------------- ConvTranspose2d(3, s=2, p=1): phase decomposition -------- #
#
# With stride 2 / padding 1, output pixel (2m+ph, 2n+pw) only touches the 2x2
# input patch {x[m,n], x[m,n+1], x[m+1,n], x[m+1,n+1]} through a fixed subset
# of kernel taps per parity phase (ph, pw):
#   (0,0): x[m,n]*W[1,1]
#   (0,1): x[m,n]*W[1,2] + x[m,n+1]*W[1,0]
#   (1,0): x[m,n]*W[2,1] + x[m+1,n]*W[0,1]
#   (1,1): x[m,n]*W[2,2] + x[m,n+1]*W[2,0] + x[m+1,n]*W[0,2] + x[m+1,n+1]*W[0,0]
# so the whole layer is one (4*Cin -> 4*Cout) matmul + pixel-shuffle + crop.

def _conv_t_weight_to_matmul(w_t):
    """(Cin, Cout, 3, 3) ConvTranspose2d weight -> (4*Cin, 4*Cout) matmul weight."""
    cin, cout = w_t.shape[0], w_t.shape[1]
    wm = jnp.zeros((4, cin, 4, cout), w_t.dtype)
    # phase g = 2*ph + pw : list of (tap, kh, kw); taps are
    # 0=(m,n), 1=(m,n+1), 2=(m+1,n), 3=(m+1,n+1)
    taps = {
        0: [(0, 1, 1)],
        1: [(0, 1, 2), (1, 1, 0)],
        2: [(0, 2, 1), (2, 0, 1)],
        3: [(0, 2, 2), (1, 2, 0), (2, 0, 2), (3, 0, 0)],
    }
    for g, entries in taps.items():
        for tap, kh, kw in entries:
            wm = wm.at[tap, :, g, :].set(w_t[:, :, kh, kw])
    return wm.reshape(4 * cin, 4 * cout)


def prepare_params(params, compute_dtype=jnp.bfloat16):
    """One-time conversion of PyTorch-layout weights to matmul-ready form."""
    return {
        "w1m": _conv_t_weight_to_matmul(params["w1"]).astype(compute_dtype),
        "b1m": jnp.tile(params["b1"].astype(jnp.float32), 4),
        "w2m": _conv_t_weight_to_matmul(params["w2"]).astype(compute_dtype),
        "b2m": jnp.tile(params["b2"].astype(jnp.float32), 4),
    }


def conv_transpose_3x3_s2_p1(x_nhwc, wmat, bvec, *, apply_relu):
    """x_nhwc: (N,H,W,Cin); wmat: (4*Cin, 4*Cout); bvec: (4*Cout,) -> (N,2H-1,2W-1,Cout)."""
    n, h, w, cin = x_nhwc.shape
    cout = wmat.shape[1] // 4
    assert wmat.shape[0] == 4 * cin

    # 2x2 tap gather; pad one zero row/col at the bottom/right -- the only
    # output positions that consume it are cropped away below.
    xc = x_nhwc.astype(wmat.dtype)
    xp = jnp.pad(xc, ((0, 0), (0, 1), (0, 1), (0, 0)))
    pat = jnp.concatenate(
        [xp[:, :h, :w, :], xp[:, :h, 1:, :],
         xp[:, 1:, :w, :], xp[:, 1:, 1:, :]], axis=-1)          # (n, h, w, 4*cin)
    pat = pat.reshape(n * h * w, 4 * cin)

    slab = pallas_matmul_bias(pat, wmat, bvec, apply_relu=apply_relu)  # (n*h*w, 4*cout)
    slab = slab.reshape(n, h, w, 2, 2, cout)
    y = jnp.transpose(slab, (0, 1, 3, 2, 4, 5)).reshape(n, 2 * h, 2 * w, cout)
    return y[:, :2 * h - 1, :2 * w - 1, :]


# ------------------------------- LocalAdapt -------------------------------- #

def init_params(key):
    k1, k2, k3, k4 = jax.random.split(key, 4)
    return {
        "w1": 0.02 * jax.random.normal(k1, (1024, 256, 3, 3), jnp.float32),
        "b1": 0.02 * jax.random.normal(k2, (256,), jnp.float32),
        "w2": 0.02 * jax.random.normal(k3, (256, 128, 3, 3), jnp.float32),
        "b2": 0.02 * jax.random.normal(k4, (128,), jnp.float32),
    }


def local_adapt_forward(x_nchw, prepared):
    x = jnp.transpose(x_nchw, (0, 2, 3, 1))                        # NCHW -> NHWC
    y = conv_transpose_3x3_s2_p1(x, prepared["w1m"], prepared["b1m"], apply_relu=True)
    y = conv_transpose_3x3_s2_p1(y, prepared["w2m"], prepared["b2m"], apply_relu=False)
    return jnp.transpose(y, (0, 3, 1, 2))                          # NHWC -> NCHW


# --------------------------- pure-JAX reference ----------------------------- #

def _ref_conv_transpose(x_nhwc, w_t, bias):
    wc = jnp.transpose(jnp.flip(w_t, axis=(2, 3)), (2, 3, 0, 1))   # HWIO
    y = lax.conv_general_dilated(
        x_nhwc, wc, window_strides=(1, 1), padding=((1, 1), (1, 1)),
        lhs_dilation=(2, 2), dimension_numbers=("NHWC", "HWIO", "NHWC"))
    return y + bias


def local_adapt_ref(x_nchw, params):
    x = jnp.transpose(x_nchw, (0, 2, 3, 1))
    y = jnp.maximum(_ref_conv_transpose(x, params["w1"], params["b1"]), 0.0)
    y = _ref_conv_transpose(y, params["w2"], params["b2"])
    return jnp.transpose(y, (0, 3, 1, 2))


if __name__ == "__main__":
    key = jax.random.PRNGKey(0)
    kx, kp = jax.random.split(key)

    # channels are fixed by the module (1024 -> 256 -> 128); small spatial/batch
    x = jax.random.normal(kx, (2, 1024, 8, 8), jnp.float32)        # NCHW
    params = init_params(kp)

    ref = local_adapt_ref(x, params)

    # 1) f32-operand run: validates the phase decomposition + kernel exactly.
    out_f32 = jax.jit(local_adapt_forward)(x, prepare_params(params, jnp.float32))
    out_f32 = jax.block_until_ready(out_f32)
    assert out_f32.shape == (2, 128, 29, 29), out_f32.shape
    err_f32 = float(jnp.max(jnp.abs(out_f32 - ref)))
    assert jnp.allclose(out_f32, ref, rtol=5e-3, atol=5e-3), err_f32

    # 2) fast path: bf16 MXU operands, f32 accumulation / bias / ReLU.
    out = jax.jit(local_adapt_forward)(x, prepare_params(params, jnp.bfloat16))
    out = jax.block_until_ready(out)
    assert out.shape == (2, 128, 29, 29), out.shape
    err_bf16 = float(jnp.max(jnp.abs(out - ref)))
    assert jnp.allclose(out, ref, rtol=5e-2, atol=5e-2), err_bf16

    print("KERNEL_OK")
</pallas_src>

<mosaic_0001>
module attributes {stable_mosaic.version = 11 : i64} {
  func.func @_matmul_bias_kernel(%arg0: i32, %arg1: i32, %arg2: memref<64x1024xf32, #tpu.memory_space<vmem>>, %arg3: memref<1024x1024xf32, #tpu.memory_space<vmem>>, %arg4: memref<1x1024xf32, #tpu.memory_space<vmem>>, %arg5: memref<64x1024xf32, #tpu.memory_space<vmem>>, %arg6: memref<64x1024xf32, #tpu.memory_space<vmem>>) attributes {dimension_semantics = [#tpu.dimension_semantics<parallel>, #tpu.dimension_semantics<arbitrary>], iteration_bounds = array<i64: 2, 4>, scalar_prefetch = 0 : i64, scratch_operands = 1 : i64, tpu.core_type = #tpu.core_type<tc>, window_params = [{transform_indices = @transform_0, window_bounds = array<i64: 64, 1024>}, {transform_indices = @transform_1, window_bounds = array<i64: 1024, 1024>}, {pipeline_mode = #tpu.pipeline_mode<synchronous>, transform_indices = @transform_2, window_bounds = array<i64: 1, 1024>}, {transform_indices = @transform_3, window_bounds = array<i64: 64, 1024>}]} {
    %c0_i32 = arith.constant 0 : i32
    %0 = arith.cmpi eq, %arg1, %c0_i32 : i32
    %1 = arith.extui %0 : i1 to i32
    %c0_i32_0 = arith.constant 0 : i32
    %2 = arith.cmpi ne, %1, %c0_i32_0 : i32
    scf.if %2 {
      %cst_9 = arith.constant 0.000000e+00 : f32
      %12 = vector.broadcast %cst_9 : f32 to vector<64x1024xf32>
      %c0_10 = arith.constant 0 : index
      %c0_11 = arith.constant 0 : index
      %13 = vector.load %arg6[%c0_10, %c0_11] : memref<64x1024xf32, #tpu.memory_space<vmem>>, vector<64x1024xf32>
      tpu.vector_store %arg6[%c0_10, %c0_11], %12 {strides = array<i32>} : memref<64x1024xf32, #tpu.memory_space<vmem>>, vector<64x1024xf32>,
    } else {
    }
    %c0 = arith.constant 0 : index
    %c0_1 = arith.constant 0 : index
    %3 = vector.load %arg6[%c0, %c0_1] : memref<64x1024xf32, #tpu.memory_space<vmem>>, vector<64x1024xf32>
    %c0_2 = arith.constant 0 : index
    %c0_3 = arith.constant 0 : index
    %4 = vector.load %arg2[%c0_2, %c0_3] : memref<64x1024xf32, #tpu.memory_space<vmem>>, vector<64x1024xf32>
    %c0_4 = arith.constant 0 : index
    %c0_5 = arith.constant 0 : index
    %5 = vector.load %arg3[%c0_4, %c0_5] : memref<1024x1024xf32, #tpu.memory_space<vmem>>, vector<1024x1024xf32>
    %cst = arith.constant dense<0.000000e+00> : vector<64x1024xf32>
    %6 = tpu.matmul %4, %5, %cst {dimension_numbers = #tpu.dot_dimension_numbers<[1], [0], [0], [1], [0, 0, 1, 1], [], []>} : vector<64x1024xf32>, vector<1024x1024xf32>, vector<64x1024xf32> -> vector<64x1024xf32>
    %7 = arith.addf %3, %6 : vector<64x1024xf32>
    %c0_6 = arith.constant 0 : index
    %c0_7 = arith.constant 0 : index
    %8 = vector.load %arg6[%c0_6, %c0_7] : memref<64x1024xf32, #tpu.memory_space<vmem>>, vector<64x1024xf32>
    tpu.vector_store %arg6[%c0_6, %c0_7], %7 {strides = array<i32>} : memref<64x1024xf32, #tpu.memory_space<vmem>>, vector<64x1024xf32>,
    %c3_i32 = arith.constant 3 : i32
    %9 = arith.cmpi eq, %arg1, %c3_i32 : i32
    %10 = arith.extui %9 : i1 to i32
    %c0_i32_8 = arith.constant 0 : i32
    %11 = arith.cmpi ne, %10, %c0_i32_8 : i32
    scf.if %11 {
      %c0_9 = arith.constant 0 : index
      %c0_10 = arith.constant 0 : index
      %12 = vector.load %arg6[%c0_9, %c0_10] : memref<64x1024xf32, #tpu.memory_space<vmem>>, vector<64x1024xf32>
      %c0_11 = arith.constant 0 : index
      %c0_12 = arith.constant 0 : index
      %13 = vector.load %arg4[%c0_11, %c0_12] : memref<1x1024xf32, #tpu.memory_space<vmem>>, vector<1x1024xf32>
      %14 = vector.broadcast %13 : vector<1x1024xf32> to vector<64x1024xf32>
      %15 = arith.addf %12, %14 : vector<64x1024xf32>
      %cst_13 = arith.constant 0.000000e+00 : f32
      %16 = vector.broadcast %cst_13 : f32 to vector<64x1024xf32>
      %17 = arith.maximumf %15, %16 : vector<64x1024xf32>
      %c0_14 = arith.constant 0 : index
      %c0_15 = arith.constant 0 : index
      %18 = vector.load %arg5[%c0_14, %c0_15] : memref<64x1024xf32, #tpu.memory_space<vmem>>, vector<64x1024xf32>
      tpu.vector_store %arg5[%c0_14, %c0_15], %17 {strides = array<i32>} : memref<64x1024xf32, #tpu.memory_space<vmem>>, vector<64x1024xf32>,
    } else {
    }
    return
  }
  func.func @transform_0(%arg0: i32, %arg1: i32) -> (i32, i32) {
    %c0_i32 = arith.constant 0 : i32
    return %arg0, %arg1 : i32, i32
  }
  func.func @transform_1(%arg0: i32, %arg1: i32) -> (i32, i32) {
    %c0_i32 = arith.constant 0 : i32
    %c0_i32_0 = arith.constant 0 : i32
    return %arg1, %c0_i32 : i32, i32
  }
  func.func @transform_2(%arg0: i32, %arg1: i32) -> (i32, i32) {
    %c0_i32 = arith.constant 0 : i32
    %c0_i32_0 = arith.constant 0 : i32
    %c0_i32_1 = arith.constant 0 : i32
    return %c0_i32, %c0_i32_0 : i32, i32
  }
  func.func @transform_3(%arg0: i32, %arg1: i32) -> (i32, i32) {
    %c0_i32 = arith.constant 0 : i32
    %c0_i32_0 = arith.constant 0 : i32
    return %arg0, %c0_i32 : i32, i32
  }
}

module attributes {stable_mosaic.version = 11 : i64} {
  func.func @_matmul_bias_kernel(%arg0: i32, %arg1: i32, %arg2: memref<128x1024xf32, #tpu.memory_space<vmem>>, %arg3: memref<1024x512xf32, #tpu.memory_space<vmem>>, %arg4: memref<1x512xf32, #tpu.memory_space<vmem>>, %arg5: memref<128x512xf32, #tpu.memory_space<vmem>>, %arg6: memref<128x512xf32, #tpu.memory_space<vmem>>) attributes {dimension_semantics = [#tpu.dimension_semantics<parallel>, #tpu.dimension_semantics<arbitrary>], iteration_bounds = array<i64: 4, 1>, scalar_prefetch = 0 : i64, scratch_operands = 1 : i64, tpu.core_type = #tpu.core_type<tc>, window_params = [{transform_indices = @transform_0, window_bounds = array<i64: 128, 1024>}, {transform_indices = @transform_1, window_bounds = array<i64: 1024, 512>}, {pipeline_mode = #tpu.pipeline_mode<synchronous>, transform_indices = @transform_2, window_bounds = array<i64: 1, 512>}, {transform_indices = @transform_3, window_bounds = array<i64: 128, 512>}]} {
    %c0_i32 = arith.constant 0 : i32
    %0 = arith.cmpi eq, %arg1, %c0_i32 : i32
    %1 = arith.extui %0 : i1 to i32
    %c0_i32_0 = arith.constant 0 : i32
    %2 = arith.cmpi ne, %1, %c0_i32_0 : i32
    scf.if %2 {
      %cst_10 = arith.constant 0.000000e+00 : f32
      %12 = vector.broadcast %cst_10 : f32 to vector<128x512xf32>
      %c0_11 = arith.constant 0 : index
      %c0_12 = arith.constant 0 : index
      %13 = vector.load %arg6[%c0_11, %c0_12] : memref<128x512xf32, #tpu.memory_space<vmem>>, vector<128x512xf32>
      tpu.vector_store %arg6[%c0_11, %c0_12], %12 {strides = array<i32>} : memref<128x512xf32, #tpu.memory_space<vmem>>, vector<128x512xf32>,
    } else {
    }
    %c0 = arith.constant 0 : index
    %c0_1 = arith.constant 0 : index
    %3 = vector.load %arg6[%c0, %c0_1] : memref<128x512xf32, #tpu.memory_space<vmem>>, vector<128x512xf32>
    %c0_2 = arith.constant 0 : index
    %c0_3 = arith.constant 0 : index
    %4 = vector.load %arg2[%c0_2, %c0_3] : memref<128x1024xf32, #tpu.memory_space<vmem>>, vector<128x1024xf32>
    %c0_4 = arith.constant 0 : index
    %c0_5 = arith.constant 0 : index
    %5 = vector.load %arg3[%c0_4, %c0_5] : memref<1024x512xf32, #tpu.memory_space<vmem>>, vector<1024x512xf32>
    %cst = arith.constant dense<0.000000e+00> : vector<128x512xf32>
    %6 = tpu.matmul %4, %5, %cst {dimension_numbers = #tpu.dot_dimension_numbers<[1], [0], [0], [1], [0, 0, 1, 1], [], []>} : vector<128x1024xf32>, vector<1024x512xf32>, vector<128x512xf32> -> vector<128x512xf32>
    %7 = arith.addf %3, %6 : vector<128x512xf32>
    %c0_6 = arith.constant 0 : index
    %c0_7 = arith.constant 0 : index
    %8 = vector.load %arg6[%c0_6, %c0_7] : memref<128x512xf32, #tpu.memory_space<vmem>>, vector<128x512xf32>
    tpu.vector_store %arg6[%c0_6, %c0_7], %7 {strides = array<i32>} : memref<128x512xf32, #tpu.memory_space<vmem>>, vector<128x512xf32>,
    %c0_i32_8 = arith.constant 0 : i32
    %9 = arith.cmpi eq, %arg1, %c0_i32_8 : i32
    %10 = arith.extui %9 : i1 to i32
    %c0_i32_9 = arith.constant 0 : i32
    %11 = arith.cmpi ne, %10, %c0_i32_9 : i32
    scf.if %11 {
      %c0_10 = arith.constant 0 : index
      %c0_11 = arith.constant 0 : index
      %12 = vector.load %arg6[%c0_10, %c0_11] : memref<128x512xf32, #tpu.memory_space<vmem>>, vector<128x512xf32>
      %c0_12 = arith.constant 0 : index
      %c0_13 = arith.constant 0 : index
      %13 = vector.load %arg4[%c0_12, %c0_13] : memref<1x512xf32, #tpu.memory_space<vmem>>, vector<1x512xf32>
      %14 = vector.broadcast %13 : vector<1x512xf32> to vector<128x512xf32>
      %15 = arith.addf %12, %14 : vector<128x512xf32>
      %c0_14 = arith.constant 0 : index
      %c0_15 = arith.constant 0 : index
      %16 = vector.load %arg5[%c0_14, %c0_15] : memref<128x512xf32, #tpu.memory_space<vmem>>, vector<128x512xf32>
      tpu.vector_store %arg5[%c0_14, %c0_15], %15 {strides = array<i32>} : memref<128x512xf32, #tpu.memory_space<vmem>>, vector<128x512xf32>,
    } else {
    }
    return
  }
  func.func @transform_0(%arg0: i32, %arg1: i32) -> (i32, i32) {
    %c0_i32 = arith.constant 0 : i32
    return %arg0, %arg1 : i32, i32
  }
  func.func @transform_1(%arg0: i32, %arg1: i32) -> (i32, i32) {
    %c0_i32 = arith.constant 0 : i32
    %c0_i32_0 = arith.constant 0 : i32
    return %arg1, %c0_i32 : i32, i32
  }
  func.func @transform_2(%arg0: i32, %arg1: i32) -> (i32, i32) {
    %c0_i32 = arith.constant 0 : i32
    %c0_i32_0 = arith.constant 0 : i32
    %c0_i32_1 = arith.constant 0 : i32
    return %c0_i32, %c0_i32_0 : i32, i32
  }
  func.func @transform_3(%arg0: i32, %arg1: i32) -> (i32, i32) {
    %c0_i32 = arith.constant 0 : i32
    %c0_i32_0 = arith.constant 0 : i32
    return %arg0, %c0_i32 : i32, i32
  }
}

</mosaic_0001>

<bundles_post_ra>
// kernel: local_adapt_forward.2
= control target key start
LH: loop header
LB: loop body
LE: loop exit
PB: predicated region body
PF: predicated region fallthrough
CT: control target
= control target key end

     0   :  { %8 = vsyncpa [#allocation5], 0  ;;  %s7187_s0 = inlined_call_operand.vmem [shape: f32[128,4096], index: 0, kind: input, shape index: {}]   ;;  %s7188_s1 = inlined_call_operand.hbm [shape: f32[4096,1024], index: 1, kind: input, shape index: {}]   ;;  %s7189_s2 = inlined_call_operand.vmem [shape: f32[1,1024], index: 2, kind: input, shape index: {}]   ;;  %s7190_s3 = inlined_call_operand.vmem [shape: f32[128,1024], index: 3, kind: output, shape index: {}]  }
   0x1   :  { %10 = vsyncpa [#allocation5 + $0x1], 0  ;;  %s5469_s12 = smov 0   ;;  %s5471_s13 = smov 0  }
   0x2   :  { %s5473_s14 = smov 0   ;;  %s5475_s15 = smov 0  }
   0x3   :  { %s5477_s16 = smov 0   ;;  %s5479_s17 = smov 0  }
   0x4   :  { %s5481_s18 = smov 0   ;;  %s5483_s19 = smov 0  }
   0x5   :  { %s5485_s20 = smov 0   ;;  %s5487_s21 = smov 0  }
   0x6 LB: > { %s3941_s22 = sadd.s32 4294967295, %s5443_s21   ;;  %s25_s23 = sadd.s32 1, %s5435_s19  ;;  %s5443_s21 = sphi %s5487_s21, %s16_s21   ;;  %s5439_s20 = sphi %s5485_s20, %s7202_s20   ;;  %s5435_s19 = sphi %s5483_s19, %s7201_s19   ;;  %s5431_s18 = sphi %s5481_s18, %s7200_s18   ;;  %s5427_s17 = sphi %s5479_s17, %s7199_s17   ;;  %s5423_s16 = sphi %s5477_s16, %s7198_s16   ;;  %s5419_s15 = sphi %s5475_s15, %s7197_s15   ;;  %s5415_s14 = sphi %s5473_s14, %s7196_s14   ;;  %s5411_s13 = sphi %s5471_s13, %s7195_s13   ;;  %s5407_s12 = sphi %s5469_s12, %s7194_s12  }
   0x7   : > { %p26_p0 = scmp.ge.s32.totalorder %s25_s23, 4  ;;  %s28_s24 = sadd.s32 1, %s5439_s20 }
   0x8   : > { %s37_s25 = sadd.s32 1, %s5423_s16  ;;  %p44_p1 = scmp.ne.s32.totalorder %s5423_s16, %s5419_s15 }
   0x9   : > { %s7204_s23 = smov (%p26_p0, %s25_s23), 0  ;;  %s7206_s24 = smov (!%p26_p0, %s28_s24), %s5439_s20 }
   0xa   : > { %s33_s26 = ssub.s32 %s5435_s19, %s7204_s23  ;;  %p45_p2 = scmp.eq.s32.totalorder %s5443_s21, 0 }
   0xb   : > { %p30_p3 = scmp.ge.s32.totalorder %s7206_s24, 2  ;;  %p61_p4 = scmp.eq.s32.totalorder %s33_s26, 0 }
   0xc   : > { %p5531_p5 = por %p45_p2, %p44_p1  ;;  %s63_s28 = sadd.s32 1, %s5415_s14 }
   0xd   : > { %s7208_s24 = smov (%p30_p3, %s7206_s24), 0  ;;  %p70_p6 = scmp.ne.s32.totalorder %s5415_s14, %s5411_s13 }
   0xe   : > { %s5539_s29 = scalar_select %p61_p4, %s5415_s14, %s63_s28  }
   0xf   : > { %s32_s30 = ssub.s32 %s5439_s20, %s7208_s24  ;;  %p76_p7 = scmp.ne.s32.totalorder %s5411_s13, %s5407_s12 }
  0x10   : > { %s34_s4 = sor.u32 %s33_s26, %s32_s30  ;;  %p5547_p9 = por %p70_p6, %p45_p2 }
  0x11   : > { %p35_p8 = scmp.eq.s32.totalorder %s34_s4, 0  ;;  %p77_p10 = scmp.eq.s32.totalorder %s3941_s22, 0 }
  0x12   : > { %p3944_p12 = scmp.ge.s32.totalorder %s5443_s21, 8 }
  0x13   : > { %s5552_s6 = scalar_select %p35_p8, %s5423_s16, %s37_s25  }
  0x14   : > { %p5554_p11 = por %p77_p10, %p76_p7  ;;  %146 = sbr.rel (%p3944_p12) target bundleno = 92 (0x5c), region = 20 }
  0x1b   : > { %149 = sbr.rel (!%p5531_p5) target bundleno = 66 (0x42), region = 24  ;;  %s151_s8 = sand.u32 (%p5531_p5), 1, %s5423_s16  }
  0x1c   : > { %s3947_s9 = sshll.u32 (%p5531_p5), %s5435_s19, 3  ;;  %s3945_s10 = sshll.u32 (%p5531_p5), %s151_s8, 9 }
  0x1d   : > { %s3964_s11 = sshll.u32 (%p5531_p5), %s5439_s20, 8  ;;  %s5572_s27 = scalar_lea.vmem (%p5531_p5), [#allocation3], %s3945_s10 }
  0x1e   : > { %s157_s12 = sadd.s32 (%p5531_p5), %s3964_s11, %s3947_s9 }
  0x1f   : > { %s3949_s22 = sshll.u32 (%p5531_p5), %s157_s12, 3 }
  0x20   : > { %s5567_s28 = scalar_lea.vmem (%p5531_p5), %s7187_s0, %s3949_s22 }
  0x21   : > { %v172_v0 = vld [vmem:[%s5567_s28] sm:$0xff] (%p5531_p5)  ;;  %v174_v1 = vld [vmem:[%s5567_s28 + $0x8] sm:$0xff] (%p5531_p5)  ;;  %v176_v2 = vld [vmem:[%s5567_s28 + $0x10] sm:$0xff] (%p5531_p5) }
  0x22   : > { %173 = vst [vmem:[%s5572_s27] sm:$0xff] %v172_v0  ;;  %175 = vst [vmem:[%s5572_s27 + $0x8] sm:$0xff] %v174_v1  ;;  %v178_v3 = vld [vmem:[%s5567_s28 + $0x18] sm:$0xff]  ;;  %v180_v4 = vld [vmem:[%s5567_s28 + $0x20] sm:$0xff] }
  0x23   : > { %177 = vst [vmem:[%s5572_s27 + $0x10] sm:$0xff] %v176_v2  ;;  %v182_v5 = vld [vmem:[%s5567_s28 + $0x28] sm:$0xff]  ;;  %179 = vst [vmem:[%s5572_s27 + $0x18] sm:$0xff] %v178_v3  ;;  %v184_v6 = vld [vmem:[%s5567_s28 + $0x30] sm:$0xff] }
  0x24   : > { %181 = vst [vmem:[%s5572_s27 + $0x20] sm:$0xff] %v180_v4  ;;  %183 = vst [vmem:[%s5572_s27 + $0x28] sm:$0xff] %v182_v5  ;;  %v186_v7 = vld [vmem:[%s5567_s28 + $0x38] sm:$0xff]  ;;  %v188_v8 = vld [vmem:[%s5567_s28 + $0x100] sm:$0xff] }
  0x25   : > { %185 = vst [vmem:[%s5572_s27 + $0x30] sm:$0xff] %v184_v6  ;;  %187 = vst [vmem:[%s5572_s27 + $0x38] sm:$0xff] %v186_v7  ;;  %v190_v9 = vld [vmem:[%s5567_s28 + $0x108] sm:$0xff]  ;;  %v192_v10 = vld [vmem:[%s5567_s28 + $0x110] sm:$0xff] }
  0x26   : > { %189 = vst [vmem:[%s5572_s27 + $0x40] sm:$0xff] %v188_v8  ;;  %v194_v11 = vld [vmem:[%s5567_s28 + $0x118] sm:$0xff]  ;;  %191 = vst [vmem:[%s5572_s27 + $0x48] sm:$0xff] %v190_v9  ;;  %v196_v12 = vld [vmem:[%s5567_s28 + $0x120] sm:$0xff] }
  0x27   : > { %193 = vst [vmem:[%s5572_s27 + $0x50] sm:$0xff] %v192_v10  ;;  %195 = vst [vmem:[%s5572_s27 + $0x58] sm:$0xff] %v194_v11  ;;  %v198_v13 = vld [vmem:[%s5567_s28 + $0x128] sm:$0xff]  ;;  %v200_v14 = vld [vmem:[%s5567_s28 + $0x130] sm:$0xff] }
  0x28   : > { %197 = vst [vmem:[%s5572_s27 + $0x60] sm:$0xff] %v196_v12  ;;  %199 = vst [vmem:[%s5572_s27 + $0x68] sm:$0xff] %v198_v13  ;;  %v202_v15 = vld [vmem:[%s5567_s28 + $0x138] sm:$0xff]  ;;  %v204_v16 = vld [vmem:[%s5567_s28 + $0x200] sm:$0xff] }
  0x29   : > { %201 = vst [vmem:[%s5572_s27 + $0x70] sm:$0xff] %v200_v14  ;;  %v206_v17 = vld [vmem:[%s5567_s28 + $0x208] sm:$0xff]  ;;  %203 = vst [vmem:[%s5572_s27 + $0x78] sm:$0xff] %v202_v15  ;;  %v208_v18 = vld [vmem:[%s5567_s28 + $0x210] sm:$0xff] }
  0x2a   : > { %205 = vst [vmem:[%s5572_s27 + $0x80] sm:$0xff] %v204_v16  ;;  %207 = vst [vmem:[%s5572_s27 + $0x88] sm:$0xff] %v206_v17  ;;  %v210_v19 = vld [vmem:[%s5567_s28 + $0x218] sm:$0xff]  ;;  %v212_v20 = vld [vmem:[%s5567_s28 + $0x220] sm:$0xff] }
  0x2b   : > { %209 = vst [vmem:[%s5572_s27 + $0x90] sm:$0xff] %v208_v18  ;;  %211 = vst [vmem:[%s5572_s27 + $0x98] sm:$0xff] %v210_v19  ;;  %v214_v21 = vld [vmem:[%s5567_s28 + $0x228] sm:$0xff]  ;;  %v216_v22 = vld [vmem:[%s5567_s28 + $0x230] sm:$0xff] }
  0x2c   : > { %213 = vst [vmem:[%s5572_s27 + $0xa0] sm:$0xff] %v212_v20  ;;  %v218_v23 = vld [vmem:[%s5567_s28 + $0x238] sm:$0xff]  ;;  %215 = vst [vmem:[%s5572_s27 + $0xa8] sm:$0xff] %v214_v21  ;;  %v220_v24 = vld [vmem:[%s5567_s28 + $0x300] sm:$0xff] }
  0x2d   : > { %217 = vst [vmem:[%s5572_s27 + $0xb0] sm:$0xff] %v216_v22  ;;  %219 = vst [vmem:[%s5572_s27 + $0xb8] sm:$0xff] %v218_v23  ;;  %v222_v25 = vld [vmem:[%s5567_s28 + $0x308] sm:$0xff]  ;;  %v224_v26 = vld [vmem:[%s5567_s28 + $0x310] sm:$0xff] }
  0x2e   : > { %221 = vst [vmem:[%s5572_s27 + $0xc0] sm:$0xff] %v220_v24  ;;  %223 = vst [vmem:[%s5572_s27 + $0xc8] sm:$0xff] %v222_v25  ;;  %v226_v27 = vld [vmem:[%s5567_s28 + $0x318] sm:$0xff]  ;;  %v228_v28 = vld [vmem:[%s5567_s28 + $0x320] sm:$0xff] }
  0x2f   : > { %225 = vst [vmem:[%s5572_s27 + $0xd0] sm:$0xff] %v224_v26  ;;  %v230_v29 = vld [vmem:[%s5567_s28 + $0x328] sm:$0xff]  ;;  %227 = vst [vmem:[%s5572_s27 + $0xd8] sm:$0xff] %v226_v27  ;;  %v232_v30 = vld [vmem:[%s5567_s28 + $0x330] sm:$0xff] }
  0x30   : > { %229 = vst [vmem:[%s5572_s27 + $0xe0] sm:$0xff] %v228_v28  ;;  %231 = vst [vmem:[%s5572_s27 + $0xe8] sm:$0xff] %v230_v29  ;;  %v234_v31 = vld [vmem:[%s5567_s28 + $0x338] sm:$0xff]  ;;  %v236_v32 = vld [vmem:[%s5567_s28 + $0x400] sm:$0xff] }
  0x31   : > { %233 = vst [vmem:[%s5572_s27 + $0xf0] sm:$0xff] %v232_v30  ;;  %235 = vst [vmem:[%s5572_s27 + $0xf8] sm:$0xff] %v234_v31  ;;  %v238_v33 = vld [vmem:[%s5567_s28 + $0x408] sm:$0xff]  ;;  %v240_v34 = vld [vmem:[%s5567_s28 + $0x410] sm:$0xff] }
  0x32   : > { %237 = vst [vmem:[%s5572_s27 + $0x100] sm:$0xff] %v236_v32  ;;  %v242_v35 = vld [vmem:[%s5567_s28 + $0x418] sm:$0xff]  ;;  %239 = vst [vmem:[%s5572_s27 + $0x108] sm:$0xff] %v238_v33  ;;  %v244_v36 = vld [vmem:[%s5567_s28 + $0x420] sm:$0xff] }
  0x33   : > { %241 = vst [vmem:[%s5572_s27 + $0x110] sm:$0xff] %v240_v34  ;;  %243 = vst [vmem:[%s5572_s27 + $0x118] sm:$0xff] %v242_v35  ;;  %v246_v37 = vld [vmem:[%s5567_s28 + $0x428] sm:$0xff]  ;;  %v248_v38 = vld [vmem:[%s5567_s28 + $0x430] sm:$0xff] }
  0x34   : > { %245 = vst [vmem:[%s5572_s27 + $0x120] sm:$0xff] %v244_v36  ;;  %247 = vst [vmem:[%s5572_s27 + $0x128] sm:$0xff] %v246_v37  ;;  %v250_v39 = vld [vmem:[%s5567_s28 + $0x438] sm:$0xff]  ;;  %v252_v40 = vld [vmem:[%s5567_s28 + $0x500] sm:$0xff] }
  0x35   : > { %249 = vst [vmem:[%s5572_s27 + $0x130] sm:$0xff] %v248_v38  ;;  %v254_v41 = vld [vmem:[%s5567_s28 + $0x508] sm:$0xff]  ;;  %251 = vst [vmem:[%s5572_s27 + $0x138] sm:$0xff] %v250_v39  ;;  %v256_v42 = vld [vmem:[%s5567_s28 + $0x510] sm:$0xff] }
  0x36   : > { %253 = vst [vmem:[%s5572_s27 + $0x140] sm:$0xff] %v252_v40  ;;  %255 = vst [vmem:[%s5572_s27 + $0x148] sm:$0xff] %v254_v41  ;;  %v258_v43 = vld [vmem:[%s5567_s28 + $0x518] sm:$0xff]  ;;  %v260_v44 = vld [vmem:[%s5567_s28 + $0x520] sm:$0xff] }
  0x37   : > { %257 = vst [vmem:[%s5572_s27 + $0x150] sm:$0xff] %v256_v42  ;;  %259 = vst [vmem:[%s5572_s27 + $0x158] sm:$0xff] %v258_v43  ;;  %v262_v45 = vld [vmem:[%s5567_s28 + $0x528] sm:$0xff]  ;;  %v264_v46 = vld [vmem:[%s5567_s28 + $0x530] sm:$0xff] }
  0x38   : > { %261 = vst [vmem:[%s5572_s27 + $0x160] sm:$0xff] %v260_v44  ;;  %v266_v47 = vld [vmem:[%s5567_s28 + $0x538] sm:$0xff]  ;;  %263 = vst [vmem:[%s5572_s27 + $0x168] sm:$0xff] %v262_v45  ;;  %v268_v48 = vld [vmem:[%s5567_s28 + $0x600] sm:$0xff] }
  0x39   : > { %265 = vst [vmem:[%s5572_s27 + $0x170] sm:$0xff] %v264_v46  ;;  %267 = vst [vmem:[%s5572_s27 + $0x178] sm:$0xff] %v266_v47  ;;  %v270_v49 = vld [vmem:[%s5567_s28 + $0x608] sm:$0xff]  ;;  %v272_v50 = vld [vmem:[%s5567_s28 + $0x610] sm:$0xff] }
  0x3a   : > { %269 = vst [vmem:[%s5572_s27 + $0x180] sm:$0xff] %v268_v48  ;;  %271 = vst [vmem:[%s5572_s27 + $0x188] sm:$0xff] %v270_v49  ;;  %v274_v51 = vld [vmem:[%s5567_s28 + $0x618] sm:$0xff]  ;;  %v276_v52 = vld [vmem:[%s5567_s28 + $0x620] sm:$0xff] }
  0x3b   : > { %273 = vst [vmem:[%s5572_s27 + $0x190] sm:$0xff] %v272_v50  ;;  %v278_v53 = vld [vmem:[%s5567_s28 + $0x628] sm:$0xff]  ;;  %275 = vst [vmem:[%s5572_s27 + $0x198] sm:$0xff] %v274_v51  ;;  %v280_v54 = vld [vmem:[%s5567_s28 + $0x630] sm:$0xff] }
  0x3c   : > { %277 = vst [vmem:[%s5572_s27 + $0x1a0] sm:$0xff] %v276_v52  ;;  %279 = vst [vmem:[%s5572_s27 + $0x1a8] sm:$0xff] %v278_v53  ;;  %v282_v55 = vld [vmem:[%s5567_s28 + $0x638] sm:$0xff]  ;;  %v284_v56 = vld [vmem:[%s5567_s28 + $0x700] sm:$0xff] }
  0x3d   : > { %281 = vst [vmem:[%s5572_s27 + $0x1b0] sm:$0xff] %v280_v54  ;;  %283 = vst [vmem:[%s5572_s27 + $0x1b8] sm:$0xff] %v282_v55  ;;  %v286_v57 = vld [vmem:[%s5567_s28 + $0x708] sm:$0xff]  ;;  %v288_v58 = vld [vmem:[%s5567_s28 + $0x710] sm:$0xff] }
  0x3e   : > { %285 = vst [vmem:[%s5572_s27 + $0x1c0] sm:$0xff] %v284_v56  ;;  %v290_v59 = vld [vmem:[%s5567_s28 + $0x718] sm:$0xff]  ;;  %287 = vst [vmem:[%s5572_s27 + $0x1c8] sm:$0xff] %v286_v57  ;;  %v292_v60 = vld [vmem:[%s5567_s28 + $0x720] sm:$0xff] }
  0x3f   : > { %289 = vst [vmem:[%s5572_s27 + $0x1d0] sm:$0xff] %v288_v58  ;;  %291 = vst [vmem:[%s5572_s27 + $0x1d8] sm:$0xff] %v290_v59  ;;  %v294_v61 = vld [vmem:[%s5567_s28 + $0x728] sm:$0xff]  ;;  %v296_v62 = vld [vmem:[%s5567_s28 + $0x730] sm:$0xff] }
  0x40   : > { %293 = vst [vmem:[%s5572_s27 + $0x1e0] sm:$0xff] %v292_v60  ;;  %295 = vst [vmem:[%s5572_s27 + $0x1e8] sm:$0xff] %v294_v61  ;;  %v298_v63 = vld [vmem:[%s5567_s28 + $0x738] sm:$0xff] }
  0x41   : > { %297 = vst [vmem:[%s5572_s27 + $0x1f0] sm:$0xff] %v296_v62  ;;  %299 = vst [vmem:[%s5572_s27 + $0x1f8] sm:$0xff] %v298_v63 }
  0x42 PF: > { %s306_s30 = sand.u32 1, %s5415_s14   ;;  %s3966_s4 = sshll.u32 %s5435_s19, 17 }
  0x43   : > { %s3950_s8 = sshll.u32 %s306_s30, 13  ;;  %s5704_s11 = scalar_lea.hbm %s7188_s1, %s3966_s4 }
  0x44   : > { %s310_s12 = scalar_lea.vmem [#allocation4], %s3950_s8  ;;  %s5708_s25 = scalar_lea.sflag [#allocation5], %s306_s30 }
  0x45   : > { %s318_s22 = sshll.u32 %s310_s12, 4  ;;  %s5333_s26 = scalar_lea.hbm %s5704_s11, 131072  ;;  %s5706_s22 = int_to_ptr.vmem [resolvable:$true] %s318_s22 }
  0x46   : > { %p5334_p13 = scmp.ne.s32.totalorder %s5704_s11, %s5333_s26  ;;  %s5337_s4 = scalar_lea.hbm %s7188_s1, 524288 }
  0x47   : > { %p5338_p2 = scmp.lt.u32.totalorder %s5704_s11, %s7188_s1  ;;  %p5339_p3 = scmp.lt.u32.totalorder %s5337_s4, %s5333_s26 }
  0x48   : > { %p5335_p0 = pnand %p5334_p13, %p5547_p9  ;;  %p5341_p5 = scmp.lt.u32.totalorder %s5333_s26, %s5704_s11 }
  0x49   : > { %p5340_p4 = por %p5339_p3, %p5338_p2 }
  0x4a   : > { %p5336_p1 = pneg %p5335_p0 }
  0x4b   : > { %p5342_p6 = por %p5341_p5, %p5340_p4 }
  0x4d   : > { %p5343_p7 = pnand %p5342_p6, %p5336_p1 }
  0x4f   : > { %5346 = shalt.err (!%p5343_p7)
}
  0x50   : > { %s5347_s30 = scalar_lea.vmem %s5706_s22, 131072  ;;  %s5445_s8 = smov [#allocation4]  }
  0x51   : > { %p5348_p8 = scmp.ne.s32.totalorder %s5706_s22, %s5347_s30  ;;  %s5351_s12 = sshll.u32 %s5445_s8, 4  ;;  %s5352_s12 = int_to_ptr.vmem [resolvable:$false] %s5351_s12 }
  0x52   : > { %s5353_s28 = scalar_lea.vmem %s5352_s12, 262144  ;;  %p5354_p13 = scmp.lt.s32.totalorder %s5706_s22, %s5352_s12 }
  0x53   : > { %p5349_p10 = pnand %p5348_p8, %p5547_p9  ;;  %p5355_p0 = scmp.lt.s32.totalorder %s5353_s28, %s5347_s30 }
  0x55   : > { %p5350_p12 = pneg %p5349_p10  ;;  %p5356_p2 = por %p5355_p0, %p5354_p13 }
  0x57   : > { %p5357_p3 = pnand %p5356_p2, %p5350_p12 }
  0x59   : > { %5360 = shalt.err (!%p5357_p3)
}
  0x5a   : > { %s5446_s26 = smov 1024   ;;  %s5447_s27 = smov 64  }
  0x5b   : > { %5184 = dma.hbm_to_vmem [thread:$0]  (%p5547_p9), %s5704_s11, 131072, %s5706_s22, %s5708_s25, %s5446_s26, %s5446_s26, %s5447_s27  }
  0x5c PF: > { %p3954_p1 = scmp.ge.s32.totalorder %s5443_s21, 1  ;;  %p326_p4 = scmp.lt.s32.totalorder %s5443_s21, 9 }
  0x5e   : > { %p327_p5 = pnand %p3954_p1, %p326_p4 }
  0x5f   : > { %s333_s4 = sand.u32 (!%p327_p5), 1, %s5419_s15   ;;  %s339_s9 = sand.u32 (!%p327_p5), 1, %s5411_s13  }
  0x60   : > { %330 = sbr.rel (%p327_p5) target bundleno = 929 (0x3a1), region = 51  ;;  %s3955_s10 = sshll.u32 (!%p327_p5), %s333_s4, 9 }
  0x61   : > { %s3956_s30 = sshll.u32 (!%p327_p5), %s339_s9, 13  ;;  %s5736_s8 = scalar_lea.vmem (!%p327_p5), [#allocation3], %s3955_s10 }
  0x62   : > { %s340_s12 = scalar_lea.sflag (!%p327_p5), [#allocation5], %s339_s9  ;;  %s5738_s28 = scalar_lea.vmem (!%p327_p5), [#allocation4], %s3956_s30 }
  0x67   : > { %5402 = dma.done.wait (%p5554_p11), %s340_s12, 131072  }
  0x68   : > { %5404 = vsyncadd (%p5554_p11), %s340_s12, 4294836224  ;;  %s3957_s5 = sshll.u32 %s5431_s18, 3  ;;  %p3960_p6 = scmp.ne.s32.totalorder %s5427_s17, 0 }
  0x69   : > { %p375_p9 = scmp.lt.s32.totalorder %s3957_s5, 15  ;;  %v5448_v0 = vmov (!%p3960_p6), 0.0  }
  0x6a   : > { %384 = sbr.rel (%p3960_p6) target bundleno = 138 (0x8a), region = 63  ;;  %385 = vst [vmem:[#allocation2] sm:$0xff] (!%p3960_p6), %v5448_v0  ;;  %386 = vst [vmem:[#allocation2 + $0x8] sm:$0xff] (!%p3960_p6), %v5448_v0 }
  0x6b   : > { %s7210_s5 = smov (!%p375_p9, %s3957_s5), 15  ;;  %387 = vst [vmem:[#allocation2 + $0x10] sm:$0xff] (!%p3960_p6), %v5448_v0  ;;  %388 = vst [vmem:[#allocation2 + $0x18] sm:$0xff] (!%p3960_p6), %v5448_v0 }
  0x6c   : > { %s3967_s11 = sshll.u32 %s7210_s5, 6  ;;  %389 = vst [vmem:[#allocation2 + $0x20] sm:$0xff] (!%p3960_p6), %v5448_v0  ;;  %390 = vst [vmem:[#allocation2 + $0x28] sm:$0xff] (!%p3960_p6), %v5448_v0 }
  0x6d   : > { %s5748_s25 = scalar_lea.vmem %s7190_s3, %s3967_s11  ;;  %391 = vst [vmem:[#allocation2 + $0x30] sm:$0xff] (!%p3960_p6), %v5448_v0  ;;  %392 = vst [vmem:[#allocation2 + $0x38] sm:$0xff] (!%p3960_p6), %v5448_v0 }
  0x6e   : > { %393 = vst [vmem:[#allocation2 + $0x40] sm:$0xff] (!%p3960_p6), %v5448_v0  ;;  %394 = vst [vmem:[#allocation2 + $0x48] sm:$0xff] (!%p3960_p6), %v5448_v0 }
  0x6f   : > { %395 = vst [vmem:[#allocation2 + $0x50] sm:$0xff] (!%p3960_p6), %v5448_v0  ;;  %396 = vst [vmem:[#allocation2 + $0x58] sm:$0xff] (!%p3960_p6), %v5448_v0 }
  0x70   : > { %397 = vst [vmem:[#allocation2 + $0x60] sm:$0xff] (!%p3960_p6), %v5448_v0  ;;  %398 = vst [vmem:[#allocation2 + $0x68] sm:$0xff] (!%p3960_p6), %v5448_v0 }
  0x71   : > { %399 = vst [vmem:[#allocation2 + $0x70] sm:$0xff] %v5448_v0  ;;  %400 = vst [vmem:[#allocation2 + $0x78] sm:$0xff] %v5448_v0 }
  0x72   : > { %401 = vst [vmem:[#allocation2 + $0x80] sm:$0xff] %v5448_v0  ;;  %402 = vst [vmem:[#allocation2 + $0x88] sm:$0xff] %v5448_v0 }
  0x73   : > { %403 = vst [vmem:[#allocation2 + $0x90] sm:$0xff] %v5448_v0  ;;  %404 = vst [vmem:[#allocation2 + $0x98] sm:$0xff] %v5448_v0 }
  0x74   : > { %405 = vst [vmem:[#allocation2 + $0xa0] sm:$0xff] %v5448_v0  ;;  %406 = vst [vmem:[#allocation2 + $0xa8] sm:$0xff] %v5448_v0 }
  0x75   : > { %407 = vst [vmem:[#allocation2 + $0xb0] sm:$0xff] %v5448_v0  ;;  %408 = vst [vmem:[#allocation2 + $0xb8] sm:$0xff] %v5448_v0 }
  0x76   : > { %409 = vst [vmem:[#allocation2 + $0xc0] sm:$0xff] %v5448_v0  ;;  %410 = vst [vmem:[#allocation2 + $0xc8] sm:$0xff] %v5448_v0 }
  0x77   : > { %411 = vst [vmem:[#allocation2 + $0xd0] sm:$0xff] %v5448_v0  ;;  %412 = vst [vmem:[#allocation2 + $0xd8] sm:$0xff] %v5448_v0 }
  0x78   : > { %413 = vst [vmem:[#allocation2 + $0xe0] sm:$0xff] %v5448_v0  ;;  %414 = vst [vmem:[#allocation2 + $0xe8] sm:$0xff] %v5448_v0 }
  0x79   : > { %415 = vst [vmem:[#allocation2 + $0xf0] sm:$0xff] %v5448_v0  ;;  %416 = vst [vmem:[#allocation2 + $0xf8] sm:$0xff] %v5448_v0 }
  0x7a   : > { %417 = vst [vmem:[#allocation2 + $0x100] sm:$0xff] %v5448_v0  ;;  %418 = vst [vmem:[#allocation2 + $0x108] sm:$0xff] %v5448_v0 }
  0x7b   : > { %419 = vst [vmem:[#allocation2 + $0x110] sm:$0xff] %v5448_v0  ;;  %420 = vst [vmem:[#allocation2 + $0x118] sm:$0xff] %v5448_v0 }
  0x7c   : > { %421 = vst [vmem:[#allocation2 + $0x120] sm:$0xff] %v5448_v0  ;;  %422 = vst [vmem:[#allocation2 + $0x128] sm:$0xff] %v5448_v0 }
  0x7d   : > { %423 = vst [vmem:[#allocation2 + $0x130] sm:$0xff] %v5448_v0  ;;  %424 = vst [vmem:[#allocation2 + $0x138] sm:$0xff] %v5448_v0 }
  0x7e   : > { %425 = vst [vmem:[#allocation2 + $0x140] sm:$0xff] %v5448_v0  ;;  %426 = vst [vmem:[#allocation2 + $0x148] sm:$0xff] %v5448_v0 }
  0x7f   : > { %427 = vst [vmem:[#allocation2 + $0x150] sm:$0xff] %v5448_v0  ;;  %428 = vst [vmem:[#allocation2 + $0x158] sm:$0xff] %v5448_v0 }
  0x80   : > { %429 = vst [vmem:[#allocation2 + $0x160] sm:$0xff] %v5448_v0  ;;  %430 = vst [vmem:[#allocation2 + $0x168] sm:$0xff] %v5448_v0 }
  0x81   : > { %431 = vst [vmem:[#allocation2 + $0x170] sm:$0xff] %v5448_v0  ;;  %432 = vst [vmem:[#allocation2 + $0x178] sm:$0xff] %v5448_v0 }
  0x82   : > { %433 = vst [vmem:[#allocation2 + $0x180] sm:$0xff] %v5448_v0  ;;  %434 = vst [vmem:[#allocation2 + $0x188] sm:$0xff] %v5448_v0 }
  0x83   : > { %435 = vst [vmem:[#allocation2 + $0x190] sm:$0xff] %v5448_v0  ;;  %436 = vst [vmem:[#allocation2 + $0x198] sm:$0xff] %v5448_v0 }
  0x84   : > { %437 = vst [vmem:[#allocation2 + $0x1a0] sm:$0xff] %v5448_v0  ;;  %438 = vst [vmem:[#allocation2 + $0x1a8] sm:$0xff] %v5448_v0 }
  0x85   : > { %439 = vst [vmem:[#allocation2 + $0x1b0] sm:$0xff] %v5448_v0  ;;  %440 = vst [vmem:[#allocation2 + $0x1b8] sm:$0xff] %v5448_v0 }
  0x86   : > { %441 = vst [vmem:[#allocation2 + $0x1c0] sm:$0xff] %v5448_v0  ;;  %442 = vst [vmem:[#allocation2 + $0x1c8] sm:$0xff] %v5448_v0 }
  0x87   : > { %443 = vst [vmem:[#allocation2 + $0x1d0] sm:$0xff] %v5448_v0  ;;  %444 = vst [vmem:[#allocation2 + $0x1d8] sm:$0xff] %v5448_v0 }
  0x88   : > { %445 = vst [vmem:[#allocation2 + $0x1e0] sm:$0xff] %v5448_v0  ;;  %446 = vst [vmem:[#allocation2 + $0x1e8] sm:$0xff] %v5448_v0 }
  0x89   : > { %447 = vst [vmem:[#allocation2 + $0x1f0] sm:$0xff] %v5448_v0  ;;  %448 = vst [vmem:[#allocation2 + $0x1f8] sm:$0xff] %v5448_v0 }
  0x8a PF: > { %v578_v1 = vld [vmem:[%s5738_s28 + $0x8] sm:$0xff]  ;;  %v580_v3 = vld [vmem:[%s5738_s28 + $0x18] sm:$0xff]  ;;  %v577_v6 = vld [vmem:[%s5738_s28] sm:$0xff]  ;;  %p3961_p11 = scmp.ne.s32.totalorder %s5427_s17, 3 }
  0x8b   : > { %v586_v2 = vld [vmem:[%s5738_s28 + $0x48] sm:$0xff]  ;;  %v588_v5 = vld [vmem:[%s5738_s28 + $0x58] sm:$0xff]  ;;  %v585_v7 = vld [vmem:[%s5738_s28 + $0x40] sm:$0xff] }
  0x8c   : > { %v3968_v4 = vpack.c.bf16 %v586_v2, %v578_v1  ;;  %v4224_v8 = vpack.c.bf16 %v588_v5, %v580_v3  ;;  %v3970_v9 = vpack.c.bf16 %v585_v7, %v577_v6  ;;  %v579_v10 = vld [vmem:[%s5738_s28 + $0x10] sm:$0xff]  ;;  %v594_v12 = vld [vmem:[%s5738_s28 + $0x88] sm:$0xff]  ;;  %v596_v15 = vld [vmem:[%s5738_s28 + $0x98] sm:$0xff] }
  0x8d   : > { %v587_v11 = vld [vmem:[%s5738_s28 + $0x50] sm:$0xff]  ;;  %v602_v14 = vld [vmem:[%s5738_s28 + $0xc8] sm:$0xff]  ;;  %v604_v16 = vld [vmem:[%s5738_s28 + $0xd8] sm:$0xff] }
  0x8e   : > { %3969 = vmatprep.subr.bf16.mxu0 %v3968_v4  ;;  %v4226_v13 = vpack.c.bf16 %v587_v11, %v579_v10  ;;  %4225 = vmatprep.subr.bf16.mxu1 %v4224_v8  ;;  %v3972_v17 = vpack.c.bf16 %v602_v14, %v594_v12  ;;  %v4228_v18 = vpack.c.bf16 %v604_v16, %v596_v15  ;;  %v593_v19 = vld [vmem:[%s5738_s28 + $0x80] sm:$0xff]  ;;  %v595_v21 = vld [vmem:[%s5738_s28 + $0x90] sm:$0xff]  ;;  %v610_v24 = vld [vmem:[%s5738_s28 + $0x108] sm:$0xff] }
  0x8f   : > { %3971 = vmatpush1.bf16.msra.mxu0 %v3970_v9  ;;  %v601_v20 = vld [vmem:[%s5738_s28 + $0xc0] sm:$0xff]  ;;  %v603_v23 = vld [vmem:[%s5738_s28 + $0xd0] sm:$0xff]  ;;  %v618_v25 = vld [vmem:[%s5738_s28 + $0x148] sm:$0xff] }
  0x90   : > { %4227 = vmatpush1.bf16.msra.mxu1 %v4226_v13  ;;  %v3974_v22 = vpack.c.bf16 %v601_v20, %v593_v19  ;;  %3973 = vmatprep.subr.bf16.mxu0 %v3972_v17  ;;  %v4230_v26 = vpack.c.bf16 %v603_v23, %v595_v21  ;;  %v3976_v27 = vpack.c.bf16 %v618_v25, %v610_v24  ;;  %v612_v28 = vld [vmem:[%s5738_s28 + $0x118] sm:$0xff]  ;;  %v609_v30 = vld [vmem:[%s5738_s28 + $0x100] sm:$0xff]  ;;  %v611_v33 = vld [vmem:[%s5738_s28 + $0x110] sm:$0xff] }
  0x91   : > { %4229 = vmatprep.subr.bf16.mxu1 %v4228_v18  ;;  %v620_v29 = vld [vmem:[%s5738_s28 + $0x158] sm:$0xff]  ;;  %v617_v32 = vld [vmem:[%s5738_s28 + $0x140] sm:$0xff]  ;;  %v619_v34 = vld [vmem:[%s5738_s28 + $0x150] sm:$0xff] }
  0x92   : > { %v4232_v31 = vpack.c.bf16 %v620_v29, %v612_v28  ;;  %v3978_v35 = vpack.c.bf16 %v617_v32, %v609_v30  ;;  %v626_v36 = vld [vmem:[%s5738_s28 + $0x188] sm:$0xff]  ;;  %v628_v38 = vld [vmem:[%s5738_s28 + $0x198] sm:$0xff]  ;;  %v4234_v39 = vpack.c.bf16 %v619_v34, %v611_v33  ;;  %v625_v42 = vld [vmem:[%s5738_s28 + $0x180] sm:$0xff] }
  0x93   : > { %3975 = vmatpush1.bf16.msra.mxu0 %v3974_v22  ;;  %v634_v37 = vld [vmem:[%s5738_s28 + $0x1c8] sm:$0xff]  ;;  %v636_v41 = vld [vmem:[%s5738_s28 + $0x1d8] sm:$0xff]  ;;  %v633_v43 = vld [vmem:[%s5738_s28 + $0x1c0] sm:$0xff] }
  0x94   : > { %4231 = vmatpush1.bf16.msra.mxu1 %v4230_v26  ;;  %3977 = vmatprep.subr.bf16.mxu0 %v3976_v27  ;;  %v3980_v40 = vpack.c.bf16 %v634_v37, %v626_v36  ;;  %v4236_v44 = vpack.c.bf16 %v636_v41, %v628_v38  ;;  %v627_v45 = vld [vmem:[%s5738_s28 + $0x190] sm:$0xff]  ;;  %v642_v47 = vld [vmem:[%s5738_s28 + $0x208] sm:$0xff]  ;;  %v644_v49 = vld [vmem:[%s5738_s28 + $0x218] sm:$0xff]  ;;  %v3982_v51 = vpack.c.bf16 %v633_v43, %v625_v42 }
  0x95   : > { %4233 = vmatprep.subr.bf16.mxu1 %v4232_v31  ;;  %v635_v46 = vld [vmem:[%s5738_s28 + $0x1d0] sm:$0xff]  ;;  %v650_v48 = vld [vmem:[%s5738_s28 + $0x248] sm:$0xff]  ;;  %v652_v50 = vld [vmem:[%s5738_s28 + $0x258] sm:$0xff] }
  0x96   : > { %v4238_v52 = vpack.c.bf16 %v635_v46, %v627_v45  ;;  %v3984_v53 = vpack.c.bf16 %v650_v48, %v642_v47  ;;  %v641_v54 = vld [vmem:[%s5738_s28 + $0x200] sm:$0xff]  ;;  %v643_v56 = vld [vmem:[%s5738_s28 + $0x210] sm:$0xff]  ;;  %v4240_v57 = vpack.c.bf16 %v652_v50, %v644_v49  ;;  %v658_v59 = vld [vmem:[%s5738_s28 + $0x288] sm:$0xff] }
  0x97   : > { %3979 = vmatpush1.bf16.msra.mxu0 %v3978_v35  ;;  %v649_v55 = vld [vmem:[%s5738_s28 + $0x240] sm:$0xff]  ;;  %v651_v58 = vld [vmem:[%s5738_s28 + $0x250] sm:$0xff]  ;;  %v666_v60 = vld [vmem:[%s5738_s28 + $0x2c8] sm:$0xff] }
  0x98   : > { %4235 = vmatpush1.bf16.msra.mxu1 %v4234_v39  ;;  %3981 = vmatprep.subr.bf16.mxu0 %v3980_v40  ;;  %v660_v61 = vld [vmem:[%s5738_s28 + $0x298] sm:$0xff]  ;;  %v3986_v63 = vpack.c.bf16 %v649_v55, %v641_v54  ;;  %v4242_v0 = vpack.c.bf16 %v651_v58, %v643_v56  ;;  %v3988_v1 = vpack.c.bf16 %v666_v60, %v658_v59  ;;  %v657_v2 = vld [vmem:[%s5738_s28 + $0x280] sm:$0xff]  ;;  %v659_v4 = vld [vmem:[%s5738_s28 + $0x290] sm:$0xff] }
  0x99   : > { %4237 = vmatprep.subr.bf16.mxu1 %v4236_v44  ;;  %v668_v62 = vld [vmem:[%s5738_s28 + $0x2d8] sm:$0xff]  ;;  %v665_v3 = vld [vmem:[%s5738_s28 + $0x2c0] sm:$0xff]  ;;  %v667_v6 = vld [vmem:[%s5738_s28 + $0x2d0] sm:$0xff] }
  0x9a   : > { %v4244_v5 = vpack.c.bf16 %v668_v62, %v660_v61  ;;  %v674_v7 = vld [vmem:[%s5738_s28 + $0x308] sm:$0xff]  ;;  %v676_v9 = vld [vmem:[%s5738_s28 + $0x318] sm:$0xff]  ;;  %v3990_v11 = vpack.c.bf16 %v665_v3, %v657_v2  ;;  %v4246_v12 = vpack.c.bf16 %v667_v6, %v659_v4  ;;  %v673_v14 = vld [vmem:[%s5738_s28 + $0x300] sm:$0xff] }
  0x9b   : > { %3983 = vmatpush1.bf16.msra.mxu0 %v3982_v51  ;;  %v682_v8 = vld [vmem:[%s5738_s28 + $0x348] sm:$0xff]  ;;  %v684_v10 = vld [vmem:[%s5738_s28 + $0x358] sm:$0xff]  ;;  %v681_v15 = vld [vmem:[%s5738_s28 + $0x340] sm:$0xff] }
  0x9c   : > { %4239 = vmatpush1.bf16.msra.mxu1 %v4238_v52  ;;  %3985 = vmatprep.subr.bf16.mxu0 %v3984_v53  ;;  %v3992_v13 = vpack.c.bf16 %v682_v8, %v674_v7  ;;  %v675_v16 = vld [vmem:[%s5738_s28 + $0x310] sm:$0xff]  ;;  %v4248_v17 = vpack.c.bf16 %v684_v10, %v676_v9  ;;  %v690_v19 = vld [vmem:[%s5738_s28 + $0x388] sm:$0xff]  ;;  %v692_v21 = vld [vmem:[%s5738_s28 + $0x398] sm:$0xff]  ;;  %v3994_v23 = vpack.c.bf16 %v681_v15, %v673_v14 }
  0x9d   : > { %4241 = vmatprep.subr.bf16.mxu1 %v4240_v57  ;;  %v683_v18 = vld [vmem:[%s5738_s28 + $0x350] sm:$0xff]  ;;  %v698_v20 = vld [vmem:[%s5738_s28 + $0x3c8] sm:$0xff]  ;;  %v700_v22 = vld [vmem:[%s5738_s28 + $0x3d8] sm:$0xff] }
  0x9e   : > { %v4250_v24 = vpack.c.bf16 %v683_v18, %v675_v16  ;;  %v3996_v25 = vpack.c.bf16 %v698_v20, %v690_v19  ;;  %v689_v26 = vld [vmem:[%s5738_s28 + $0x380] sm:$0xff]  ;;  %v691_v28 = vld [vmem:[%s5738_s28 + $0x390] sm:$0xff]  ;;  %v4252_v29 = vpack.c.bf16 %v700_v22, %v692_v21  ;;  %v706_v31 = vld [vmem:[%s5738_s28 + $0x408] sm:$0xff] }
  0x9f   : > { %3987 = vmatpush1.bf16.msra.mxu0 %v3986_v63  ;;  %v697_v27 = vld [vmem:[%s5738_s28 + $0x3c0] sm:$0xff]  ;;  %v699_v30 = vld [vmem:[%s5738_s28 + $0x3d0] sm:$0xff]  ;;  %v714_v32 = vld [vmem:[%s5738_s28 + $0x448] sm:$0xff] }
  0xa0   : > { %4243 = vmatpush1.bf16.msra.mxu1 %v4242_v0  ;;  %3989 = vmatprep.subr.bf16.mxu0 %v3988_v1  ;;  %v708_v33 = vld [vmem:[%s5738_s28 + $0x418] sm:$0xff]  ;;  %v3998_v35 = vpack.c.bf16 %v697_v27, %v689_v26  ;;  %v4254_v36 = vpack.c.bf16 %v699_v30, %v691_v28  ;;  %v4000_v37 = vpack.c.bf16 %v714_v32, %v706_v31  ;;  %v705_v38 = vld [vmem:[%s5738_s28 + $0x400] sm:$0xff]  ;;  %v707_v40 = vld [vmem:[%s5738_s28 + $0x410] sm:$0xff] }
  0xa1   : > { %4245 = vmatprep.subr.bf16.mxu1 %v4244_v5  ;;  %v716_v34 = vld [vmem:[%s5738_s28 + $0x458] sm:$0xff]  ;;  %v713_v39 = vld [vmem:[%s5738_s28 + $0x440] sm:$0xff]  ;;  %v715_v42 = vld [vmem:[%s5738_s28 + $0x450] sm:$0xff] }
  0xa2   : > { %v4256_v41 = vpack.c.bf16 %v716_v34, %v708_v33  ;;  %v722_v43 = vld [vmem:[%s5738_s28 + $0x488] sm:$0xff]  ;;  %v724_v45 = vld [vmem:[%s5738_s28 + $0x498] sm:$0xff]  ;;  %v4002_v47 = vpack.c.bf16 %v713_v39, %v705_v38  ;;  %v4258_v48 = vpack.c.bf16 %v715_v42, %v707_v40  ;;  %v721_v50 = vld [vmem:[%s5738_s28 + $0x480] sm:$0xff] }
  0xa3   : > { %3991 = vmatpush1.bf16.msra.mxu0 %v3990_v11  ;;  %v730_v44 = vld [vmem:[%s5738_s28 + $0x4c8] sm:$0xff]  ;;  %v732_v46 = vld [vmem:[%s5738_s28 + $0x4d8] sm:$0xff]  ;;  %v729_v51 = vld [vmem:[%s5738_s28 + $0x4c0] sm:$0xff] }
  0xa4   : > { %4247 = vmatpush1.bf16.msra.mxu1 %v4246_v12  ;;  %3993 = vmatprep.subr.bf16.mxu0 %v3992_v13  ;;  %v4004_v49 = vpack.c.bf16 %v730_v44, %v722_v43  ;;  %v723_v52 = vld [vmem:[%s5738_s28 + $0x490] sm:$0xff]  ;;  %v4260_v53 = vpack.c.bf16 %v732_v46, %v724_v45  ;;  %v738_v55 = vld [vmem:[%s5738_s28 + $0x508] sm:$0xff]  ;;  %v740_v57 = vld [vmem:[%s5738_s28 + $0x518] sm:$0xff]  ;;  %v4006_v59 = vpack.c.bf16 %v729_v51, %v721_v50 }
  0xa5   : > { %4249 = vmatprep.subr.bf16.mxu1 %v4248_v17  ;;  %v731_v54 = vld [vmem:[%s5738_s28 + $0x4d0] sm:$0xff]  ;;  %v746_v56 = vld [vmem:[%s5738_s28 + $0x548] sm:$0xff]  ;;  %v748_v58 = vld [vmem:[%s5738_s28 + $0x558] sm:$0xff] }
  0xa6   : > { %v4262_v60 = vpack.c.bf16 %v731_v54, %v723_v52  ;;  %v4008_v61 = vpack.c.bf16 %v746_v56, %v738_v55  ;;  %v737_v62 = vld [vmem:[%s5738_s28 + $0x500] sm:$0xff]  ;;  %v739_v0 = vld [vmem:[%s5738_s28 + $0x510] sm:$0xff]  ;;  %v4264_v1 = vpack.c.bf16 %v748_v58, %v740_v57  ;;  %v754_v3 = vld [vmem:[%s5738_s28 + $0x588] sm:$0xff] }
  0xa7   : > { %3995 = vmatpush1.bf16.msra.mxu0 %v3994_v23  ;;  %v745_v63 = vld [vmem:[%s5738_s28 + $0x540] sm:$0xff]  ;;  %v747_v2 = vld [vmem:[%s5738_s28 + $0x550] sm:$0xff]  ;;  %v762_v4 = vld [vmem:[%s5738_s28 + $0x5c8] sm:$0xff] }
  0xa8   : > { %4251 = vmatpush1.bf16.msra.mxu1 %v4250_v24  ;;  %3997 = vmatprep.subr.bf16.mxu0 %v3996_v25  ;;  %v756_v5 = vld [vmem:[%s5738_s28 + $0x598] sm:$0xff]  ;;  %v4010_v7 = vpack.c.bf16 %v745_v63, %v737_v62  ;;  %v753_v8 = vld [vmem:[%s5738_s28 + $0x580] sm:$0xff]  ;;  %v4266_v9 = vpack.c.bf16 %v747_v2, %v739_v0  ;;  %v4012_v10 = vpack.c.bf16 %v762_v4, %v754_v3  ;;  %v755_v12 = vld [vmem:[%s5738_s28 + $0x590] sm:$0xff] }
  0xa9   : > { %4253 = vmatprep.subr.bf16.mxu1 %v4252_v29  ;;  %v764_v6 = vld [vmem:[%s5738_s28 + $0x5d8] sm:$0xff]  ;;  %v761_v11 = vld [vmem:[%s5738_s28 + $0x5c0] sm:$0xff]  ;;  %v763_v13 = vld [vmem:[%s5738_s28 + $0x5d0] sm:$0xff] }
  0xaa   : > { %v4268_v14 = vpack.c.bf16 %v764_v6, %v756_v5  ;;  %v770_v15 = vld [vmem:[%s5738_s28 + $0x608] sm:$0xff]  ;;  %v772_v18 = vld [vmem:[%s5738_s28 + $0x618] sm:$0xff]  ;;  %v4014_v20 = vpack.c.bf16 %v761_v11, %v753_v8  ;;  %v4270_v21 = vpack.c.bf16 %v763_v13, %v755_v12  ;;  %v769_v23 = vld [vmem:[%s5738_s28 + $0x600] sm:$0xff] }
  0xab   : > { %3999 = vmatpush1.bf16.msra.mxu0 %v3998_v35  ;;  %v778_v16 = vld [vmem:[%s5738_s28 + $0x648] sm:$0xff]  ;;  %v780_v19 = vld [vmem:[%s5738_s28 + $0x658] sm:$0xff]  ;;  %v777_v24 = vld [vmem:[%s5738_s28 + $0x640] sm:$0xff] }
  0xac   : > { %4255 = vmatpush1.bf16.msra.mxu1 %v4254_v36  ;;  %4001 = vmatprep.subr.bf16.mxu0 %v4000_v37  ;;  %v514_v17 = vld [vmem:[%s5736_s8 + $0x8] sm:$0xff]  ;;  %v4016_v22 = vpack.c.bf16 %v778_v16, %v770_v15  ;;  %v771_v25 = vld [vmem:[%s5738_s28 + $0x610] sm:$0xff]  ;;  %v4272_v26 = vpack.c.bf16 %v780_v19, %v772_v18  ;;  %v788_v30 = vld [vmem:[%s5738_s28 + $0x698] sm:$0xff]  ;;  %v4018_v32 = vpack.c.bf16 %v777_v24, %v769_v23 }
  0xad   : > { %4257 = vmatprep.subr.bf16.mxu1 %v4256_v41  ;;  %1665 = vmatprep.mubr.f32.mxu0 %v514_v17  ;;  %v779_v27 = vld [vmem:[%s5738_s28 + $0x650] sm:$0xff]  ;;  %v786_v28 = vld [vmem:[%s5738_s28 + $0x688] sm:$0xff]  ;;  %v796_v31 = vld [vmem:[%s5738_s28 + $0x6d8] sm:$0xff] }
  0xae   : > { %2117 = vmatprep.mubr.f32.mxu1 %v514_v17  ;;  %v794_v29 = vld [vmem:[%s5738_s28 + $0x6c8] sm:$0xff]  ;;  %v4274_v33 = vpack.c.bf16 %v779_v27, %v771_v25  ;;  %v785_v35 = vld [vmem:[%s5738_s28 + $0x680] sm:$0xff]  ;;  %v787_v37 = vld [vmem:[%s5738_s28 + $0x690] sm:$0xff]  ;;  %v4276_v38 = vpack.c.bf16 %v796_v31, %v788_v30 }
  0xaf   : > { %4003 = vmatpush1.bf16.msra.mxu0 %v4002_v47  ;;  %v4020_v34 = vpack.c.bf16 %v794_v29, %v786_v28  ;;  %v793_v36 = vld [vmem:[%s5738_s28 + $0x6c0] sm:$0xff]  ;;  %v795_v39 = vld [vmem:[%s5738_s28 + $0x6d0] sm:$0xff]  ;;  %v802_v40 = vld [vmem:[%s5738_s28 + $0x708] sm:$0xff] }
  0xb0   : > { %4259 = vmatpush1.bf16.msra.mxu1 %v4258_v48  ;;  %4005 = vmatprep.subr.bf16.mxu0 %v4004_v49  ;;  %v810_v41 = vld [vmem:[%s5738_s28 + $0x748] sm:$0xff]  ;;  %v804_v42 = vld [vmem:[%s5738_s28 + $0x718] sm:$0xff]  ;;  %v4022_v44 = vpack.c.bf16 %v793_v36, %v785_v35  ;;  %v4278_v45 = vpack.c.bf16 %v795_v39, %v787_v37  ;;  %v801_v47 = vld [vmem:[%s5738_s28 + $0x700] sm:$0xff] }
  0xb1   : > { %4261 = vmatprep.subr.bf16.mxu1 %v4260_v53  ;;  %v812_v43 = vld [vmem:[%s5738_s28 + $0x758] sm:$0xff]  ;;  %v4024_v46 = vpack.c.bf16 %v810_v41, %v802_v40  ;;  %v809_v48 = vld [vmem:[%s5738_s28 + $0x740] sm:$0xff]  ;;  %v803_v49 = vld [vmem:[%s5738_s28 + $0x710] sm:$0xff] }
  0xb2   : > { %v4280_v50 = vpack.c.bf16 %v812_v43, %v804_v42  ;;  %v811_v51 = vld [vmem:[%s5738_s28 + $0x750] sm:$0xff]  ;;  %v818_v52 = vld [vmem:[%s5738_s28 + $0x788] sm:$0xff]  ;;  %v820_v54 = vld [vmem:[%s5738_s28 + $0x798] sm:$0xff]  ;;  %v4026_v56 = vpack.c.bf16 %v809_v48, %v801_v47 }
  0xb3   : > { %4007 = vmatpush1.bf16.msra.mxu0 %v4006_v59  ;;  %v826_v53 = vld [vmem:[%s5738_s28 + $0x7c8] sm:$0xff]  ;;  %v828_v55 = vld [vmem:[%s5738_s28 + $0x7d8] sm:$0xff]  ;;  %v4282_v57 = vpack.c.bf16 %v811_v51, %v803_v49  ;;  %v817_v59 = vld [vmem:[%s5738_s28 + $0x780] sm:$0xff] }
  0xb4   : > { %4263 = vmatpush1.bf16.msra.mxu1 %v4262_v60  ;;  %4009 = vmatprep.subr.bf16.mxu0 %v4008_v61  ;;  %v4028_v58 = vpack.c.bf16 %v826_v53, %v818_v52  ;;  %v825_v60 = vld [vmem:[%s5738_s28 + $0x7c0] sm:$0xff]  ;;  %v819_v61 = vld [vmem:[%s5738_s28 + $0x790] sm:$0xff]  ;;  %v4284_v62 = vpack.c.bf16 %v828_v55, %v820_v54  ;;  %v834_v0 = vld [vmem:[%s5738_s28 + $0x808] sm:$0xff] }
  0xb5   : > { %4265 = vmatprep.subr.bf16.mxu1 %v4264_v1  ;;  %v827_v63 = vld [vmem:[%s5738_s28 + $0x7d0] sm:$0xff]  ;;  %v842_v1 = vld [vmem:[%s5738_s28 + $0x848] sm:$0xff]  ;;  %v836_v2 = vld [vmem:[%s5738_s28 + $0x818] sm:$0xff]  ;;  %v4030_v4 = vpack.c.bf16 %v825_v60, %v817_v59 }
  0xb6   : > { %v844_v3 = vld [vmem:[%s5738_s28 + $0x858] sm:$0xff]  ;;  %v4286_v5 = vpack.c.bf16 %v827_v63, %v819_v61  ;;  %v4032_v6 = vpack.c.bf16 %v842_v1, %v834_v0  ;;  %v841_v8 = vld [vmem:[%s5738_s28 + $0x840] sm:$0xff]  ;;  %v843_v11 = vld [vmem:[%s5738_s28 + $0x850] sm:$0xff] }
  0xb7   : > { %4011 = vmatpush1.bf16.msra.mxu0 %v4010_v7  ;;  %v833_v7 = vld [vmem:[%s5738_s28 + $0x800] sm:$0xff]  ;;  %v850_v12 = vld [vmem:[%s5738_s28 + $0x888] sm:$0xff]  ;;  %v860_v15 = vld [vmem:[%s5738_s28 + $0x8d8] sm:$0xff] }
  0xb8   : > { %4267 = vmatpush1.bf16.msra.mxu1 %v4266_v9  ;;  %4013 = vmatprep.subr.bf16.mxu0 %v4012_v10  ;;  %v835_v9 = vld [vmem:[%s5738_s28 + $0x810] sm:$0xff]  ;;  %v4288_v10 = vpack.c.bf16 %v844_v3, %v836_v2  ;;  %v858_v13 = vld [vmem:[%s5738_s28 + $0x8c8] sm:$0xff]  ;;  %v513_v16 = vld [vmem:[%s5736_s8] sm:$0xff]  ;;  %v4034_v17 = vpack.c.bf16 %v841_v8, %v833_v7 }
  0xb9   : > { %4269 = vmatprep.subr.bf16.mxu1 %v4268_v14  ;;  %v852_v14 = vld [vmem:[%s5738_s28 + $0x898] sm:$0xff]  ;;  %v4290_v18 = vpack.c.bf16 %v843_v11, %v835_v9  ;;  %v4036_v19 = vpack.c.bf16 %v858_v13, %v850_v12  ;;  %v859_v24 = vld [vmem:[%s5738_s28 + $0x8d0] sm:$0xff]  ;;  %v866_v25 = vld [vmem:[%s5738_s28 + $0x908] sm:$0xff] }
  0xba   : > { %v4292_v23 = vpack.c.bf16 %v860_v15, %v852_v14  ;;  %v868_v27 = vld [vmem:[%s5738_s28 + $0x918] sm:$0xff]  ;;  %v522_v29 = vld [vmem:[%s5736_s8 + $0x48] sm:$0xff]  ;;  %v865_v31 = vld [vmem:[%s5738_s28 + $0x900] sm:$0xff] }
  0xbb   : > { %4015 = vmatpush1.bf16.msra.mxu0 %v4014_v20  ;;  %v849_v20 = vld [vmem:[%s5738_s28 + $0x880] sm:$0xff]  ;;  %v876_v28 = vld [vmem:[%s5738_s28 + $0x958] sm:$0xff]  ;;  %v867_v35 = vld [vmem:[%s5738_s28 + $0x910] sm:$0xff] }
  0xbc   : > { %4271 = vmatpush1.bf16.msra.mxu1 %v4270_v21  ;;  %4017 = vmatprep.subr.bf16.mxu0 %v4016_v22  ;;  %v857_v21 = vld [vmem:[%s5738_s28 + $0x8c0] sm:$0xff]  ;;  %v851_v22 = vld [vmem:[%s5738_s28 + $0x890] sm:$0xff]  ;;  %v4296_v37 = vpack.c.bf16 %v876_v28, %v868_v27  ;;  %v882_v39 = vld [vmem:[%s5738_s28 + $0x988] sm:$0xff] }
  0xbd   : > { %4273 = vmatprep.subr.bf16.mxu1 %v4272_v26  ;;  %v874_v26 = vld [vmem:[%s5738_s28 + $0x948] sm:$0xff]  ;;  %v4038_v30 = vpack.c.bf16 %v857_v21, %v849_v20  ;;  %v521_v36 = vld [vmem:[%s5736_s8 + $0x40] sm:$0xff]  ;;  %v884_v41 = vld [vmem:[%s5738_s28 + $0x998] sm:$0xff] }
  0xbe   : > { %v890_v40 = vld [vmem:[%s5738_s28 + $0x9c8] sm:$0xff]  ;;  %v892_v42 = vld [vmem:[%s5738_s28 + $0x9d8] sm:$0xff]  ;;  %v881_v48 = vld [vmem:[%s5738_s28 + $0x980] sm:$0xff] }
  0xbf   : > { %4019 = vmatpush1.bf16.msra.mxu0 %v4018_v32  ;;  %v4294_v32 = vpack.c.bf16 %v859_v24, %v851_v22  ;;  %v530_v43 = vld [vmem:[%s5736_s8 + $0x88] sm:$0xff]  ;;  %v4044_v47 = vpack.c.bf16 %v890_v40, %v882_v39  ;;  %v889_v49 = vld [vmem:[%s5738_s28 + $0x9c0] sm:$0xff]  ;;  %v4300_v51 = vpack.c.bf16 %v892_v42, %v884_v41  ;;  %v891_v52 = vld [vmem:[%s5738_s28 + $0x9d0] sm:$0xff] }
  0xc0   : > { %4275 = vmatpush1.bf16.msra.mxu1 %v4274_v33  ;;  %4021 = vmatprep.subr.bf16.mxu0 %v4020_v34  ;;  %v4040_v33 = vpack.c.bf16 %v874_v26, %v866_v25  ;;  %v873_v34 = vld [vmem:[%s5738_s28 + $0x940] sm:$0xff]  ;;  %v898_v53 = vld [vmem:[%s5738_s28 + $0xa08] sm:$0xff]  ;;  %v900_v55 = vld [vmem:[%s5738_s28 + $0xa18] sm:$0xff] }
  0xc1   : > { %4277 = vmatprep.subr.bf16.mxu1 %v4276_v38  ;;  %v875_v38 = vld [vmem:[%s5738_s28 + $0x950] sm:$0xff]  ;;  %v906_v54 = vld [vmem:[%s5738_s28 + $0xa48] sm:$0xff]  ;;  %v537_v59 = vld [vmem:[%s5736_s8 + $0xc0] sm:$0xff] }
  0xc2   : > { %v4048_v61 = vpack.c.bf16 %v906_v54, %v898_v53  ;;  %v905_v63 = vld [vmem:[%s5738_s28 + $0xa40] sm:$0xff]  ;;  %v899_v0 = vld [vmem:[%s5738_s28 + $0xa10] sm:$0xff]  ;;  %v914_v3 = vld [vmem:[%s5738_s28 + $0xa88] sm:$0xff] }
  0xc3   : > { %4023 = vmatpush1.bf16.msra.mxu0 %v4022_v44  ;;  %v4042_v44 = vpack.c.bf16 %v873_v34, %v865_v31  ;;  %v907_v2 = vld [vmem:[%s5738_s28 + $0xa50] sm:$0xff]  ;;  %v546_v7 = vld [vmem:[%s5736_s8 + $0x108] sm:$0xff]  ;;  %v545_v9 = vld [vmem:[%s5736_s8 + $0x100] sm:$0xff] }
  0xc4   : > { %4279 = vmatpush1.bf16.msra.mxu1 %v4278_v45  ;;  %4025 = vmatprep.subr.bf16.mxu0 %v4024_v46  ;;  %v529_v45 = vld [vmem:[%s5736_s8 + $0x80] sm:$0xff]  ;;  %v4298_v46 = vpack.c.bf16 %v875_v38, %v867_v35  ;;  %v915_v14 = vld [vmem:[%s5738_s28 + $0xa90] sm:$0xff]  ;;  %v940_v20 = vld [vmem:[%s5738_s28 + $0xb58] sm:$0xff] }
  0xc5   : > { %4281 = vmatprep.subr.bf16.mxu1 %v4280_v50  ;;  %v883_v50 = vld [vmem:[%s5738_s28 + $0x990] sm:$0xff]  ;;  %v913_v12 = vld [vmem:[%s5738_s28 + $0xa80] sm:$0xff]  ;;  %v554_v21 = vld [vmem:[%s5736_s8 + $0x148] sm:$0xff] }
  0xc6   : > { %v4302_v60 = vpack.c.bf16 %v891_v52, %v883_v50  ;;  %v921_v13 = vld [vmem:[%s5738_s28 + $0xac0] sm:$0xff]  ;;  %v931_v28 = vld [vmem:[%s5738_s28 + $0xb10] sm:$0xff]  ;;  %v946_v31 = vld [vmem:[%s5738_s28 + $0xb88] sm:$0xff] }
  0xc7   : > { %4027 = vmatpush1.bf16.msra.mxu0 %v4026_v56  ;;  %v908_v56 = vld [vmem:[%s5738_s28 + $0xa58] sm:$0xff]  ;;  %v4054_v22 = vpack.c.bf16 %v921_v13, %v913_v12  ;;  %v929_v26 = vld [vmem:[%s5738_s28 + $0xb00] sm:$0xff]  ;;  %v562_v35 = vld [vmem:[%s5736_s8 + $0x188] sm:$0xff] }
  0xc8   : > { %4283 = vmatpush1.bf16.msra.mxu1 %v4282_v57  ;;  %4029 = vmatprep.subr.bf16.mxu0 %v4028_v58  ;;  %v538_v57 = vld [vmem:[%s5736_s8 + $0xc8] sm:$0xff]  ;;  %v4046_v58 = vpack.c.bf16 %v889_v49, %v881_v48  ;;  %v4304_v1 = vpack.c.bf16 %v908_v56, %v900_v55  ;;  %v937_v27 = vld [vmem:[%s5738_s28 + $0xb40] sm:$0xff]  ;;  %v956_v34 = vld [vmem:[%s5738_s28 + $0xbd8] sm:$0xff] }
  0xc9   : > { %4285 = vmatprep.subr.bf16.mxu1 %v4284_v62  ;;  %v897_v62 = vld [vmem:[%s5738_s28 + $0xa00] sm:$0xff]  ;;  %v947_v42 = vld [vmem:[%s5738_s28 + $0xb90] sm:$0xff]  ;;  %v972_v48 = vld [vmem:[%s5738_s28 + $0xc58] sm:$0xff] }
  0xca   : > { %v4050_v8 = vpack.c.bf16 %v905_v63, %v897_v62  ;;  %v945_v40 = vld [vmem:[%s5738_s28 + $0xb80] sm:$0xff]  ;;  %v570_v49 = vld [vmem:[%s5736_s8 + $0x1c8] sm:$0xff]  ;;  %v963_v56 = vld [vmem:[%s5738_s28 + $0xc10] sm:$0xff] }
  0xcb   : > { %4031 = vmatpush1.bf16.msra.mxu0 %v4030_v4  ;;  %v922_v4 = vld [vmem:[%s5738_s28 + $0xac8] sm:$0xff]  ;;  %v953_v41 = vld [vmem:[%s5738_s28 + $0xbc0] sm:$0xff]  ;;  %v988_v62 = vld [vmem:[%s5738_s28 + $0xcd8] sm:$0xff] }
  0xcc   : > { %4287 = vmatpush1.bf16.msra.mxu1 %v4286_v5  ;;  %4033 = vmatprep.subr.bf16.mxu0 %v4032_v6  ;;  %v916_v5 = vld [vmem:[%s5738_s28 + $0xa98] sm:$0xff]  ;;  %v4052_v11 = vpack.c.bf16 %v922_v4, %v914_v3  ;;  %v4062_v50 = vpack.c.bf16 %v953_v41, %v945_v40  ;;  %v961_v54 = vld [vmem:[%s5738_s28 + $0xc00] sm:$0xff]  ;;  %v1027_v41 = vld [vmem:[%s5738_s28 + $0xe10] sm:$0xff] }
  0xcd   : > { %4289 = vmatprep.subr.bf16.mxu1 %v4288_v10  ;;  %v924_v6 = vld [vmem:[%s5738_s28 + $0xad8] sm:$0xff]  ;;  %v4306_v10 = vpack.c.bf16 %v907_v2, %v899_v0  ;;  %v969_v55 = vld [vmem:[%s5738_s28 + $0xc40] sm:$0xff] }
  0xce   : > { %1666 = vmatmul.mubr.f32.vlgmr.msra.gmra.mrb[0].mxu0 %v513_v16  ;;  %v4308_v15 = vpack.c.bf16 %v924_v6, %v916_v5  ;;  %v516_v63 = vld [vmem:[%s5736_s8 + $0x18] sm:$0xff]  ;;  %v4066_v0 = vpack.c.bf16 %v969_v55, %v961_v54  ;;  %v977_v3 = vld [vmem:[%s5738_s28 + $0xc80] sm:$0xff]  ;;  %v979_v5 = vld [vmem:[%s5738_s28 + $0xc90] sm:$0xff] }
  0xcf   : > { %4035 = vmatpush1.bf16.msra.mxu0 %v4034_v17  ;;  %2118 = vmatmul.mubr.f32.vlgmr.msra.gmra.mrb[0].mxu1 %v513_v16  ;;  %v923_v16 = vld [vmem:[%s5738_s28 + $0xad0] sm:$0xff]  ;;  %v930_v17 = vld [vmem:[%s5738_s28 + $0xb08] sm:$0xff]  ;;  %v985_v4 = vld [vmem:[%s5738_s28 + $0xcc0] sm:$0xff] }
  0xd0   : > { %4291 = vmatpush1.bf16.msra.mxu1 %v4290_v18  ;;  %4037 = vmatprep.subr.bf16.mxu0 %v4036_v19  ;;  %v938_v18 = vld [vmem:[%s5738_s28 + $0xb48] sm:$0xff]  ;;  %v932_v19 = vld [vmem:[%s5738_s28 + $0xb18] sm:$0xff]  ;;  %v4310_v24 = vpack.c.bf16 %v923_v16, %v915_v14  ;;  %v4070_v12 = vpack.c.bf16 %v985_v4, %v977_v3  ;;  %v1001_v16 = vld [vmem:[%s5738_s28 + $0xd40] sm:$0xff] }
  0xd1   : > { %4293 = vmatprep.subr.bf16.mxu1 %v4292_v23  ;;  %1671 = vmatprep.mubr.f32.mxu0 %v522_v29  ;;  %v553_v23 = vld [vmem:[%s5736_s8 + $0x140] sm:$0xff]  ;;  %v4056_v25 = vpack.c.bf16 %v938_v18, %v930_v17  ;;  %v995_v17 = vld [vmem:[%s5738_s28 + $0xd10] sm:$0xff]  ;;  %v1074_v4 = vld [vmem:[%s5738_s28 + $0xf88] sm:$0xff] }
  0xd2   : > { %2123 = vmatprep.mubr.f32.mxu1 %v522_v29  ;;  %1672 = vmatmul.mubr.f32.gmra.mrb[2].mxu0 %v521_v36  ;;  %v4312_v29 = vpack.c.bf16 %v940_v20, %v932_v19  ;;  %v1003_v19 = vld [vmem:[%s5738_s28 + $0xd50] sm:$0xff]  ;;  %v1010_v20 = vld [vmem:[%s5738_s28 + $0xd88] sm:$0xff]  ;;  %v1033_v40 = vld [vmem:[%s5738_s28 + $0xe40] sm:$0xff] }
  0xd3   : > { %4039 = vmatpush1.bf16.msra.mxu0 %v4038_v30  ;;  %2124 = vmatmul.mubr.f32.gmra.mrb[2].mxu1 %v521_v36  ;;  %v939_v30 = vld [vmem:[%s5738_s28 + $0xb50] sm:$0xff]  ;;  %v4058_v36 = vpack.c.bf16 %v937_v27, %v929_v26  ;;  %v1009_v27 = vld [vmem:[%s5738_s28 + $0xd80] sm:$0xff] }
  0xd4   : > { %4295 = vmatpush1.bf16.msra.mxu1 %v4294_v32  ;;  %4041 = vmatprep.subr.bf16.mxu0 %v4040_v33  ;;  %v954_v32 = vld [vmem:[%s5738_s28 + $0xbc8] sm:$0xff]  ;;  %v948_v33 = vld [vmem:[%s5738_s28 + $0xb98] sm:$0xff]  ;;  %v4314_v38 = vpack.c.bf16 %v939_v30, %v931_v28  ;;  %v1017_v28 = vld [vmem:[%s5738_s28 + $0xdc0] sm:$0xff] }
  0xd5   : > { %4297 = vmatprep.subr.bf16.mxu1 %v4296_v37  ;;  %1677 = vmatprep.mubr.f32.mxu0 %v530_v43  ;;  %v561_v37 = vld [vmem:[%s5736_s8 + $0x180] sm:$0xff]  ;;  %v4060_v39 = vpack.c.bf16 %v954_v32, %v946_v31  ;;  %v1019_v31 = vld [vmem:[%s5738_s28 + $0xdd0] sm:$0xff]  ;;  %v1026_v32 = vld [vmem:[%s5738_s28 + $0xe08] sm:$0xff] }
  0xd6   : > { %2129 = vmatprep.mubr.f32.mxu1 %v530_v43  ;;  %1678 = vmatmul.mubr.f32.gmra.mrb[4].mxu0 %v529_v45  ;;  %v4316_v43 = vpack.c.bf16 %v956_v34, %v948_v33  ;;  %v1034_v33 = vld [vmem:[%s5738_s28 + $0xe48] sm:$0xff]  ;;  %v1028_v34 = vld [vmem:[%s5738_s28 + $0xe18] sm:$0xff]  ;;  %v1051_v55 = vld [vmem:[%s5738_s28 + $0xed0] sm:$0xff] }
  0xd7   : > { %4043 = vmatpush1.bf16.msra.mxu0 %v4042_v44  ;;  %2130 = vmatmul.mubr.f32.gmra.mrb[4].mxu1 %v529_v45  ;;  %v955_v44 = vld [vmem:[%s5738_s28 + $0xbd0] sm:$0xff]  ;;  %v962_v45 = vld [vmem:[%s5738_s28 + $0xc08] sm:$0xff] }
  0xd8   : > { %4299 = vmatpush1.bf16.msra.mxu1 %v4298_v46  ;;  %4045 = vmatprep.subr.bf16.mxu0 %v4044_v47  ;;  %v970_v46 = vld [vmem:[%s5738_s28 + $0xc48] sm:$0xff]  ;;  %v964_v47 = vld [vmem:[%s5738_s28 + $0xc18] sm:$0xff]  ;;  %v4318_v52 = vpack.c.bf16 %v955_v44, %v947_v42  ;;  %v1067_v3 = vld [vmem:[%s5738_s28 + $0xf50] sm:$0xff] }
  0xd9   : > { %4301 = vmatprep.subr.bf16.mxu1 %v4300_v51  ;;  %1683 = vmatprep.mubr.f32.mxu0 %v538_v57  ;;  %v569_v51 = vld [vmem:[%s5736_s8 + $0x1c0] sm:$0xff]  ;;  %v4064_v53 = vpack.c.bf16 %v970_v46, %v962_v45  ;;  %v1042_v44 = vld [vmem:[%s5738_s28 + $0xe88] sm:$0xff]  ;;  %v1044_v46 = vld [vmem:[%s5738_s28 + $0xe98] sm:$0xff] }
  0xda   : > { %2135 = vmatprep.mubr.f32.mxu1 %v538_v57  ;;  %1684 = vmatmul.mubr.f32.gmra.mrb[6].mxu0 %v537_v59  ;;  %v4320_v57 = vpack.c.bf16 %v972_v48, %v964_v47  ;;  %v1050_v45 = vld [vmem:[%s5738_s28 + $0xec8] sm:$0xff]  ;;  %v1052_v47 = vld [vmem:[%s5738_s28 + $0xed8] sm:$0xff] }
  0xdb   : > { %4047 = vmatpush1.bf16.msra.mxu0 %v4046_v58  ;;  %2136 = vmatmul.mubr.f32.gmra.mrb[6].mxu1 %v537_v59  ;;  %v971_v58 = vld [vmem:[%s5738_s28 + $0xc50] sm:$0xff]  ;;  %v978_v59 = vld [vmem:[%s5738_s28 + $0xc88] sm:$0xff]  ;;  %v4340_v54 = vpack.c.bf16 %v1052_v47, %v1044_v46 }
  0xdc   : > { %4303 = vmatpush1.bf16.msra.mxu1 %v4302_v60  ;;  %4049 = vmatprep.subr.bf16.mxu0 %v4048_v61  ;;  %v986_v60 = vld [vmem:[%s5738_s28 + $0xcc8] sm:$0xff]  ;;  %v980_v61 = vld [vmem:[%s5738_s28 + $0xc98] sm:$0xff]  ;;  %v523_v47 = vld [vmem:[%s5736_s8 + $0x50] sm:$0xff] }
  0xdd   : > { %4305 = vmatprep.subr.bf16.mxu1 %v4304_v1  ;;  %1689 = vmatprep.mubr.f32.mxu0 %v546_v7  ;;  %v4322_v1 = vpack.c.bf16 %v971_v58, %v963_v56  ;;  %v4068_v2 = vpack.c.bf16 %v986_v60, %v978_v59  ;;  %v4324_v6 = vpack.c.bf16 %v988_v62, %v980_v61  ;;  %v1058_v56 = vld [vmem:[%s5738_s28 + $0xf08] sm:$0xff]  ;;  %v1060_v58 = vld [vmem:[%s5738_s28 + $0xf18] sm:$0xff] }
  0xde   : > { %2141 = vmatprep.mubr.f32.mxu1 %v546_v7  ;;  %1690 = vmatmul.mubr.f32.gmra.mrb[8].mxu0 %v545_v9  ;;  %v987_v7 = vld [vmem:[%s5738_s28 + $0xcd0] sm:$0xff]  ;;  %v1068_v59 = vld [vmem:[%s5738_s28 + $0xf58] sm:$0xff] }
  0xdf   : > { %4051 = vmatpush1.bf16.msra.mxu0 %v4050_v8  ;;  %2142 = vmatmul.mubr.f32.gmra.mrb[8].mxu1 %v545_v9  ;;  %v994_v8 = vld [vmem:[%s5738_s28 + $0xd08] sm:$0xff]  ;;  %v4326_v13 = vpack.c.bf16 %v987_v7, %v979_v5  ;;  %v1084_v7 = vld [vmem:[%s5738_s28 + $0xfd8] sm:$0xff] }
  0xe0   : > { %4307 = vmatpush1.bf16.msra.mxu1 %v4306_v10  ;;  %4053 = vmatprep.subr.bf16.mxu0 %v4052_v11  ;;  %v1002_v9 = vld [vmem:[%s5738_s28 + $0xd48] sm:$0xff]  ;;  %v996_v10 = vld [vmem:[%s5738_s28 + $0xd18] sm:$0xff] }
  0xe1   : > { %4309 = vmatprep.subr.bf16.mxu1 %v4308_v15  ;;  %1695 = vmatprep.mubr.f32.mxu0 %v554_v21  ;;  %v1004_v11 = vld [vmem:[%s5738_s28 + $0xd58] sm:$0xff]  ;;  %v4072_v14 = vpack.c.bf16 %v1002_v9, %v994_v8  ;;  %v993_v15 = vld [vmem:[%s5738_s28 + $0xd00] sm:$0xff]  ;;  %v1082_v5 = vld [vmem:[%s5738_s28 + $0xfc8] sm:$0xff] }
  0xe2   : > { %2147 = vmatprep.mubr.f32.mxu1 %v554_v21  ;;  %1696 = vmatmul.mubr.f32.gmra.mrb[10].mxu0 %v553_v23  ;;  %v4328_v18 = vpack.c.bf16 %v1004_v11, %v996_v10  ;;  %v1018_v21 = vld [vmem:[%s5738_s28 + $0xdc8] sm:$0xff]  ;;  %v4092_v10 = vpack.c.bf16 %v1082_v5, %v1074_v4  ;;  %v1073_v11 = vld [vmem:[%s5738_s28 + $0xf80] sm:$0xff]  ;;  %v1147_v4 = vld [vmem:[%s5738_s28 + $0x11d0] sm:$0xff] }
  0xe3   : > { %4055 = vmatpush1.bf16.msra.mxu0 %v4054_v22  ;;  %2148 = vmatmul.mubr.f32.gmra.mrb[10].mxu1 %v553_v23  ;;  %v1012_v22 = vld [vmem:[%s5738_s28 + $0xd98] sm:$0xff]  ;;  %v4076_v26 = vpack.c.bf16 %v1018_v21, %v1010_v20  ;;  %v1154_v5 = vld [vmem:[%s5738_s28 + $0x1208] sm:$0xff] }
  0xe4   : > { %4311 = vmatpush1.bf16.msra.mxu1 %v4310_v24  ;;  %4057 = vmatprep.subr.bf16.mxu0 %v4056_v25  ;;  %v1020_v23 = vld [vmem:[%s5738_s28 + $0xdd8] sm:$0xff]  ;;  %v4074_v24 = vpack.c.bf16 %v1001_v16, %v993_v15  ;;  %v4330_v25 = vpack.c.bf16 %v1003_v19, %v995_v17  ;;  %v1083_v15 = vld [vmem:[%s5738_s28 + $0xfd0] sm:$0xff]  ;;  %v1090_v16 = vld [vmem:[%s5738_s28 + $0x1008] sm:$0xff] }
  0xe5   : > { %4313 = vmatprep.subr.bf16.mxu1 %v4312_v29  ;;  %1701 = vmatprep.mubr.f32.mxu0 %v562_v35  ;;  %v1011_v29 = vld [vmem:[%s5738_s28 + $0xd90] sm:$0xff]  ;;  %v4332_v30 = vpack.c.bf16 %v1020_v23, %v1012_v22  ;;  %v1098_v17 = vld [vmem:[%s5738_s28 + $0x1048] sm:$0xff]  ;;  %v1100_v19 = vld [vmem:[%s5738_s28 + $0x1058] sm:$0xff] }
  0xe6   : > { %2153 = vmatprep.mubr.f32.mxu1 %v562_v35  ;;  %1702 = vmatmul.mubr.f32.gmra.mrb[12].mxu0 %v561_v37  ;;  %v1036_v35 = vld [vmem:[%s5738_s28 + $0xe58] sm:$0xff]  ;;  %v4096_v22 = vpack.c.bf16 %v1098_v17, %v1090_v16  ;;  %v1089_v23 = vld [vmem:[%s5738_s28 + $0x1000] sm:$0xff]  ;;  %v1155_v16 = vld [vmem:[%s5738_s28 + $0x1210] sm:$0xff] }
  0xe7   : > { %4059 = vmatpush1.bf16.msra.mxu0 %v4058_v36  ;;  %2154 = vmatmul.mubr.f32.gmra.mrb[12].mxu1 %v561_v37  ;;  %v4078_v36 = vpack.c.bf16 %v1017_v28, %v1009_v27  ;;  %v4334_v37 = vpack.c.bf16 %v1019_v31, %v1011_v29  ;;  %v4336_v42 = vpack.c.bf16 %v1036_v35, %v1028_v34  ;;  %v1099_v27 = vld [vmem:[%s5738_s28 + $0x1050] sm:$0xff]  ;;  %v1106_v28 = vld [vmem:[%s5738_s28 + $0x1088] sm:$0xff]  ;;  %v1116_v31 = vld [vmem:[%s5738_s28 + $0x10d8] sm:$0xff] }
  0xe8   : > { %4315 = vmatpush1.bf16.msra.mxu1 %v4314_v38  ;;  %4061 = vmatprep.subr.bf16.mxu0 %v4060_v39  ;;  %v4080_v38 = vpack.c.bf16 %v1034_v33, %v1026_v32  ;;  %v1025_v39 = vld [vmem:[%s5738_s28 + $0xe00] sm:$0xff]  ;;  %v1114_v29 = vld [vmem:[%s5738_s28 + $0x10c8] sm:$0xff]  ;;  %v515_v32 = vld [vmem:[%s5736_s8 + $0x10] sm:$0xff] }
  0xe9   : > { %4317 = vmatprep.subr.bf16.mxu1 %v4316_v43  ;;  %1707 = vmatprep.mubr.f32.mxu0 %v570_v49  ;;  %v1035_v43 = vld [vmem:[%s5738_s28 + $0xe50] sm:$0xff]  ;;  %v4082_v48 = vpack.c.bf16 %v1033_v40, %v1025_v39  ;;  %v4100_v35 = vpack.c.bf16 %v1114_v29, %v1106_v28  ;;  %v1169_v28 = vld [vmem:[%s5738_s28 + $0x1280] sm:$0xff] }
  0xea   : > { %2159 = vmatprep.mubr.f32.mxu1 %v570_v49  ;;  %1708 = vmatmul.mubr.f32.gmra.mrb[14].mxu0 %v569_v51  ;;  %v4338_v49 = vpack.c.bf16 %v1035_v43, %v1027_v41  ;;  %v1115_v40 = vld [vmem:[%s5738_s28 + $0x10d0] sm:$0xff]  ;;  %v1122_v41 = vld [vmem:[%s5738_s28 + $0x1108] sm:$0xff]  ;;  %v1124_v43 = vld [vmem:[%s5738_s28 + $0x1118] sm:$0xff] }
  0xeb   : > { %4063 = vmatpush1.bf16.msra.mxu0 %v4062_v50  ;;  %2160 = vmatmul.mubr.f32.gmra.mrb[14].mxu1 %v569_v51  ;;  %v4084_v50 = vpack.c.bf16 %v1050_v45, %v1042_v44  ;;  %v1041_v51 = vld [vmem:[%s5738_s28 + $0xe80] sm:$0xff]  ;;  %v1132_v44 = vld [vmem:[%s5738_s28 + $0x1158] sm:$0xff] }
  0xec   : > { %4319 = vmatpush1.bf16.msra.mxu1 %v4318_v52  ;;  %4065 = vmatprep.subr.bf16.mxu0 %v4064_v53  ;;  %v1049_v52 = vld [vmem:[%s5738_s28 + $0xec0] sm:$0xff]  ;;  %v1043_v53 = vld [vmem:[%s5738_s28 + $0xe90] sm:$0xff]  ;;  %v524_v45 = vld [vmem:[%s5736_s8 + $0x58] sm:$0xff] }
  0xed   : > { %4321 = vmatprep.subr.bf16.mxu1 %v4320_v57  ;;  %1778 = vmatprep.mubr.f32.mxu0 %v516_v63  ;;  %v1066_v57 = vld [vmem:[%s5738_s28 + $0xf48] sm:$0xff]  ;;  %v4086_v60 = vpack.c.bf16 %v1049_v52, %v1041_v51  ;;  %v4342_v61 = vpack.c.bf16 %v1051_v55, %v1043_v53  ;;  %v1129_v51 = vld [vmem:[%s5738_s28 + $0x1140] sm:$0xff]  ;;  %v1123_v52 = vld [vmem:[%s5738_s28 + $0x1110] sm:$0xff]  ;;  %v4360_v53 = vpack.c.bf16 %v1132_v44, %v1124_v43 }
  0xee   : > { %2230 = vmatprep.mubr.f32.mxu1 %v516_v63  ;;  %v4088_v62 = vpack.c.bf16 %v1066_v57, %v1058_v56  ;;  %v1057_v63 = vld [vmem:[%s5738_s28 + $0xf00] sm:$0xff]  ;;  %v1138_v55 = vld [vmem:[%s5738_s28 + $0x1188] sm:$0xff]  ;;  %v1140_v57 = vld [vmem:[%s5738_s28 + $0x1198] sm:$0xff] }
  0xef   : > { %4067 = vmatpush1.bf16.msra.mxu0 %v4066_v0  ;;  %v1065_v0 = vld [vmem:[%s5738_s28 + $0xf40] sm:$0xff]  ;;  %v1146_v56 = vld [vmem:[%s5738_s28 + $0x11c8] sm:$0xff]  ;;  %v1187_v44 = vld [vmem:[%s5738_s28 + $0x1310] sm:$0xff] }
  0xf0   : > { %4323 = vmatpush1.bf16.msra.mxu1 %v4322_v1  ;;  %4069 = vmatprep.subr.bf16.mxu0 %v4068_v2  ;;  %v1059_v1 = vld [vmem:[%s5738_s28 + $0xf10] sm:$0xff]  ;;  %v4344_v2 = vpack.c.bf16 %v1068_v59, %v1060_v58  ;;  %v4090_v8 = vpack.c.bf16 %v1065_v0, %v1057_v63  ;;  %v1148_v58 = vld [vmem:[%s5738_s28 + $0x11d8] sm:$0xff]  ;;  %v4108_v63 = vpack.c.bf16 %v1146_v56, %v1138_v55  ;;  %v1137_v0 = vld [vmem:[%s5738_s28 + $0x1180] sm:$0xff] }
  0xf1   : > { %4325 = vmatprep.subr.bf16.mxu1 %v4324_v6  ;;  %v1076_v6 = vld [vmem:[%s5738_s28 + $0xf98] sm:$0xff]  ;;  %v4346_v9 = vpack.c.bf16 %v1067_v3, %v1059_v1  ;;  %v1145_v1 = vld [vmem:[%s5738_s28 + $0x11c0] sm:$0xff]  ;;  %v4364_v3 = vpack.c.bf16 %v1148_v58, %v1140_v57  ;;  %v1203_v58 = vld [vmem:[%s5738_s28 + $0x1390] sm:$0xff] }
  0xf2   : > { %v532_v59 = vld [vmem:[%s5736_s8 + $0x98] sm:$0xff]  ;;  %v1177_v29 = vld [vmem:[%s5738_s28 + $0x12c0] sm:$0xff] }
  0xf3   : > { %4071 = vmatpush1.bf16.msra.mxu0 %v4070_v12  ;;  %v1081_v12 = vld [vmem:[%s5738_s28 + $0xfc0] sm:$0xff] }
  0xf4   : > { %4327 = vmatpush1.bf16.msra.mxu1 %v4326_v13  ;;  %4073 = vmatprep.subr.bf16.mxu0 %v4072_v14  ;;  %v1075_v13 = vld [vmem:[%s5738_s28 + $0xf90] sm:$0xff]  ;;  %v4348_v14 = vpack.c.bf16 %v1084_v7, %v1076_v6  ;;  %v4094_v20 = vpack.c.bf16 %v1081_v12, %v1073_v11  ;;  %v1162_v6 = vld [vmem:[%s5738_s28 + $0x1248] sm:$0xff]  ;;  %v1156_v7 = vld [vmem:[%s5738_s28 + $0x1218] sm:$0xff] }
  0xf5   : > { %4329 = vmatprep.subr.bf16.mxu1 %v4328_v18  ;;  %v1092_v18 = vld [vmem:[%s5738_s28 + $0x1018] sm:$0xff]  ;;  %v4350_v21 = vpack.c.bf16 %v1083_v15, %v1075_v13  ;;  %v539_v11 = vld [vmem:[%s5736_s8 + $0xd0] sm:$0xff]  ;;  %v4112_v13 = vpack.c.bf16 %v1162_v6, %v1154_v5  ;;  %v1161_v15 = vld [vmem:[%s5738_s28 + $0x1240] sm:$0xff] }
  0xf6   : > { %v1193_v43 = vld [vmem:[%s5738_s28 + $0x1340] sm:$0xff] }
  0xf7   : > { %4075 = vmatpush1.bf16.msra.mxu0 %v4074_v24  ;;  %v1097_v24 = vld [vmem:[%s5738_s28 + $0x1040] sm:$0xff] }
  0xf8   : > { %4331 = vmatpush1.bf16.msra.mxu1 %v4330_v25  ;;  %4077 = vmatprep.subr.bf16.mxu0 %v4076_v26  ;;  %v1091_v25 = vld [vmem:[%s5738_s28 + $0x1010] sm:$0xff]  ;;  %v4352_v26 = vpack.c.bf16 %v1100_v19, %v1092_v18  ;;  %v4098_v33 = vpack.c.bf16 %v1097_v24, %v1089_v23  ;;  %v1170_v19 = vld [vmem:[%s5738_s28 + $0x1288] sm:$0xff]  ;;  %v548_v23 = vld [vmem:[%s5736_s8 + $0x118] sm:$0xff] }
  0xf9   : > { %4333 = vmatprep.subr.bf16.mxu1 %v4332_v30  ;;  %v1108_v30 = vld [vmem:[%s5738_s28 + $0x1098] sm:$0xff]  ;;  %v4354_v34 = vpack.c.bf16 %v1099_v27, %v1091_v25  ;;  %v1163_v18 = vld [vmem:[%s5738_s28 + $0x1250] sm:$0xff]  ;;  %v1201_v56 = vld [vmem:[%s5738_s28 + $0x1380] sm:$0xff] }
  0xfa   : > { %v4356_v39 = vpack.c.bf16 %v1116_v31, %v1108_v30  ;;  %v547_v25 = vld [vmem:[%s5736_s8 + $0x110] sm:$0xff]  ;;  %v1209_v57 = vld [vmem:[%s5738_s28 + $0x13c0] sm:$0xff] }
  0xfb   : > { %4079 = vmatpush1.bf16.msra.mxu0 %v4078_v36  ;;  %v1105_v36 = vld [vmem:[%s5738_s28 + $0x1080] sm:$0xff]  ;;  %v1171_v30 = vld [vmem:[%s5738_s28 + $0x1290] sm:$0xff] }
  0xfc   : > { %4335 = vmatpush1.bf16.msra.mxu1 %v4334_v37  ;;  %4081 = vmatprep.subr.bf16.mxu0 %v4080_v38  ;;  %v1113_v37 = vld [vmem:[%s5738_s28 + $0x10c0] sm:$0xff]  ;;  %v1107_v38 = vld [vmem:[%s5738_s28 + $0x1090] sm:$0xff] }
  0xfd   : > { %4337 = vmatprep.subr.bf16.mxu1 %v4336_v42  ;;  %v1130_v42 = vld [vmem:[%s5738_s28 + $0x1148] sm:$0xff]  ;;  %v4102_v46 = vpack.c.bf16 %v1113_v37, %v1105_v36  ;;  %v1196_v36 = vld [vmem:[%s5738_s28 + $0x1358] sm:$0xff]  ;;  %v1217_v6 = vld [vmem:[%s5738_s28 + $0x1400] sm:$0xff] }
  0xfe   : > { %v556_v37 = vld [vmem:[%s5736_s8 + $0x158] sm:$0xff] }
  0xff   : > { %4083 = vmatpush1.bf16.msra.mxu0 %v4082_v48  ;;  %v4358_v48 = vpack.c.bf16 %v1115_v40, %v1107_v38  ;;  %v4118_v38 = vpack.c.bf16 %v1177_v29, %v1169_v28 }
 0x100   : > { %4339 = vmatpush1.bf16.msra.mxu1 %v4338_v49  ;;  %4085 = vmatprep.subr.bf16.mxu0 %v4084_v50  ;;  %v4104_v49 = vpack.c.bf16 %v1130_v42, %v1122_v41  ;;  %v1121_v50 = vld [vmem:[%s5738_s28 + $0x1100] sm:$0xff] }
 0x101   : > { %4341 = vmatprep.subr.bf16.mxu1 %v4340_v54  ;;  %v1131_v54 = vld [vmem:[%s5738_s28 + $0x1150] sm:$0xff]  ;;  %v1185_v42 = vld [vmem:[%s5738_s28 + $0x1300] sm:$0xff] }
 0x103   : > { %4087 = vmatpush1.bf16.msra.mxu0 %v4086_v60  ;;  %v4106_v60 = vpack.c.bf16 %v1129_v51, %v1121_v50  ;;  %v1212_v50 = vld [vmem:[%s5738_s28 + $0x13d8] sm:$0xff] }
 0x104   : > { %4343 = vmatpush1.bf16.msra.mxu1 %v4342_v61  ;;  %4089 = vmatprep.subr.bf16.mxu0 %v4088_v62  ;;  %v531_v61 = vld [vmem:[%s5736_s8 + $0x90] sm:$0xff]  ;;  %v4362_v62 = vpack.c.bf16 %v1131_v54, %v1123_v52  ;;  %v564_v51 = vld [vmem:[%s5736_s8 + $0x198] sm:$0xff]  ;;  %v4122_v52 = vpack.c.bf16 %v1193_v43, %v1185_v42  ;;  %v1265_v43 = vld [vmem:[%s5738_s28 + $0x1580] sm:$0xff] }
 0x105   : > { %4345 = vmatprep.subr.bf16.mxu1 %v4344_v2  ;;  %v1139_v2 = vld [vmem:[%s5738_s28 + $0x1190] sm:$0xff] }
 0x106   : > { %v4366_v12 = vpack.c.bf16 %v1147_v4, %v1139_v2  ;;  %v4126_v2 = vpack.c.bf16 %v1209_v57, %v1201_v56  ;;  %v1289_v56 = vld [vmem:[%s5738_s28 + $0x1640] sm:$0xff]  ;;  %v1283_v57 = vld [vmem:[%s5738_s28 + $0x1610] sm:$0xff] }
 0x107   : > { %4091 = vmatpush1.bf16.msra.mxu0 %v4090_v8  ;;  %v1164_v8 = vld [vmem:[%s5738_s28 + $0x1258] sm:$0xff] }
 0x108   : > { %4347 = vmatpush1.bf16.msra.mxu1 %v4346_v9  ;;  %4093 = vmatprep.subr.bf16.mxu0 %v4092_v10  ;;  %v540_v9 = vld [vmem:[%s5736_s8 + $0xd8] sm:$0xff]  ;;  %v4110_v10 = vpack.c.bf16 %v1145_v1, %v1137_v0  ;;  %v4368_v17 = vpack.c.bf16 %v1164_v8, %v1156_v7  ;;  %v1225_v7 = vld [vmem:[%s5738_s28 + $0x1440] sm:$0xff]  ;;  %v1219_v8 = vld [vmem:[%s5738_s28 + $0x1410] sm:$0xff] }
 0x109   : > { %4349 = vmatprep.subr.bf16.mxu1 %v4348_v14  ;;  %v1153_v14 = vld [vmem:[%s5738_s28 + $0x1200] sm:$0xff]  ;;  %v1228_v0 = vld [vmem:[%s5738_s28 + $0x1458] sm:$0xff] }
 0x10a   : > { %v4114_v24 = vpack.c.bf16 %v1161_v15, %v1153_v14  ;;  %v572_v1 = vld [vmem:[%s5736_s8 + $0x1d8] sm:$0xff]  ;;  %v518_v15 = vld [vmem:[%s5736_s8 + $0x28] sm:$0xff] }
 0x10b   : > { %4095 = vmatpush1.bf16.msra.mxu0 %v4094_v20  ;;  %v1178_v20 = vld [vmem:[%s5738_s28 + $0x12c8] sm:$0xff]  ;;  %v1244_v14 = vld [vmem:[%s5738_s28 + $0x14d8] sm:$0xff] }
 0x10c   : > { %4351 = vmatpush1.bf16.msra.mxu1 %v4350_v21  ;;  %4097 = vmatprep.subr.bf16.mxu0 %v4096_v22  ;;  %v1172_v21 = vld [vmem:[%s5738_s28 + $0x1298] sm:$0xff]  ;;  %v4116_v27 = vpack.c.bf16 %v1178_v20, %v1170_v19  ;;  %v1233_v19 = vld [vmem:[%s5738_s28 + $0x1480] sm:$0xff] }
 0x10d   : > { %4353 = vmatprep.subr.bf16.mxu1 %v4352_v26  ;;  %v1180_v22 = vld [vmem:[%s5738_s28 + $0x12d8] sm:$0xff]  ;;  %v4370_v26 = vpack.c.bf16 %v1163_v18, %v1155_v16  ;;  %v4130_v16 = vpack.c.bf16 %v1225_v7, %v1217_v6  ;;  %v1241_v20 = vld [vmem:[%s5738_s28 + $0x14c0] sm:$0xff]  ;;  %v1307_v7 = vld [vmem:[%s5738_s28 + $0x16d0] sm:$0xff] }
 0x10e   : > { %1779 = vmatmul.mubr.f32.vlgmr.msra.gmra.mrb[0].mxu0 %v515_v32  ;;  %v4372_v31 = vpack.c.bf16 %v1180_v22, %v1172_v21  ;;  %v1235_v21 = vld [vmem:[%s5738_s28 + $0x1490] sm:$0xff]  ;;  %v4134_v28 = vpack.c.bf16 %v1241_v20, %v1233_v19  ;;  %v1330_v20 = vld [vmem:[%s5738_s28 + $0x1788] sm:$0xff] }
 0x10f   : > { %4099 = vmatpush1.bf16.msra.mxu0 %v4098_v33  ;;  %2231 = vmatmul.mubr.f32.vlgmr.msra.gmra.mrb[0].mxu1 %v515_v32  ;;  %v1179_v32 = vld [vmem:[%s5738_s28 + $0x12d0] sm:$0xff]  ;;  %v1186_v33 = vld [vmem:[%s5738_s28 + $0x1308] sm:$0xff] }
 0x110   : > { %4355 = vmatpush1.bf16.msra.mxu1 %v4354_v34  ;;  %4101 = vmatprep.subr.bf16.mxu0 %v4100_v35  ;;  %v1194_v34 = vld [vmem:[%s5738_s28 + $0x1348] sm:$0xff]  ;;  %v1188_v35 = vld [vmem:[%s5738_s28 + $0x1318] sm:$0xff]  ;;  %v4374_v40 = vpack.c.bf16 %v1179_v32, %v1171_v30  ;;  %v1257_v32 = vld [vmem:[%s5738_s28 + $0x1540] sm:$0xff] }
 0x111   : > { %4357 = vmatprep.subr.bf16.mxu1 %v4356_v39  ;;  %1784 = vmatprep.mubr.f32.mxu0 %v524_v45  ;;  %v555_v39 = vld [vmem:[%s5736_s8 + $0x150] sm:$0xff]  ;;  %v4120_v41 = vpack.c.bf16 %v1194_v34, %v1186_v33 }
 0x112   : > { %2236 = vmatprep.mubr.f32.mxu1 %v524_v45  ;;  %1785 = vmatmul.mubr.f32.gmra.mrb[2].mxu0 %v523_v47  ;;  %v4376_v45 = vpack.c.bf16 %v1196_v36, %v1188_v35  ;;  %v1251_v33 = vld [vmem:[%s5738_s28 + $0x1510] sm:$0xff]  ;;  %v1266_v36 = vld [vmem:[%s5738_s28 + $0x1588] sm:$0xff] }
 0x113   : > { %4103 = vmatpush1.bf16.msra.mxu0 %v4102_v46  ;;  %2237 = vmatmul.mubr.f32.gmra.mrb[2].mxu1 %v523_v47  ;;  %v1195_v46 = vld [vmem:[%s5738_s28 + $0x1350] sm:$0xff]  ;;  %v1202_v47 = vld [vmem:[%s5738_s28 + $0x1388] sm:$0xff] }
 0x114   : > { %4359 = vmatpush1.bf16.msra.mxu1 %v4358_v48  ;;  %4105 = vmatprep.subr.bf16.mxu0 %v4104_v49  ;;  %v1210_v48 = vld [vmem:[%s5738_s28 + $0x13c8] sm:$0xff]  ;;  %v1204_v49 = vld [vmem:[%s5738_s28 + $0x1398] sm:$0xff]  ;;  %v4378_v54 = vpack.c.bf16 %v1195_v46, %v1187_v44  ;;  %v1259_v35 = vld [vmem:[%s5738_s28 + $0x1550] sm:$0xff] }
 0x115   : > { %4361 = vmatprep.subr.bf16.mxu1 %v4360_v53  ;;  %1790 = vmatprep.mubr.f32.mxu0 %v532_v59  ;;  %v563_v53 = vld [vmem:[%s5736_s8 + $0x190] sm:$0xff]  ;;  %v4124_v55 = vpack.c.bf16 %v1210_v48, %v1202_v47  ;;  %v1273_v44 = vld [vmem:[%s5738_s28 + $0x15c0] sm:$0xff]  ;;  %v1282_v48 = vld [vmem:[%s5738_s28 + $0x1608] sm:$0xff] }
 0x116   : > { %2242 = vmatprep.mubr.f32.mxu1 %v532_v59  ;;  %1791 = vmatmul.mubr.f32.gmra.mrb[4].mxu0 %v531_v61  ;;  %v4380_v59 = vpack.c.bf16 %v1212_v50, %v1204_v49  ;;  %v1275_v47 = vld [vmem:[%s5738_s28 + $0x15d0] sm:$0xff]  ;;  %v1290_v49 = vld [vmem:[%s5738_s28 + $0x1648] sm:$0xff]  ;;  %v1284_v50 = vld [vmem:[%s5738_s28 + $0x1618] sm:$0xff] }
 0x117   : > { %4107 = vmatpush1.bf16.msra.mxu0 %v4106_v60  ;;  %2243 = vmatmul.mubr.f32.gmra.mrb[4].mxu1 %v531_v61  ;;  %v1211_v60 = vld [vmem:[%s5738_s28 + $0x13d0] sm:$0xff]  ;;  %v1218_v61 = vld [vmem:[%s5738_s28 + $0x1408] sm:$0xff] }
 0x118   : > { %4363 = vmatpush1.bf16.msra.mxu1 %v4362_v62  ;;  %4109 = vmatprep.subr.bf16.mxu0 %v4108_v63  ;;  %v1226_v62 = vld [vmem:[%s5738_s28 + $0x1448] sm:$0xff]  ;;  %v1220_v63 = vld [vmem:[%s5738_s28 + $0x1418] sm:$0xff]  ;;  %v4382_v4 = vpack.c.bf16 %v1211_v60, %v1203_v58  ;;  %v1323_v19 = vld [vmem:[%s5738_s28 + $0x1750] sm:$0xff] }
 0x119   : > { %4365 = vmatprep.subr.bf16.mxu1 %v4364_v3  ;;  %1796 = vmatprep.mubr.f32.mxu0 %v540_v9  ;;  %v571_v3 = vld [vmem:[%s5736_s8 + $0x1d0] sm:$0xff]  ;;  %v4128_v5 = vpack.c.bf16 %v1226_v62, %v1218_v61  ;;  %v1298_v60 = vld [vmem:[%s5738_s28 + $0x1688] sm:$0xff]  ;;  %v1300_v62 = vld [vmem:[%s5738_s28 + $0x1698] sm:$0xff] }
 0x11a   : > { %2248 = vmatprep.mubr.f32.mxu1 %v540_v9  ;;  %1797 = vmatmul.mubr.f32.gmra.mrb[6].mxu0 %v539_v11  ;;  %v4384_v9 = vpack.c.bf16 %v1228_v0, %v1220_v63  ;;  %v1306_v61 = vld [vmem:[%s5738_s28 + $0x16c8] sm:$0xff]  ;;  %v1308_v63 = vld [vmem:[%s5738_s28 + $0x16d8] sm:$0xff] }
 0x11b   : > { %4111 = vmatpush1.bf16.msra.mxu0 %v4110_v10  ;;  %2249 = vmatmul.mubr.f32.gmra.mrb[6].mxu1 %v539_v11  ;;  %v1227_v10 = vld [vmem:[%s5738_s28 + $0x1450] sm:$0xff]  ;;  %v1234_v11 = vld [vmem:[%s5738_s28 + $0x1488] sm:$0xff]  ;;  %v4404_v6 = vpack.c.bf16 %v1308_v63, %v1300_v62  ;;  %v525_v63 = vld [vmem:[%s5736_s8 + $0x60] sm:$0xff] }
 0x11c   : > { %4367 = vmatpush1.bf16.msra.mxu1 %v4366_v12  ;;  %4113 = vmatprep.subr.bf16.mxu0 %v4112_v13  ;;  %v1242_v12 = vld [vmem:[%s5738_s28 + $0x14c8] sm:$0xff]  ;;  %v1236_v13 = vld [vmem:[%s5738_s28 + $0x1498] sm:$0xff] }
 0x11d   : > { %4369 = vmatprep.subr.bf16.mxu1 %v4368_v17  ;;  %1802 = vmatprep.mubr.f32.mxu0 %v548_v23  ;;  %v4386_v17 = vpack.c.bf16 %v1227_v10, %v1219_v8  ;;  %v4132_v18 = vpack.c.bf16 %v1242_v12, %v1234_v11  ;;  %v4388_v22 = vpack.c.bf16 %v1244_v14, %v1236_v13  ;;  %v1314_v8 = vld [vmem:[%s5738_s28 + $0x1708] sm:$0xff]  ;;  %v1316_v10 = vld [vmem:[%s5738_s28 + $0x1718] sm:$0xff] }
 0x11e   : > { %2254 = vmatprep.mubr.f32.mxu1 %v548_v23  ;;  %1803 = vmatmul.mubr.f32.gmra.mrb[8].mxu0 %v547_v25  ;;  %v1243_v23 = vld [vmem:[%s5738_s28 + $0x14d0] sm:$0xff]  ;;  %v1324_v11 = vld [vmem:[%s5738_s28 + $0x1758] sm:$0xff] }
 0x11f   : > { %4115 = vmatpush1.bf16.msra.mxu0 %v4114_v24  ;;  %2255 = vmatmul.mubr.f32.gmra.mrb[8].mxu1 %v547_v25  ;;  %v1250_v24 = vld [vmem:[%s5738_s28 + $0x1508] sm:$0xff]  ;;  %v4390_v29 = vpack.c.bf16 %v1243_v23, %v1235_v21  ;;  %v1340_v23 = vld [vmem:[%s5738_s28 + $0x17d8] sm:$0xff] }
 0x120   : > { %4371 = vmatpush1.bf16.msra.mxu1 %v4370_v26  ;;  %4117 = vmatprep.subr.bf16.mxu0 %v4116_v27  ;;  %v1258_v25 = vld [vmem:[%s5738_s28 + $0x1548] sm:$0xff]  ;;  %v1252_v26 = vld [vmem:[%s5738_s28 + $0x1518] sm:$0xff] }
 0x121   : > { %4373 = vmatprep.subr.bf16.mxu1 %v4372_v31  ;;  %1808 = vmatprep.mubr.f32.mxu0 %v556_v37  ;;  %v1260_v27 = vld [vmem:[%s5738_s28 + $0x1558] sm:$0xff]  ;;  %v4136_v30 = vpack.c.bf16 %v1258_v25, %v1250_v24  ;;  %v1249_v31 = vld [vmem:[%s5738_s28 + $0x1500] sm:$0xff]  ;;  %v1338_v21 = vld [vmem:[%s5738_s28 + $0x17c8] sm:$0xff] }
 0x122   : > { %2260 = vmatprep.mubr.f32.mxu1 %v556_v37  ;;  %1809 = vmatmul.mubr.f32.gmra.mrb[10].mxu0 %v555_v39  ;;  %v4392_v34 = vpack.c.bf16 %v1260_v27, %v1252_v26  ;;  %v1274_v37 = vld [vmem:[%s5738_s28 + $0x15c8] sm:$0xff]  ;;  %v4156_v26 = vpack.c.bf16 %v1338_v21, %v1330_v20  ;;  %v1329_v27 = vld [vmem:[%s5738_s28 + $0x1780] sm:$0xff]  ;;  %v1403_v20 = vld [vmem:[%s5738_s28 + $0x19d0] sm:$0xff] }
 0x123   : > { %4119 = vmatpush1.bf16.msra.mxu0 %v4118_v38  ;;  %2261 = vmatmul.mubr.f32.gmra.mrb[10].mxu1 %v555_v39  ;;  %v1268_v38 = vld [vmem:[%s5738_s28 + $0x1598] sm:$0xff]  ;;  %v4140_v42 = vpack.c.bf16 %v1274_v37, %v1266_v36  ;;  %v1410_v21 = vld [vmem:[%s5738_s28 + $0x1a08] sm:$0xff] }
 0x124   : > { %4375 = vmatpush1.bf16.msra.mxu1 %v4374_v40  ;;  %4121 = vmatprep.subr.bf16.mxu0 %v4120_v41  ;;  %v1276_v39 = vld [vmem:[%s5738_s28 + $0x15d8] sm:$0xff]  ;;  %v4138_v40 = vpack.c.bf16 %v1257_v32, %v1249_v31  ;;  %v4394_v41 = vpack.c.bf16 %v1259_v35, %v1251_v33  ;;  %v1339_v31 = vld [vmem:[%s5738_s28 + $0x17d0] sm:$0xff]  ;;  %v1346_v32 = vld [vmem:[%s5738_s28 + $0x1808] sm:$0xff] }
 0x125   : > { %4377 = vmatprep.subr.bf16.mxu1 %v4376_v45  ;;  %1814 = vmatprep.mubr.f32.mxu0 %v564_v51  ;;  %v1267_v45 = vld [vmem:[%s5738_s28 + $0x1590] sm:$0xff]  ;;  %v4396_v46 = vpack.c.bf16 %v1276_v39, %v1268_v38  ;;  %v1354_v33 = vld [vmem:[%s5738_s28 + $0x1848] sm:$0xff]  ;;  %v1356_v35 = vld [vmem:[%s5738_s28 + $0x1858] sm:$0xff] }
 0x126   : > { %2266 = vmatprep.mubr.f32.mxu1 %v564_v51  ;;  %1815 = vmatmul.mubr.f32.gmra.mrb[12].mxu0 %v563_v53  ;;  %v1292_v51 = vld [vmem:[%s5738_s28 + $0x1658] sm:$0xff]  ;;  %v4160_v38 = vpack.c.bf16 %v1354_v33, %v1346_v32  ;;  %v1345_v39 = vld [vmem:[%s5738_s28 + $0x1800] sm:$0xff]  ;;  %v1411_v32 = vld [vmem:[%s5738_s28 + $0x1a10] sm:$0xff] }
 0x127   : > { %4123 = vmatpush1.bf16.msra.mxu0 %v4122_v52  ;;  %2267 = vmatmul.mubr.f32.gmra.mrb[12].mxu1 %v563_v53  ;;  %v4142_v52 = vpack.c.bf16 %v1273_v44, %v1265_v43  ;;  %v4398_v53 = vpack.c.bf16 %v1275_v47, %v1267_v45  ;;  %v4400_v58 = vpack.c.bf16 %v1292_v51, %v1284_v50  ;;  %v1355_v43 = vld [vmem:[%s5738_s28 + $0x1850] sm:$0xff]  ;;  %v1362_v44 = vld [vmem:[%s5738_s28 + $0x1888] sm:$0xff]  ;;  %v1372_v47 = vld [vmem:[%s5738_s28 + $0x18d8] sm:$0xff] }
 0x128   : > { %4379 = vmatpush1.bf16.msra.mxu1 %v4378_v54  ;;  %4125 = vmatprep.subr.bf16.mxu0 %v4124_v55  ;;  %v4144_v54 = vpack.c.bf16 %v1290_v49, %v1282_v48  ;;  %v1281_v55 = vld [vmem:[%s5738_s28 + $0x1600] sm:$0xff]  ;;  %v1370_v45 = vld [vmem:[%s5738_s28 + $0x18c8] sm:$0xff] }
 0x129   : > { %4381 = vmatprep.subr.bf16.mxu1 %v4380_v59  ;;  %1820 = vmatprep.mubr.f32.mxu0 %v572_v1  ;;  %v1291_v59 = vld [vmem:[%s5738_s28 + $0x1650] sm:$0xff]  ;;  %v4146_v0 = vpack.c.bf16 %v1289_v56, %v1281_v55  ;;  %v517_v48 = vld [vmem:[%s5736_s8 + $0x20] sm:$0xff]  ;;  %v4164_v51 = vpack.c.bf16 %v1370_v45, %v1362_v44 }
 0x12a   : > { %2272 = vmatprep.mubr.f32.mxu1 %v572_v1  ;;  %1821 = vmatmul.mubr.f32.gmra.mrb[14].mxu0 %v571_v3  ;;  %v4402_v1 = vpack.c.bf16 %v1291_v59, %v1283_v57  ;;  %v1371_v56 = vld [vmem:[%s5738_s28 + $0x18d0] sm:$0xff]  ;;  %v1378_v57 = vld [vmem:[%s5738_s28 + $0x1908] sm:$0xff]  ;;  %v1380_v59 = vld [vmem:[%s5738_s28 + $0x1918] sm:$0xff] }
 0x12b   : > { %4127 = vmatpush1.bf16.msra.mxu0 %v4126_v2  ;;  %2273 = vmatmul.mubr.f32.gmra.mrb[14].mxu1 %v571_v3  ;;  %v4148_v2 = vpack.c.bf16 %v1306_v61, %v1298_v60  ;;  %v1297_v3 = vld [vmem:[%s5738_s28 + $0x1680] sm:$0xff]  ;;  %v1388_v60 = vld [vmem:[%s5738_s28 + $0x1958] sm:$0xff]  ;;  %v526_v61 = vld [vmem:[%s5736_s8 + $0x68] sm:$0xff] }
 0x12c   : > { %4383 = vmatpush1.bf16.msra.mxu1 %v4382_v4  ;;  %4129 = vmatprep.subr.bf16.mxu0 %v4128_v5  ;;  %v1305_v4 = vld [vmem:[%s5738_s28 + $0x16c0] sm:$0xff]  ;;  %v1299_v5 = vld [vmem:[%s5738_s28 + $0x1690] sm:$0xff] }
 0x12d   : > { %4385 = vmatprep.subr.bf16.mxu1 %v4384_v9  ;;  %1891 = vmatprep.mubr.f32.mxu0 %v518_v15  ;;  %v1322_v9 = vld [vmem:[%s5738_s28 + $0x1748] sm:$0xff]  ;;  %v4150_v12 = vpack.c.bf16 %v1305_v4, %v1297_v3  ;;  %v4406_v13 = vpack.c.bf16 %v1307_v7, %v1299_v5  ;;  %v1385_v3 = vld [vmem:[%s5738_s28 + $0x1940] sm:$0xff]  ;;  %v1379_v4 = vld [vmem:[%s5738_s28 + $0x1910] sm:$0xff]  ;;  %v4424_v5 = vpack.c.bf16 %v1388_v60, %v1380_v59 }
 0x12e   : > { %2343 = vmatprep.mubr.f32.mxu1 %v518_v15  ;;  %v4152_v14 = vpack.c.bf16 %v1322_v9, %v1314_v8  ;;  %v1313_v15 = vld [vmem:[%s5738_s28 + $0x1700] sm:$0xff]  ;;  %v1394_v7 = vld [vmem:[%s5738_s28 + $0x1988] sm:$0xff]  ;;  %v1396_v9 = vld [vmem:[%s5738_s28 + $0x1998] sm:$0xff] }
 0x12f   : > { %4131 = vmatpush1.bf16.msra.mxu0 %v4130_v16  ;;  %v1321_v16 = vld [vmem:[%s5738_s28 + $0x1740] sm:$0xff]  ;;  %v1402_v8 = vld [vmem:[%s5738_s28 + $0x19c8] sm:$0xff]  ;;  %v1443_v60 = vld [vmem:[%s5738_s28 + $0x1b10] sm:$0xff] }
 0x130   : > { %4387 = vmatpush1.bf16.msra.mxu1 %v4386_v17  ;;  %4133 = vmatprep.subr.bf16.mxu0 %v4132_v18  ;;  %v1315_v17 = vld [vmem:[%s5738_s28 + $0x1710] sm:$0xff]  ;;  %v4408_v18 = vpack.c.bf16 %v1324_v11, %v1316_v10  ;;  %v4154_v24 = vpack.c.bf16 %v1321_v16, %v1313_v15  ;;  %v1404_v10 = vld [vmem:[%s5738_s28 + $0x19d8] sm:$0xff]  ;;  %v534_v11 = vld [vmem:[%s5736_s8 + $0xa8] sm:$0xff]  ;;  %v4172_v15 = vpack.c.bf16 %v1402_v8, %v1394_v7 }
 0x131   : > { %4389 = vmatprep.subr.bf16.mxu1 %v4388_v22  ;;  %v1332_v22 = vld [vmem:[%s5738_s28 + $0x1798] sm:$0xff]  ;;  %v4410_v25 = vpack.c.bf16 %v1323_v19, %v1315_v17  ;;  %v1393_v16 = vld [vmem:[%s5738_s28 + $0x1980] sm:$0xff]  ;;  %v4428_v19 = vpack.c.bf16 %v1404_v10, %v1396_v9  ;;  %v1459_v10 = vld [vmem:[%s5738_s28 + $0x1b90] sm:$0xff] }
 0x132   : > { %v1401_v17 = vld [vmem:[%s5738_s28 + $0x19c0] sm:$0xff] }
 0x133   : > { %4135 = vmatpush1.bf16.msra.mxu0 %v4134_v28  ;;  %v1337_v28 = vld [vmem:[%s5738_s28 + $0x17c0] sm:$0xff] }
 0x134   : > { %4391 = vmatpush1.bf16.msra.mxu1 %v4390_v29  ;;  %4137 = vmatprep.subr.bf16.mxu0 %v4136_v30  ;;  %v1331_v29 = vld [vmem:[%s5738_s28 + $0x1790] sm:$0xff]  ;;  %v4412_v30 = vpack.c.bf16 %v1340_v23, %v1332_v22  ;;  %v4158_v36 = vpack.c.bf16 %v1337_v28, %v1329_v27  ;;  %v1418_v22 = vld [vmem:[%s5738_s28 + $0x1a48] sm:$0xff]  ;;  %v1412_v23 = vld [vmem:[%s5738_s28 + $0x1a18] sm:$0xff] }
 0x135   : > { %4393 = vmatprep.subr.bf16.mxu1 %v4392_v34  ;;  %v1348_v34 = vld [vmem:[%s5738_s28 + $0x1818] sm:$0xff]  ;;  %v4414_v37 = vpack.c.bf16 %v1339_v31, %v1331_v29  ;;  %v541_v27 = vld [vmem:[%s5736_s8 + $0xe0] sm:$0xff]  ;;  %v4176_v29 = vpack.c.bf16 %v1418_v22, %v1410_v21 }
 0x136   : > { %v1417_v31 = vld [vmem:[%s5738_s28 + $0x1a40] sm:$0xff] }
 0x137   : > { %4139 = vmatpush1.bf16.msra.mxu0 %v4138_v40  ;;  %v1353_v40 = vld [vmem:[%s5738_s28 + $0x1840] sm:$0xff] }
 0x138   : > { %4395 = vmatpush1.bf16.msra.mxu1 %v4394_v41  ;;  %4141 = vmatprep.subr.bf16.mxu0 %v4140_v42  ;;  %v1347_v41 = vld [vmem:[%s5738_s28 + $0x1810] sm:$0xff]  ;;  %v4416_v42 = vpack.c.bf16 %v1356_v35, %v1348_v34  ;;  %v4162_v49 = vpack.c.bf16 %v1353_v40, %v1345_v39  ;;  %v1426_v35 = vld [vmem:[%s5738_s28 + $0x1a88] sm:$0xff]  ;;  %v1425_v44 = vld [vmem:[%s5738_s28 + $0x1a80] sm:$0xff] }
 0x139   : > { %4397 = vmatprep.subr.bf16.mxu1 %v4396_v46  ;;  %v1364_v46 = vld [vmem:[%s5738_s28 + $0x1898] sm:$0xff]  ;;  %v4418_v50 = vpack.c.bf16 %v1355_v43, %v1347_v41  ;;  %v1419_v34 = vld [vmem:[%s5738_s28 + $0x1a50] sm:$0xff]  ;;  %v550_v39 = vld [vmem:[%s5736_s8 + $0x128] sm:$0xff] }
 0x13a   : > { %v4420_v55 = vpack.c.bf16 %v1372_v47, %v1364_v46  ;;  %v549_v41 = vld [vmem:[%s5736_s8 + $0x120] sm:$0xff]  ;;  %v1427_v46 = vld [vmem:[%s5738_s28 + $0x1a90] sm:$0xff] }
 0x13b   : > { %4143 = vmatpush1.bf16.msra.mxu0 %v4142_v52  ;;  %v1361_v52 = vld [vmem:[%s5738_s28 + $0x1880] sm:$0xff] }
 0x13c   : > { %4399 = vmatpush1.bf16.msra.mxu1 %v4398_v53  ;;  %4145 = vmatprep.subr.bf16.mxu0 %v4144_v54  ;;  %v1369_v53 = vld [vmem:[%s5738_s28 + $0x18c0] sm:$0xff]  ;;  %v1363_v54 = vld [vmem:[%s5738_s28 + $0x1890] sm:$0xff] }
 0x13d   : > { %4401 = vmatprep.subr.bf16.mxu1 %v4400_v58  ;;  %v1386_v58 = vld [vmem:[%s5738_s28 + $0x1948] sm:$0xff]  ;;  %v4166_v62 = vpack.c.bf16 %v1369_v53, %v1361_v52  ;;  %v1433_v45 = vld [vmem:[%s5738_s28 + $0x1ac0] sm:$0xff]  ;;  %v1452_v52 = vld [vmem:[%s5738_s28 + $0x1b58] sm:$0xff] }
 0x13e   : > { %v558_v53 = vld [vmem:[%s5736_s8 + $0x168] sm:$0xff]  ;;  %v1449_v59 = vld [vmem:[%s5738_s28 + $0x1b40] sm:$0xff] }
 0x13f   : > { %4147 = vmatpush1.bf16.msra.mxu0 %v4146_v0  ;;  %v4422_v0 = vpack.c.bf16 %v1371_v56, %v1363_v54  ;;  %v4182_v54 = vpack.c.bf16 %v1433_v45, %v1425_v44  ;;  %v1457_v8 = vld [vmem:[%s5738_s28 + $0x1b80] sm:$0xff] }
 0x140   : > { %4403 = vmatpush1.bf16.msra.mxu1 %v4402_v1  ;;  %4149 = vmatprep.subr.bf16.mxu0 %v4148_v2  ;;  %v4168_v1 = vpack.c.bf16 %v1386_v58, %v1378_v57  ;;  %v1377_v2 = vld [vmem:[%s5738_s28 + $0x1900] sm:$0xff] }
 0x141   : > { %4405 = vmatprep.subr.bf16.mxu1 %v4404_v6  ;;  %v1387_v6 = vld [vmem:[%s5738_s28 + $0x1950] sm:$0xff]  ;;  %v1441_v58 = vld [vmem:[%s5738_s28 + $0x1b00] sm:$0xff] }
 0x142   : > { %v1465_v9 = vld [vmem:[%s5738_s28 + $0x1bc0] sm:$0xff] }
 0x143   : > { %4151 = vmatpush1.bf16.msra.mxu0 %v4150_v12  ;;  %v4170_v12 = vpack.c.bf16 %v1385_v3, %v1377_v2  ;;  %v1468_v2 = vld [vmem:[%s5738_s28 + $0x1bd8] sm:$0xff]  ;;  %v566_v3 = vld [vmem:[%s5736_s8 + $0x1a8] sm:$0xff]  ;;  %v1473_v22 = vld [vmem:[%s5738_s28 + $0x1c00] sm:$0xff] }
 0x144   : > { %4407 = vmatpush1.bf16.msra.mxu1 %v4406_v13  ;;  %4153 = vmatprep.subr.bf16.mxu0 %v4152_v14  ;;  %v533_v13 = vld [vmem:[%s5736_s8 + $0xa0] sm:$0xff]  ;;  %v4426_v14 = vpack.c.bf16 %v1387_v6, %v1379_v4  ;;  %v4186_v4 = vpack.c.bf16 %v1449_v59, %v1441_v58 }
 0x145   : > { %4409 = vmatprep.subr.bf16.mxu1 %v4408_v18  ;;  %v1395_v18 = vld [vmem:[%s5738_s28 + $0x1990] sm:$0xff]  ;;  %v1521_v59 = vld [vmem:[%s5738_s28 + $0x1d80] sm:$0xff] }
 0x146   : > { %v4430_v28 = vpack.c.bf16 %v1403_v20, %v1395_v18  ;;  %v4190_v18 = vpack.c.bf16 %v1465_v9, %v1457_v8  ;;  %v1545_v8 = vld [vmem:[%s5738_s28 + $0x1e40] sm:$0xff]  ;;  %v1539_v9 = vld [vmem:[%s5738_s28 + $0x1e10] sm:$0xff] }
 0x147   : > { %4155 = vmatpush1.bf16.msra.mxu0 %v4154_v24  ;;  %v1420_v24 = vld [vmem:[%s5738_s28 + $0x1a58] sm:$0xff] }
 0x148   : > { %4411 = vmatpush1.bf16.msra.mxu1 %v4410_v25  ;;  %4157 = vmatprep.subr.bf16.mxu0 %v4156_v26  ;;  %v542_v25 = vld [vmem:[%s5736_s8 + $0xe8] sm:$0xff]  ;;  %v4174_v26 = vpack.c.bf16 %v1401_v17, %v1393_v16  ;;  %v4432_v33 = vpack.c.bf16 %v1420_v24, %v1412_v23  ;;  %v1484_v16 = vld [vmem:[%s5738_s28 + $0x1c58] sm:$0xff]  ;;  %v1481_v23 = vld [vmem:[%s5738_s28 + $0x1c40] sm:$0xff] }
 0x149   : > { %4413 = vmatprep.subr.bf16.mxu1 %v4412_v30  ;;  %v1409_v30 = vld [vmem:[%s5738_s28 + $0x1a00] sm:$0xff]  ;;  %v574_v17 = vld [vmem:[%s5736_s8 + $0x1e8] sm:$0xff]  ;;  %v1475_v24 = vld [vmem:[%s5738_s28 + $0x1c10] sm:$0xff] }
 0x14a   : > { %v4178_v40 = vpack.c.bf16 %v1417_v31, %v1409_v30  ;;  %v1500_v30 = vld [vmem:[%s5738_s28 + $0x1cd8] sm:$0xff] }
 0x14b   : > { %4159 = vmatpush1.bf16.msra.mxu0 %v4158_v36  ;;  %v1434_v36 = vld [vmem:[%s5738_s28 + $0x1ac8] sm:$0xff]  ;;  %v520_v31 = vld [vmem:[%s5736_s8 + $0x38] sm:$0xff] }
 0x14c   : > { %4415 = vmatpush1.bf16.msra.mxu1 %v4414_v37  ;;  %4161 = vmatprep.subr.bf16.mxu0 %v4160_v38  ;;  %v1428_v37 = vld [vmem:[%s5738_s28 + $0x1a98] sm:$0xff]  ;;  %v4180_v43 = vpack.c.bf16 %v1434_v36, %v1426_v35  ;;  %v1489_v35 = vld [vmem:[%s5738_s28 + $0x1c80] sm:$0xff] }
 0x14d   : > { %4417 = vmatprep.subr.bf16.mxu1 %v4416_v42  ;;  %v1436_v38 = vld [vmem:[%s5738_s28 + $0x1ad8] sm:$0xff]  ;;  %v4434_v42 = vpack.c.bf16 %v1419_v34, %v1411_v32  ;;  %v4194_v32 = vpack.c.bf16 %v1481_v23, %v1473_v22  ;;  %v1497_v36 = vld [vmem:[%s5738_s28 + $0x1cc0] sm:$0xff]  ;;  %v1563_v23 = vld [vmem:[%s5738_s28 + $0x1ed0] sm:$0xff] }
 0x14e   : > { %1892 = vmatmul.mubr.f32.vlgmr.msra.gmra.mrb[0].mxu0 %v517_v48  ;;  %v4436_v47 = vpack.c.bf16 %v1436_v38, %v1428_v37  ;;  %v1491_v37 = vld [vmem:[%s5738_s28 + $0x1c90] sm:$0xff]  ;;  %v4198_v44 = vpack.c.bf16 %v1497_v36, %v1489_v35  ;;  %v1586_v36 = vld [vmem:[%s5738_s28 + $0x1f88] sm:$0xff] }
 0x14f   : > { %4163 = vmatpush1.bf16.msra.mxu0 %v4162_v49  ;;  %2344 = vmatmul.mubr.f32.vlgmr.msra.gmra.mrb[0].mxu1 %v517_v48  ;;  %v1435_v48 = vld [vmem:[%s5738_s28 + $0x1ad0] sm:$0xff]  ;;  %v1442_v49 = vld [vmem:[%s5738_s28 + $0x1b08] sm:$0xff] }
 0x150   : > { %4419 = vmatpush1.bf16.msra.mxu1 %v4418_v50  ;;  %4165 = vmatprep.subr.bf16.mxu0 %v4164_v51  ;;  %v1450_v50 = vld [vmem:[%s5738_s28 + $0x1b48] sm:$0xff]  ;;  %v1444_v51 = vld [vmem:[%s5738_s28 + $0x1b18] sm:$0xff]  ;;  %v4438_v56 = vpack.c.bf16 %v1435_v48, %v1427_v46  ;;  %v1513_v48 = vld [vmem:[%s5738_s28 + $0x1d40] sm:$0xff] }
 0x151   : > { %4421 = vmatprep.subr.bf16.mxu1 %v4420_v55  ;;  %1897 = vmatprep.mubr.f32.mxu0 %v526_v61  ;;  %v557_v55 = vld [vmem:[%s5736_s8 + $0x160] sm:$0xff]  ;;  %v4184_v57 = vpack.c.bf16 %v1450_v50, %v1442_v49  ;;  %v1507_v49 = vld [vmem:[%s5738_s28 + $0x1d10] sm:$0xff] }
 0x152   : > { %2349 = vmatprep.mubr.f32.mxu1 %v526_v61  ;;  %1898 = vmatmul.mubr.f32.gmra.mrb[2].mxu0 %v525_v63  ;;  %v4440_v61 = vpack.c.bf16 %v1452_v52, %v1444_v51  ;;  %v1515_v51 = vld [vmem:[%s5738_s28 + $0x1d50] sm:$0xff]  ;;  %v1522_v52 = vld [vmem:[%s5738_s28 + $0x1d88] sm:$0xff] }
 0x153   : > { %4167 = vmatpush1.bf16.msra.mxu0 %v4166_v62  ;;  %2350 = vmatmul.mubr.f32.gmra.mrb[2].mxu1 %v525_v63  ;;  %v1451_v62 = vld [vmem:[%s5738_s28 + $0x1b50] sm:$0xff]  ;;  %v1458_v63 = vld [vmem:[%s5738_s28 + $0x1b88] sm:$0xff] }
 0x154   : > { %4423 = vmatpush1.bf16.msra.mxu1 %v4422_v0  ;;  %4169 = vmatprep.subr.bf16.mxu0 %v4168_v1  ;;  %v1466_v0 = vld [vmem:[%s5738_s28 + $0x1bc8] sm:$0xff]  ;;  %v1460_v1 = vld [vmem:[%s5738_s28 + $0x1b98] sm:$0xff]  ;;  %v4442_v6 = vpack.c.bf16 %v1451_v62, %v1443_v60  ;;  %v1529_v60 = vld [vmem:[%s5738_s28 + $0x1dc0] sm:$0xff] }
 0x155   : > { %4425 = vmatprep.subr.bf16.mxu1 %v4424_v5  ;;  %1903 = vmatprep.mubr.f32.mxu0 %v534_v11  ;;  %v565_v5 = vld [vmem:[%s5736_s8 + $0x1a0] sm:$0xff]  ;;  %v4188_v7 = vpack.c.bf16 %v1466_v0, %v1458_v63  ;;  %v1531_v63 = vld [vmem:[%s5738_s28 + $0x1dd0] sm:$0xff]  ;;  %v1538_v0 = vld [vmem:[%s5738_s28 + $0x1e08] sm:$0xff] }
 0x156   : > { %2355 = vmatprep.mubr.f32.mxu1 %v534_v11  ;;  %1904 = vmatmul.mubr.f32.gmra.mrb[4].mxu0 %v533_v13  ;;  %v4444_v11 = vpack.c.bf16 %v1468_v2, %v1460_v1  ;;  %v1546_v1 = vld [vmem:[%s5738_s28 + $0x1e48] sm:$0xff]  ;;  %v1540_v2 = vld [vmem:[%s5738_s28 + $0x1e18] sm:$0xff]  ;;  %v1579_v35 = vld [vmem:[%s5738_s28 + $0x1f50] sm:$0xff] }
 0x157   : > { %4171 = vmatpush1.bf16.msra.mxu0 %v4170_v12  ;;  %2356 = vmatmul.mubr.f32.gmra.mrb[4].mxu1 %v533_v13  ;;  %v1467_v12 = vld [vmem:[%s5738_s28 + $0x1bd0] sm:$0xff]  ;;  %v1474_v13 = vld [vmem:[%s5738_s28 + $0x1c08] sm:$0xff] }
 0x158   : > { %4427 = vmatpush1.bf16.msra.mxu1 %v4426_v14  ;;  %4173 = vmatprep.subr.bf16.mxu0 %v4172_v15  ;;  %v1482_v14 = vld [vmem:[%s5738_s28 + $0x1c48] sm:$0xff]  ;;  %v1476_v15 = vld [vmem:[%s5738_s28 + $0x1c18] sm:$0xff]  ;;  %v4446_v20 = vpack.c.bf16 %v1467_v12, %v1459_v10 }
 0x159   : > { %4429 = vmatprep.subr.bf16.mxu1 %v4428_v19  ;;  %1909 = vmatprep.mubr.f32.mxu0 %v542_v25  ;;  %v573_v19 = vld [vmem:[%s5736_s8 + $0x1e0] sm:$0xff]  ;;  %v4192_v21 = vpack.c.bf16 %v1482_v14, %v1474_v13  ;;  %v1554_v12 = vld [vmem:[%s5738_s28 + $0x1e88] sm:$0xff]  ;;  %v1556_v14 = vld [vmem:[%s5738_s28 + $0x1e98] sm:$0xff] }
 0x15a   : > { %2361 = vmatprep.mubr.f32.mxu1 %v542_v25  ;;  %1910 = vmatmul.mubr.f32.gmra.mrb[6].mxu0 %v541_v27  ;;  %v4448_v25 = vpack.c.bf16 %v1484_v16, %v1476_v15  ;;  %v1562_v13 = vld [vmem:[%s5738_s28 + $0x1ec8] sm:$0xff]  ;;  %v1564_v15 = vld [vmem:[%s5738_s28 + $0x1ed8] sm:$0xff] }
 0x15b   : > { %4175 = vmatpush1.bf16.msra.mxu0 %v4174_v26  ;;  %2362 = vmatmul.mubr.f32.gmra.mrb[6].mxu1 %v541_v27  ;;  %v1483_v26 = vld [vmem:[%s5738_s28 + $0x1c50] sm:$0xff]  ;;  %v1490_v27 = vld [vmem:[%s5738_s28 + $0x1c88] sm:$0xff]  ;;  %v4468_v22 = vpack.c.bf16 %v1564_v15, %v1556_v14  ;;  %v616_v14 = vld [vmem:[%s5738_s28 + $0x138] sm:$0xff] }
 0x15c   : > { %4431 = vmatpush1.bf16.msra.mxu1 %v4430_v28  ;;  %4177 = vmatprep.subr.bf16.mxu0 %v4176_v29  ;;  %v1498_v28 = vld [vmem:[%s5738_s28 + $0x1cc8] sm:$0xff]  ;;  %v1492_v29 = vld [vmem:[%s5738_s28 + $0x1c98] sm:$0xff] }
 0x15d   : > { %4433 = vmatprep.subr.bf16.mxu1 %v4432_v33  ;;  %1915 = vmatprep.mubr.f32.mxu0 %v550_v39  ;;  %v4450_v33 = vpack.c.bf16 %v1483_v26, %v1475_v24  ;;  %v4196_v34 = vpack.c.bf16 %v1498_v28, %v1490_v27  ;;  %v4452_v38 = vpack.c.bf16 %v1500_v30, %v1492_v29  ;;  %v1570_v24 = vld [vmem:[%s5738_s28 + $0x1f08] sm:$0xff]  ;;  %v1572_v26 = vld [vmem:[%s5738_s28 + $0x1f18] sm:$0xff] }
 0x15e   : > { %2367 = vmatprep.mubr.f32.mxu1 %v550_v39  ;;  %1916 = vmatmul.mubr.f32.gmra.mrb[8].mxu0 %v549_v41  ;;  %v1499_v39 = vld [vmem:[%s5738_s28 + $0x1cd0] sm:$0xff]  ;;  %v1580_v27 = vld [vmem:[%s5738_s28 + $0x1f58] sm:$0xff] }
 0x15f   : > { %4179 = vmatpush1.bf16.msra.mxu0 %v4178_v40  ;;  %2368 = vmatmul.mubr.f32.gmra.mrb[8].mxu1 %v549_v41  ;;  %v1506_v40 = vld [vmem:[%s5738_s28 + $0x1d08] sm:$0xff]  ;;  %v4454_v45 = vpack.c.bf16 %v1499_v39, %v1491_v37  ;;  %v1596_v39 = vld [vmem:[%s5738_s28 + $0x1fd8] sm:$0xff] }
 0x160   : > { %4435 = vmatpush1.bf16.msra.mxu1 %v4434_v42  ;;  %4181 = vmatprep.subr.bf16.mxu0 %v4180_v43  ;;  %v1514_v41 = vld [vmem:[%s5738_s28 + $0x1d48] sm:$0xff]  ;;  %v1508_v42 = vld [vmem:[%s5738_s28 + $0x1d18] sm:$0xff] }
 0x161   : > { %4437 = vmatprep.subr.bf16.mxu1 %v4436_v47  ;;  %1921 = vmatprep.mubr.f32.mxu0 %v558_v53  ;;  %v1516_v43 = vld [vmem:[%s5738_s28 + $0x1d58] sm:$0xff]  ;;  %v4200_v46 = vpack.c.bf16 %v1514_v41, %v1506_v40  ;;  %v1505_v47 = vld [vmem:[%s5738_s28 + $0x1d00] sm:$0xff]  ;;  %v1594_v37 = vld [vmem:[%s5738_s28 + $0x1fc8] sm:$0xff] }
 0x162   : > { %2373 = vmatprep.mubr.f32.mxu1 %v558_v53  ;;  %1922 = vmatmul.mubr.f32.gmra.mrb[10].mxu0 %v557_v55  ;;  %v4456_v50 = vpack.c.bf16 %v1516_v43, %v1508_v42  ;;  %v1530_v53 = vld [vmem:[%s5738_s28 + $0x1dc8] sm:$0xff]  ;;  %v4220_v42 = vpack.c.bf16 %v1594_v37, %v1586_v36  ;;  %v1585_v43 = vld [vmem:[%s5738_s28 + $0x1f80] sm:$0xff]  ;;  %v624_v15 = vld [vmem:[%s5738_s28 + $0x178] sm:$0xff] }
 0x163   : > { %4183 = vmatpush1.bf16.msra.mxu0 %v4182_v54  ;;  %2374 = vmatmul.mubr.f32.gmra.mrb[10].mxu1 %v557_v55  ;;  %v1524_v54 = vld [vmem:[%s5738_s28 + $0x1d98] sm:$0xff]  ;;  %v4204_v58 = vpack.c.bf16 %v1530_v53, %v1522_v52  ;;  %v639_v36 = vld [vmem:[%s5738_s28 + $0x1f0] sm:$0xff] }
 0x164   : > { %4439 = vmatpush1.bf16.msra.mxu1 %v4438_v56  ;;  %4185 = vmatprep.subr.bf16.mxu0 %v4184_v57  ;;  %v1532_v55 = vld [vmem:[%s5738_s28 + $0x1dd8] sm:$0xff]  ;;  %v4202_v56 = vpack.c.bf16 %v1513_v48, %v1505_v47  ;;  %v4458_v57 = vpack.c.bf16 %v1515_v51, %v1507_v49  ;;  %v1595_v47 = vld [vmem:[%s5738_s28 + $0x1fd0] sm:$0xff]  ;;  %v582_v48 = vld [vmem:[%s5738_s28 + $0x28] sm:$0xff] }
 0x165   : > { %4441 = vmatprep.subr.bf16.mxu1 %v4440_v61  ;;  %1927 = vmatprep.mubr.f32.mxu0 %v566_v3  ;;  %v1523_v61 = vld [vmem:[%s5738_s28 + $0x1d90] sm:$0xff]  ;;  %v4460_v62 = vpack.c.bf16 %v1532_v55, %v1524_v54  ;;  %v590_v49 = vld [vmem:[%s5738_s28 + $0x68] sm:$0xff]  ;;  %v592_v51 = vld [vmem:[%s5738_s28 + $0x78] sm:$0xff] }
 0x166   : > { %2379 = vmatprep.mubr.f32.mxu1 %v566_v3  ;;  %1928 = vmatmul.mubr.f32.gmra.mrb[12].mxu0 %v565_v5  ;;  %v1548_v3 = vld [vmem:[%s5738_s28 + $0x1e58] sm:$0xff]  ;;  %v4480_v54 = vpack.c.bf16 %v590_v49, %v582_v48  ;;  %v581_v55 = vld [vmem:[%s5738_s28 + $0x20] sm:$0xff]  ;;  %v647_v49 = vld [vmem:[%s5738_s28 + $0x230] sm:$0xff] }
 0x167   : > { %4187 = vmatpush1.bf16.msra.mxu0 %v4186_v4  ;;  %2380 = vmatmul.mubr.f32.gmra.mrb[12].mxu1 %v565_v5  ;;  %v4206_v4 = vpack.c.bf16 %v1529_v60, %v1521_v59  ;;  %v4462_v5 = vpack.c.bf16 %v1531_v63, %v1523_v61  ;;  %v4464_v10 = vpack.c.bf16 %v1548_v3, %v1540_v2  ;;  %v591_v59 = vld [vmem:[%s5738_s28 + $0x70] sm:$0xff]  ;;  %v598_v60 = vld [vmem:[%s5738_s28 + $0xa8] sm:$0xff]  ;;  %v597_v3 = vld [vmem:[%s5738_s28 + $0xa0] sm:$0xff] }
 0x168   : > { %4443 = vmatpush1.bf16.msra.mxu1 %v4442_v6  ;;  %4189 = vmatprep.subr.bf16.mxu0 %v4188_v7  ;;  %v4208_v6 = vpack.c.bf16 %v1546_v1, %v1538_v0  ;;  %v1537_v7 = vld [vmem:[%s5738_s28 + $0x1e00] sm:$0xff]  ;;  %v606_v61 = vld [vmem:[%s5738_s28 + $0xe8] sm:$0xff]  ;;  %v600_v0 = vld [vmem:[%s5738_s28 + $0xb8] sm:$0xff] }
 0x169   : > { %4445 = vmatprep.subr.bf16.mxu1 %v4444_v11  ;;  %1933 = vmatprep.mubr.f32.mxu0 %v574_v17  ;;  %v1547_v11 = vld [vmem:[%s5738_s28 + $0x1e50] sm:$0xff]  ;;  %v4210_v16 = vpack.c.bf16 %v1545_v8, %v1537_v7  ;;  %v608_v1 = vld [vmem:[%s5738_s28 + $0xf8] sm:$0xff] }
 0x16a   : > { %2385 = vmatprep.mubr.f32.mxu1 %v574_v17  ;;  %1934 = vmatmul.mubr.f32.gmra.mrb[14].mxu0 %v573_v19  ;;  %v4466_v17 = vpack.c.bf16 %v1547_v11, %v1539_v9  ;;  %v599_v7 = vld [vmem:[%s5738_s28 + $0xb0] sm:$0xff]  ;;  %v4740_v9 = vpack.c.bf16 %v608_v1, %v600_v0  ;;  %v622_v11 = vld [vmem:[%s5738_s28 + $0x168] sm:$0xff] }
 0x16b   : > { %4191 = vmatpush1.bf16.msra.mxu0 %v4190_v18  ;;  %2386 = vmatmul.mubr.f32.gmra.mrb[14].mxu1 %v573_v19  ;;  %v4212_v18 = vpack.c.bf16 %v1562_v13, %v1554_v12  ;;  %v1553_v19 = vld [vmem:[%s5738_s28 + $0x1e80] sm:$0xff]  ;;  %v607_v8 = vld [vmem:[%s5738_s28 + $0xf0] sm:$0xff] }
 0x16c   : > { %4447 = vmatpush1.bf16.msra.mxu1 %v4446_v20  ;;  %4193 = vmatprep.subr.bf16.mxu0 %v4192_v21  ;;  %v1561_v20 = vld [vmem:[%s5738_s28 + $0x1ec0] sm:$0xff]  ;;  %v1555_v21 = vld [vmem:[%s5738_s28 + $0x1e90] sm:$0xff] }
 0x16d   : > { %4449 = vmatprep.subr.bf16.mxu1 %v4448_v25  ;;  %2004 = vmatprep.mubr.f32.mxu0 %v520_v31  ;;  %v1578_v25 = vld [vmem:[%s5738_s28 + $0x1f48] sm:$0xff]  ;;  %v4214_v28 = vpack.c.bf16 %v1561_v20, %v1553_v19  ;;  %v4470_v29 = vpack.c.bf16 %v1563_v23, %v1555_v21  ;;  %v527_v12 = vld [vmem:[%s5736_s8 + $0x70] sm:$0xff]  ;;  %v536_v19 = vld [vmem:[%s5736_s8 + $0xb8] sm:$0xff]  ;;  %v4744_v23 = vpack.c.bf16 %v624_v15, %v616_v14 }
 0x16e   : > { %2456 = vmatprep.mubr.f32.mxu1 %v520_v31  ;;  %v4216_v30 = vpack.c.bf16 %v1578_v25, %v1570_v24  ;;  %v1569_v31 = vld [vmem:[%s5738_s28 + $0x1f00] sm:$0xff]  ;;  %v615_v21 = vld [vmem:[%s5738_s28 + $0x130] sm:$0xff]  ;;  %v630_v24 = vld [vmem:[%s5738_s28 + $0x1a8] sm:$0xff] }
 0x16f   : > { %4195 = vmatpush1.bf16.msra.mxu0 %v4194_v32  ;;  %v1577_v32 = vld [vmem:[%s5738_s28 + $0x1f40] sm:$0xff]  ;;  %v638_v25 = vld [vmem:[%s5738_s28 + $0x1e8] sm:$0xff]  ;;  %v671_v0 = vld [vmem:[%s5738_s28 + $0x2f0] sm:$0xff] }
 0x170   : > { %4451 = vmatpush1.bf16.msra.mxu1 %v4450_v33  ;;  %4197 = vmatprep.subr.bf16.mxu0 %v4196_v34  ;;  %v1571_v33 = vld [vmem:[%s5738_s28 + $0x1f10] sm:$0xff]  ;;  %v4472_v34 = vpack.c.bf16 %v1580_v27, %v1572_v26  ;;  %v4218_v40 = vpack.c.bf16 %v1577_v32, %v1569_v31  ;;  %v629_v31 = vld [vmem:[%s5738_s28 + $0x1a0] sm:$0xff] }
 0x171   : > { %4453 = vmatprep.subr.bf16.mxu1 %v4452_v38  ;;  %v1588_v38 = vld [vmem:[%s5738_s28 + $0x1f98] sm:$0xff]  ;;  %v4474_v41 = vpack.c.bf16 %v1579_v35, %v1571_v33  ;;  %v535_v26 = vld [vmem:[%s5736_s8 + $0xb0] sm:$0xff]  ;;  %v637_v32 = vld [vmem:[%s5738_s28 + $0x1e0] sm:$0xff] }
 0x172   : > { %v544_v33 = vld [vmem:[%s5736_s8 + $0xf8] sm:$0xff]  ;;  %v631_v35 = vld [vmem:[%s5738_s28 + $0x1b0] sm:$0xff] }
 0x173   : > { %4199 = vmatpush1.bf16.msra.mxu0 %v4198_v44  ;;  %v1593_v44 = vld [vmem:[%s5738_s28 + $0x1fc0] sm:$0xff]  ;;  %v687_v14 = vld [vmem:[%s5738_s28 + $0x370] sm:$0xff] }
 0x174   : > { %4455 = vmatpush1.bf16.msra.mxu1 %v4454_v45  ;;  %4201 = vmatprep.subr.bf16.mxu0 %v4200_v46  ;;  %v1587_v45 = vld [vmem:[%s5738_s28 + $0x1f90] sm:$0xff]  ;;  %v4476_v46 = vpack.c.bf16 %v1596_v39, %v1588_v38  ;;  %v4222_v52 = vpack.c.bf16 %v1593_v44, %v1585_v43  ;;  %v646_v38 = vld [vmem:[%s5738_s28 + $0x228] sm:$0xff]  ;;  %v656_v43 = vld [vmem:[%s5738_s28 + $0x278] sm:$0xff]  ;;  %v4750_v44 = vpack.c.bf16 %v639_v36, %v631_v35 }
 0x175   : > { %4457 = vmatprep.subr.bf16.mxu1 %v4456_v50  ;;  %v584_v50 = vld [vmem:[%s5738_s28 + $0x38] sm:$0xff]  ;;  %v4478_v53 = vpack.c.bf16 %v1595_v47, %v1587_v45  ;;  %v654_v39 = vld [vmem:[%s5738_s28 + $0x268] sm:$0xff]  ;;  %v645_v45 = vld [vmem:[%s5738_s28 + $0x220] sm:$0xff] }
 0x176   : > { %v552_v47 = vld [vmem:[%s5736_s8 + $0x138] sm:$0xff]  ;;  %v4496_v48 = vpack.c.bf16 %v654_v39, %v646_v38  ;;  %v567_v15 = vld [vmem:[%s5736_s8 + $0x1b0] sm:$0xff]  ;;  %v709_v38 = vld [vmem:[%s5738_s28 + $0x420] sm:$0xff] }
 0x177   : > { %4203 = vmatpush1.bf16.msra.mxu0 %v4202_v56  ;;  %v589_v56 = vld [vmem:[%s5738_s28 + $0x60] sm:$0xff] }
 0x178   : > { %4459 = vmatpush1.bf16.msra.mxu1 %v4458_v57  ;;  %4205 = vmatprep.subr.bf16.mxu0 %v4204_v58  ;;  %v4736_v57 = vpack.c.bf16 %v592_v51, %v584_v50  ;;  %v583_v58 = vld [vmem:[%s5738_s28 + $0x30] sm:$0xff]  ;;  %v4482_v63 = vpack.c.bf16 %v589_v56, %v581_v55  ;;  %v664_v56 = vld [vmem:[%s5738_s28 + $0x2b8] sm:$0xff]  ;;  %v717_v39 = vld [vmem:[%s5738_s28 + $0x460] sm:$0xff] }
 0x179   : > { %4461 = vmatprep.subr.bf16.mxu1 %v4460_v62  ;;  %v519_v62 = vld [vmem:[%s5736_s8 + $0x30] sm:$0xff]  ;;  %v4738_v2 = vpack.c.bf16 %v591_v59, %v583_v58  ;;  %v661_v59 = vld [vmem:[%s5738_s28 + $0x2a0] sm:$0xff] }
 0x17a   : > { %v655_v50 = vld [vmem:[%s5738_s28 + $0x270] sm:$0xff] }
 0x17b   : > { %4207 = vmatpush1.bf16.msra.mxu0 %v4206_v4  ;;  %v605_v4 = vld [vmem:[%s5738_s28 + $0xe0] sm:$0xff]  ;;  %v4754_v58 = vpack.c.bf16 %v655_v50, %v647_v49 }
 0x17c   : > { %4463 = vmatpush1.bf16.msra.mxu1 %v4462_v5  ;;  %4209 = vmatprep.subr.bf16.mxu0 %v4208_v6  ;;  %v528_v5 = vld [vmem:[%s5736_s8 + $0x78] sm:$0xff]  ;;  %v4484_v6 = vpack.c.bf16 %v606_v61, %v598_v60  ;;  %v4486_v13 = vpack.c.bf16 %v605_v4, %v597_v3  ;;  %v669_v60 = vld [vmem:[%s5738_s28 + $0x2e0] sm:$0xff]  ;;  %v686_v3 = vld [vmem:[%s5738_s28 + $0x368] sm:$0xff] }
 0x17d   : > { %4465 = vmatprep.subr.bf16.mxu1 %v4464_v10  ;;  %v614_v10 = vld [vmem:[%s5738_s28 + $0x128] sm:$0xff]  ;;  %v560_v61 = vld [vmem:[%s5736_s8 + $0x178] sm:$0xff]  ;;  %v559_v4 = vld [vmem:[%s5736_s8 + $0x170] sm:$0xff] }
 0x17e   : > { %v4488_v20 = vpack.c.bf16 %v622_v11, %v614_v10  ;;  %v685_v10 = vld [vmem:[%s5738_s28 + $0x360] sm:$0xff]  ;;  %v568_v11 = vld [vmem:[%s5736_s8 + $0x1b8] sm:$0xff] }
 0x17f   : > { %4211 = vmatpush1.bf16.msra.mxu0 %v4210_v16  ;;  %v4742_v16 = vpack.c.bf16 %v607_v8, %v599_v7  ;;  %v688_v7 = vld [vmem:[%s5738_s28 + $0x378] sm:$0xff]  ;;  %v725_v50 = vld [vmem:[%s5738_s28 + $0x4a0] sm:$0xff] }
 0x180   : > { %4467 = vmatpush1.bf16.msra.mxu1 %v4466_v17  ;;  %4213 = vmatprep.subr.bf16.mxu0 %v4212_v18  ;;  %v613_v17 = vld [vmem:[%s5738_s28 + $0x120] sm:$0xff] }
 0x181   : > { %4469 = vmatprep.subr.bf16.mxu1 %v4468_v22  ;;  %v621_v18 = vld [vmem:[%s5738_s28 + $0x160] sm:$0xff]  ;;  %v623_v22 = vld [vmem:[%s5738_s28 + $0x170] sm:$0xff] }
 0x182   : > { %v4490_v27 = vpack.c.bf16 %v621_v18, %v613_v17  ;;  %v694_v17 = vld [vmem:[%s5738_s28 + $0x3a8] sm:$0xff] }
 0x183   : > { %4215 = vmatpush1.bf16.msra.mxu0 %v4214_v28  ;;  %v632_v28 = vld [vmem:[%s5738_s28 + $0x1b8] sm:$0xff]  ;;  %v702_v18 = vld [vmem:[%s5738_s28 + $0x3e8] sm:$0xff] }
 0x184   : > { %4471 = vmatpush1.bf16.msra.mxu1 %v4470_v29  ;;  %4217 = vmatprep.subr.bf16.mxu0 %v4216_v30  ;;  %v640_v29 = vld [vmem:[%s5738_s28 + $0x1f8] sm:$0xff]  ;;  %v4746_v30 = vpack.c.bf16 %v623_v22, %v615_v21 }
 0x185   : > { %4473 = vmatprep.subr.bf16.mxu1 %v4472_v34  ;;  %v4492_v34 = vpack.c.bf16 %v638_v25, %v630_v24  ;;  %v4748_v37 = vpack.c.bf16 %v640_v29, %v632_v28  ;;  %v696_v21 = vld [vmem:[%s5738_s28 + $0x3b8] sm:$0xff]  ;;  %v693_v24 = vld [vmem:[%s5738_s28 + $0x3a0] sm:$0xff]  ;;  %v703_v28 = vld [vmem:[%s5738_s28 + $0x3f0] sm:$0xff] }
 0x186   : > { %v704_v22 = vld [vmem:[%s5738_s28 + $0x3f8] sm:$0xff]  ;;  %v701_v25 = vld [vmem:[%s5738_s28 + $0x3e0] sm:$0xff]  ;;  %v710_v29 = vld [vmem:[%s5738_s28 + $0x428] sm:$0xff] }
 0x187   : > { %4219 = vmatpush1.bf16.msra.mxu0 %v4218_v40  ;;  %v543_v40 = vld [vmem:[%s5736_s8 + $0xf0] sm:$0xff]  ;;  %v4510_v35 = vpack.c.bf16 %v701_v25, %v693_v24  ;;  %v781_v24 = vld [vmem:[%s5738_s28 + $0x660] sm:$0xff] }
 0x188   : > { %4475 = vmatpush1.bf16.msra.mxu1 %v4474_v41  ;;  %4221 = vmatprep.subr.bf16.mxu0 %v4220_v42  ;;  %v4494_v41 = vpack.c.bf16 %v637_v32, %v629_v31  ;;  %v648_v42 = vld [vmem:[%s5738_s28 + $0x238] sm:$0xff]  ;;  %v4764_v31 = vpack.c.bf16 %v704_v22, %v696_v21  ;;  %v775_v25 = vld [vmem:[%s5738_s28 + $0x630] sm:$0xff] }
 0x189   : > { %4477 = vmatprep.subr.bf16.mxu1 %v4476_v46  ;;  %v653_v46 = vld [vmem:[%s5738_s28 + $0x260] sm:$0xff]  ;;  %v4752_v51 = vpack.c.bf16 %v656_v43, %v648_v42  ;;  %v712_v32 = vld [vmem:[%s5738_s28 + $0x438] sm:$0xff]  ;;  %v719_v42 = vld [vmem:[%s5738_s28 + $0x470] sm:$0xff] }
 0x18a   : > { %v4498_v55 = vpack.c.bf16 %v653_v46, %v645_v45  ;;  %v726_v43 = vld [vmem:[%s5738_s28 + $0x4a8] sm:$0xff]  ;;  %v728_v45 = vld [vmem:[%s5738_s28 + $0x4b8] sm:$0xff] }
 0x18b   : > { %4223 = vmatpush1.bf16.msra.mxu0 %v4222_v52  ;;  %v662_v52 = vld [vmem:[%s5738_s28 + $0x2a8] sm:$0xff]  ;;  %v736_v46 = vld [vmem:[%s5738_s28 + $0x4f8] sm:$0xff] }
 0x18c   : > { %4479 = vmatpush1.bf16.msra.mxu1 %v4478_v53  ;;  %4481 = vmatprep.subr.bf16.mxu0 %v4480_v54  ;;  %v670_v53 = vld [vmem:[%s5738_s28 + $0x2e8] sm:$0xff]  ;;  %v551_v54 = vld [vmem:[%s5736_s8 + $0x130] sm:$0xff] }
 0x18d   : > { %4737 = vmatprep.subr.bf16.mxu1 %v4736_v57  ;;  %v672_v57 = vld [vmem:[%s5738_s28 + $0x2f8] sm:$0xff] }
 0x18e   : > { %2005 = vmatmul.mubr.f32.vlgmr.msra.gmra.mrb[0].mxu0 %v519_v62  ;;  %v4756_v1 = vpack.c.bf16 %v672_v57, %v664_v56  ;;  %v750_v56 = vld [vmem:[%s5738_s28 + $0x568] sm:$0xff] }
 0x18f   : > { %2457 = vmatmul.mubr.f32.vlgmr.msra.gmra.mrb[0].mxu1 %v519_v62  ;;  %4483 = vmatpush1.bf16.msra.mxu0 %v4482_v63  ;;  %v4500_v62 = vpack.c.bf16 %v670_v53, %v662_v52  ;;  %v663_v63 = vld [vmem:[%s5738_s28 + $0x2b0] sm:$0xff]  ;;  %v4772_v53 = vpack.c.bf16 %v736_v46, %v728_v45  ;;  %v5269_v57 = vld [vmem:[%s5736_s8 + $0x8] sm:$0xff] }
 0x190   : > { %4739 = vmatpush1.bf16.msra.mxu1 %v4738_v2  ;;  %2010 = vmatprep.mubr.f32.mxu0 %v528_v5  ;;  %v678_v2 = vld [vmem:[%s5738_s28 + $0x328] sm:$0xff]  ;;  %v4758_v8 = vpack.c.bf16 %v671_v0, %v663_v63  ;;  %v727_v52 = vld [vmem:[%s5738_s28 + $0x4b0] sm:$0xff]  ;;  %v741_v63 = vld [vmem:[%s5738_s28 + $0x520] sm:$0xff] }
 0x191   : > { %2462 = vmatprep.mubr.f32.mxu1 %v528_v5  ;;  %4485 = vmatprep.subr.bf16.mxu0 %v4484_v6  ;;  %v4502_v5 = vpack.c.bf16 %v669_v60, %v661_v59  ;;  %v680_v6 = vld [vmem:[%s5738_s28 + $0x338] sm:$0xff]  ;;  %v749_v0 = vld [vmem:[%s5738_s28 + $0x560] sm:$0xff] }
 0x192   : > { %2011 = vmatmul.mubr.f32.gmra.mrb[2].mxu0 %v527_v12  ;;  %4741 = vmatprep.subr.bf16.mxu1 %v4740_v9  ;;  %v677_v9 = vld [vmem:[%s5738_s28 + $0x320] sm:$0xff]  ;;  %v752_v59 = vld [vmem:[%s5738_s28 + $0x578] sm:$0xff] }
 0x193   : > { %2463 = vmatmul.mubr.f32.gmra.mrb[2].mxu1 %v527_v12  ;;  %4487 = vmatpush1.bf16.msra.mxu0 %v4486_v13  ;;  %v4504_v12 = vpack.c.bf16 %v686_v3, %v678_v2  ;;  %v679_v13 = vld [vmem:[%s5738_s28 + $0x330] sm:$0xff] }
 0x194   : > { %4743 = vmatpush1.bf16.msra.mxu1 %v4742_v16  ;;  %2016 = vmatprep.mubr.f32.mxu0 %v536_v19  ;;  %v4760_v16 = vpack.c.bf16 %v688_v7, %v680_v6  ;;  %v751_v3 = vld [vmem:[%s5738_s28 + $0x570] sm:$0xff]  ;;  %v760_v6 = vld [vmem:[%s5738_s28 + $0x5b8] sm:$0xff] }
 0x195   : > { %2468 = vmatprep.mubr.f32.mxu1 %v536_v19  ;;  %4489 = vmatprep.subr.bf16.mxu0 %v4488_v20  ;;  %v4506_v19 = vpack.c.bf16 %v685_v10, %v677_v9  ;;  %v576_v20 = vld [vmem:[%s5736_s8 + $0x1f8] sm:$0xff] }
 0x196   : > { %2017 = vmatmul.mubr.f32.gmra.mrb[4].mxu0 %v535_v26  ;;  %4745 = vmatprep.subr.bf16.mxu1 %v4744_v23  ;;  %v4762_v23 = vpack.c.bf16 %v687_v14, %v679_v13  ;;  %v768_v7 = vld [vmem:[%s5738_s28 + $0x5f8] sm:$0xff]  ;;  %v759_v13 = vld [vmem:[%s5738_s28 + $0x5b0] sm:$0xff] }
 0x197   : > { %2469 = vmatmul.mubr.f32.gmra.mrb[4].mxu1 %v535_v26  ;;  %4491 = vmatpush1.bf16.msra.mxu0 %v4490_v27  ;;  %v695_v26 = vld [vmem:[%s5738_s28 + $0x3b0] sm:$0xff]  ;;  %v4508_v27 = vpack.c.bf16 %v702_v18, %v694_v17  ;;  %v4780_v14 = vpack.c.bf16 %v768_v7, %v760_v6  ;;  %v782_v17 = vld [vmem:[%s5738_s28 + $0x668] sm:$0xff]  ;;  %v776_v18 = vld [vmem:[%s5738_s28 + $0x638] sm:$0xff] }
 0x198   : > { %4747 = vmatpush1.bf16.msra.mxu1 %v4746_v30  ;;  %2022 = vmatprep.mubr.f32.mxu0 %v544_v33  ;;  %v718_v30 = vld [vmem:[%s5738_s28 + $0x468] sm:$0xff]  ;;  %v4766_v36 = vpack.c.bf16 %v703_v28, %v695_v26  ;;  %v837_v7 = vld [vmem:[%s5738_s28 + $0x820] sm:$0xff] }
 0x199   : > { %2474 = vmatprep.mubr.f32.mxu1 %v544_v33  ;;  %4493 = vmatprep.subr.bf16.mxu0 %v4492_v34  ;;  %v720_v33 = vld [vmem:[%s5738_s28 + $0x478] sm:$0xff]  ;;  %v575_v34 = vld [vmem:[%s5736_s8 + $0x1f0] sm:$0xff]  ;;  %v790_v28 = vld [vmem:[%s5738_s28 + $0x6a8] sm:$0xff] }
 0x19a   : > { %2023 = vmatmul.mubr.f32.gmra.mrb[6].mxu0 %v543_v40  ;;  %4749 = vmatprep.subr.bf16.mxu1 %v4748_v37  ;;  %v4512_v37 = vpack.c.bf16 %v718_v30, %v710_v29  ;;  %v798_v29 = vld [vmem:[%s5738_s28 + $0x6e8] sm:$0xff]  ;;  %v792_v30 = vld [vmem:[%s5738_s28 + $0x6b8] sm:$0xff] }
 0x19b   : > { %2475 = vmatmul.mubr.f32.gmra.mrb[6].mxu1 %v543_v40  ;;  %4495 = vmatpush1.bf16.msra.mxu0 %v4494_v41  ;;  %v711_v40 = vld [vmem:[%s5738_s28 + $0x430] sm:$0xff]  ;;  %v4768_v41 = vpack.c.bf16 %v720_v33, %v712_v32 }
 0x19c   : > { %4751 = vmatpush1.bf16.msra.mxu1 %v4750_v44  ;;  %2028 = vmatprep.mubr.f32.mxu0 %v552_v47  ;;  %v734_v44 = vld [vmem:[%s5738_s28 + $0x4e8] sm:$0xff] }
 0x19d   : > { %2480 = vmatprep.mubr.f32.mxu1 %v552_v47  ;;  %4497 = vmatprep.subr.bf16.mxu0 %v4496_v48  ;;  %v4514_v47 = vpack.c.bf16 %v717_v39, %v709_v38  ;;  %v4770_v48 = vpack.c.bf16 %v719_v42, %v711_v40  ;;  %v4516_v49 = vpack.c.bf16 %v734_v44, %v726_v43  ;;  %v799_v39 = vld [vmem:[%s5738_s28 + $0x6f0] sm:$0xff]  ;;  %v806_v40 = vld [vmem:[%s5738_s28 + $0x728] sm:$0xff]  ;;  %v808_v42 = vld [vmem:[%s5738_s28 + $0x738] sm:$0xff] }
 0x19e   : > { %2029 = vmatmul.mubr.f32.gmra.mrb[8].mxu0 %v551_v54  ;;  %4753 = vmatprep.subr.bf16.mxu1 %v4752_v51  ;;  %v733_v51 = vld [vmem:[%s5738_s28 + $0x4e0] sm:$0xff]  ;;  %v816_v43 = vld [vmem:[%s5738_s28 + $0x778] sm:$0xff] }
 0x19f   : > { %2481 = vmatmul.mubr.f32.gmra.mrb[8].mxu1 %v551_v54  ;;  %4499 = vmatpush1.bf16.msra.mxu0 %v4498_v55  ;;  %v735_v54 = vld [vmem:[%s5738_s28 + $0x4f0] sm:$0xff]  ;;  %v742_v55 = vld [vmem:[%s5738_s28 + $0x528] sm:$0xff]  ;;  %v4518_v60 = vpack.c.bf16 %v733_v51, %v725_v50  ;;  %v4792_v50 = vpack.c.bf16 %v816_v43, %v808_v42  ;;  %v5272_v42 = vld [vmem:[%s5736_s8 + $0x40] sm:$0xff] }
 0x1a0   : > { %4755 = vmatpush1.bf16.msra.mxu1 %v4754_v58  ;;  %2034 = vmatprep.mubr.f32.mxu0 %v560_v61  ;;  %v744_v58 = vld [vmem:[%s5738_s28 + $0x538] sm:$0xff]  ;;  %v815_v51 = vld [vmem:[%s5738_s28 + $0x770] sm:$0xff] }
 0x1a1   : > { %2486 = vmatprep.mubr.f32.mxu1 %v560_v61  ;;  %4501 = vmatprep.subr.bf16.mxu0 %v4500_v62  ;;  %v4774_v61 = vpack.c.bf16 %v735_v54, %v727_v52  ;;  %v4520_v62 = vpack.c.bf16 %v750_v56, %v742_v55  ;;  %v4776_v2 = vpack.c.bf16 %v752_v59, %v744_v58  ;;  %v822_v52 = vld [vmem:[%s5738_s28 + $0x7a8] sm:$0xff]  ;;  %v824_v54 = vld [vmem:[%s5738_s28 + $0x7b8] sm:$0xff]  ;;  %v821_v59 = vld [vmem:[%s5738_s28 + $0x7a0] sm:$0xff] }
 0x1a2   : > { %2035 = vmatmul.mubr.f32.gmra.mrb[10].mxu0 %v559_v4  ;;  %4757 = vmatprep.subr.bf16.mxu1 %v4756_v1  ;;  %v743_v1 = vld [vmem:[%s5738_s28 + $0x530] sm:$0xff]  ;;  %v832_v55 = vld [vmem:[%s5738_s28 + $0x7f8] sm:$0xff] }
 0x1a3   : > { %2487 = vmatmul.mubr.f32.gmra.mrb[10].mxu1 %v559_v4  ;;  %4503 = vmatpush1.bf16.msra.mxu0 %v4502_v5  ;;  %v758_v4 = vld [vmem:[%s5738_s28 + $0x5a8] sm:$0xff]  ;;  %v4778_v9 = vpack.c.bf16 %v751_v3, %v743_v1  ;;  %v848_v3 = vld [vmem:[%s5738_s28 + $0x878] sm:$0xff] }
 0x1a4   : > { %4759 = vmatpush1.bf16.msra.mxu1 %v4758_v8  ;;  %2040 = vmatprep.mubr.f32.mxu0 %v568_v11  ;;  %v766_v5 = vld [vmem:[%s5738_s28 + $0x5e8] sm:$0xff]  ;;  %v4522_v8 = vpack.c.bf16 %v749_v0, %v741_v63  ;;  %v831_v63 = vld [vmem:[%s5738_s28 + $0x7f0] sm:$0xff] }
 0x1a5   : > { %2492 = vmatprep.mubr.f32.mxu1 %v568_v11  ;;  %4505 = vmatprep.subr.bf16.mxu0 %v4504_v12  ;;  %v4524_v10 = vpack.c.bf16 %v766_v5, %v758_v4  ;;  %v757_v11 = vld [vmem:[%s5738_s28 + $0x5a0] sm:$0xff]  ;;  %v838_v0 = vld [vmem:[%s5738_s28 + $0x828] sm:$0xff] }
 0x1a6   : > { %2041 = vmatmul.mubr.f32.gmra.mrb[12].mxu0 %v567_v15  ;;  %4761 = vmatprep.subr.bf16.mxu1 %v4760_v16  ;;  %v765_v12 = vld [vmem:[%s5738_s28 + $0x5e0] sm:$0xff]  ;;  %v774_v16 = vld [vmem:[%s5738_s28 + $0x628] sm:$0xff] }
 0x1a7   : > { %2493 = vmatmul.mubr.f32.gmra.mrb[12].mxu1 %v567_v15  ;;  %4507 = vmatpush1.bf16.msra.mxu0 %v4506_v19  ;;  %v767_v15 = vld [vmem:[%s5738_s28 + $0x5f0] sm:$0xff]  ;;  %v784_v19 = vld [vmem:[%s5738_s28 + $0x678] sm:$0xff]  ;;  %v4528_v22 = vpack.c.bf16 %v782_v17, %v774_v16  ;;  %v846_v1 = vld [vmem:[%s5738_s28 + $0x868] sm:$0xff] }
 0x1a8   : > { %4763 = vmatpush1.bf16.msra.mxu1 %v4762_v23  ;;  %2046 = vmatprep.mubr.f32.mxu0 %v576_v20  ;;  %v4782_v21 = vpack.c.bf16 %v767_v15, %v759_v13  ;;  %v773_v23 = vld [vmem:[%s5738_s28 + $0x620] sm:$0xff]  ;;  %v4784_v26 = vpack.c.bf16 %v784_v19, %v776_v18  ;;  %v4544_v6 = vpack.c.bf16 %v846_v1, %v838_v0  ;;  %v862_v13 = vld [vmem:[%s5738_s28 + $0x8e8] sm:$0xff]  ;;  %v864_v15 = vld [vmem:[%s5738_s28 + $0x8f8] sm:$0xff] }
 0x1a9   : > { %2498 = vmatprep.mubr.f32.mxu1 %v576_v20  ;;  %4509 = vmatprep.subr.bf16.mxu0 %v4508_v27  ;;  %v4526_v20 = vpack.c.bf16 %v765_v12, %v757_v11  ;;  %v783_v27 = vld [vmem:[%s5738_s28 + $0x670] sm:$0xff]  ;;  %v4530_v32 = vpack.c.bf16 %v781_v24, %v773_v23  ;;  %v854_v12 = vld [vmem:[%s5738_s28 + $0x8a8] sm:$0xff]  ;;  %v853_v19 = vld [vmem:[%s5738_s28 + $0x8a0] sm:$0xff] }
 0x1aa   : > { %2047 = vmatmul.mubr.f32.gmra.mrb[14].mxu0 %v575_v34  ;;  %4765 = vmatprep.subr.bf16.mxu1 %v4764_v31  ;;  %v800_v31 = vld [vmem:[%s5738_s28 + $0x6f8] sm:$0xff]  ;;  %v4786_v33 = vpack.c.bf16 %v783_v27, %v775_v25  ;;  %v847_v11 = vld [vmem:[%s5738_s28 + $0x870] sm:$0xff]  ;;  %v4548_v18 = vpack.c.bf16 %v862_v13, %v854_v12  ;;  %v870_v24 = vld [vmem:[%s5738_s28 + $0x928] sm:$0xff] }
 0x1ab   : > { %2499 = vmatmul.mubr.f32.gmra.mrb[14].mxu1 %v575_v34  ;;  %4511 = vmatpush1.bf16.msra.mxu0 %v4510_v35  ;;  %v4532_v34 = vpack.c.bf16 %v798_v29, %v790_v28  ;;  %v789_v35 = vld [vmem:[%s5738_s28 + $0x6a0] sm:$0xff]  ;;  %v4788_v38 = vpack.c.bf16 %v800_v31, %v792_v30  ;;  %v863_v23 = vld [vmem:[%s5738_s28 + $0x8f0] sm:$0xff]  ;;  %v878_v25 = vld [vmem:[%s5738_s28 + $0x968] sm:$0xff] }
 0x1ac   : > { %4767 = vmatpush1.bf16.msra.mxu1 %v4766_v36  ;;  %4513 = vmatprep.subr.bf16.mxu0 %v4512_v37  ;;  %v797_v36 = vld [vmem:[%s5738_s28 + $0x6e0] sm:$0xff]  ;;  %v791_v37 = vld [vmem:[%s5738_s28 + $0x6b0] sm:$0xff]  ;;  %v872_v27 = vld [vmem:[%s5738_s28 + $0x938] sm:$0xff]  ;;  %v4552_v31 = vpack.c.bf16 %v878_v25, %v870_v24 }
 0x1ad   : > { %4769 = vmatprep.subr.bf16.mxu1 %v4768_v41  ;;  %2569 = vmatprep.mubr.f32.mxu0 %v5269_v57  ;;  %v814_v41 = vld [vmem:[%s5738_s28 + $0x768] sm:$0xff]  ;;  %v4534_v44 = vpack.c.bf16 %v797_v36, %v789_v35  ;;  %v4790_v45 = vpack.c.bf16 %v799_v39, %v791_v37  ;;  %v880_v28 = vld [vmem:[%s5738_s28 + $0x978] sm:$0xff]  ;;  %v879_v36 = vld [vmem:[%s5738_s28 + $0x970] sm:$0xff] }
 0x1ae   : > { %3021 = vmatprep.mubr.f32.mxu1 %v5269_v57  ;;  %v4536_v46 = vpack.c.bf16 %v814_v41, %v806_v40  ;;  %v4808_v35 = vpack.c.bf16 %v880_v28, %v872_v27  ;;  %v886_v37 = vld [vmem:[%s5738_s28 + $0x9a8] sm:$0xff]  ;;  %v888_v40 = vld [vmem:[%s5738_s28 + $0x9b8] sm:$0xff]  ;;  %v911_v0 = vld [vmem:[%s5738_s28 + $0xa70] sm:$0xff] }
 0x1af   : > { %4515 = vmatpush1.bf16.msra.mxu0 %v4514_v47  ;;  %v805_v47 = vld [vmem:[%s5738_s28 + $0x720] sm:$0xff]  ;;  %v5271_v39 = vld [vmem:[%s5736_s8 + $0x48] sm:$0xff]  ;;  %v896_v41 = vld [vmem:[%s5738_s28 + $0x9f8] sm:$0xff] }
 0x1b0   : > { %4771 = vmatpush1.bf16.msra.mxu1 %v4770_v48  ;;  %4517 = vmatprep.subr.bf16.mxu0 %v4516_v49  ;;  %v813_v48 = vld [vmem:[%s5738_s28 + $0x760] sm:$0xff]  ;;  %v807_v49 = vld [vmem:[%s5738_s28 + $0x730] sm:$0xff]  ;;  %v918_v1 = vld [vmem:[%s5738_s28 + $0xaa8] sm:$0xff] }
 0x1b1   : > { %4773 = vmatprep.subr.bf16.mxu1 %v4772_v53  ;;  %v830_v53 = vld [vmem:[%s5738_s28 + $0x7e8] sm:$0xff]  ;;  %v4538_v56 = vpack.c.bf16 %v813_v48, %v805_v47  ;;  %v4794_v57 = vpack.c.bf16 %v815_v51, %v807_v49  ;;  %v893_v47 = vld [vmem:[%s5738_s28 + $0x9e0] sm:$0xff]  ;;  %v887_v48 = vld [vmem:[%s5738_s28 + $0x9b0] sm:$0xff]  ;;  %v4812_v49 = vpack.c.bf16 %v896_v41, %v888_v40 }
 0x1b2   : > { %v4540_v58 = vpack.c.bf16 %v830_v53, %v822_v52  ;;  %v902_v51 = vld [vmem:[%s5738_s28 + $0xa28] sm:$0xff]  ;;  %v919_v12 = vld [vmem:[%s5738_s28 + $0xab0] sm:$0xff]  ;;  %v933_v24 = vld [vmem:[%s5738_s28 + $0xb20] sm:$0xff] }
 0x1b3   : > { %4519 = vmatpush1.bf16.msra.mxu0 %v4518_v60  ;;  %v829_v60 = vld [vmem:[%s5738_s28 + $0x7e0] sm:$0xff]  ;;  %v910_v52 = vld [vmem:[%s5738_s28 + $0xa68] sm:$0xff]  ;;  %v943_v28 = vld [vmem:[%s5738_s28 + $0xb70] sm:$0xff] }
 0x1b4   : > { %4775 = vmatpush1.bf16.msra.mxu1 %v4774_v61  ;;  %4521 = vmatprep.subr.bf16.mxu0 %v4520_v62  ;;  %v823_v61 = vld [vmem:[%s5738_s28 + $0x7b0] sm:$0xff]  ;;  %v4796_v62 = vpack.c.bf16 %v832_v55, %v824_v54  ;;  %v4542_v4 = vpack.c.bf16 %v829_v60, %v821_v59  ;;  %v5273_v53 = vld [vmem:[%s5736_s8 + $0x88] sm:$0xff]  ;;  %v904_v54 = vld [vmem:[%s5738_s28 + $0xa38] sm:$0xff]  ;;  %v4560_v59 = vpack.c.bf16 %v910_v52, %v902_v51 }
 0x1b5   : > { %4777 = vmatprep.subr.bf16.mxu1 %v4776_v2  ;;  %v840_v2 = vld [vmem:[%s5738_s28 + $0x838] sm:$0xff]  ;;  %v4798_v5 = vpack.c.bf16 %v831_v63, %v823_v61  ;;  %v901_v60 = vld [vmem:[%s5738_s28 + $0xa20] sm:$0xff]  ;;  %v951_v40 = vld [vmem:[%s5738_s28 + $0xbb0] sm:$0xff] }
 0x1b6   : > { %v912_v55 = vld [vmem:[%s5738_s28 + $0xa78] sm:$0xff]  ;;  %v909_v61 = vld [vmem:[%s5738_s28 + $0xa60] sm:$0xff] }
 0x1b7   : > { %4523 = vmatpush1.bf16.msra.mxu0 %v4522_v8  ;;  %v845_v8 = vld [vmem:[%s5738_s28 + $0x860] sm:$0xff]  ;;  %v4816_v63 = vpack.c.bf16 %v912_v55, %v904_v54  ;;  %v967_v54 = vld [vmem:[%s5738_s28 + $0xc30] sm:$0xff] }
 0x1b8   : > { %4779 = vmatpush1.bf16.msra.mxu1 %v4778_v9  ;;  %4525 = vmatprep.subr.bf16.mxu0 %v4524_v10  ;;  %v839_v9 = vld [vmem:[%s5738_s28 + $0x830] sm:$0xff]  ;;  %v4800_v10 = vpack.c.bf16 %v848_v3, %v840_v2  ;;  %v4546_v16 = vpack.c.bf16 %v845_v8, %v837_v7  ;;  %v926_v2 = vld [vmem:[%s5738_s28 + $0xae8] sm:$0xff]  ;;  %v4562_v7 = vpack.c.bf16 %v909_v61, %v901_v60  ;;  %v941_v25 = vld [vmem:[%s5738_s28 + $0xb60] sm:$0xff] }
 0x1b9   : > { %4781 = vmatprep.subr.bf16.mxu1 %v4780_v14  ;;  %v856_v14 = vld [vmem:[%s5738_s28 + $0x8b8] sm:$0xff]  ;;  %v4802_v17 = vpack.c.bf16 %v847_v11, %v839_v9  ;;  %v5275_v3 = vld [vmem:[%s5736_s8 + $0xc8] sm:$0xff]  ;;  %v4564_v9 = vpack.c.bf16 %v926_v2, %v918_v1  ;;  %v925_v11 = vld [vmem:[%s5738_s28 + $0xae0] sm:$0xff] }
 0x1ba   : > { %v965_v52 = vld [vmem:[%s5738_s28 + $0xc20] sm:$0xff]  ;;  %v984_v60 = vld [vmem:[%s5738_s28 + $0xcb8] sm:$0xff] }
 0x1bb   : > { %4527 = vmatpush1.bf16.msra.mxu0 %v4526_v20  ;;  %v861_v20 = vld [vmem:[%s5738_s28 + $0x8e0] sm:$0xff]  ;;  %v992_v61 = vld [vmem:[%s5738_s28 + $0xcf8] sm:$0xff] }
 0x1bc   : > { %4783 = vmatpush1.bf16.msra.mxu1 %v4782_v21  ;;  %4529 = vmatprep.subr.bf16.mxu0 %v4528_v22  ;;  %v855_v21 = vld [vmem:[%s5738_s28 + $0x8b0] sm:$0xff]  ;;  %v4804_v22 = vpack.c.bf16 %v864_v15, %v856_v14  ;;  %v4550_v29 = vpack.c.bf16 %v861_v20, %v853_v19  ;;  %v934_v15 = vld [vmem:[%s5738_s28 + $0xb28] sm:$0xff]  ;;  %v944_v19 = vld [vmem:[%s5738_s28 + $0xb78] sm:$0xff] }
 0x1bd   : > { %4785 = vmatprep.subr.bf16.mxu1 %v4784_v26  ;;  %v5270_v26 = vld [vmem:[%s5736_s8] sm:$0xff]  ;;  %v4806_v30 = vpack.c.bf16 %v863_v23, %v855_v21  ;;  %v927_v14 = vld [vmem:[%s5738_s28 + $0xaf0] sm:$0xff] }
 0x1be   : > { %v5278_v20 = vld [vmem:[%s5736_s8 + $0x100] sm:$0xff] }
 0x1bf   : > { %4531 = vmatpush1.bf16.msra.mxu0 %v4530_v32  ;;  %v869_v32 = vld [vmem:[%s5738_s28 + $0x920] sm:$0xff] }
 0x1c0   : > { %4787 = vmatpush1.bf16.msra.mxu1 %v4786_v33  ;;  %4533 = vmatprep.subr.bf16.mxu0 %v4532_v34  ;;  %v877_v33 = vld [vmem:[%s5738_s28 + $0x960] sm:$0xff]  ;;  %v871_v34 = vld [vmem:[%s5738_s28 + $0x930] sm:$0xff] }
 0x1c1   : > { %4789 = vmatprep.subr.bf16.mxu1 %v4788_v38  ;;  %v894_v38 = vld [vmem:[%s5738_s28 + $0x9e8] sm:$0xff]  ;;  %v4554_v43 = vpack.c.bf16 %v877_v33, %v869_v32  ;;  %v952_v32 = vld [vmem:[%s5738_s28 + $0xbb8] sm:$0xff]  ;;  %v981_v2 = vld [vmem:[%s5738_s28 + $0xca0] sm:$0xff] }
 0x1c2   : > { %v960_v33 = vld [vmem:[%s5738_s28 + $0xbf8] sm:$0xff] }
 0x1c3   : > { %4535 = vmatpush1.bf16.msra.mxu0 %v4534_v44  ;;  %v4810_v44 = vpack.c.bf16 %v879_v36, %v871_v34  ;;  %v5280_v34 = vld [vmem:[%s5736_s8 + $0x140] sm:$0xff]  ;;  %v4828_v41 = vpack.c.bf16 %v960_v33, %v952_v32  ;;  %v1030_v32 = vld [vmem:[%s5738_s28 + $0xe28] sm:$0xff] }
 0x1c4   : > { %4791 = vmatpush1.bf16.msra.mxu1 %v4790_v45  ;;  %4537 = vmatprep.subr.bf16.mxu0 %v4536_v46  ;;  %v4556_v45 = vpack.c.bf16 %v894_v38, %v886_v37  ;;  %v885_v46 = vld [vmem:[%s5738_s28 + $0x9a0] sm:$0xff]  ;;  %v1038_v33 = vld [vmem:[%s5738_s28 + $0xe68] sm:$0xff] }
 0x1c5   : > { %4793 = vmatprep.subr.bf16.mxu1 %v4792_v50  ;;  %v895_v50 = vld [vmem:[%s5738_s28 + $0x9f0] sm:$0xff]  ;;  %v949_v38 = vld [vmem:[%s5738_s28 + $0xba0] sm:$0xff] }
 0x1c7   : > { %4539 = vmatpush1.bf16.msra.mxu0 %v4538_v56  ;;  %v5274_v56 = vld [vmem:[%s5736_s8 + $0x80] sm:$0xff] }
 0x1c8   : > { %4795 = vmatpush1.bf16.msra.mxu1 %v4794_v57  ;;  %4541 = vmatprep.subr.bf16.mxu0 %v4540_v58  ;;  %v4558_v57 = vpack.c.bf16 %v893_v47, %v885_v46  ;;  %v4814_v58 = vpack.c.bf16 %v895_v50, %v887_v48  ;;  %v968_v46 = vld [vmem:[%s5738_s28 + $0xc38] sm:$0xff]  ;;  %v5282_v48 = vld [vmem:[%s5736_s8 + $0x180] sm:$0xff] }
 0x1c9   : > { %4797 = vmatprep.subr.bf16.mxu1 %v4796_v62  ;;  %v903_v62 = vld [vmem:[%s5738_s28 + $0xa30] sm:$0xff]  ;;  %v976_v47 = vld [vmem:[%s5738_s28 + $0xc78] sm:$0xff] }
 0x1ca   : > { %v4818_v8 = vpack.c.bf16 %v911_v0, %v903_v62  ;;  %v4832_v55 = vpack.c.bf16 %v976_v47, %v968_v46  ;;  %v5284_v62 = vld [vmem:[%s5736_s8 + $0x1c0] sm:$0xff]  ;;  %v1048_v46 = vld [vmem:[%s5738_s28 + $0xeb8] sm:$0xff] }
 0x1cb   : > { %4543 = vmatpush1.bf16.msra.mxu0 %v4542_v4  ;;  %v920_v4 = vld [vmem:[%s5738_s28 + $0xab8] sm:$0xff] }
 0x1cc   : > { %4799 = vmatpush1.bf16.msra.mxu1 %v4798_v5  ;;  %4545 = vmatprep.subr.bf16.mxu0 %v4544_v6  ;;  %v928_v5 = vld [vmem:[%s5738_s28 + $0xaf8] sm:$0xff]  ;;  %v5276_v6 = vld [vmem:[%s5736_s8 + $0xc0] sm:$0xff] }
 0x1cd   : > { %4801 = vmatprep.subr.bf16.mxu1 %v4800_v10  ;;  %v917_v10 = vld [vmem:[%s5738_s28 + $0xaa0] sm:$0xff]  ;;  %v4820_v13 = vpack.c.bf16 %v928_v5, %v920_v4  ;;  %v983_v4 = vld [vmem:[%s5738_s28 + $0xcb0] sm:$0xff]  ;;  %v4836_v5 = vpack.c.bf16 %v992_v61, %v984_v60  ;;  %v1056_v47 = vld [vmem:[%s5738_s28 + $0xef8] sm:$0xff] }
 0x1ce   : > { %2570 = vmatmul.mubr.f32.vlgmr.msra.gmra.mrb[16].mxu0 %v5270_v26  ;;  %v4566_v21 = vpack.c.bf16 %v925_v11, %v917_v10  ;;  %v1000_v10 = vld [vmem:[%s5738_s28 + $0xd38] sm:$0xff] }
 0x1cf   : > { %4547 = vmatpush1.bf16.msra.mxu0 %v4546_v16  ;;  %3022 = vmatmul.mubr.f32.vlgmr.msra.gmra.mrb[16].mxu1 %v5270_v26  ;;  %v942_v16 = vld [vmem:[%s5738_s28 + $0xb68] sm:$0xff]  ;;  %v935_v26 = vld [vmem:[%s5738_s28 + $0xb30] sm:$0xff]  ;;  %v1008_v11 = vld [vmem:[%s5738_s28 + $0xd78] sm:$0xff] }
 0x1d0   : > { %4803 = vmatpush1.bf16.msra.mxu1 %v4802_v17  ;;  %4549 = vmatprep.subr.bf16.mxu0 %v4548_v18  ;;  %v5277_v17 = vld [vmem:[%s5736_s8 + $0x108] sm:$0xff]  ;;  %v936_v18 = vld [vmem:[%s5738_s28 + $0xb38] sm:$0xff]  ;;  %v4568_v23 = vpack.c.bf16 %v942_v16, %v934_v15  ;;  %v4826_v36 = vpack.c.bf16 %v943_v28, %v935_v26  ;;  %v997_v15 = vld [vmem:[%s5738_s28 + $0xd20] sm:$0xff] }
 0x1d1   : > { %4805 = vmatprep.subr.bf16.mxu1 %v4804_v22  ;;  %2575 = vmatprep.mubr.f32.mxu0 %v5271_v39  ;;  %v4822_v22 = vpack.c.bf16 %v927_v14, %v919_v12  ;;  %v4824_v27 = vpack.c.bf16 %v944_v19, %v936_v18  ;;  %v1005_v16 = vld [vmem:[%s5738_s28 + $0xd60] sm:$0xff]  ;;  %v4840_v18 = vpack.c.bf16 %v1008_v11, %v1000_v10  ;;  %v1007_v19 = vld [vmem:[%s5738_s28 + $0xd70] sm:$0xff] }
 0x1d2   : > { %3027 = vmatprep.mubr.f32.mxu1 %v5271_v39  ;;  %2576 = vmatmul.mubr.f32.gmra.mrb[18].mxu0 %v5272_v42  ;;  %v957_v39 = vld [vmem:[%s5738_s28 + $0xbe0] sm:$0xff] }
 0x1d3   : > { %4551 = vmatpush1.bf16.msra.mxu0 %v4550_v29  ;;  %3028 = vmatmul.mubr.f32.gmra.mrb[18].mxu1 %v5272_v42  ;;  %v950_v29 = vld [vmem:[%s5738_s28 + $0xba8] sm:$0xff]  ;;  %v959_v42 = vld [vmem:[%s5738_s28 + $0xbf0] sm:$0xff]  ;;  %v1021_v28 = vld [vmem:[%s5738_s28 + $0xde0] sm:$0xff] }
 0x1d4   : > { %4807 = vmatpush1.bf16.msra.mxu1 %v4806_v30  ;;  %4553 = vmatprep.subr.bf16.mxu0 %v4552_v31  ;;  %v958_v30 = vld [vmem:[%s5738_s28 + $0xbe8] sm:$0xff]  ;;  %v4830_v50 = vpack.c.bf16 %v959_v42, %v951_v40  ;;  %v1037_v40 = vld [vmem:[%s5738_s28 + $0xe60] sm:$0xff] }
 0x1d5   : > { %4809 = vmatprep.subr.bf16.mxu1 %v4808_v35  ;;  %2581 = vmatprep.mubr.f32.mxu0 %v5273_v53  ;;  %v5279_v31 = vld [vmem:[%s5736_s8 + $0x148] sm:$0xff]  ;;  %v4570_v35 = vpack.c.bf16 %v941_v25, %v933_v24  ;;  %v4572_v37 = vpack.c.bf16 %v958_v30, %v950_v29  ;;  %v4586_v24 = vpack.c.bf16 %v1005_v16, %v997_v15  ;;  %v1015_v29 = vld [vmem:[%s5738_s28 + $0xdb0] sm:$0xff]  ;;  %v1077_v11 = vld [vmem:[%s5738_s28 + $0xfa0] sm:$0xff] }
 0x1d6   : > { %3033 = vmatprep.mubr.f32.mxu1 %v5273_v53  ;;  %2582 = vmatmul.mubr.f32.gmra.mrb[20].mxu0 %v5274_v56  ;;  %v973_v53 = vld [vmem:[%s5738_s28 + $0xc60] sm:$0xff]  ;;  %v1087_v15 = vld [vmem:[%s5738_s28 + $0xff0] sm:$0xff]  ;;  %v1094_v16 = vld [vmem:[%s5738_s28 + $0x1028] sm:$0xff] }
 0x1d7   : > { %4555 = vmatpush1.bf16.msra.mxu0 %v4554_v43  ;;  %3034 = vmatmul.mubr.f32.gmra.mrb[20].mxu1 %v5274_v56  ;;  %v966_v43 = vld [vmem:[%s5738_s28 + $0xc28] sm:$0xff]  ;;  %v975_v56 = vld [vmem:[%s5738_s28 + $0xc70] sm:$0xff] }
 0x1d8   : > { %4811 = vmatpush1.bf16.msra.mxu1 %v4810_v44  ;;  %4557 = vmatprep.subr.bf16.mxu0 %v4556_v45  ;;  %v974_v44 = vld [vmem:[%s5738_s28 + $0xc68] sm:$0xff]  ;;  %v4834_v0 = vpack.c.bf16 %v975_v56, %v967_v54  ;;  %v4852_v54 = vpack.c.bf16 %v1056_v47, %v1048_v46 }
 0x1d9   : > { %4813 = vmatprep.subr.bf16.mxu1 %v4812_v49  ;;  %2587 = vmatprep.mubr.f32.mxu0 %v5275_v3  ;;  %v5281_v45 = vld [vmem:[%s5736_s8 + $0x188] sm:$0xff]  ;;  %v4574_v49 = vpack.c.bf16 %v957_v39, %v949_v38  ;;  %v4576_v51 = vpack.c.bf16 %v974_v44, %v966_v43  ;;  %v4592_v38 = vpack.c.bf16 %v1038_v33, %v1030_v32  ;;  %v1029_v39 = vld [vmem:[%s5738_s28 + $0xe20] sm:$0xff]  ;;  %v1039_v43 = vld [vmem:[%s5738_s28 + $0xe70] sm:$0xff] }
 0x1da   : > { %3039 = vmatprep.mubr.f32.mxu1 %v5275_v3  ;;  %2588 = vmatmul.mubr.f32.gmra.mrb[22].mxu0 %v5276_v6  ;;  %v989_v3 = vld [vmem:[%s5738_s28 + $0xce0] sm:$0xff]  ;;  %v1046_v44 = vld [vmem:[%s5738_s28 + $0xea8] sm:$0xff] }
 0x1db   : > { %4559 = vmatpush1.bf16.msra.mxu0 %v4558_v57  ;;  %3040 = vmatmul.mubr.f32.gmra.mrb[22].mxu1 %v5276_v6  ;;  %v982_v57 = vld [vmem:[%s5738_s28 + $0xca8] sm:$0xff]  ;;  %v991_v6 = vld [vmem:[%s5738_s28 + $0xcf0] sm:$0xff]  ;;  %v4582_v12 = vpack.c.bf16 %v989_v3, %v981_v2 }
 0x1dc   : > { %4815 = vmatpush1.bf16.msra.mxu1 %v4814_v58  ;;  %4561 = vmatprep.subr.bf16.mxu0 %v4560_v59  ;;  %v990_v58 = vld [vmem:[%s5738_s28 + $0xce8] sm:$0xff]  ;;  %v1071_v3 = vld [vmem:[%s5738_s28 + $0xf70] sm:$0xff] }
 0x1dd   : > { %4817 = vmatprep.subr.bf16.mxu1 %v4816_v63  ;;  %2593 = vmatprep.mubr.f32.mxu0 %v5277_v17  ;;  %v5283_v59 = vld [vmem:[%s5736_s8 + $0x1c8] sm:$0xff]  ;;  %v4578_v63 = vpack.c.bf16 %v973_v53, %v965_v52  ;;  %v4580_v1 = vpack.c.bf16 %v990_v58, %v982_v57  ;;  %v1053_v52 = vld [vmem:[%s5738_s28 + $0xee0] sm:$0xff]  ;;  %v1047_v53 = vld [vmem:[%s5738_s28 + $0xeb0] sm:$0xff] }
 0x1de   : > { %3045 = vmatprep.mubr.f32.mxu1 %v5277_v17  ;;  %2594 = vmatmul.mubr.f32.gmra.mrb[24].mxu0 %v5278_v20  ;;  %v999_v17 = vld [vmem:[%s5738_s28 + $0xd30] sm:$0xff]  ;;  %v1062_v56 = vld [vmem:[%s5738_s28 + $0xf28] sm:$0xff]  ;;  %v1064_v58 = vld [vmem:[%s5738_s28 + $0xf38] sm:$0xff] }
 0x1df   : > { %4563 = vmatpush1.bf16.msra.mxu0 %v4562_v7  ;;  %3046 = vmatmul.mubr.f32.gmra.mrb[24].mxu1 %v5278_v20  ;;  %v998_v7 = vld [vmem:[%s5738_s28 + $0xd28] sm:$0xff]  ;;  %v4842_v25 = vpack.c.bf16 %v1007_v19, %v999_v17  ;;  %v1104_v19 = vld [vmem:[%s5738_s28 + $0x1078] sm:$0xff] }
 0x1e0   : > { %4819 = vmatpush1.bf16.msra.mxu1 %v4818_v8  ;;  %4565 = vmatprep.subr.bf16.mxu0 %v4564_v9  ;;  %v1006_v8 = vld [vmem:[%s5738_s28 + $0xd68] sm:$0xff]  ;;  %v5285_v9 = vld [vmem:[%s5736_s8 + $0x18] sm:$0xff] }
 0x1e1   : > { %4821 = vmatprep.subr.bf16.mxu1 %v4820_v13  ;;  %2599 = vmatprep.mubr.f32.mxu0 %v5279_v31  ;;  %v4838_v13 = vpack.c.bf16 %v991_v6, %v983_v4  ;;  %v4584_v14 = vpack.c.bf16 %v1006_v8, %v998_v7  ;;  %v1014_v20 = vld [vmem:[%s5738_s28 + $0xda8] sm:$0xff]  ;;  %v1080_v6 = vld [vmem:[%s5738_s28 + $0xfb8] sm:$0xff] }
 0x1e2   : > { %3051 = vmatprep.mubr.f32.mxu1 %v5279_v31  ;;  %2600 = vmatmul.mubr.f32.gmra.mrb[26].mxu0 %v5280_v34  ;;  %v1023_v31 = vld [vmem:[%s5738_s28 + $0xdf0] sm:$0xff]  ;;  %v1070_v57 = vld [vmem:[%s5738_s28 + $0xf68] sm:$0xff]  ;;  %v1088_v7 = vld [vmem:[%s5738_s28 + $0xff8] sm:$0xff] }
 0x1e3   : > { %4567 = vmatpush1.bf16.msra.mxu0 %v4566_v21  ;;  %3052 = vmatmul.mubr.f32.gmra.mrb[26].mxu1 %v5280_v34  ;;  %v1022_v21 = vld [vmem:[%s5738_s28 + $0xde8] sm:$0xff]  ;;  %v1032_v34 = vld [vmem:[%s5738_s28 + $0xe38] sm:$0xff] }
 0x1e4   : > { %4823 = vmatpush1.bf16.msra.mxu1 %v4822_v22  ;;  %4569 = vmatprep.subr.bf16.mxu0 %v4568_v23  ;;  %v1016_v22 = vld [vmem:[%s5738_s28 + $0xdb8] sm:$0xff]  ;;  %v4588_v26 = vpack.c.bf16 %v1022_v21, %v1014_v20  ;;  %v1078_v4 = vld [vmem:[%s5738_s28 + $0xfa8] sm:$0xff] }
 0x1e5   : > { %4825 = vmatprep.subr.bf16.mxu1 %v4824_v27  ;;  %2605 = vmatprep.mubr.f32.mxu0 %v5281_v45  ;;  %v1024_v23 = vld [vmem:[%s5738_s28 + $0xdf8] sm:$0xff]  ;;  %v1013_v27 = vld [vmem:[%s5738_s28 + $0xda0] sm:$0xff]  ;;  %v1102_v17 = vld [vmem:[%s5738_s28 + $0x1068] sm:$0xff] }
 0x1e6   : > { %3057 = vmatprep.mubr.f32.mxu1 %v5281_v45  ;;  %2606 = vmatmul.mubr.f32.gmra.mrb[28].mxu0 %v5282_v48  ;;  %v4844_v30 = vpack.c.bf16 %v1024_v23, %v1016_v22  ;;  %v1054_v45 = vld [vmem:[%s5738_s28 + $0xee8] sm:$0xff]  ;;  %v4608_v22 = vpack.c.bf16 %v1102_v17, %v1094_v16  ;;  %v1093_v23 = vld [vmem:[%s5738_s28 + $0x1020] sm:$0xff]  ;;  %v1167_v16 = vld [vmem:[%s5738_s28 + $0x1270] sm:$0xff] }
 0x1e7   : > { %4571 = vmatpush1.bf16.msra.mxu0 %v4570_v35  ;;  %3058 = vmatmul.mubr.f32.gmra.mrb[28].mxu1 %v5282_v48  ;;  %v1040_v35 = vld [vmem:[%s5738_s28 + $0xe78] sm:$0xff]  ;;  %v4594_v48 = vpack.c.bf16 %v1037_v40, %v1029_v39  ;;  %v1119_v39 = vld [vmem:[%s5738_s28 + $0x10f0] sm:$0xff]  ;;  %v1126_v40 = vld [vmem:[%s5738_s28 + $0x1128] sm:$0xff] }
 0x1e8   : > { %4827 = vmatpush1.bf16.msra.mxu1 %v4826_v36  ;;  %4573 = vmatprep.subr.bf16.mxu0 %v4572_v37  ;;  %v4590_v36 = vpack.c.bf16 %v1021_v28, %v1013_v27  ;;  %v4846_v37 = vpack.c.bf16 %v1023_v31, %v1015_v29  ;;  %v4848_v42 = vpack.c.bf16 %v1040_v35, %v1032_v34  ;;  %v1103_v27 = vld [vmem:[%s5738_s28 + $0x1070] sm:$0xff]  ;;  %v1110_v28 = vld [vmem:[%s5738_s28 + $0x10a8] sm:$0xff]  ;;  %v1120_v31 = vld [vmem:[%s5738_s28 + $0x10f8] sm:$0xff] }
 0x1e9   : > { %4829 = vmatprep.subr.bf16.mxu1 %v4828_v41  ;;  %2611 = vmatprep.mubr.f32.mxu0 %v5283_v59  ;;  %v1031_v41 = vld [vmem:[%s5738_s28 + $0xe30] sm:$0xff]  ;;  %v1118_v29 = vld [vmem:[%s5738_s28 + $0x10e8] sm:$0xff]  ;;  %v1109_v35 = vld [vmem:[%s5738_s28 + $0x10a0] sm:$0xff] }
 0x1ea   : > { %3063 = vmatprep.mubr.f32.mxu1 %v5283_v59  ;;  %2612 = vmatmul.mubr.f32.gmra.mrb[30].mxu0 %v5284_v62  ;;  %v1072_v59 = vld [vmem:[%s5738_s28 + $0xf78] sm:$0xff]  ;;  %v4612_v34 = vpack.c.bf16 %v1118_v29, %v1110_v28  ;;  %v1174_v17 = vld [vmem:[%s5738_s28 + $0x12a8] sm:$0xff]  ;;  %v1175_v28 = vld [vmem:[%s5738_s28 + $0x12b0] sm:$0xff] }
 0x1eb   : > { %4575 = vmatpush1.bf16.msra.mxu0 %v4574_v49  ;;  %3064 = vmatmul.mubr.f32.gmra.mrb[30].mxu1 %v5284_v62  ;;  %v4850_v49 = vpack.c.bf16 %v1039_v43, %v1031_v41  ;;  %v4600_v62 = vpack.c.bf16 %v1070_v57, %v1062_v56  ;;  %v4856_v2 = vpack.c.bf16 %v1072_v59, %v1064_v58  ;;  %v1134_v41 = vld [vmem:[%s5738_s28 + $0x1168] sm:$0xff]  ;;  %v1128_v43 = vld [vmem:[%s5738_s28 + $0x1138] sm:$0xff]  ;;  %v5288_v58 = vld [vmem:[%s5736_s8 + $0x50] sm:$0xff] }
 0x1ec   : > { %4831 = vmatpush1.bf16.msra.mxu1 %v4830_v50  ;;  %4577 = vmatprep.subr.bf16.mxu0 %v4576_v51  ;;  %v4596_v50 = vpack.c.bf16 %v1054_v45, %v1046_v44  ;;  %v1045_v51 = vld [vmem:[%s5738_s28 + $0xea0] sm:$0xff]  ;;  %v1136_v44 = vld [vmem:[%s5738_s28 + $0x1178] sm:$0xff]  ;;  %v4616_v47 = vpack.c.bf16 %v1134_v41, %v1126_v40 }
 0x1ed   : > { %4833 = vmatprep.subr.bf16.mxu1 %v4832_v55  ;;  %2682 = vmatprep.mubr.f32.mxu0 %v5285_v9  ;;  %v1055_v55 = vld [vmem:[%s5738_s28 + $0xef0] sm:$0xff]  ;;  %v4598_v60 = vpack.c.bf16 %v1053_v52, %v1045_v51  ;;  %v4872_v51 = vpack.c.bf16 %v1136_v44, %v1128_v43  ;;  %v1144_v56 = vld [vmem:[%s5738_s28 + $0x11b8] sm:$0xff]  ;;  %v1189_v40 = vld [vmem:[%s5738_s28 + $0x1320] sm:$0xff] }
 0x1ee   : > { %3134 = vmatprep.mubr.f32.mxu1 %v5285_v9  ;;  %v4854_v61 = vpack.c.bf16 %v1055_v55, %v1047_v53  ;;  %v1135_v52 = vld [vmem:[%s5738_s28 + $0x1170] sm:$0xff]  ;;  %v1142_v53 = vld [vmem:[%s5738_s28 + $0x11a8] sm:$0xff]  ;;  %v5287_v55 = vld [vmem:[%s5736_s8 + $0x58] sm:$0xff] }
 0x1ef   : > { %4579 = vmatpush1.bf16.msra.mxu0 %v4578_v63  ;;  %v1061_v63 = vld [vmem:[%s5738_s28 + $0xf20] sm:$0xff]  ;;  %v1152_v57 = vld [vmem:[%s5738_s28 + $0x11f8] sm:$0xff]  ;;  %v1199_v44 = vld [vmem:[%s5738_s28 + $0x1370] sm:$0xff] }
 0x1f0   : > { %4835 = vmatpush1.bf16.msra.mxu1 %v4834_v0  ;;  %4581 = vmatprep.subr.bf16.mxu0 %v4580_v1  ;;  %v1069_v0 = vld [vmem:[%s5738_s28 + $0xf60] sm:$0xff]  ;;  %v1063_v1 = vld [vmem:[%s5738_s28 + $0xf30] sm:$0xff] }
 0x1f1   : > { %4837 = vmatprep.subr.bf16.mxu1 %v4836_v5  ;;  %v1086_v5 = vld [vmem:[%s5738_s28 + $0xfe8] sm:$0xff]  ;;  %v4602_v8 = vpack.c.bf16 %v1069_v0, %v1061_v63  ;;  %v4858_v9 = vpack.c.bf16 %v1071_v3, %v1063_v1  ;;  %v1149_v63 = vld [vmem:[%s5738_s28 + $0x11e0] sm:$0xff]  ;;  %v1143_v0 = vld [vmem:[%s5738_s28 + $0x11b0] sm:$0xff]  ;;  %v4876_v1 = vpack.c.bf16 %v1152_v57, %v1144_v56 }
 0x1f2   : > { %v4604_v10 = vpack.c.bf16 %v1086_v5, %v1078_v4  ;;  %v1158_v3 = vld [vmem:[%s5738_s28 + $0x1228] sm:$0xff]  ;;  %v5289_v5 = vld [vmem:[%s5736_s8 + $0x98] sm:$0xff]  ;;  %v1197_v41 = vld [vmem:[%s5738_s28 + $0x1360] sm:$0xff] }
 0x1f3   : > { %4583 = vmatpush1.bf16.msra.mxu0 %v4582_v12  ;;  %v1085_v12 = vld [vmem:[%s5738_s28 + $0xfe0] sm:$0xff]  ;;  %v1166_v4 = vld [vmem:[%s5738_s28 + $0x1268] sm:$0xff]  ;;  %v1207_v56 = vld [vmem:[%s5738_s28 + $0x13b0] sm:$0xff] }
 0x1f4   : > { %4839 = vmatpush1.bf16.msra.mxu1 %v4838_v13  ;;  %4585 = vmatprep.subr.bf16.mxu0 %v4584_v14  ;;  %v1079_v13 = vld [vmem:[%s5738_s28 + $0xfb0] sm:$0xff]  ;;  %v4860_v14 = vpack.c.bf16 %v1088_v7, %v1080_v6  ;;  %v4606_v20 = vpack.c.bf16 %v1085_v12, %v1077_v11  ;;  %v1160_v6 = vld [vmem:[%s5738_s28 + $0x1238] sm:$0xff]  ;;  %v4624_v11 = vpack.c.bf16 %v1166_v4, %v1158_v3  ;;  %v1157_v12 = vld [vmem:[%s5738_s28 + $0x1220] sm:$0xff] }
 0x1f5   : > { %4841 = vmatprep.subr.bf16.mxu1 %v4840_v18  ;;  %v1096_v18 = vld [vmem:[%s5738_s28 + $0x1038] sm:$0xff]  ;;  %v4862_v21 = vpack.c.bf16 %v1087_v15, %v1079_v13  ;;  %v1165_v13 = vld [vmem:[%s5738_s28 + $0x1260] sm:$0xff] }
 0x1f6   : > { %v1168_v7 = vld [vmem:[%s5738_s28 + $0x1278] sm:$0xff]  ;;  %v1221_v4 = vld [vmem:[%s5738_s28 + $0x1420] sm:$0xff] }
 0x1f7   : > { %4587 = vmatpush1.bf16.msra.mxu0 %v4586_v24  ;;  %v1101_v24 = vld [vmem:[%s5738_s28 + $0x1060] sm:$0xff]  ;;  %v4880_v15 = vpack.c.bf16 %v1168_v7, %v1160_v6  ;;  %v1223_v6 = vld [vmem:[%s5738_s28 + $0x1430] sm:$0xff] }
 0x1f8   : > { %4843 = vmatpush1.bf16.msra.mxu1 %v4842_v25  ;;  %4589 = vmatprep.subr.bf16.mxu0 %v4588_v26  ;;  %v1095_v25 = vld [vmem:[%s5738_s28 + $0x1030] sm:$0xff]  ;;  %v4864_v26 = vpack.c.bf16 %v1104_v19, %v1096_v18  ;;  %v4610_v32 = vpack.c.bf16 %v1101_v24, %v1093_v23  ;;  %v1182_v18 = vld [vmem:[%s5738_s28 + $0x12e8] sm:$0xff]  ;;  %v5291_v19 = vld [vmem:[%s5736_s8 + $0xd8] sm:$0xff]  ;;  %v4626_v23 = vpack.c.bf16 %v1165_v13, %v1157_v12 }
 0x1f9   : > { %4845 = vmatprep.subr.bf16.mxu1 %v4844_v30  ;;  %v1112_v30 = vld [vmem:[%s5738_s28 + $0x10b8] sm:$0xff]  ;;  %v4866_v33 = vpack.c.bf16 %v1103_v27, %v1095_v25  ;;  %v4628_v25 = vpack.c.bf16 %v1182_v18, %v1174_v17  ;;  %v1181_v27 = vld [vmem:[%s5738_s28 + $0x12e0] sm:$0xff] }
 0x1fa   : > { %v1240_v12 = vld [vmem:[%s5738_s28 + $0x14b8] sm:$0xff]  ;;  %v1237_v18 = vld [vmem:[%s5738_s28 + $0x14a0] sm:$0xff] }
 0x1fb   : > { %4591 = vmatpush1.bf16.msra.mxu0 %v4590_v36  ;;  %v1117_v36 = vld [vmem:[%s5738_s28 + $0x10e0] sm:$0xff]  ;;  %v1248_v13 = vld [vmem:[%s5738_s28 + $0x14f8] sm:$0xff] }
 0x1fc   : > { %4847 = vmatpush1.bf16.msra.mxu1 %v4846_v37  ;;  %4593 = vmatprep.subr.bf16.mxu0 %v4592_v38  ;;  %v1111_v37 = vld [vmem:[%s5738_s28 + $0x10b0] sm:$0xff]  ;;  %v4868_v38 = vpack.c.bf16 %v1120_v31, %v1112_v30  ;;  %v4614_v45 = vpack.c.bf16 %v1117_v36, %v1109_v35  ;;  %v1190_v31 = vld [vmem:[%s5738_s28 + $0x1328] sm:$0xff]  ;;  %v1200_v35 = vld [vmem:[%s5738_s28 + $0x1378] sm:$0xff] }
 0x1fd   : > { %4849 = vmatprep.subr.bf16.mxu1 %v4848_v42  ;;  %v5286_v42 = vld [vmem:[%s5736_s8 + $0x10] sm:$0xff]  ;;  %v4870_v46 = vpack.c.bf16 %v1119_v39, %v1111_v37 }
 0x1fe   : > { %v1183_v30 = vld [vmem:[%s5738_s28 + $0x12f0] sm:$0xff] }
 0x1ff   : > { %4595 = vmatpush1.bf16.msra.mxu0 %v4594_v48  ;;  %v1125_v48 = vld [vmem:[%s5738_s28 + $0x1120] sm:$0xff]  ;;  %v5294_v36 = vld [vmem:[%s5736_s8 + $0x110] sm:$0xff] }
 0x200   : > { %4851 = vmatpush1.bf16.msra.mxu1 %v4850_v49  ;;  %4597 = vmatprep.subr.bf16.mxu0 %v4596_v50  ;;  %v1133_v49 = vld [vmem:[%s5738_s28 + $0x1160] sm:$0xff]  ;;  %v1127_v50 = vld [vmem:[%s5738_s28 + $0x1130] sm:$0xff] }
 0x201   : > { %4853 = vmatprep.subr.bf16.mxu1 %v4852_v54  ;;  %v1150_v54 = vld [vmem:[%s5738_s28 + $0x11e8] sm:$0xff]  ;;  %v4618_v59 = vpack.c.bf16 %v1133_v49, %v1125_v48  ;;  %v1208_v48 = vld [vmem:[%s5738_s28 + $0x13b8] sm:$0xff] }
 0x202   : > { %v1216_v49 = vld [vmem:[%s5738_s28 + $0x13f8] sm:$0xff] }
 0x203   : > { %4599 = vmatpush1.bf16.msra.mxu0 %v4598_v60  ;;  %v4874_v60 = vpack.c.bf16 %v1135_v52, %v1127_v50  ;;  %v5296_v50 = vld [vmem:[%s5736_s8 + $0x150] sm:$0xff]  ;;  %v4892_v57 = vpack.c.bf16 %v1216_v49, %v1208_v48  ;;  %v1286_v48 = vld [vmem:[%s5738_s28 + $0x1628] sm:$0xff] }
 0x204   : > { %4855 = vmatpush1.bf16.msra.mxu1 %v4854_v61  ;;  %4601 = vmatprep.subr.bf16.mxu0 %v4600_v62  ;;  %v4620_v61 = vpack.c.bf16 %v1150_v54, %v1142_v53  ;;  %v1141_v62 = vld [vmem:[%s5738_s28 + $0x11a0] sm:$0xff]  ;;  %v1294_v49 = vld [vmem:[%s5738_s28 + $0x1668] sm:$0xff] }
 0x205   : > { %4857 = vmatprep.subr.bf16.mxu1 %v4856_v2  ;;  %v1151_v2 = vld [vmem:[%s5738_s28 + $0x11f0] sm:$0xff]  ;;  %v1205_v54 = vld [vmem:[%s5738_s28 + $0x13a0] sm:$0xff] }
 0x207   : > { %4603 = vmatpush1.bf16.msra.mxu0 %v4602_v8  ;;  %v5290_v8 = vld [vmem:[%s5736_s8 + $0x90] sm:$0xff] }
 0x208   : > { %4859 = vmatpush1.bf16.msra.mxu1 %v4858_v9  ;;  %4605 = vmatprep.subr.bf16.mxu0 %v4604_v10  ;;  %v4622_v9 = vpack.c.bf16 %v1149_v63, %v1141_v62  ;;  %v4878_v10 = vpack.c.bf16 %v1151_v2, %v1143_v0  ;;  %v1224_v62 = vld [vmem:[%s5738_s28 + $0x1438] sm:$0xff]  ;;  %v5298_v0 = vld [vmem:[%s5736_s8 + $0x190] sm:$0xff] }
 0x209   : > { %4861 = vmatprep.subr.bf16.mxu1 %v4860_v14  ;;  %v1159_v14 = vld [vmem:[%s5738_s28 + $0x1230] sm:$0xff]  ;;  %v1232_v63 = vld [vmem:[%s5738_s28 + $0x1478] sm:$0xff] }
 0x20a   : > { %v4882_v24 = vpack.c.bf16 %v1167_v16, %v1159_v14  ;;  %v4896_v7 = vpack.c.bf16 %v1232_v63, %v1224_v62  ;;  %v5300_v14 = vld [vmem:[%s5736_s8 + $0x1d0] sm:$0xff]  ;;  %v1304_v62 = vld [vmem:[%s5738_s28 + $0x16b8] sm:$0xff] }
 0x20b   : > { %4607 = vmatpush1.bf16.msra.mxu0 %v4606_v20  ;;  %v1176_v20 = vld [vmem:[%s5738_s28 + $0x12b8] sm:$0xff] }
 0x20c   : > { %4863 = vmatpush1.bf16.msra.mxu1 %v4862_v21  ;;  %4609 = vmatprep.subr.bf16.mxu0 %v4608_v22  ;;  %v1184_v21 = vld [vmem:[%s5738_s28 + $0x12f8] sm:$0xff]  ;;  %v5292_v22 = vld [vmem:[%s5736_s8 + $0xd0] sm:$0xff] }
 0x20d   : > { %4865 = vmatprep.subr.bf16.mxu1 %v4864_v26  ;;  %v1173_v26 = vld [vmem:[%s5738_s28 + $0x12a0] sm:$0xff]  ;;  %v4884_v29 = vpack.c.bf16 %v1184_v21, %v1176_v20  ;;  %v1239_v20 = vld [vmem:[%s5738_s28 + $0x14b0] sm:$0xff]  ;;  %v4900_v21 = vpack.c.bf16 %v1248_v13, %v1240_v12  ;;  %v1312_v63 = vld [vmem:[%s5738_s28 + $0x16f8] sm:$0xff] }
 0x20e   : > { %2683 = vmatmul.mubr.f32.vlgmr.msra.gmra.mrb[16].mxu0 %v5286_v42  ;;  %v4630_v37 = vpack.c.bf16 %v1181_v27, %v1173_v26  ;;  %v1256_v26 = vld [vmem:[%s5738_s28 + $0x1538] sm:$0xff] }
 0x20f   : > { %4611 = vmatpush1.bf16.msra.mxu0 %v4610_v32  ;;  %3135 = vmatmul.mubr.f32.vlgmr.msra.gmra.mrb[16].mxu1 %v5286_v42  ;;  %v1198_v32 = vld [vmem:[%s5738_s28 + $0x1368] sm:$0xff]  ;;  %v1191_v42 = vld [vmem:[%s5738_s28 + $0x1330] sm:$0xff]  ;;  %v1264_v27 = vld [vmem:[%s5738_s28 + $0x1578] sm:$0xff] }
 0x210   : > { %4867 = vmatpush1.bf16.msra.mxu1 %v4866_v33  ;;  %4613 = vmatprep.subr.bf16.mxu0 %v4612_v34  ;;  %v5293_v33 = vld [vmem:[%s5736_s8 + $0x118] sm:$0xff]  ;;  %v4632_v39 = vpack.c.bf16 %v1198_v32, %v1190_v31  ;;  %v4890_v52 = vpack.c.bf16 %v1199_v44, %v1191_v42  ;;  %v1253_v31 = vld [vmem:[%s5738_s28 + $0x1520] sm:$0xff] }
 0x211   : > { %4869 = vmatprep.subr.bf16.mxu1 %v4868_v38  ;;  %2688 = vmatprep.mubr.f32.mxu0 %v5287_v55  ;;  %v1192_v34 = vld [vmem:[%s5738_s28 + $0x1338] sm:$0xff]  ;;  %v4886_v38 = vpack.c.bf16 %v1183_v30, %v1175_v28  ;;  %v1261_v32 = vld [vmem:[%s5738_s28 + $0x1560] sm:$0xff] }
 0x212   : > { %3140 = vmatprep.mubr.f32.mxu1 %v5287_v55  ;;  %2689 = vmatmul.mubr.f32.gmra.mrb[18].mxu0 %v5288_v58  ;;  %v4888_v43 = vpack.c.bf16 %v1200_v35, %v1192_v34  ;;  %v1213_v55 = vld [vmem:[%s5738_s28 + $0x13e0] sm:$0xff]  ;;  %v4904_v34 = vpack.c.bf16 %v1264_v27, %v1256_v26  ;;  %v1263_v35 = vld [vmem:[%s5738_s28 + $0x1570] sm:$0xff] }
 0x213   : > { %4615 = vmatpush1.bf16.msra.mxu0 %v4614_v45  ;;  %3141 = vmatmul.mubr.f32.gmra.mrb[18].mxu1 %v5288_v58  ;;  %v1206_v45 = vld [vmem:[%s5738_s28 + $0x13a8] sm:$0xff]  ;;  %v1215_v58 = vld [vmem:[%s5738_s28 + $0x13f0] sm:$0xff]  ;;  %v1277_v44 = vld [vmem:[%s5738_s28 + $0x15e0] sm:$0xff] }
 0x214   : > { %4871 = vmatpush1.bf16.msra.mxu1 %v4870_v46  ;;  %4617 = vmatprep.subr.bf16.mxu0 %v4616_v47  ;;  %v1214_v46 = vld [vmem:[%s5738_s28 + $0x13e8] sm:$0xff]  ;;  %v5295_v47 = vld [vmem:[%s5736_s8 + $0x158] sm:$0xff]  ;;  %v4894_v2 = vpack.c.bf16 %v1215_v58, %v1207_v56  ;;  %v1293_v56 = vld [vmem:[%s5738_s28 + $0x1660] sm:$0xff] }
 0x215   : > { %4873 = vmatprep.subr.bf16.mxu1 %v4872_v51  ;;  %2694 = vmatprep.mubr.f32.mxu0 %v5289_v5  ;;  %v4634_v51 = vpack.c.bf16 %v1197_v41, %v1189_v40  ;;  %v4636_v53 = vpack.c.bf16 %v1214_v46, %v1206_v45  ;;  %v4650_v40 = vpack.c.bf16 %v1261_v32, %v1253_v31  ;;  %v1271_v45 = vld [vmem:[%s5738_s28 + $0x15b0] sm:$0xff]  ;;  %v1333_v27 = vld [vmem:[%s5738_s28 + $0x17a0] sm:$0xff]  ;;  %v1350_v32 = vld [vmem:[%s5738_s28 + $0x1828] sm:$0xff] }
 0x216   : > { %3146 = vmatprep.mubr.f32.mxu1 %v5289_v5  ;;  %2695 = vmatmul.mubr.f32.gmra.mrb[20].mxu0 %v5290_v8  ;;  %v1229_v5 = vld [vmem:[%s5738_s28 + $0x1460] sm:$0xff]  ;;  %v1343_v31 = vld [vmem:[%s5738_s28 + $0x17f0] sm:$0xff] }
 0x217   : > { %4619 = vmatpush1.bf16.msra.mxu0 %v4618_v59  ;;  %3147 = vmatmul.mubr.f32.gmra.mrb[20].mxu1 %v5290_v8  ;;  %v1222_v59 = vld [vmem:[%s5738_s28 + $0x1428] sm:$0xff]  ;;  %v1231_v8 = vld [vmem:[%s5738_s28 + $0x1470] sm:$0xff] }
 0x218   : > { %4875 = vmatpush1.bf16.msra.mxu1 %v4874_v60  ;;  %4621 = vmatprep.subr.bf16.mxu0 %v4620_v61  ;;  %v1230_v60 = vld [vmem:[%s5738_s28 + $0x1468] sm:$0xff]  ;;  %v5297_v61 = vld [vmem:[%s5736_s8 + $0x198] sm:$0xff]  ;;  %v4898_v16 = vpack.c.bf16 %v1231_v8, %v1223_v6  ;;  %v4916_v6 = vpack.c.bf16 %v1312_v63, %v1304_v62 }
 0x219   : > { %4877 = vmatprep.subr.bf16.mxu1 %v4876_v1  ;;  %2700 = vmatprep.mubr.f32.mxu0 %v5291_v19  ;;  %v4638_v1 = vpack.c.bf16 %v1213_v55, %v1205_v54  ;;  %v4640_v3 = vpack.c.bf16 %v1230_v60, %v1222_v59  ;;  %v4656_v54 = vpack.c.bf16 %v1294_v49, %v1286_v48  ;;  %v1285_v55 = vld [vmem:[%s5738_s28 + $0x1620] sm:$0xff]  ;;  %v1295_v59 = vld [vmem:[%s5738_s28 + $0x1670] sm:$0xff]  ;;  %v1302_v60 = vld [vmem:[%s5738_s28 + $0x16a8] sm:$0xff] }
 0x21a   : > { %3152 = vmatprep.mubr.f32.mxu1 %v5291_v19  ;;  %2701 = vmatmul.mubr.f32.gmra.mrb[22].mxu0 %v5292_v22  ;;  %v1245_v19 = vld [vmem:[%s5738_s28 + $0x14e0] sm:$0xff]  ;;  %v1318_v8 = vld [vmem:[%s5738_s28 + $0x1728] sm:$0xff] }
 0x21b   : > { %4623 = vmatpush1.bf16.msra.mxu0 %v4622_v9  ;;  %3153 = vmatmul.mubr.f32.gmra.mrb[22].mxu1 %v5292_v22  ;;  %v1238_v9 = vld [vmem:[%s5738_s28 + $0x14a8] sm:$0xff]  ;;  %v1247_v22 = vld [vmem:[%s5738_s28 + $0x14f0] sm:$0xff]  ;;  %v4646_v28 = vpack.c.bf16 %v1245_v19, %v1237_v18 }
 0x21c   : > { %4879 = vmatpush1.bf16.msra.mxu1 %v4878_v10  ;;  %4625 = vmatprep.subr.bf16.mxu0 %v4624_v11  ;;  %v1246_v10 = vld [vmem:[%s5738_s28 + $0x14e8] sm:$0xff]  ;;  %v5299_v11 = vld [vmem:[%s5736_s8 + $0x1d8] sm:$0xff]  ;;  %v1327_v19 = vld [vmem:[%s5738_s28 + $0x1770] sm:$0xff] }
 0x21d   : > { %4881 = vmatprep.subr.bf16.mxu1 %v4880_v15  ;;  %2706 = vmatprep.mubr.f32.mxu0 %v5293_v33  ;;  %v4642_v15 = vpack.c.bf16 %v1229_v5, %v1221_v4  ;;  %v4644_v17 = vpack.c.bf16 %v1246_v10, %v1238_v9  ;;  %v1309_v4 = vld [vmem:[%s5738_s28 + $0x16e0] sm:$0xff]  ;;  %v1303_v5 = vld [vmem:[%s5738_s28 + $0x16b0] sm:$0xff]  ;;  %v1326_v9 = vld [vmem:[%s5738_s28 + $0x1768] sm:$0xff] }
 0x21e   : > { %3158 = vmatprep.mubr.f32.mxu1 %v5293_v33  ;;  %2707 = vmatmul.mubr.f32.gmra.mrb[24].mxu0 %v5294_v36  ;;  %v1255_v33 = vld [vmem:[%s5738_s28 + $0x1530] sm:$0xff]  ;;  %v1320_v10 = vld [vmem:[%s5738_s28 + $0x1738] sm:$0xff] }
 0x21f   : > { %4627 = vmatpush1.bf16.msra.mxu0 %v4626_v23  ;;  %3159 = vmatmul.mubr.f32.gmra.mrb[24].mxu1 %v5294_v36  ;;  %v1254_v23 = vld [vmem:[%s5738_s28 + $0x1528] sm:$0xff]  ;;  %v4906_v41 = vpack.c.bf16 %v1263_v35, %v1255_v33  ;;  %v1360_v35 = vld [vmem:[%s5738_s28 + $0x1878] sm:$0xff] }
 0x220   : > { %4883 = vmatpush1.bf16.msra.mxu1 %v4882_v24  ;;  %4629 = vmatprep.subr.bf16.mxu0 %v4628_v25  ;;  %v1262_v24 = vld [vmem:[%s5738_s28 + $0x1568] sm:$0xff] }
 0x221   : > { %4885 = vmatprep.subr.bf16.mxu1 %v4884_v29  ;;  %2712 = vmatprep.mubr.f32.mxu0 %v5295_v47  ;;  %v5301_v25 = vld [vmem:[%s5736_s8 + $0x28] sm:$0xff]  ;;  %v4902_v29 = vpack.c.bf16 %v1247_v22, %v1239_v20  ;;  %v4648_v30 = vpack.c.bf16 %v1262_v24, %v1254_v23  ;;  %v1336_v22 = vld [vmem:[%s5738_s28 + $0x17b8] sm:$0xff] }
 0x222   : > { %3164 = vmatprep.mubr.f32.mxu1 %v5295_v47  ;;  %2713 = vmatmul.mubr.f32.gmra.mrb[26].mxu0 %v5296_v50  ;;  %v1270_v36 = vld [vmem:[%s5738_s28 + $0x15a8] sm:$0xff]  ;;  %v1279_v47 = vld [vmem:[%s5738_s28 + $0x15f0] sm:$0xff]  ;;  %v1344_v23 = vld [vmem:[%s5738_s28 + $0x17f8] sm:$0xff] }
 0x223   : > { %4631 = vmatpush1.bf16.msra.mxu0 %v4630_v37  ;;  %3165 = vmatmul.mubr.f32.gmra.mrb[26].mxu1 %v5296_v50  ;;  %v1278_v37 = vld [vmem:[%s5738_s28 + $0x15e8] sm:$0xff]  ;;  %v1288_v50 = vld [vmem:[%s5738_s28 + $0x1638] sm:$0xff] }
 0x224   : > { %4887 = vmatpush1.bf16.msra.mxu1 %v4886_v38  ;;  %4633 = vmatprep.subr.bf16.mxu0 %v4632_v39  ;;  %v1272_v38 = vld [vmem:[%s5738_s28 + $0x15b8] sm:$0xff]  ;;  %v4652_v42 = vpack.c.bf16 %v1278_v37, %v1270_v36  ;;  %v1334_v20 = vld [vmem:[%s5738_s28 + $0x17a8] sm:$0xff] }
 0x225   : > { %4889 = vmatprep.subr.bf16.mxu1 %v4888_v43  ;;  %2718 = vmatprep.mubr.f32.mxu0 %v5297_v61  ;;  %v1280_v39 = vld [vmem:[%s5738_s28 + $0x15f8] sm:$0xff]  ;;  %v1269_v43 = vld [vmem:[%s5738_s28 + $0x15a0] sm:$0xff]  ;;  %v1358_v33 = vld [vmem:[%s5738_s28 + $0x1868] sm:$0xff] }
 0x226   : > { %3170 = vmatprep.mubr.f32.mxu1 %v5297_v61  ;;  %2719 = vmatmul.mubr.f32.gmra.mrb[28].mxu0 %v5298_v0  ;;  %v4908_v46 = vpack.c.bf16 %v1280_v39, %v1272_v38  ;;  %v1310_v61 = vld [vmem:[%s5738_s28 + $0x16e8] sm:$0xff]  ;;  %v4672_v38 = vpack.c.bf16 %v1358_v33, %v1350_v32  ;;  %v1349_v39 = vld [vmem:[%s5738_s28 + $0x1820] sm:$0xff]  ;;  %v1423_v32 = vld [vmem:[%s5738_s28 + $0x1a70] sm:$0xff] }
 0x227   : > { %4635 = vmatpush1.bf16.msra.mxu0 %v4634_v51  ;;  %3171 = vmatmul.mubr.f32.gmra.mrb[28].mxu1 %v5298_v0  ;;  %v1296_v51 = vld [vmem:[%s5738_s28 + $0x1678] sm:$0xff]  ;;  %v4658_v0 = vpack.c.bf16 %v1293_v56, %v1285_v55  ;;  %v1375_v55 = vld [vmem:[%s5738_s28 + $0x18f0] sm:$0xff]  ;;  %v1382_v56 = vld [vmem:[%s5738_s28 + $0x1928] sm:$0xff] }
 0x228   : > { %4891 = vmatpush1.bf16.msra.mxu1 %v4890_v52  ;;  %4637 = vmatprep.subr.bf16.mxu0 %v4636_v53  ;;  %v4654_v52 = vpack.c.bf16 %v1277_v44, %v1269_v43  ;;  %v4910_v53 = vpack.c.bf16 %v1279_v47, %v1271_v45  ;;  %v4912_v58 = vpack.c.bf16 %v1296_v51, %v1288_v50  ;;  %v1359_v43 = vld [vmem:[%s5738_s28 + $0x1870] sm:$0xff]  ;;  %v1366_v44 = vld [vmem:[%s5738_s28 + $0x18a8] sm:$0xff]  ;;  %v1376_v47 = vld [vmem:[%s5738_s28 + $0x18f8] sm:$0xff] }
 0x229   : > { %4893 = vmatprep.subr.bf16.mxu1 %v4892_v57  ;;  %2724 = vmatprep.mubr.f32.mxu0 %v5299_v11  ;;  %v1287_v57 = vld [vmem:[%s5738_s28 + $0x1630] sm:$0xff]  ;;  %v1374_v45 = vld [vmem:[%s5738_s28 + $0x18e8] sm:$0xff]  ;;  %v1365_v51 = vld [vmem:[%s5738_s28 + $0x18a0] sm:$0xff] }
 0x22a   : > { %3176 = vmatprep.mubr.f32.mxu1 %v5299_v11  ;;  %2725 = vmatmul.mubr.f32.gmra.mrb[30].mxu0 %v5300_v14  ;;  %v1328_v11 = vld [vmem:[%s5738_s28 + $0x1778] sm:$0xff]  ;;  %v4676_v50 = vpack.c.bf16 %v1374_v45, %v1366_v44  ;;  %v1430_v33 = vld [vmem:[%s5738_s28 + $0x1aa8] sm:$0xff]  ;;  %v1431_v44 = vld [vmem:[%s5738_s28 + $0x1ab0] sm:$0xff] }
 0x22b   : > { %4639 = vmatpush1.bf16.msra.mxu0 %v4638_v1  ;;  %3177 = vmatmul.mubr.f32.gmra.mrb[30].mxu1 %v5300_v14  ;;  %v4914_v1 = vpack.c.bf16 %v1295_v59, %v1287_v57  ;;  %v4664_v14 = vpack.c.bf16 %v1326_v9, %v1318_v8  ;;  %v4920_v18 = vpack.c.bf16 %v1328_v11, %v1320_v10  ;;  %v1390_v57 = vld [vmem:[%s5738_s28 + $0x1968] sm:$0xff]  ;;  %v1384_v59 = vld [vmem:[%s5738_s28 + $0x1938] sm:$0xff]  ;;  %v5304_v10 = vld [vmem:[%s5736_s8 + $0x60] sm:$0xff] }
 0x22c   : > { %4895 = vmatpush1.bf16.msra.mxu1 %v4894_v2  ;;  %4641 = vmatprep.subr.bf16.mxu0 %v4640_v3  ;;  %v4660_v2 = vpack.c.bf16 %v1310_v61, %v1302_v60  ;;  %v1301_v3 = vld [vmem:[%s5738_s28 + $0x16a0] sm:$0xff]  ;;  %v1392_v60 = vld [vmem:[%s5738_s28 + $0x1978] sm:$0xff]  ;;  %v4680_v63 = vpack.c.bf16 %v1390_v57, %v1382_v56 }
 0x22d   : > { %4897 = vmatprep.subr.bf16.mxu1 %v4896_v7  ;;  %2795 = vmatprep.mubr.f32.mxu0 %v5301_v25  ;;  %v1311_v7 = vld [vmem:[%s5738_s28 + $0x16f0] sm:$0xff]  ;;  %v4662_v12 = vpack.c.bf16 %v1309_v4, %v1301_v3  ;;  %v4936_v3 = vpack.c.bf16 %v1392_v60, %v1384_v59  ;;  %v1400_v8 = vld [vmem:[%s5738_s28 + $0x19b8] sm:$0xff]  ;;  %v1445_v60 = vld [vmem:[%s5738_s28 + $0x1b20] sm:$0xff] }
 0x22e   : > { %3247 = vmatprep.mubr.f32.mxu1 %v5301_v25  ;;  %v4918_v13 = vpack.c.bf16 %v1311_v7, %v1303_v5  ;;  %v1391_v4 = vld [vmem:[%s5738_s28 + $0x1970] sm:$0xff]  ;;  %v1398_v5 = vld [vmem:[%s5738_s28 + $0x19a8] sm:$0xff]  ;;  %v1408_v9 = vld [vmem:[%s5738_s28 + $0x19f8] sm:$0xff] }
 0x22f   : > { %4643 = vmatpush1.bf16.msra.mxu0 %v4642_v15  ;;  %v1317_v15 = vld [vmem:[%s5738_s28 + $0x1720] sm:$0xff]  ;;  %v5303_v7 = vld [vmem:[%s5736_s8 + $0x68] sm:$0xff]  ;;  %v452_v56 = vld [vmem:[#allocation2 + $0x18] sm:$0xff] }
 0x230   : > { %4899 = vmatpush1.bf16.msra.mxu1 %v4898_v16  ;;  %4645 = vmatprep.subr.bf16.mxu0 %v4644_v17  ;;  %v1325_v16 = vld [vmem:[%s5738_s28 + $0x1760] sm:$0xff]  ;;  %v1319_v17 = vld [vmem:[%s5738_s28 + $0x1730] sm:$0xff] }
 0x231   : > { %4901 = vmatprep.subr.bf16.mxu1 %v4900_v21  ;;  %v1342_v21 = vld [vmem:[%s5738_s28 + $0x17e8] sm:$0xff]  ;;  %v4666_v24 = vpack.c.bf16 %v1325_v16, %v1317_v15  ;;  %v4922_v25 = vpack.c.bf16 %v1327_v19, %v1319_v17  ;;  %v1405_v15 = vld [vmem:[%s5738_s28 + $0x19e0] sm:$0xff]  ;;  %v1399_v16 = vld [vmem:[%s5738_s28 + $0x19b0] sm:$0xff]  ;;  %v4940_v17 = vpack.c.bf16 %v1408_v9, %v1400_v8 }
 0x232   : > { %v4668_v26 = vpack.c.bf16 %v1342_v21, %v1334_v20  ;;  %v1414_v19 = vld [vmem:[%s5738_s28 + $0x1a28] sm:$0xff]  ;;  %v457_v8 = vld [vmem:[#allocation2 + $0x40] sm:$0xff]  ;;  %v6883_v9 = vld [vmem:[%s5738_s28 + $0x1bb8] sm:$0xff] }
 0x233   : > { %4647 = vmatpush1.bf16.msra.mxu0 %v4646_v28  ;;  %v1341_v28 = vld [vmem:[%s5738_s28 + $0x17e0] sm:$0xff]  ;;  %v1422_v20 = vld [vmem:[%s5738_s28 + $0x1a68] sm:$0xff] }
 0x234   : > { %4903 = vmatpush1.bf16.msra.mxu1 %v4902_v29  ;;  %4649 = vmatprep.subr.bf16.mxu0 %v4648_v30  ;;  %v1335_v29 = vld [vmem:[%s5738_s28 + $0x17b0] sm:$0xff]  ;;  %v4924_v30 = vpack.c.bf16 %v1344_v23, %v1336_v22  ;;  %v4670_v36 = vpack.c.bf16 %v1341_v28, %v1333_v27  ;;  %v5305_v21 = vld [vmem:[%s5736_s8 + $0xa8] sm:$0xff]  ;;  %v1416_v22 = vld [vmem:[%s5738_s28 + $0x1a38] sm:$0xff]  ;;  %v4688_v27 = vpack.c.bf16 %v1422_v20, %v1414_v19 }
 0x235   : > { %4905 = vmatprep.subr.bf16.mxu1 %v4904_v34  ;;  %v1352_v34 = vld [vmem:[%s5738_s28 + $0x1838] sm:$0xff]  ;;  %v4926_v37 = vpack.c.bf16 %v1343_v31, %v1335_v29  ;;  %v1413_v28 = vld [vmem:[%s5738_s28 + $0x1a20] sm:$0xff] }
 0x236   : > { %v1424_v23 = vld [vmem:[%s5738_s28 + $0x1a78] sm:$0xff]  ;;  %v1421_v29 = vld [vmem:[%s5738_s28 + $0x1a60] sm:$0xff] }
 0x237   : > { %4651 = vmatpush1.bf16.msra.mxu0 %v4650_v40  ;;  %v1357_v40 = vld [vmem:[%s5738_s28 + $0x1860] sm:$0xff]  ;;  %v4944_v31 = vpack.c.bf16 %v1424_v23, %v1416_v22 }
 0x238   : > { %4907 = vmatpush1.bf16.msra.mxu1 %v4906_v41  ;;  %4653 = vmatprep.subr.bf16.mxu0 %v4652_v42  ;;  %v1351_v41 = vld [vmem:[%s5738_s28 + $0x1830] sm:$0xff]  ;;  %v4928_v42 = vpack.c.bf16 %v1360_v35, %v1352_v34  ;;  %v4674_v48 = vpack.c.bf16 %v1357_v40, %v1349_v39  ;;  %v1438_v34 = vld [vmem:[%s5738_s28 + $0x1ae8] sm:$0xff]  ;;  %v4690_v39 = vpack.c.bf16 %v1421_v29, %v1413_v28  ;;  %v6893_v22 = vld [vmem:[%s5738_s28 + $0x1ba0] sm:$0xff] }
 0x239   : > { %4909 = vmatprep.subr.bf16.mxu1 %v4908_v46  ;;  %v1368_v46 = vld [vmem:[%s5738_s28 + $0x18b8] sm:$0xff]  ;;  %v4930_v49 = vpack.c.bf16 %v1359_v43, %v1351_v41  ;;  %v5307_v35 = vld [vmem:[%s5736_s8 + $0xe8] sm:$0xff]  ;;  %v4692_v41 = vpack.c.bf16 %v1438_v34, %v1430_v33  ;;  %v1437_v43 = vld [vmem:[%s5738_s28 + $0x1ae0] sm:$0xff] }
 0x23a   : > { %v6896_v23 = vld [vmem:[%s5738_s28 + $0x1be0] sm:$0xff]  ;;  %v6907_v28 = vld [vmem:[%s5738_s28 + $0x1c28] sm:$0xff] }
 0x23b   : > { %4655 = vmatpush1.bf16.msra.mxu0 %v4654_v52  ;;  %v1373_v52 = vld [vmem:[%s5738_s28 + $0x18e0] sm:$0xff]  ;;  %v6910_v29 = vld [vmem:[%s5738_s28 + $0x1c68] sm:$0xff] }
 0x23c   : > { %4911 = vmatpush1.bf16.msra.mxu1 %v4910_v53  ;;  %4657 = vmatprep.subr.bf16.mxu0 %v4656_v54  ;;  %v1367_v53 = vld [vmem:[%s5738_s28 + $0x18b0] sm:$0xff]  ;;  %v4932_v54 = vpack.c.bf16 %v1376_v47, %v1368_v46  ;;  %v4678_v61 = vpack.c.bf16 %v1373_v52, %v1365_v51  ;;  %v1446_v47 = vld [vmem:[%s5738_s28 + $0x1b28] sm:$0xff]  ;;  %v1448_v51 = vld [vmem:[%s5738_s28 + $0x1b38] sm:$0xff] }
 0x23d   : > { %4913 = vmatprep.subr.bf16.mxu1 %v4912_v58  ;;  %v5302_v58 = vld [vmem:[%s5736_s8 + $0x20] sm:$0xff]  ;;  %v4934_v62 = vpack.c.bf16 %v1375_v55, %v1367_v53  ;;  %v1439_v46 = vld [vmem:[%s5738_s28 + $0x1af0] sm:$0xff]  ;;  %v1456_v52 = vld [vmem:[%s5738_s28 + $0x1b78] sm:$0xff] }
 0x23e   : > { %v5310_v53 = vld [vmem:[%s5736_s8 + $0x120] sm:$0xff]  ;;  %v450_v55 = vld [vmem:[#allocation2 + $0x8] sm:$0xff] }
 0x23f   : > { %4659 = vmatpush1.bf16.msra.mxu0 %v4658_v0  ;;  %v1381_v0 = vld [vmem:[%s5738_s28 + $0x1920] sm:$0xff] }
 0x240   : > { %4915 = vmatpush1.bf16.msra.mxu1 %v4914_v1  ;;  %4661 = vmatprep.subr.bf16.mxu0 %v4660_v2  ;;  %v1389_v1 = vld [vmem:[%s5738_s28 + $0x1960] sm:$0xff]  ;;  %v1383_v2 = vld [vmem:[%s5738_s28 + $0x1930] sm:$0xff] }
 0x241   : > { %4917 = vmatprep.subr.bf16.mxu1 %v4916_v6  ;;  %v1406_v6 = vld [vmem:[%s5738_s28 + $0x19e8] sm:$0xff]  ;;  %v4682_v11 = vpack.c.bf16 %v1389_v1, %v1381_v0  ;;  %v4952_v0 = vpack.c.bf16 %v1456_v52, %v1448_v51  ;;  %v6875_v1 = vld [vmem:[%s5738_s28 + $0x1b70] sm:$0xff]  ;;  %v465_v34 = vld [vmem:[#allocation2 + $0x80] sm:$0xff] }
 0x243   : > { %4663 = vmatpush1.bf16.msra.mxu0 %v4662_v12  ;;  %v4938_v12 = vpack.c.bf16 %v1391_v4, %v1383_v2  ;;  %v6878_v2 = vld [vmem:[%s5738_s28 + $0x1ba8] sm:$0xff] }
 0x244   : > { %4919 = vmatpush1.bf16.msra.mxu1 %v4918_v13  ;;  %4665 = vmatprep.subr.bf16.mxu0 %v4664_v14  ;;  %v4684_v13 = vpack.c.bf16 %v1406_v6, %v1398_v5  ;;  %v1397_v14 = vld [vmem:[%s5738_s28 + $0x19a0] sm:$0xff]  ;;  %v5311_v4 = vld [vmem:[%s5736_s8 + $0x168] sm:$0xff] }
 0x245   : > { %4921 = vmatprep.subr.bf16.mxu1 %v4920_v18  ;;  %v1407_v18 = vld [vmem:[%s5738_s28 + $0x19f0] sm:$0xff] }
 0x247   : > { %4667 = vmatpush1.bf16.msra.mxu0 %v4666_v24  ;;  %v5306_v24 = vld [vmem:[%s5736_s8 + $0xa0] sm:$0xff] }
 0x248   : > { %4923 = vmatpush1.bf16.msra.mxu1 %v4922_v25  ;;  %4669 = vmatprep.subr.bf16.mxu0 %v4668_v26  ;;  %v4686_v25 = vpack.c.bf16 %v1405_v15, %v1397_v14  ;;  %v4942_v26 = vpack.c.bf16 %v1407_v18, %v1399_v16  ;;  %v459_v15 = vld [vmem:[#allocation2 + $0x50] sm:$0xff]  ;;  %v458_v16 = vld [vmem:[#allocation2 + $0x48] sm:$0xff] }
 0x249   : > { %4925 = vmatprep.subr.bf16.mxu1 %v4924_v30  ;;  %v1415_v30 = vld [vmem:[%s5738_s28 + $0x1a30] sm:$0xff] }
 0x24a   : > { %v4946_v40 = vpack.c.bf16 %v1423_v32, %v1415_v30  ;;  %v5313_v30 = vld [vmem:[%s5736_s8 + $0x1a8] sm:$0xff] }
 0x24b   : > { %4671 = vmatpush1.bf16.msra.mxu0 %v4670_v36  ;;  %v1432_v36 = vld [vmem:[%s5738_s28 + $0x1ab8] sm:$0xff] }
 0x24c   : > { %4927 = vmatpush1.bf16.msra.mxu1 %v4926_v37  ;;  %4673 = vmatprep.subr.bf16.mxu0 %v4672_v38  ;;  %v1440_v37 = vld [vmem:[%s5738_s28 + $0x1af8] sm:$0xff]  ;;  %v5308_v38 = vld [vmem:[%s5736_s8 + $0xe0] sm:$0xff] }
 0x24d   : > { %4929 = vmatprep.subr.bf16.mxu1 %v4928_v42  ;;  %v1429_v42 = vld [vmem:[%s5738_s28 + $0x1aa0] sm:$0xff]  ;;  %v4948_v45 = vpack.c.bf16 %v1440_v37, %v1432_v36  ;;  %v6917_v36 = vld [vmem:[%s5738_s28 + $0x1c78] sm:$0xff] }
 0x24e   : > { %2796 = vmatmul.mubr.f32.vlgmr.msra.gmra.mrb[16].mxu0 %v5302_v58  ;;  %v4694_v57 = vpack.c.bf16 %v1437_v43, %v1429_v42  ;;  %v5314_v37 = vld [vmem:[%s5736_s8 + $0x1a0] sm:$0xff]  ;;  %v466_v42 = vld [vmem:[#allocation2 + $0x88] sm:$0xff]  ;;  %v468_v43 = vld [vmem:[#allocation2 + $0x98] sm:$0xff] }
 0x24f   : > { %4675 = vmatpush1.bf16.msra.mxu0 %v4674_v48  ;;  %3248 = vmatmul.mubr.f32.vlgmr.msra.gmra.mrb[16].mxu1 %v5302_v58  ;;  %v1454_v48 = vld [vmem:[%s5738_s28 + $0x1b68] sm:$0xff]  ;;  %v4950_v58 = vpack.c.bf16 %v1439_v46, %v1431_v44  ;;  %v4702_v44 = vpack.c.bf16 %v6896_v23, %v6893_v22  ;;  %v481_v22 = vld [vmem:[#allocation2 + $0x100] sm:$0xff]  ;;  %v1512_v23 = vld [vmem:[%s5738_s28 + $0x1d38] sm:$0xff] }
 0x250   : > { %4931 = vmatpush1.bf16.msra.mxu1 %v4930_v49  ;;  %4677 = vmatprep.subr.bf16.mxu0 %v4676_v50  ;;  %v5309_v49 = vld [vmem:[%s5736_s8 + $0x128] sm:$0xff]  ;;  %v449_v50 = vld [vmem:[#allocation2] sm:$0xff]  ;;  %v4696_v59 = vpack.c.bf16 %v1454_v48, %v1446_v47  ;;  %v4704_v47 = vpack.c.bf16 %v6910_v29, %v6907_v28  ;;  %v483_v28 = vld [vmem:[#allocation2 + $0x110] sm:$0xff] }
 0x251   : > { %4933 = vmatprep.subr.bf16.mxu1 %v4932_v54  ;;  %2801 = vmatprep.mubr.f32.mxu0 %v5303_v7  ;;  %v451_v54 = vld [vmem:[#allocation2 + $0x10] sm:$0xff]  ;;  %v1477_v48 = vld [vmem:[%s5738_s28 + $0x1c20] sm:$0xff]  ;;  %v482_v29 = vld [vmem:[#allocation2 + $0x108] sm:$0xff] }
 0x252   : > { %3253 = vmatprep.mubr.f32.mxu1 %v5303_v7  ;;  %2802 = vmatmul.mubr.f32.gmra.mrb[18].mxu0 %v5304_v10 }
 0x253   : > { %4679 = vmatpush1.bf16.msra.mxu0 %v4678_v61  ;;  %3254 = vmatmul.mubr.f32.gmra.mrb[18].mxu1 %v5304_v10  ;;  %v1453_v61 = vld [vmem:[%s5738_s28 + $0x1b60] sm:$0xff]  ;;  %v6886_v10 = vld [vmem:[%s5738_s28 + $0x1bf8] sm:$0xff] }
 0x254   : > { %4935 = vmatpush1.bf16.msra.mxu1 %v4934_v62  ;;  %4681 = vmatprep.subr.bf16.mxu0 %v4680_v63  ;;  %v6872_v62 = vld [vmem:[%s5738_s28 + $0x1b30] sm:$0xff]  ;;  %v4698_v18 = vpack.c.bf16 %v1453_v61, %v1445_v60  ;;  %v473_v60 = vld [vmem:[#allocation2 + $0xc0] sm:$0xff]  ;;  %v1496_v61 = vld [vmem:[%s5738_s28 + $0x1cb8] sm:$0xff] }
 0x255   : > { %4937 = vmatprep.subr.bf16.mxu1 %v4936_v3  ;;  %2807 = vmatprep.mubr.f32.mxu0 %v5305_v21  ;;  %v1470_v3 = vld [vmem:[%s5738_s28 + $0x1be8] sm:$0xff]  ;;  %v4954_v20 = vpack.c.bf16 %v6875_v1, %v6872_v62  ;;  %v1504_v62 = vld [vmem:[%s5738_s28 + $0x1cf8] sm:$0xff] }
 0x256   : > { %3259 = vmatprep.mubr.f32.mxu1 %v5305_v21  ;;  %2808 = vmatmul.mubr.f32.gmra.mrb[20].mxu0 %v5306_v24  ;;  %v4700_v21 = vpack.c.bf16 %v1470_v3, %v6878_v2  ;;  %v475_v3 = vld [vmem:[#allocation2 + $0xd0] sm:$0xff] }
 0x257   : > { %4683 = vmatpush1.bf16.msra.mxu0 %v4682_v11  ;;  %3260 = vmatmul.mubr.f32.gmra.mrb[20].mxu1 %v5306_v24  ;;  %v5312_v11 = vld [vmem:[%s5736_s8 + $0x160] sm:$0xff]  ;;  %v6899_v24 = vld [vmem:[%s5738_s28 + $0x1bb0] sm:$0xff] }
 0x258   : > { %4939 = vmatpush1.bf16.msra.mxu1 %v4938_v12  ;;  %4685 = vmatprep.subr.bf16.mxu0 %v4684_v13 }
 0x259   : > { %4941 = vmatprep.subr.bf16.mxu1 %v4940_v17  ;;  %2813 = vmatprep.mubr.f32.mxu0 %v5307_v35  ;;  %v460_v17 = vld [vmem:[#allocation2 + $0x58] sm:$0xff] }
 0x25a   : > { %3265 = vmatprep.mubr.f32.mxu1 %v5307_v35  ;;  %2814 = vmatmul.mubr.f32.gmra.mrb[22].mxu0 %v5308_v38  ;;  %v6914_v35 = vld [vmem:[%s5738_s28 + $0x1c38] sm:$0xff] }
 0x25b   : > { %4687 = vmatpush1.bf16.msra.mxu0 %v4686_v25  ;;  %3266 = vmatmul.mubr.f32.gmra.mrb[22].mxu1 %v5308_v38  ;;  %v4960_v52 = vpack.c.bf16 %v6917_v36, %v6914_v35  ;;  %v1509_v35 = vld [vmem:[%s5738_s28 + $0x1d20] sm:$0xff] }
 0x25c   : > { %4943 = vmatpush1.bf16.msra.mxu1 %v4942_v26  ;;  %4689 = vmatprep.subr.bf16.mxu0 %v4688_v27  ;;  %v4956_v26 = vpack.c.bf16 %v6886_v10, %v6883_v9  ;;  %v6904_v27 = vld [vmem:[%s5738_s28 + $0x1bf0] sm:$0xff]  ;;  %v1493_v10 = vld [vmem:[%s5738_s28 + $0x1ca0] sm:$0xff] }
 0x25d   : > { %4945 = vmatprep.subr.bf16.mxu1 %v4944_v31  ;;  %2819 = vmatprep.mubr.f32.mxu0 %v5309_v49  ;;  %v4958_v46 = vpack.c.bf16 %v6904_v27, %v6899_v24  ;;  %v1520_v24 = vld [vmem:[%s5738_s28 + $0x1d78] sm:$0xff]  ;;  %v1517_v36 = vld [vmem:[%s5738_s28 + $0x1d60] sm:$0xff] }
 0x25e   : > { %3271 = vmatprep.mubr.f32.mxu1 %v5309_v49  ;;  %2820 = vmatmul.mubr.f32.gmra.mrb[24].mxu0 %v5310_v53  ;;  %v1485_v49 = vld [vmem:[%s5738_s28 + $0x1c60] sm:$0xff] }
 0x25f   : > { %4691 = vmatpush1.bf16.msra.mxu0 %v4690_v39  ;;  %3272 = vmatmul.mubr.f32.gmra.mrb[24].mxu1 %v5310_v53  ;;  %v1487_v53 = vld [vmem:[%s5738_s28 + $0x1c70] sm:$0xff] }
 0x260   : > { %4947 = vmatpush1.bf16.msra.mxu1 %v4946_v40  ;;  %4693 = vmatprep.subr.bf16.mxu0 %v4692_v41  ;;  %v467_v41 = vld [vmem:[#allocation2 + $0x90] sm:$0xff] }
 0x261   : > { %v2006_v63 = vpop.f32.mrb[0].mxu0  ;;  %4949 = vmatprep.subr.bf16.mxu1 %v4948_v45  ;;  %2825 = vmatprep.mubr.f32.mxu0 %v5311_v4 }
 0x262   : > { %v3409_v5 = vadd.f32 %v2006_v63, %v449_v50  ;;  %v2458_v6 = vpop.f32.mrb[0].mxu1  ;;  %v2008_v7 = vpop.f32.mrb[1].mxu0  ;;  %3277 = vmatprep.mubr.f32.mxu1 %v5311_v4  ;;  %2826 = vmatmul.mubr.f32.gmra.mrb[26].mxu0 %v5312_v11  ;;  %v6929_v50 = vld [vmem:[%s5738_s28 + $0x1c30] sm:$0xff]  ;;  %v5316_v63 = vld [vmem:[%s5736_s8 + $0x1e0] sm:$0xff]  ;;  %v474_v4 = vld [vmem:[#allocation2 + $0xc8] sm:$0xff] }
 0x263   : > { %v3411_v12 = vadd.f32 %v2458_v6, %v451_v54  ;;  %v3410_v13 = vadd.f32 %v2008_v7, %v450_v55  ;;  %v2460_v14 = vpop.f32.mrb[1].mxu1  ;;  %4695 = vmatpush1.bf16.msra.mxu0 %v4694_v57  ;;  %3278 = vmatmul.mubr.f32.gmra.mrb[26].mxu1 %v5312_v11  ;;  %v1494_v54 = vld [vmem:[%s5738_s28 + $0x1ca8] sm:$0xff]  ;;  %v4706_v6 = vpack.c.bf16 %v1485_v49, %v1477_v48  ;;  %v1501_v11 = vld [vmem:[%s5738_s28 + $0x1ce0] sm:$0xff]  ;;  %v1536_v48 = vld [vmem:[%s5738_s28 + $0x1df8] sm:$0xff] }
 0x264   : > { %3473 = vst [vmem:[#allocation2] sm:$0xff] %v3409_v5  ;;  %v3412_v19 = vadd.f32 %v2460_v14, %v452_v56  ;;  %4951 = vmatpush1.bf16.msra.mxu1 %v4950_v58  ;;  %4697 = vmatprep.subr.bf16.mxu0 %v4696_v59  ;;  %v1502_v55 = vld [vmem:[%s5738_s28 + $0x1ce8] sm:$0xff]  ;;  %v476_v5 = vld [vmem:[#allocation2 + $0xd8] sm:$0xff]  ;;  %v4964_v14 = vpack.c.bf16 %v1504_v62, %v1496_v61  ;;  %v1527_v61 = vld [vmem:[%s5738_s28 + $0x1db0] sm:$0xff] }
 0x265   : > { %3475 = vst [vmem:[#allocation2 + $0x10] sm:$0xff] %v3411_v12  ;;  %3474 = vst [vmem:[#allocation2 + $0x8] sm:$0xff] %v3410_v13  ;;  %v2012_v25 = vpop.f32.mrb[2].mxu0  ;;  %4953 = vmatprep.subr.bf16.mxu1 %v4952_v0  ;;  %2831 = vmatprep.mubr.f32.mxu0 %v5313_v30  ;;  %v5315_v56 = vld [vmem:[%s5736_s8 + $0x1e8] sm:$0xff]  ;;  %v4708_v9 = vpack.c.bf16 %v1502_v55, %v1494_v54  ;;  %v1495_v12 = vld [vmem:[%s5738_s28 + $0x1cb0] sm:$0xff]  ;;  %v4714_v55 = vpack.c.bf16 %v1517_v36, %v1509_v35 }
 0x266   : > { %3476 = vst [vmem:[#allocation2 + $0x18] sm:$0xff] %v3412_v19  ;;  %v3417_v31 = vadd.f32 %v2012_v25, %v457_v8  ;;  %v2464_v32 = vpop.f32.mrb[2].mxu1  ;;  %v2014_v33 = vpop.f32.mrb[3].mxu0  ;;  %3283 = vmatprep.mubr.f32.mxu1 %v5313_v30  ;;  %2832 = vmatmul.mubr.f32.gmra.mrb[28].mxu0 %v5314_v37  ;;  %v4962_v8 = vpack.c.bf16 %v1487_v53, %v6929_v50  ;;  %v484_v30 = vld [vmem:[#allocation2 + $0x118] sm:$0xff]  ;;  %v490_v53 = vld [vmem:[#allocation2 + $0x148] sm:$0xff]  ;;  %v507_v36 = vld [vmem:[#allocation2 + $0x1d0] sm:$0xff] }
 0x267   : > { %v3419_v38 = vadd.f32 %v2464_v32, %v459_v15  ;;  %v3418_v39 = vadd.f32 %v2014_v33, %v458_v16  ;;  %v2466_v40 = vpop.f32.mrb[3].mxu1  ;;  %4699 = vmatpush1.bf16.msra.mxu0 %v4698_v18  ;;  %3284 = vmatmul.mubr.f32.gmra.mrb[28].mxu1 %v5314_v37  ;;  %v1503_v15 = vld [vmem:[%s5738_s28 + $0x1cf0] sm:$0xff]  ;;  %v1510_v16 = vld [vmem:[%s5738_s28 + $0x1d28] sm:$0xff]  ;;  %v5317_v18 = vld [vmem:[%s5736_s8 + $0x38] sm:$0xff] }
 0x268   : > { %3481 = vst [vmem:[#allocation2 + $0x40] sm:$0xff] %v3417_v31  ;;  %v3420_v45 = vadd.f32 %v2466_v40, %v460_v17  ;;  %4955 = vmatpush1.bf16.msra.mxu1 %v4954_v20  ;;  %4701 = vmatprep.subr.bf16.mxu0 %v4700_v21  ;;  %v1518_v17 = vld [vmem:[%s5738_s28 + $0x1d68] sm:$0xff]  ;;  %v4710_v31 = vpack.c.bf16 %v1501_v11, %v1493_v10  ;;  %v1511_v37 = vld [vmem:[%s5738_s28 + $0x1d30] sm:$0xff]  ;;  %v492_v54 = vld [vmem:[#allocation2 + $0x158] sm:$0xff] }
 0x269   : > { %3483 = vst [vmem:[#allocation2 + $0x50] sm:$0xff] %v3419_v38  ;;  %3482 = vst [vmem:[#allocation2 + $0x48] sm:$0xff] %v3418_v39  ;;  %v2018_v51 = vpop.f32.mrb[4].mxu0  ;;  %4957 = vmatprep.subr.bf16.mxu1 %v4956_v26  ;;  %2837 = vmatprep.mubr.f32.mxu0 %v5315_v56  ;;  %v4966_v33 = vpack.c.bf16 %v1503_v15, %v1495_v12  ;;  %v4968_v39 = vpack.c.bf16 %v1520_v24, %v1512_v23  ;;  %v1519_v40 = vld [vmem:[%s5738_s28 + $0x1d70] sm:$0xff] }
 0x26a   : > { %3484 = vst [vmem:[#allocation2 + $0x58] sm:$0xff] %v3420_v45  ;;  %v3425_v57 = vadd.f32 %v2018_v51, %v465_v34  ;;  %v2470_v58 = vpop.f32.mrb[4].mxu1  ;;  %v2020_v59 = vpop.f32.mrb[5].mxu0  ;;  %3289 = vmatprep.mubr.f32.mxu1 %v5315_v56  ;;  %2838 = vmatmul.mubr.f32.gmra.mrb[30].mxu0 %v5316_v63  ;;  %v4712_v34 = vpack.c.bf16 %v1518_v17, %v1510_v16  ;;  %v499_v12 = vld [vmem:[#allocation2 + $0x190] sm:$0xff] }
 0x26b   : > { %v3427_v0 = vadd.f32 %v2470_v58, %v467_v41  ;;  %v3426_v1 = vadd.f32 %v2020_v59, %v466_v42  ;;  %v2472_v2 = vpop.f32.mrb[5].mxu1  ;;  %4703 = vmatpush1.bf16.msra.mxu0 %v4702_v44  ;;  %3290 = vmatmul.mubr.f32.gmra.mrb[30].mxu1 %v5316_v63  ;;  %v1526_v41 = vld [vmem:[%s5738_s28 + $0x1da8] sm:$0xff]  ;;  %v1525_v59 = vld [vmem:[%s5738_s28 + $0x1da0] sm:$0xff]  ;;  %v1551_v24 = vld [vmem:[%s5738_s28 + $0x1e70] sm:$0xff] }
 0x26c   : > { %3489 = vst [vmem:[#allocation2 + $0x80] sm:$0xff] %v3425_v57  ;;  %v3428_v7 = vadd.f32 %v2472_v2, %v468_v43  ;;  %4959 = vmatpush1.bf16.msra.mxu1 %v4958_v46  ;;  %4705 = vmatprep.subr.bf16.mxu0 %v4704_v47  ;;  %v1534_v42 = vld [vmem:[%s5738_s28 + $0x1de8] sm:$0xff]  ;;  %v489_v46 = vld [vmem:[#allocation2 + $0x140] sm:$0xff]  ;;  %v1528_v47 = vld [vmem:[%s5738_s28 + $0x1db8] sm:$0xff]  ;;  %v4970_v57 = vpack.c.bf16 %v1519_v40, %v1511_v37 }
 0x26d   : > { %3491 = vst [vmem:[#allocation2 + $0x90] sm:$0xff] %v3427_v0  ;;  %3490 = vst [vmem:[#allocation2 + $0x88] sm:$0xff] %v3426_v1  ;;  %v2024_v13 = vpop.f32.mrb[6].mxu0  ;;  %4961 = vmatprep.subr.bf16.mxu1 %v4960_v52  ;;  %2908 = vmatprep.mubr.f32.mxu0 %v5317_v18  ;;  %v491_v52 = vld [vmem:[#allocation2 + $0x150] sm:$0xff]  ;;  %v4716_v58 = vpack.c.bf16 %v1534_v42, %v1526_v41  ;;  %v4972_v63 = vpack.c.bf16 %v1536_v48, %v1528_v47  ;;  %v1542_v1 = vld [vmem:[%s5738_s28 + $0x1e28] sm:$0xff] }
 0x26e   : > { %3492 = vst [vmem:[#allocation2 + $0x98] sm:$0xff] %v3428_v7  ;;  %v3433_v19 = vadd.f32 %v2024_v13, %v473_v60  ;;  %v2476_v20 = vpop.f32.mrb[6].mxu1  ;;  %v2026_v21 = vpop.f32.mrb[7].mxu0  ;;  %3360 = vmatprep.mubr.f32.mxu1 %v5317_v18  ;;  %v1533_v60 = vld [vmem:[%s5738_s28 + $0x1de0] sm:$0xff]  ;;  %v1535_v0 = vld [vmem:[%s5738_s28 + $0x1df0] sm:$0xff]  ;;  %v1550_v2 = vld [vmem:[%s5738_s28 + $0x1e68] sm:$0xff] }
 0x26f   : > { %v3435_v25 = vadd.f32 %v2476_v20, %v475_v3  ;;  %v3434_v26 = vadd.f32 %v2026_v21, %v474_v4  ;;  %v2478_v27 = vpop.f32.mrb[7].mxu1  ;;  %4707 = vmatpush1.bf16.msra.mxu0 %v4706_v6  ;;  %v497_v6 = vld [vmem:[#allocation2 + $0x180] sm:$0xff]  ;;  %v1544_v7 = vld [vmem:[%s5738_s28 + $0x1e38] sm:$0xff]  ;;  %v498_v13 = vld [vmem:[#allocation2 + $0x188] sm:$0xff]  ;;  %v4718_v15 = vpack.c.bf16 %v1533_v60, %v1525_v59  ;;  %v4974_v17 = vpack.c.bf16 %v1535_v0, %v1527_v61 }
 0x270   : > { %3497 = vst [vmem:[#allocation2 + $0xc0] sm:$0xff] %v3433_v19  ;;  %v3436_v32 = vadd.f32 %v2478_v27, %v476_v5  ;;  %4963 = vmatpush1.bf16.msra.mxu1 %v4962_v8  ;;  %4709 = vmatprep.subr.bf16.mxu0 %v4708_v9  ;;  %v1552_v8 = vld [vmem:[%s5738_s28 + $0x1e78] sm:$0xff]  ;;  %v4720_v18 = vpack.c.bf16 %v1550_v2, %v1542_v1  ;;  %v1541_v19 = vld [vmem:[%s5738_s28 + $0x1e20] sm:$0xff]  ;;  %v1543_v21 = vld [vmem:[%s5738_s28 + $0x1e30] sm:$0xff] }
 0x271   : > { %3499 = vst [vmem:[#allocation2 + $0xd0] sm:$0xff] %v3435_v25  ;;  %3498 = vst [vmem:[#allocation2 + $0xc8] sm:$0xff] %v3434_v26  ;;  %v2030_v38 = vpop.f32.mrb[8].mxu0  ;;  %4965 = vmatprep.subr.bf16.mxu1 %v4964_v14  ;;  %v500_v14 = vld [vmem:[#allocation2 + $0x198] sm:$0xff]  ;;  %v1549_v20 = vld [vmem:[%s5738_s28 + $0x1e60] sm:$0xff]  ;;  %v4976_v23 = vpack.c.bf16 %v1552_v8, %v1544_v7  ;;  %v4978_v41 = vpack.c.bf16 %v1551_v24, %v1543_v21 }
 0x272   : > { %3500 = vst [vmem:[#allocation2 + $0xd8] sm:$0xff] %v3436_v32  ;;  %v3441_v43 = vadd.f32 %v2030_v38, %v481_v22  ;;  %v2482_v44 = vpop.f32.mrb[8].mxu1  ;;  %v2032_v45 = vpop.f32.mrb[9].mxu0  ;;  %v1558_v25 = vld [vmem:[%s5738_s28 + $0x1ea8] sm:$0xff]  ;;  %v1568_v32 = vld [vmem:[%s5738_s28 + $0x1ef8] sm:$0xff]  ;;  %v1567_v48 = vld [vmem:[%s5738_s28 + $0x1ef0] sm:$0xff] }
 0x273   : > { %v3443_v49 = vadd.f32 %v2482_v44, %v483_v28  ;;  %v3442_v50 = vadd.f32 %v2032_v45, %v482_v29  ;;  %v2484_v51 = vpop.f32.mrb[9].mxu1  ;;  %4711 = vmatpush1.bf16.msra.mxu0 %v4710_v31  ;;  %v1566_v26 = vld [vmem:[%s5738_s28 + $0x1ee8] sm:$0xff]  ;;  %v1560_v31 = vld [vmem:[%s5738_s28 + $0x1eb8] sm:$0xff]  ;;  %v1565_v44 = vld [vmem:[%s5738_s28 + $0x1ee0] sm:$0xff] }
 0x274   : > { %3505 = vst [vmem:[#allocation2 + $0x100] sm:$0xff] %v3441_v43  ;;  %v3444_v56 = vadd.f32 %v2484_v51, %v484_v30  ;;  %4967 = vmatpush1.bf16.msra.mxu1 %v4966_v33  ;;  %4713 = vmatprep.subr.bf16.mxu0 %v4712_v34  ;;  %v505_v30 = vld [vmem:[#allocation2 + $0x1c0] sm:$0xff]  ;;  %v506_v37 = vld [vmem:[#allocation2 + $0x1c8] sm:$0xff]  ;;  %v508_v38 = vld [vmem:[#allocation2 + $0x1d8] sm:$0xff]  ;;  %v4724_v42 = vpack.c.bf16 %v1566_v26, %v1558_v25 }
 0x275   : > { %3507 = vst [vmem:[#allocation2 + $0x110] sm:$0xff] %v3443_v49  ;;  %3506 = vst [vmem:[#allocation2 + $0x108] sm:$0xff] %v3442_v50  ;;  %v2036_v62 = vpop.f32.mrb[10].mxu0  ;;  %4969 = vmatprep.subr.bf16.mxu1 %v4968_v39  ;;  %v4722_v39 = vpack.c.bf16 %v1549_v20, %v1541_v19  ;;  %v1557_v43 = vld [vmem:[%s5738_s28 + $0x1ea0] sm:$0xff]  ;;  %v1559_v45 = vld [vmem:[%s5738_s28 + $0x1eb0] sm:$0xff]  ;;  %v4980_v47 = vpack.c.bf16 %v1568_v32, %v1560_v31 }
 0x276   : > { %3508 = vst [vmem:[#allocation2 + $0x118] sm:$0xff] %v3444_v56  ;;  %v3449_v3 = vadd.f32 %v2036_v62, %v489_v46  ;;  %v2488_v4 = vpop.f32.mrb[10].mxu1  ;;  %v2038_v5 = vpop.f32.mrb[11].mxu0  ;;  %v1574_v49 = vld [vmem:[%s5738_s28 + $0x1f28] sm:$0xff]  ;;  %v4726_v59 = vpack.c.bf16 %v1565_v44, %v1557_v43  ;;  %v4982_v61 = vpack.c.bf16 %v1567_v48, %v1559_v45  ;;  %v1581_v0 = vld [vmem:[%s5738_s28 + $0x1f60] sm:$0xff]  ;;  %v1575_v1 = vld [vmem:[%s5738_s28 + $0x1f30] sm:$0xff] }
 0x277   : > { %v3451_v9 = vadd.f32 %v2488_v4, %v491_v52  ;;  %v3450_v10 = vadd.f32 %v2038_v5, %v490_v53  ;;  %v2490_v11 = vpop.f32.mrb[11].mxu1  ;;  %4715 = vmatpush1.bf16.msra.mxu0 %v4714_v55  ;;  %v1582_v50 = vld [vmem:[%s5738_s28 + $0x1f68] sm:$0xff]  ;;  %v1584_v55 = vld [vmem:[%s5738_s28 + $0x1f78] sm:$0xff]  ;;  %v5320_v20 = vld [vmem:[%s5736_s8 + $0x70] sm:$0xff] }
 0x278   : > { %3513 = vst [vmem:[#allocation2 + $0x140] sm:$0xff] %v3449_v3  ;;  %v3452_v16 = vadd.f32 %v2490_v11, %v492_v54  ;;  %4971 = vmatpush1.bf16.msra.mxu1 %v4970_v57  ;;  %4717 = vmatprep.subr.bf16.mxu0 %v4716_v58  ;;  %v1576_v54 = vld [vmem:[%s5738_s28 + $0x1f38] sm:$0xff]  ;;  %v4728_v62 = vpack.c.bf16 %v1582_v50, %v1574_v49  ;;  %v1583_v3 = vld [vmem:[%s5738_s28 + $0x1f70] sm:$0xff]  ;;  %v1590_v4 = vld [vmem:[%s5738_s28 + $0x1fa8] sm:$0xff] }
 0x279   : > { %3515 = vst [vmem:[#allocation2 + $0x150] sm:$0xff] %v3451_v9  ;;  %3514 = vst [vmem:[#allocation2 + $0x148] sm:$0xff] %v3450_v10  ;;  %v2042_v22 = vpop.f32.mrb[12].mxu0  ;;  %4973 = vmatprep.subr.bf16.mxu1 %v4972_v63  ;;  %v1573_v63 = vld [vmem:[%s5738_s28 + $0x1f20] sm:$0xff]  ;;  %v4984_v2 = vpack.c.bf16 %v1584_v55, %v1576_v54  ;;  %v1598_v5 = vld [vmem:[%s5738_s28 + $0x1fe8] sm:$0xff]  ;;  %v4986_v9 = vpack.c.bf16 %v1583_v3, %v1575_v1 }
 0x27a   : > { %3516 = vst [vmem:[#allocation2 + $0x158] sm:$0xff] %v3452_v16  ;;  %v3457_v27 = vadd.f32 %v2042_v22, %v497_v6  ;;  %v2494_v28 = vpop.f32.mrb[12].mxu1  ;;  %v2044_v29 = vpop.f32.mrb[13].mxu0  ;;  %v1592_v6 = vld [vmem:[%s5738_s28 + $0x1fb8] sm:$0xff]  ;;  %v4730_v8 = vpack.c.bf16 %v1581_v0, %v1573_v63  ;;  %v4732_v10 = vpack.c.bf16 %v1598_v5, %v1590_v4  ;;  %v1589_v11 = vld [vmem:[%s5738_s28 + $0x1fa0] sm:$0xff]  ;;  %v5322_v22 = vld [vmem:[%s5736_s8 + $0xb0] sm:$0xff] }
 0x27b   : > { %v3459_v33 = vadd.f32 %v2494_v28, %v499_v12  ;;  %v3458_v34 = vadd.f32 %v2044_v29, %v498_v13  ;;  %v2496_v35 = vpop.f32.mrb[13].mxu1  ;;  %4719 = vmatpush1.bf16.msra.mxu0 %v4718_v15  ;;  %v1600_v7 = vld [vmem:[%s5738_s28 + $0x1ff8] sm:$0xff]  ;;  %v1597_v12 = vld [vmem:[%s5738_s28 + $0x1fe0] sm:$0xff]  ;;  %v1599_v15 = vld [vmem:[%s5738_s28 + $0x1ff0] sm:$0xff] }
 0x27c   : > { %3521 = vst [vmem:[#allocation2 + $0x180] sm:$0xff] %v3457_v27  ;;  %v3460_v40 = vadd.f32 %v2496_v35, %v500_v14  ;;  %4975 = vmatpush1.bf16.msra.mxu1 %v4974_v17  ;;  %4721 = vmatprep.subr.bf16.mxu0 %v4720_v18  ;;  %v4988_v13 = vpack.c.bf16 %v1600_v7, %v1592_v6  ;;  %v1591_v14 = vld [vmem:[%s5738_s28 + $0x1fb0] sm:$0xff]  ;;  %v5319_v19 = vld [vmem:[%s5736_s8 + $0x78] sm:$0xff]  ;;  %v454_v35 = vld [vmem:[#allocation2 + $0x28] sm:$0xff] }
 0x27d   : > { %3523 = vst [vmem:[#allocation2 + $0x190] sm:$0xff] %v3459_v33  ;;  %3522 = vst [vmem:[#allocation2 + $0x188] sm:$0xff] %v3458_v34  ;;  %v2048_v46 = vpop.f32.mrb[14].mxu0  ;;  %4977 = vmatprep.subr.bf16.mxu1 %v4976_v23  ;;  %v4734_v16 = vpack.c.bf16 %v1597_v12, %v1589_v11  ;;  %v4990_v17 = vpack.c.bf16 %v1599_v15, %v1591_v14  ;;  %v5318_v18 = vld [vmem:[%s5736_s8 + $0x30] sm:$0xff]  ;;  %v5321_v21 = vld [vmem:[%s5736_s8 + $0xb8] sm:$0xff] }
 0x27e   : > { %3524 = vst [vmem:[#allocation2 + $0x198] sm:$0xff] %v3460_v40  ;;  %v3465_v51 = vadd.f32 %v2048_v46, %v505_v30  ;;  %v2500_v52 = vpop.f32.mrb[14].mxu1  ;;  %v2050_v53 = vpop.f32.mrb[15].mxu0  ;;  %v5323_v23 = vld [vmem:[%s5736_s8 + $0xf8] sm:$0xff]  ;;  %v5324_v24 = vld [vmem:[%s5736_s8 + $0xf0] sm:$0xff]  ;;  %v453_v33 = vld [vmem:[#allocation2 + $0x20] sm:$0xff] }
 0x27f   : > { %v3467_v56 = vadd.f32 %v2500_v52, %v507_v36  ;;  %v3466_v57 = vadd.f32 %v2050_v53, %v506_v37  ;;  %v2502_v58 = vpop.f32.mrb[15].mxu1  ;;  %4723 = vmatpush1.bf16.msra.mxu0 %v4722_v39  ;;  %v5325_v25 = vld [vmem:[%s5736_s8 + $0x138] sm:$0xff]  ;;  %v5326_v26 = vld [vmem:[%s5736_s8 + $0x130] sm:$0xff]  ;;  %v461_v44 = vld [vmem:[#allocation2 + $0x60] sm:$0xff] }
 0x280   : > { %3529 = vst [vmem:[#allocation2 + $0x1c0] sm:$0xff] %v3465_v51  ;;  %v3468_v60 = vadd.f32 %v2502_v58, %v508_v38  ;;  %4979 = vmatpush1.bf16.msra.mxu1 %v4978_v41  ;;  %4725 = vmatprep.subr.bf16.mxu0 %v4724_v42  ;;  %v5327_v27 = vld [vmem:[%s5736_s8 + $0x178] sm:$0xff]  ;;  %v5328_v28 = vld [vmem:[%s5736_s8 + $0x170] sm:$0xff]  ;;  %v477_v4 = vld [vmem:[#allocation2 + $0xe0] sm:$0xff] }
 0x281   : > { %3531 = vst [vmem:[#allocation2 + $0x1d0] sm:$0xff] %v3467_v56  ;;  %3530 = vst [vmem:[#allocation2 + $0x1c8] sm:$0xff] %v3466_v57  ;;  %4981 = vmatprep.subr.bf16.mxu1 %v4980_v47  ;;  %v5329_v29 = vld [vmem:[%s5736_s8 + $0x1b8] sm:$0xff]  ;;  %v5330_v30 = vld [vmem:[%s5736_s8 + $0x1b0] sm:$0xff] }
 0x282   : > { %3532 = vst [vmem:[#allocation2 + $0x1d8] sm:$0xff] %v3468_v60  ;;  %v5331_v31 = vld [vmem:[%s5736_s8 + $0x1f8] sm:$0xff]  ;;  %v5332_v32 = vld [vmem:[%s5736_s8 + $0x1f0] sm:$0xff]  ;;  %v462_v47 = vld [vmem:[#allocation2 + $0x68] sm:$0xff] }
 0x283   : > { %4727 = vmatpush1.bf16.msra.mxu0 %v4726_v59  ;;  %v455_v34 = vld [vmem:[#allocation2 + $0x30] sm:$0xff]  ;;  %v456_v37 = vld [vmem:[#allocation2 + $0x38] sm:$0xff]  ;;  %v469_v56 = vld [vmem:[#allocation2 + $0xa0] sm:$0xff] }
 0x284   : > { %4983 = vmatpush1.bf16.msra.mxu1 %v4982_v61  ;;  %4729 = vmatprep.subr.bf16.mxu0 %v4728_v62  ;;  %v463_v46 = vld [vmem:[#allocation2 + $0x70] sm:$0xff]  ;;  %v464_v49 = vld [vmem:[#allocation2 + $0x78] sm:$0xff]  ;;  %v470_v59 = vld [vmem:[#allocation2 + $0xa8] sm:$0xff] }
 0x285   : > { %4985 = vmatprep.subr.bf16.mxu1 %v4984_v2  ;;  %v471_v58 = vld [vmem:[#allocation2 + $0xb0] sm:$0xff]  ;;  %v472_v61 = vld [vmem:[#allocation2 + $0xb8] sm:$0xff]  ;;  %v478_v7 = vld [vmem:[#allocation2 + $0xe8] sm:$0xff] }
 0x286   : > { %v479_v6 = vld [vmem:[#allocation2 + $0xf0] sm:$0xff] }
 0x287   : > { %4731 = vmatpush1.bf16.msra.mxu0 %v4730_v8 }
 0x288   : > { %4987 = vmatpush1.bf16.msra.mxu1 %v4986_v9  ;;  %4733 = vmatprep.subr.bf16.mxu0 %v4732_v10  ;;  %v480_v9 = vld [vmem:[#allocation2 + $0xf8] sm:$0xff] }
 0x289   : > { %4989 = vmatprep.subr.bf16.mxu1 %v4988_v13 }
 0x28b   : > { %4735 = vmatpush1.bf16.msra.mxu0 %v4734_v16  ;;  %v485_v16 = vld [vmem:[#allocation2 + $0x120] sm:$0xff] }
 0x28c   : > { %4991 = vmatpush1.bf16.msra.mxu1 %v4990_v17 }
 0x28e   : > { %2909 = vmatmul.mubr.f32.vlgmr.msra.gmra.mrb[16].mxu0 %v5318_v18 }
 0x28f   : > { %3361 = vmatmul.mubr.f32.vlgmr.msra.gmra.mrb[16].mxu1 %v5318_v18  ;;  %2914 = vmatprep.mubr.f32.mxu0 %v5319_v19  ;;  %v487_v18 = vld [vmem:[#allocation2 + $0x130] sm:$0xff] }
 0x290   : > { %3366 = vmatprep.mubr.f32.mxu1 %v5319_v19  ;;  %v486_v19 = vld [vmem:[#allocation2 + $0x128] sm:$0xff] }
 0x292   : > { %2915 = vmatmul.mubr.f32.gmra.mrb[18].mxu0 %v5320_v20 }
 0x293   : > { %3367 = vmatmul.mubr.f32.gmra.mrb[18].mxu1 %v5320_v20  ;;  %2920 = vmatprep.mubr.f32.mxu0 %v5321_v21 }
 0x294   : > { %3372 = vmatprep.mubr.f32.mxu1 %v5321_v21  ;;  %v488_v21 = vld [vmem:[#allocation2 + $0x138] sm:$0xff] }
 0x296   : > { %2921 = vmatmul.mubr.f32.gmra.mrb[20].mxu0 %v5322_v22 }
 0x297   : > { %3373 = vmatmul.mubr.f32.gmra.mrb[20].mxu1 %v5322_v22  ;;  %2926 = vmatprep.mubr.f32.mxu0 %v5323_v23 }
 0x298   : > { %3378 = vmatprep.mubr.f32.mxu1 %v5323_v23 }
 0x29a   : > { %2927 = vmatmul.mubr.f32.gmra.mrb[22].mxu0 %v5324_v24 }
 0x29b   : > { %3379 = vmatmul.mubr.f32.gmra.mrb[22].mxu1 %v5324_v24  ;;  %2932 = vmatprep.mubr.f32.mxu0 %v5325_v25 }
 0x29c   : > { %3384 = vmatprep.mubr.f32.mxu1 %v5325_v25 }
 0x29e   : > { %2933 = vmatmul.mubr.f32.gmra.mrb[24].mxu0 %v5326_v26 }
 0x29f   : > { %3385 = vmatmul.mubr.f32.gmra.mrb[24].mxu1 %v5326_v26  ;;  %2938 = vmatprep.mubr.f32.mxu0 %v5327_v27 }
 0x2a0   : > { %3390 = vmatprep.mubr.f32.mxu1 %v5327_v27 }
 0x2a2   : > { %2939 = vmatmul.mubr.f32.gmra.mrb[26].mxu0 %v5328_v28 }
 0x2a3   : > { %3391 = vmatmul.mubr.f32.gmra.mrb[26].mxu1 %v5328_v28  ;;  %2944 = vmatprep.mubr.f32.mxu0 %v5329_v29  ;;  %v493_v28 = vld [vmem:[#allocation2 + $0x160] sm:$0xff] }
 0x2a4   : > { %3396 = vmatprep.mubr.f32.mxu1 %v5329_v29 }
 0x2a6   : > { %2945 = vmatmul.mubr.f32.gmra.mrb[28].mxu0 %v5330_v30 }
 0x2a7   : > { %3397 = vmatmul.mubr.f32.gmra.mrb[28].mxu1 %v5330_v30  ;;  %2950 = vmatprep.mubr.f32.mxu0 %v5331_v31  ;;  %v495_v30 = vld [vmem:[#allocation2 + $0x170] sm:$0xff] }
 0x2a8   : > { %3402 = vmatprep.mubr.f32.mxu1 %v5331_v31  ;;  %v494_v31 = vld [vmem:[#allocation2 + $0x168] sm:$0xff] }
 0x2aa   : > { %2951 = vmatmul.mubr.f32.gmra.mrb[30].mxu0 %v5332_v32 }
 0x2ab   : > { %3403 = vmatmul.mubr.f32.gmra.mrb[30].mxu1 %v5332_v32 }
 0x361   : > { %v2910_v36 = vpop.f32.mrb[16].mxu0 }
 0x362   : > { %v3413_v38 = vadd.f32 %v2910_v36, %v453_v33  ;;  %v3362_v39 = vpop.f32.mrb[16].mxu1  ;;  %v2912_v40 = vpop.f32.mrb[17].mxu0  ;;  %v496_v33 = vld [vmem:[#allocation2 + $0x178] sm:$0xff] }
 0x363   : > { %v3415_v41 = vadd.f32 %v3362_v39, %v455_v34  ;;  %v3414_v42 = vadd.f32 %v2912_v40, %v454_v35  ;;  %v3364_v43 = vpop.f32.mrb[17].mxu1  ;;  %v501_v40 = vld [vmem:[#allocation2 + $0x1a0] sm:$0xff] }
 0x364   : > { %3477 = vst [vmem:[#allocation2 + $0x20] sm:$0xff] %v3413_v38  ;;  %v3416_v45 = vadd.f32 %v3364_v43, %v456_v37  ;;  %v502_v43 = vld [vmem:[#allocation2 + $0x1a8] sm:$0xff] }
 0x365   : > { %3479 = vst [vmem:[#allocation2 + $0x30] sm:$0xff] %v3415_v41  ;;  %3478 = vst [vmem:[#allocation2 + $0x28] sm:$0xff] %v3414_v42  ;;  %v2916_v48 = vpop.f32.mrb[18].mxu0  ;;  %v503_v42 = vld [vmem:[#allocation2 + $0x1b0] sm:$0xff] }
 0x366   : > { %3480 = vst [vmem:[#allocation2 + $0x38] sm:$0xff] %v3416_v45  ;;  %v3421_v50 = vadd.f32 %v2916_v48, %v461_v44  ;;  %v3368_v51 = vpop.f32.mrb[18].mxu1  ;;  %v2918_v52 = vpop.f32.mrb[19].mxu0  ;;  %v504_v45 = vld [vmem:[#allocation2 + $0x1b8] sm:$0xff] }
 0x367   : > { %v3423_v53 = vadd.f32 %v3368_v51, %v463_v46  ;;  %v3422_v54 = vadd.f32 %v2918_v52, %v462_v47  ;;  %v3370_v55 = vpop.f32.mrb[19].mxu1  ;;  %v509_v52 = vld [vmem:[#allocation2 + $0x1e0] sm:$0xff] }
 0x368   : > { %3485 = vst [vmem:[#allocation2 + $0x60] sm:$0xff] %v3421_v50  ;;  %v3424_v57 = vadd.f32 %v3370_v55, %v464_v49  ;;  %v510_v55 = vld [vmem:[#allocation2 + $0x1e8] sm:$0xff] }
 0x369   : > { %3487 = vst [vmem:[#allocation2 + $0x70] sm:$0xff] %v3423_v53  ;;  %3486 = vst [vmem:[#allocation2 + $0x68] sm:$0xff] %v3422_v54  ;;  %v2922_v60 = vpop.f32.mrb[20].mxu0  ;;  %v511_v54 = vld [vmem:[#allocation2 + $0x1f0] sm:$0xff] }
 0x36a   : > { %3488 = vst [vmem:[#allocation2 + $0x78] sm:$0xff] %v3424_v57  ;;  %v3429_v62 = vadd.f32 %v2922_v60, %v469_v56  ;;  %v3374_v63 = vpop.f32.mrb[20].mxu1  ;;  %v2924_v0 = vpop.f32.mrb[21].mxu0  ;;  %v512_v57 = vld [vmem:[#allocation2 + $0x1f8] sm:$0xff] }
 0x36b   : > { %v3431_v1 = vadd.f32 %v3374_v63, %v471_v58  ;;  %v3430_v2 = vadd.f32 %v2924_v0, %v470_v59  ;;  %v3376_v3 = vpop.f32.mrb[21].mxu1 }
 0x36c   : > { %3493 = vst [vmem:[#allocation2 + $0xa0] sm:$0xff] %v3429_v62  ;;  %v3432_v5 = vadd.f32 %v3376_v3, %v472_v61  ;;  %v3541_v3 = vld [vmem:[#allocation2] sm:$0xff] (!%p3961_p11) }
 0x36d   : > { %3495 = vst [vmem:[#allocation2 + $0xb0] sm:$0xff] %v3431_v1  ;;  %3494 = vst [vmem:[#allocation2 + $0xa8] sm:$0xff] %v3430_v2  ;;  %v2928_v8 = vpop.f32.mrb[22].mxu0  ;;  %v3607_v1 = vlaneseq (!%p3961_p11) }
 0x36e   : > { %3496 = vst [vmem:[#allocation2 + $0xb8] sm:$0xff] %v3432_v5  ;;  %v3437_v10 = vadd.f32 %v2928_v8, %v477_v4  ;;  %v3380_v11 = vpop.f32.mrb[22].mxu1  ;;  %v2930_v12 = vpop.f32.mrb[23].mxu0  ;;  %v3605_v4 = vld [vmem:[%s7189_s2] sm:$0xff] (!%p3961_p11)  ;;  %v3543_v8 = vld [vmem:[#allocation2 + $0x10] sm:$0xff] (!%p3961_p11) }
 0x36f   : > { %v3439_v13 = vadd.f32 %v3380_v11, %v479_v6  ;;  %v3438_v14 = vadd.f32 %v2930_v12, %v478_v7  ;;  %v3382_v15 = vpop.f32.mrb[23].mxu1  ;;  %v3608_v2 = vshrl.u32 (!%p3961_p11), %v3607_v1, 7  ;;  %v3542_v6 = vld [vmem:[#allocation2 + $0x8] sm:$0xff] (!%p3961_p11)  ;;  %v3544_v11 = vld [vmem:[#allocation2 + $0x18] sm:$0xff] (!%p3961_p11)  ;;  %v3545_v12 = vld [vmem:[#allocation2 + $0x20] sm:$0xff] (!%p3961_p11) }
 0x370   : > { %3501 = vst [vmem:[#allocation2 + $0xe0] sm:$0xff] %v3437_v10  ;;  %v3440_v17 = vadd.f32 %v3382_v15, %v480_v9 }
 0x371   : > { %3503 = vst [vmem:[#allocation2 + $0xf0] sm:$0xff] %v3439_v13  ;;  %3502 = vst [vmem:[#allocation2 + $0xe8] sm:$0xff] %v3438_v14  ;;  %v2934_v20 = vpop.f32.mrb[24].mxu0  ;;  %v3609_v5 = vsub.s32 (!%p3961_p11), 0, %v3608_v2  ;;  %v3613_v7 = vsub.s32 (!%p3961_p11), 1, %v3608_v2  ;;  %v3617_v9 = vsub.s32 (!%p3961_p11), 2, %v3608_v2 }
 0x372   : > { %3504 = vst [vmem:[#allocation2 + $0xf8] sm:$0xff] %v3440_v17  ;;  %v3445_v22 = vadd.f32 %v2934_v20, %v485_v16  ;;  %v3386_v23 = vpop.f32.mrb[24].mxu1  ;;  %v2936_v24 = vpop.f32.mrb[25].mxu0  ;;  %v3621_v10 = vsub.s32 (!%p3961_p11), 3, %v3608_v2  ;;  %v3625_v13 = vsub.s32 (!%p3961_p11), 4, %v3608_v2  ;;  %v3629_v14 = vsub.s32 (!%p3961_p11), 5, %v3608_v2 }
 0x373   : > { %v3447_v25 = vadd.f32 %v3386_v23, %v487_v18  ;;  %v3446_v26 = vadd.f32 %v2936_v24, %v486_v19  ;;  %v3388_v27 = vpop.f32.mrb[25].mxu1  ;;  %v3633_v15 = vsub.s32 (!%p3961_p11), 6, %v3608_v2  ;;  %v3637_v16 = vsub.s32 (!%p3961_p11), 7, %v3608_v2  ;;  %v3548_v23 = vld [vmem:[#allocation2 + $0x38] sm:$0xff] (!%p3961_p11) }
 0x374   : > { %3509 = vst [vmem:[#allocation2 + $0x120] sm:$0xff] %v3445_v22  ;;  %v3448_v29 = vadd.f32 %v3388_v27, %v488_v21  ;;  %v7013_v17 = vrot.slane (!%p3961_p11), %v3605_v4, %v3609_v5  ;;  %v7015_v18 = vrot.slane (!%p3961_p11), %v3605_v4, %v3613_v7  ;;  %v7017_v19 = vrot.slane (!%p3961_p11), %v3605_v4, %v3617_v9  ;;  %v3546_v21 = vld [vmem:[#allocation2 + $0x28] sm:$0xff] (!%p3961_p11)  ;;  %v3547_v22 = vld [vmem:[#allocation2 + $0x30] sm:$0xff] (!%p3961_p11) }
 0x375   : > { %3511 = vst [vmem:[#allocation2 + $0x130] sm:$0xff] %v3447_v25  ;;  %3510 = vst [vmem:[#allocation2 + $0x128] sm:$0xff] %v3446_v26  ;;  %v2940_v32 = vpop.f32.mrb[26].mxu0  ;;  %v7019_v20 = vrot.slane (!%p3961_p11), %v3605_v4, %v3621_v10  ;;  %v7021_v24 = vrot.slane (!%p3961_p11), %v3605_v4, %v3625_v13  ;;  %v7023_v25 = vrot.slane (!%p3961_p11), %v3605_v4, %v3629_v14  ;;  %v3562_v1 = vld [vmem:[#allocation2 + $0xa8] sm:$0xff] (!%p3961_p11)  ;;  %v3564_v7 = vld [vmem:[#allocation2 + $0xb8] sm:$0xff] (!%p3961_p11) }
 0x376   : > { %3512 = vst [vmem:[#allocation2 + $0x138] sm:$0xff] %v3448_v29  ;;  %v3453_v34 = vadd.f32 %v2940_v32, %v493_v28  ;;  %v3392_v35 = vpop.f32.mrb[26].mxu1  ;;  %v2942_v36 = vpop.f32.mrb[27].mxu0  ;;  %v7025_v26 = vrot.slane (!%p3961_p11), %v3605_v4, %v3633_v15  ;;  %v7027_v27 = vrot.slane (!%p3961_p11), %v3605_v4, %v3637_v16  ;;  %v3647_v28 = vadd.f32 (!%p3961_p11), %v7013_v17, %v3541_v3  ;;  %v3549_v32 = vld [vmem:[#allocation2 + $0x40] sm:$0xff] (!%p3961_p11) }
 0x377   : > { %v3455_v37 = vadd.f32 %v3392_v35, %v495_v30  ;;  %v3454_v38 = vadd.f32 %v2942_v36, %v494_v31  ;;  %v3394_v39 = vpop.f32.mrb[27].mxu1  ;;  %v3648_v29 = vadd.f32 (!%p3961_p11), %v7015_v18, %v3542_v6  ;;  %v3649_v30 = vadd.f32 (!%p3961_p11), %v7017_v19, %v3543_v8  ;;  %v3563_v6 = vld [vmem:[#allocation2 + $0xb0] sm:$0xff] (!%p3961_p11)  ;;  %v3565_v16 = vld [vmem:[#allocation2 + $0xc0] sm:$0xff] (!%p3961_p11) }
 0x378   : > { %3517 = vst [vmem:[#allocation2 + $0x160] sm:$0xff] %v3453_v34  ;;  %v3456_v41 = vadd.f32 %v3394_v39, %v496_v33  ;;  %v3650_v31 = vadd.f32 (!%p3961_p11), %v7019_v20, %v3544_v11  ;;  %v3550_v33 = vld [vmem:[#allocation2 + $0x48] sm:$0xff] (!%p3961_p11)  ;;  %v3551_v34 = vld [vmem:[#allocation2 + $0x50] sm:$0xff] (!%p3961_p11)  ;;  %v3651_v35 = vadd.f32 (!%p3961_p11), %v7021_v24, %v3545_v12  ;;  %v3652_v36 = vadd.f32 (!%p3961_p11), %v7023_v25, %v3546_v21  ;;  %v3552_v39 = vld [vmem:[#allocation2 + $0x58] sm:$0xff] (!%p3961_p11) }
 0x379   : > { %3519 = vst [vmem:[#allocation2 + $0x170] sm:$0xff] %v3455_v37  ;;  %3518 = vst [vmem:[#allocation2 + $0x168] sm:$0xff] %v3454_v38  ;;  %v2946_v44 = vpop.f32.mrb[28].mxu0  ;;  %v3653_v37 = vadd.f32 (!%p3961_p11), %v7025_v26, %v3547_v22  ;;  %v3654_v38 = vadd.f32 (!%p3961_p11), %v7027_v27, %v3548_v23  ;;  %v3566_v21 = vld [vmem:[#allocation2 + $0xc8] sm:$0xff] (!%p3961_p11)  ;;  %v3567_v22 = vld [vmem:[#allocation2 + $0xd0] sm:$0xff] (!%p3961_p11) }
 0x37a   : > { %3520 = vst [vmem:[#allocation2 + $0x178] sm:$0xff] %v3456_v41  ;;  %v3461_v46 = vadd.f32 %v2946_v44, %v501_v40  ;;  %v3398_v47 = vpop.f32.mrb[28].mxu1  ;;  %v2948_v48 = vpop.f32.mrb[29].mxu0  ;;  %v3553_v40 = vld [vmem:[#allocation2 + $0x60] sm:$0xff] (!%p3961_p11)  ;;  %v3554_v41 = vld [vmem:[#allocation2 + $0x68] sm:$0xff] (!%p3961_p11)  ;;  %v3713_v44 = vmax.f32 (!%p3961_p11), %v3649_v30, 0.0  ;;  %v3670_v30 = vadd.f32 (!%p3961_p11), %v7027_v27, %v3564_v7 }
 0x37b   : > { %v3463_v49 = vadd.f32 %v3398_v47, %v503_v42  ;;  %v3462_v50 = vadd.f32 %v2948_v48, %v502_v43  ;;  %v3400_v51 = vpop.f32.mrb[29].mxu1  ;;  %v3711_v42 = vmax.f32 (!%p3961_p11), %v3647_v28, 0.0  ;;  %v3712_v43 = vmax.f32 (!%p3961_p11), %v3648_v29, 0.0  ;;  %v3556_v47 = vld [vmem:[#allocation2 + $0x78] sm:$0xff] (!%p3961_p11) }
 0x37c   : > { %3525 = vst [vmem:[#allocation2 + $0x1a0] sm:$0xff] %v3461_v46  ;;  %v3464_v53 = vadd.f32 %v3400_v51, %v504_v45  ;;  %3540 = sbr.rel (%p3961_p11) target bundleno = 929 (0x3a1), region = 67  ;;  %v3714_v45 = vmax.f32 (!%p3961_p11), %v3650_v31, 0.0  ;;  %v3555_v46 = vld [vmem:[#allocation2 + $0x70] sm:$0xff] (!%p3961_p11)  ;;  %v3715_v48 = vmax.f32 (!%p3961_p11), %v3651_v35, 0.0  ;;  %v3718_v51 = vmax.f32 (!%p3961_p11), %v3654_v38, 0.0 }
 0x37d   : > { %3527 = vst [vmem:[#allocation2 + $0x1b0] sm:$0xff] %v3463_v49  ;;  %3526 = vst [vmem:[#allocation2 + $0x1a8] sm:$0xff] %v3462_v50  ;;  %v2952_v56 = vpop.f32.mrb[30].mxu0  ;;  %v3716_v49 = vmax.f32 (!%p3961_p11), %v3652_v36, 0.0  ;;  %v3717_v50 = vmax.f32 (!%p3961_p11), %v3653_v37, 0.0  ;;  %v3668_v28 = vadd.f32 (!%p3961_p11), %v7023_v25, %v3562_v1  ;;  %v3669_v29 = vadd.f32 (!%p3961_p11), %v7025_v26, %v3563_v6  ;;  %v3568_v31 = vld [vmem:[#allocation2 + $0xd8] sm:$0xff] (!%p3961_p11) }
 0x37e   : > { %3528 = vst [vmem:[#allocation2 + $0x1b8] sm:$0xff] %v3464_v53  ;;  %v3469_v58 = vadd.f32 %v2952_v56, %v509_v52  ;;  %v3404_v59 = vpop.f32.mrb[30].mxu1  ;;  %v2954_v60 = vpop.f32.mrb[31].mxu0  ;;  %3775 = vst [vmem:[%s5748_s25] sm:$0xff] (!%p3961_p11), %v3711_v42  ;;  %v3655_v52 = vadd.f32 (!%p3961_p11), %v7013_v17, %v3549_v32  ;;  %v3656_v53 = vadd.f32 (!%p3961_p11), %v7015_v18, %v3550_v33  ;;  %v3557_v56 = vld [vmem:[#allocation2 + $0x80] sm:$0xff] (!%p3961_p11)  ;;  %v3570_v33 = vld [vmem:[#allocation2 + $0xe8] sm:$0xff] (!%p3961_p11) }
 0x37f   : > { %v3471_v61 = vadd.f32 %v3404_v59, %v511_v54  ;;  %v3470_v62 = vadd.f32 %v2954_v60, %v510_v55  ;;  %v3406_v63 = vpop.f32.mrb[31].mxu1  ;;  %3776 = vst [vmem:[%s5748_s25 + $0x8] sm:$0xff] (!%p3961_p11), %v3712_v43  ;;  %3777 = vst [vmem:[%s5748_s25 + $0x10] sm:$0xff] (!%p3961_p11), %v3713_v44  ;;  %v3657_v54 = vadd.f32 (!%p3961_p11), %v7017_v19, %v3551_v34  ;;  %v3569_v32 = vld [vmem:[#allocation2 + $0xe0] sm:$0xff] (!%p3961_p11)  ;;  %v3571_v38 = vld [vmem:[#allocation2 + $0xf0] sm:$0xff] (!%p3961_p11)  ;;  %v3733_v42 = vmax.f32 (!%p3961_p11), %v3669_v29, 0.0 }
 0x380   : > { %3533 = vst [vmem:[#allocation2 + $0x1e0] sm:$0xff] %v3469_v58  ;;  %v3472_v0 = vadd.f32 %v3406_v63, %v512_v57  ;;  %3778 = vst [vmem:[%s5748_s25 + $0x18] sm:$0xff] (!%p3961_p11), %v3714_v45  ;;  %v3658_v55 = vadd.f32 (!%p3961_p11), %v7019_v20, %v3552_v39  ;;  %v3558_v57 = vld [vmem:[#allocation2 + $0x88] sm:$0xff] (!%p3961_p11)  ;;  %v3559_v58 = vld [vmem:[#allocation2 + $0x90] sm:$0xff] (!%p3961_p11)  ;;  %v3659_v59 = vadd.f32 (!%p3961_p11), %v7021_v24, %v3553_v40  ;;  %v3719_v2 = vmax.f32 (!%p3961_p11), %v3655_v52, 0.0 }
 0x381   : > { %3535 = vst [vmem:[#allocation2 + $0x1f0] sm:$0xff] %v3471_v61  ;;  %3534 = vst [vmem:[#allocation2 + $0x1e8] sm:$0xff] %v3470_v62  ;;  %v3660_v60 = vadd.f32 (!%p3961_p11), %v7023_v25, %v3554_v41  ;;  %v3661_v61 = vadd.f32 (!%p3961_p11), %v7025_v26, %v3555_v46  ;;  %v3662_v62 = vadd.f32 (!%p3961_p11), %v7027_v27, %v3556_v47  ;;  %v3560_v63 = vld [vmem:[#allocation2 + $0x98] sm:$0xff] (!%p3961_p11)  ;;  %v3720_v3 = vmax.f32 (!%p3961_p11), %v3656_v53, 0.0 }
 0x382   : > { %3536 = vst [vmem:[#allocation2 + $0x1f8] sm:$0xff] %v3472_v0  ;;  %3779 = vst [vmem:[%s5748_s25 + $0x20] sm:$0xff] (!%p3961_p11), %v3715_v48  ;;  %v3561_v0 = vld [vmem:[#allocation2 + $0xa0] sm:$0xff] (!%p3961_p11)  ;;  %v3721_v4 = vmax.f32 (!%p3961_p11), %v3657_v54, 0.0  ;;  %v3722_v5 = vmax.f32 (!%p3961_p11), %v3658_v55, 0.0  ;;  %v3723_v8 = vmax.f32 (!%p3961_p11), %v3659_v59, 0.0  ;;  %v3663_v12 = vadd.f32 (!%p3961_p11), %v7013_v17, %v3557_v56 }
 0x383   : > { %3780 = vst [vmem:[%s5748_s25 + $0x28] sm:$0xff] %v3716_v49  ;;  %3781 = vst [vmem:[%s5748_s25 + $0x30] sm:$0xff] %v3717_v50  ;;  %v3724_v9 = vmax.f32 %v3660_v60, 0.0  ;;  %v3725_v10 = vmax.f32 %v3661_v61, 0.0  ;;  %v3726_v11 = vmax.f32 %v3662_v62, 0.0  ;;  %v3664_v13 = vadd.f32 %v7015_v18, %v3558_v57  ;;  %v3572_v39 = vld [vmem:[#allocation2 + $0xf8] sm:$0xff] }
 0x384   : > { %3782 = vst [vmem:[%s5748_s25 + $0x38] sm:$0xff] %v3718_v51  ;;  %3783 = vst [vmem:[%s5748_s25 + $0x40] sm:$0xff] %v3719_v2  ;;  %v3665_v14 = vadd.f32 %v7017_v19, %v3559_v58  ;;  %v3666_v15 = vadd.f32 %v7019_v20, %v3560_v63  ;;  %v3667_v23 = vadd.f32 %v7021_v24, %v3561_v0  ;;  %v3727_v34 = vmax.f32 %v3663_v12, 0.0  ;;  %v3573_v48 = vld [vmem:[#allocation2 + $0x100] sm:$0xff]  ;;  %v3574_v49 = vld [vmem:[#allocation2 + $0x108] sm:$0xff] }
 0x385   : > { %3784 = vst [vmem:[%s5748_s25 + $0x48] sm:$0xff] %v3720_v3  ;;  %3785 = vst [vmem:[%s5748_s25 + $0x50] sm:$0xff] %v3721_v4  ;;  %v3728_v35 = vmax.f32 %v3664_v13, 0.0  ;;  %v3732_v41 = vmax.f32 %v3668_v28, 0.0  ;;  %v3734_v43 = vmax.f32 %v3670_v30, 0.0  ;;  %v3671_v44 = vadd.f32 %v7013_v17, %v3565_v16  ;;  %v3575_v50 = vld [vmem:[#allocation2 + $0x110] sm:$0xff] }
 0x386   : > { %3786 = vst [vmem:[%s5748_s25 + $0x58] sm:$0xff] %v3722_v5  ;;  %3787 = vst [vmem:[%s5748_s25 + $0x60] sm:$0xff] %v3723_v8  ;;  %v3729_v36 = vmax.f32 %v3665_v14, 0.0  ;;  %v3730_v37 = vmax.f32 %v3666_v15, 0.0  ;;  %v3731_v40 = vmax.f32 %v3667_v23, 0.0  ;;  %v3672_v45 = vadd.f32 %v7015_v18, %v3566_v21  ;;  %v3576_v55 = vld [vmem:[#allocation2 + $0x118] sm:$0xff] }
 0x387   : > { %3788 = vst [vmem:[%s5748_s25 + $0x68] sm:$0xff] %v3724_v9  ;;  %3789 = vst [vmem:[%s5748_s25 + $0x70] sm:$0xff] %v3725_v10  ;;  %v3673_v46 = vadd.f32 %v7017_v19, %v3567_v22  ;;  %v3674_v47 = vadd.f32 %v7019_v20, %v3568_v31  ;;  %v3675_v51 = vadd.f32 %v7021_v24, %v3569_v32  ;;  %v3577_v56 = vld [vmem:[#allocation2 + $0x120] sm:$0xff]  ;;  %v3578_v57 = vld [vmem:[#allocation2 + $0x128] sm:$0xff]  ;;  %v3735_v58 = vmax.f32 %v3671_v44, 0.0 }
 0x388   : > { %3790 = vst [vmem:[%s5748_s25 + $0x78] sm:$0xff] %v3726_v11  ;;  %3791 = vst [vmem:[%s5748_s25 + $0x80] sm:$0xff] %v3727_v34  ;;  %v3676_v52 = vadd.f32 %v7023_v25, %v3570_v33  ;;  %v3677_v53 = vadd.f32 %v7025_v26, %v3571_v38  ;;  %v3678_v54 = vadd.f32 %v7027_v27, %v3572_v39  ;;  %v3736_v59 = vmax.f32 %v3672_v45, 0.0  ;;  %v3579_v62 = vld [vmem:[#allocation2 + $0x130] sm:$0xff]  ;;  %v3580_v63 = vld [vmem:[#allocation2 + $0x138] sm:$0xff] }
 0x389   : > { %3792 = vst [vmem:[%s5748_s25 + $0x88] sm:$0xff] %v3728_v35  ;;  %3793 = vst [vmem:[%s5748_s25 + $0x90] sm:$0xff] %v3729_v36  ;;  %v3737_v60 = vmax.f32 %v3673_v46, 0.0  ;;  %v3738_v61 = vmax.f32 %v3674_v47, 0.0  ;;  %v3739_v0 = vmax.f32 %v3675_v51, 0.0  ;;  %v3679_v4 = vadd.f32 %v7013_v17, %v3573_v48  ;;  %v3581_v8 = vld [vmem:[#allocation2 + $0x140] sm:$0xff] }
 0x38a   : > { %3794 = vst [vmem:[%s5748_s25 + $0x98] sm:$0xff] %v3730_v37  ;;  %3795 = vst [vmem:[%s5748_s25 + $0xa0] sm:$0xff] %v3731_v40  ;;  %v3740_v1 = vmax.f32 %v3676_v52, 0.0  ;;  %v3741_v2 = vmax.f32 %v3677_v53, 0.0  ;;  %v3742_v3 = vmax.f32 %v3678_v54, 0.0  ;;  %v3680_v5 = vadd.f32 %v7015_v18, %v3574_v49  ;;  %v3582_v9 = vld [vmem:[#allocation2 + $0x148] sm:$0xff] }
 0x38b   : > { %3796 = vst [vmem:[%s5748_s25 + $0xa8] sm:$0xff] %v3732_v41  ;;  %3797 = vst [vmem:[%s5748_s25 + $0xb0] sm:$0xff] %v3733_v42  ;;  %v3681_v6 = vadd.f32 %v7017_v19, %v3575_v50  ;;  %v3682_v7 = vadd.f32 %v7019_v20, %v3576_v55  ;;  %v3583_v10 = vld [vmem:[#allocation2 + $0x150] sm:$0xff]  ;;  %v3683_v11 = vadd.f32 %v7021_v24, %v3577_v56  ;;  %v3584_v15 = vld [vmem:[#allocation2 + $0x158] sm:$0xff]  ;;  %v3743_v22 = vmax.f32 %v3679_v4, 0.0 }
 0x38c   : > { %3798 = vst [vmem:[%s5748_s25 + $0xb8] sm:$0xff] %v3734_v43  ;;  %3799 = vst [vmem:[%s5748_s25 + $0xc0] sm:$0xff] %v3735_v58  ;;  %v3684_v12 = vadd.f32 %v7023_v25, %v3578_v57  ;;  %v3685_v13 = vadd.f32 %v7025_v26, %v3579_v62  ;;  %v3686_v14 = vadd.f32 %v7027_v27, %v3580_v63  ;;  %v3585_v16 = vld [vmem:[#allocation2 + $0x160] sm:$0xff]  ;;  %v3586_v21 = vld [vmem:[#allocation2 + $0x168] sm:$0xff]  ;;  %v3744_v23 = vmax.f32 %v3680_v5, 0.0 }
 0x38d   : > { %3800 = vst [vmem:[%s5748_s25 + $0xc8] sm:$0xff] %v3736_v59  ;;  %3801 = vst [vmem:[%s5748_s25 + $0xd0] sm:$0xff] %v3737_v60  ;;  %v3745_v28 = vmax.f32 %v3681_v6, 0.0  ;;  %v3746_v29 = vmax.f32 %v3682_v7, 0.0  ;;  %v3587_v30 = vld [vmem:[#allocation2 + $0x170] sm:$0xff]  ;;  %v3588_v31 = vld [vmem:[#allocation2 + $0x178] sm:$0xff]  ;;  %v3687_v36 = vadd.f32 %v7013_v17, %v3581_v8  ;;  %v3688_v37 = vadd.f32 %v7015_v18, %v3582_v9 }
 0x38e   : > { %3802 = vst [vmem:[%s5748_s25 + $0xd8] sm:$0xff] %v3738_v61  ;;  %3803 = vst [vmem:[%s5748_s25 + $0xe0] sm:$0xff] %v3739_v0  ;;  %v3747_v32 = vmax.f32 %v3683_v11, 0.0  ;;  %v3748_v33 = vmax.f32 %v3684_v12, 0.0  ;;  %v3749_v34 = vmax.f32 %v3685_v13, 0.0  ;;  %v3750_v35 = vmax.f32 %v3686_v14, 0.0 }
 0x38f   : > { %3804 = vst [vmem:[%s5748_s25 + $0xe8] sm:$0xff] %v3740_v1  ;;  %3805 = vst [vmem:[%s5748_s25 + $0xf0] sm:$0xff] %v3741_v2  ;;  %v3689_v38 = vadd.f32 %v7017_v19, %v3583_v10  ;;  %v3690_v39 = vadd.f32 %v7019_v20, %v3584_v15  ;;  %v3589_v40 = vld [vmem:[#allocation2 + $0x180] sm:$0xff]  ;;  %v3590_v41 = vld [vmem:[#allocation2 + $0x188] sm:$0xff]  ;;  %v3691_v43 = vadd.f32 %v7021_v24, %v3585_v16  ;;  %v3751_v50 = vmax.f32 %v3687_v36, 0.0 }
 0x390   : > { %3806 = vst [vmem:[%s5748_s25 + $0xf8] sm:$0xff] %v3742_v3  ;;  %3807 = vst [vmem:[%s5748_s25 + $0x100] sm:$0xff] %v3743_v22  ;;  %v3591_v42 = vld [vmem:[#allocation2 + $0x190] sm:$0xff]  ;;  %v3692_v44 = vadd.f32 %v7023_v25, %v3586_v21  ;;  %v3693_v45 = vadd.f32 %v7025_v26, %v3587_v30  ;;  %v3694_v46 = vadd.f32 %v7027_v27, %v3588_v31  ;;  %v3592_v47 = vld [vmem:[#allocation2 + $0x198] sm:$0xff]  ;;  %v3752_v51 = vmax.f32 %v3688_v37, 0.0 }
 0x391   : > { %3808 = vst [vmem:[%s5748_s25 + $0x108] sm:$0xff] %v3744_v23  ;;  %3809 = vst [vmem:[%s5748_s25 + $0x110] sm:$0xff] %v3745_v28  ;;  %v3593_v48 = vld [vmem:[#allocation2 + $0x1a0] sm:$0xff]  ;;  %v3594_v49 = vld [vmem:[#allocation2 + $0x1a8] sm:$0xff]  ;;  %v3753_v52 = vmax.f32 %v3689_v38, 0.0  ;;  %v3754_v53 = vmax.f32 %v3690_v39, 0.0  ;;  %v3695_v60 = vadd.f32 %v7013_v17, %v3589_v40  ;;  %v3696_v61 = vadd.f32 %v7015_v18, %v3590_v41 }
 0x392   : > { %3810 = vst [vmem:[%s5748_s25 + $0x118] sm:$0xff] %v3746_v29  ;;  %3811 = vst [vmem:[%s5748_s25 + $0x120] sm:$0xff] %v3747_v32  ;;  %v3595_v54 = vld [vmem:[#allocation2 + $0x1b0] sm:$0xff]  ;;  %v3596_v55 = vld [vmem:[#allocation2 + $0x1b8] sm:$0xff]  ;;  %v3755_v56 = vmax.f32 %v3691_v43, 0.0  ;;  %v3756_v57 = vmax.f32 %v3692_v44, 0.0  ;;  %v3697_v62 = vadd.f32 %v7017_v19, %v3591_v42  ;;  %v3698_v63 = vadd.f32 %v7019_v20, %v3592_v47 }
 0x393   : > { %3812 = vst [vmem:[%s5748_s25 + $0x128] sm:$0xff] %v3748_v33  ;;  %3813 = vst [vmem:[%s5748_s25 + $0x130] sm:$0xff] %v3749_v34  ;;  %v3757_v58 = vmax.f32 %v3693_v45, 0.0  ;;  %v3758_v59 = vmax.f32 %v3694_v46, 0.0  ;;  %v3597_v0 = vld [vmem:[#allocation2 + $0x1c0] sm:$0xff]  ;;  %v3598_v1 = vld [vmem:[#allocation2 + $0x1c8] sm:$0xff]  ;;  %v3699_v3 = vadd.f32 %v7021_v24, %v3593_v48  ;;  %v3700_v4 = vadd.f32 %v7023_v25, %v3594_v49 }
 0x394   : > { %3814 = vst [vmem:[%s5748_s25 + $0x138] sm:$0xff] %v3750_v35  ;;  %3815 = vst [vmem:[%s5748_s25 + $0x140] sm:$0xff] %v3751_v50  ;;  %v3599_v2 = vld [vmem:[#allocation2 + $0x1d0] sm:$0xff]  ;;  %v3701_v5 = vadd.f32 %v7025_v26, %v3595_v54  ;;  %v3702_v6 = vadd.f32 %v7027_v27, %v3596_v55  ;;  %v3600_v7 = vld [vmem:[#allocation2 + $0x1d8] sm:$0xff]  ;;  %v3759_v10 = vmax.f32 %v3695_v60, 0.0  ;;  %v3760_v11 = vmax.f32 %v3696_v61, 0.0 }
 0x395   : > { %3816 = vst [vmem:[%s5748_s25 + $0x148] sm:$0xff] %v3752_v51  ;;  %3817 = vst [vmem:[%s5748_s25 + $0x150] sm:$0xff] %v3753_v52  ;;  %v3601_v8 = vld [vmem:[#allocation2 + $0x1e0] sm:$0xff]  ;;  %v3602_v9 = vld [vmem:[#allocation2 + $0x1e8] sm:$0xff]  ;;  %v3761_v12 = vmax.f32 %v3697_v62, 0.0  ;;  %v3762_v13 = vmax.f32 %v3698_v63, 0.0  ;;  %v3703_v28 = vadd.f32 %v7013_v17, %v3597_v0  ;;  %v3704_v29 = vadd.f32 %v7015_v18, %v3598_v1 }
 0x396   : > { %3818 = vst [vmem:[%s5748_s25 + $0x158] sm:$0xff] %v3754_v53  ;;  %3819 = vst [vmem:[%s5748_s25 + $0x160] sm:$0xff] %v3755_v56  ;;  %v3603_v14 = vld [vmem:[#allocation2 + $0x1f0] sm:$0xff]  ;;  %v3604_v15 = vld [vmem:[#allocation2 + $0x1f8] sm:$0xff]  ;;  %v3763_v16 = vmax.f32 %v3699_v3, 0.0  ;;  %v3764_v21 = vmax.f32 %v3700_v4, 0.0  ;;  %v3705_v30 = vadd.f32 %v7017_v19, %v3599_v2  ;;  %v3706_v31 = vadd.f32 %v7019_v20, %v3600_v7 }
 0x397   : > { %3820 = vst [vmem:[%s5748_s25 + $0x168] sm:$0xff] %v3756_v57  ;;  %3821 = vst [vmem:[%s5748_s25 + $0x170] sm:$0xff] %v3757_v58  ;;  %v3765_v22 = vmax.f32 %v3701_v5, 0.0  ;;  %v3766_v23 = vmax.f32 %v3702_v6, 0.0  ;;  %v3707_v32 = vadd.f32 %v7021_v24, %v3601_v8  ;;  %v3708_v33 = vadd.f32 %v7023_v25, %v3602_v9 }
 0x398   : > { %3822 = vst [vmem:[%s5748_s25 + $0x178] sm:$0xff] %v3758_v59  ;;  %3823 = vst [vmem:[%s5748_s25 + $0x180] sm:$0xff] %v3759_v10  ;;  %v3709_v17 = vadd.f32 %v7025_v26, %v3603_v14  ;;  %v3710_v18 = vadd.f32 %v7027_v27, %v3604_v15  ;;  %v3767_v19 = vmax.f32 %v3703_v28, 0.0  ;;  %v3768_v20 = vmax.f32 %v3704_v29, 0.0 }
 0x399   : > { %3824 = vst [vmem:[%s5748_s25 + $0x188] sm:$0xff] %v3760_v11  ;;  %3825 = vst [vmem:[%s5748_s25 + $0x190] sm:$0xff] %v3761_v12  ;;  %v3769_v34 = vmax.f32 %v3705_v30, 0.0  ;;  %v3770_v35 = vmax.f32 %v3706_v31, 0.0  ;;  %v3771_v36 = vmax.f32 %v3707_v32, 0.0  ;;  %v3772_v37 = vmax.f32 %v3708_v33, 0.0 }
 0x39a   : > { %3826 = vst [vmem:[%s5748_s25 + $0x198] sm:$0xff] %v3762_v13  ;;  %3827 = vst [vmem:[%s5748_s25 + $0x1a0] sm:$0xff] %v3763_v16  ;;  %v3773_v38 = vmax.f32 %v3709_v17, 0.0  ;;  %v3774_v39 = vmax.f32 %v3710_v18, 0.0 }
 0x39b   : > { %3828 = vst [vmem:[%s5748_s25 + $0x1a8] sm:$0xff] %v3764_v21  ;;  %3829 = vst [vmem:[%s5748_s25 + $0x1b0] sm:$0xff] %v3765_v22 }
 0x39c   : > { %3830 = vst [vmem:[%s5748_s25 + $0x1b8] sm:$0xff] %v3766_v23  ;;  %3831 = vst [vmem:[%s5748_s25 + $0x1c0] sm:$0xff] %v3767_v19 }
 0x39d   : > { %3832 = vst [vmem:[%s5748_s25 + $0x1c8] sm:$0xff] %v3768_v20  ;;  %3833 = vst [vmem:[%s5748_s25 + $0x1d0] sm:$0xff] %v3769_v34 }
 0x39e   : > { %3834 = vst [vmem:[%s5748_s25 + $0x1d8] sm:$0xff] %v3770_v35  ;;  %3835 = vst [vmem:[%s5748_s25 + $0x1e0] sm:$0xff] %v3771_v36 }
 0x39f   : > { %3836 = vst [vmem:[%s5748_s25 + $0x1e8] sm:$0xff] %v3772_v37  ;;  %3837 = vst [vmem:[%s5748_s25 + $0x1f0] sm:$0xff] %v3773_v38 }
 0x3a0   : > { %3838 = vst [vmem:[%s5748_s25 + $0x1f8] sm:$0xff] %v3774_v39 }
 0x3a1 PF: > { %s16_s21 = sadd.s32 1, %s5443_s21   ;;  %s7194_s12 = smov %s5411_s13 }
 0x3a2   : > { %p13_p7 = scmp.ge.s32.totalorder %s16_s21, 10   ;;  %s7195_s13 = smov %s5415_s14 }
 0x3a3   : > { %s7196_s14 = smov %s5539_s29  ;;  %s7197_s15 = smov %s5423_s16 }
 0x3a4   : > { %s7198_s16 = smov %s5552_s6  ;;  %s7199_s17 = smov %s5435_s19 }
 0x3a5   : > { %s7200_s18 = smov %s5439_s20  ;;  %s7201_s19 = smov %s7204_s23 }
 0x3a6   : > { %s7202_s20 = smov %s7208_s24  ;;  %15 = sbr.rel (!%p13_p7) target bundleno = 6 (0x6), region = 111 }
 0x3ad   :  { %3863 = vsyncpa [#allocation5], 1 }
 0x3ae   :  { %3865 = vsyncpa [#allocation5 + $0x1], 1 }

// kernel: local_adapt_forward.3
= control target key start
LH: loop header
LB: loop body
LE: loop exit
PB: predicated region body
PF: predicated region fallthrough
CT: control target
= control target key end

     0   :  { %s3513_s12 = smov 0   ;;  %s3515_s13 = smov 0   ;;  %s5366_s0 = inlined_call_operand.vmem [shape: f32[512,1024], index: 0, kind: input, shape index: {}]   ;;  %s5367_s1 = inlined_call_operand.vmem [shape: f32[1024,512], index: 1, kind: input, shape index: {}]   ;;  %s5368_s2 = inlined_call_operand.vmem [shape: f32[1,512], index: 2, kind: input, shape index: {}]   ;;  %s5369_s3 = inlined_call_operand.vmem [shape: f32[512,512], index: 3, kind: output, shape index: {}]  }
   0x1   :  { %s3517_s14 = smov 0  }
   0x2 LB: > { %s25_s15 = sadd.s32 1, %s3487_s13  ;;  %p2730_p0 = scmp.ge.s32.totalorder %s3491_s14, 1  ;;  %s3491_s14 = sphi %s3517_s14, %s13_s14   ;;  %s3487_s13 = sphi %s3515_s13, %s5372_s13   ;;  %s3483_s12 = sphi %s3513_s12, %s5371_s12  }
   0x3   : > { %p27_p1 = scmp.ge.s32.totalorder %s25_s15, 4  ;;  %p170_p2 = scmp.lt.s32.totalorder %s3491_s14, 5 }
   0x5   : > { %s5374_s15 = smov (%p27_p1, %s25_s15), 0  ;;  %p171_p3 = pnand %p2730_p0, %p170_p2 }
   0x6   : > { %v493_v0 = vld [vmem:[%s5367_s1 + $0x8] sm:$0xff] (!%p171_p3)  ;;  %v495_v2 = vld [vmem:[%s5367_s1 + $0x18] sm:$0xff] (!%p171_p3)  ;;  %v492_v5 = vld [vmem:[%s5367_s1] sm:$0xff] (!%p171_p3)  ;;  %s2731_s27 = sshll.u32 (!%p171_p3), %s3483_s12, 4 }
   0x7   : > { %174 = sbr.rel (%p171_p3) target bundleno = 543 (0x21f), region = 32  ;;  %v497_v1 = vld [vmem:[%s5367_s1 + $0x28] sm:$0xff] (!%p171_p3)  ;;  %v499_v4 = vld [vmem:[%s5367_s1 + $0x38] sm:$0xff] (!%p171_p3)  ;;  %v496_v6 = vld [vmem:[%s5367_s1 + $0x20] sm:$0xff] (!%p171_p3)  ;;  %p3738_p4 = scmp.lt.s32.totalorder (!%p171_p3), %s2731_s27, 63 }
   0x8   : > { %v2741_v3 = vpack.c.bf16 (!%p171_p3), %v497_v1, %v493_v0  ;;  %v2997_v7 = vpack.c.bf16 (!%p171_p3), %v499_v4, %v495_v2  ;;  %v2743_v8 = vpack.c.bf16 (!%p171_p3), %v496_v6, %v492_v5  ;;  %v494_v9 = vld [vmem:[%s5367_s1 + $0x10] sm:$0xff] (!%p171_p3)  ;;  %v501_v11 = vld [vmem:[%s5367_s1 + $0x48] sm:$0xff] (!%p171_p3)  ;;  %v503_v14 = vld [vmem:[%s5367_s1 + $0x58] sm:$0xff] (!%p171_p3) }
   0x9   : > { %v498_v10 = vld [vmem:[%s5367_s1 + $0x30] sm:$0xff] (!%p171_p3)  ;;  %v505_v13 = vld [vmem:[%s5367_s1 + $0x68] sm:$0xff] (!%p171_p3)  ;;  %v507_v15 = vld [vmem:[%s5367_s1 + $0x78] sm:$0xff] (!%p171_p3) }
   0xa   : > { %2742 = vmatprep.subr.bf16.mxu0 (!%p171_p3), %v2741_v3  ;;  %v2999_v12 = vpack.c.bf16 (!%p171_p3), %v498_v10, %v494_v9  ;;  %2998 = vmatprep.subr.bf16.mxu1 (!%p171_p3), %v2997_v7  ;;  %v2745_v16 = vpack.c.bf16 (!%p171_p3), %v505_v13, %v501_v11  ;;  %v3001_v17 = vpack.c.bf16 (!%p171_p3), %v507_v15, %v503_v14  ;;  %v500_v18 = vld [vmem:[%s5367_s1 + $0x40] sm:$0xff] (!%p171_p3)  ;;  %v502_v20 = vld [vmem:[%s5367_s1 + $0x50] sm:$0xff] (!%p171_p3)  ;;  %v509_v23 = vld [vmem:[%s5367_s1 + $0x88] sm:$0xff] (!%p171_p3) }
   0xb   : > { %2744 = vmatpush1.bf16.msra.mxu0 (!%p171_p3), %v2743_v8  ;;  %v504_v19 = vld [vmem:[%s5367_s1 + $0x60] sm:$0xff] (!%p171_p3)  ;;  %v506_v22 = vld [vmem:[%s5367_s1 + $0x70] sm:$0xff] (!%p171_p3)  ;;  %v513_v24 = vld [vmem:[%s5367_s1 + $0xa8] sm:$0xff] (!%p171_p3) }
   0xc   : > { %3000 = vmatpush1.bf16.msra.mxu1 (!%p171_p3), %v2999_v12  ;;  %v2747_v21 = vpack.c.bf16 (!%p171_p3), %v504_v19, %v500_v18  ;;  %2746 = vmatprep.subr.bf16.mxu0 (!%p171_p3), %v2745_v16  ;;  %v3003_v25 = vpack.c.bf16 (!%p171_p3), %v506_v22, %v502_v20  ;;  %v2749_v26 = vpack.c.bf16 (!%p171_p3), %v513_v24, %v509_v23  ;;  %v511_v27 = vld [vmem:[%s5367_s1 + $0x98] sm:$0xff] (!%p171_p3)  ;;  %v508_v29 = vld [vmem:[%s5367_s1 + $0x80] sm:$0xff] (!%p171_p3)  ;;  %v510_v32 = vld [vmem:[%s5367_s1 + $0x90] sm:$0xff] (!%p171_p3) }
   0xd   : > { %3002 = vmatprep.subr.bf16.mxu1 (!%p171_p3), %v3001_v17  ;;  %v515_v28 = vld [vmem:[%s5367_s1 + $0xb8] sm:$0xff] (!%p171_p3)  ;;  %v512_v31 = vld [vmem:[%s5367_s1 + $0xa0] sm:$0xff] (!%p171_p3)  ;;  %v514_v33 = vld [vmem:[%s5367_s1 + $0xb0] sm:$0xff] (!%p171_p3) }
   0xe   : > { %v3005_v30 = vpack.c.bf16 %v515_v28, %v511_v27  ;;  %v2751_v34 = vpack.c.bf16 %v512_v31, %v508_v29  ;;  %v517_v35 = vld [vmem:[%s5367_s1 + $0xc8] sm:$0xff]  ;;  %v519_v37 = vld [vmem:[%s5367_s1 + $0xd8] sm:$0xff]  ;;  %v3007_v38 = vpack.c.bf16 %v514_v33, %v510_v32  ;;  %v516_v41 = vld [vmem:[%s5367_s1 + $0xc0] sm:$0xff]  ;;  %s5376_s27 = smov (!%p3738_p4, %s2731_s27), 63 }
   0xf   : > { %2748 = vmatpush1.bf16.msra.mxu0 %v2747_v21  ;;  %v521_v36 = vld [vmem:[%s5367_s1 + $0xe8] sm:$0xff]  ;;  %v523_v40 = vld [vmem:[%s5367_s1 + $0xf8] sm:$0xff]  ;;  %v520_v42 = vld [vmem:[%s5367_s1 + $0xe0] sm:$0xff]  ;;  %s2739_s24 = sshll.u32 %s5376_s27, 6 }
  0x10   : > { %3004 = vmatpush1.bf16.msra.mxu1 %v3003_v25  ;;  %2750 = vmatprep.subr.bf16.mxu0 %v2749_v26  ;;  %v2753_v39 = vpack.c.bf16 %v521_v36, %v517_v35  ;;  %v3009_v43 = vpack.c.bf16 %v523_v40, %v519_v37  ;;  %v518_v44 = vld [vmem:[%s5367_s1 + $0xd0] sm:$0xff]  ;;  %v525_v46 = vld [vmem:[%s5367_s1 + $0x108] sm:$0xff]  ;;  %v527_v48 = vld [vmem:[%s5367_s1 + $0x118] sm:$0xff]  ;;  %v2755_v50 = vpack.c.bf16 %v520_v42, %v516_v41  ;;  %s3822_s20 = scalar_lea.vmem %s5366_s0, %s2739_s24  ;;  %s2740_s24 = sshll.u32 %s5376_s27, 5 }
  0x11   : > { %3006 = vmatprep.subr.bf16.mxu1 %v3005_v30  ;;  %v522_v45 = vld [vmem:[%s5367_s1 + $0xf0] sm:$0xff]  ;;  %v529_v47 = vld [vmem:[%s5367_s1 + $0x128] sm:$0xff]  ;;  %v531_v49 = vld [vmem:[%s5367_s1 + $0x138] sm:$0xff]  ;;  %s5227_s30 = scalar_lea.vmem %s5369_s3, %s2740_s24 }
  0x12   : > { %v3011_v51 = vpack.c.bf16 %v522_v45, %v518_v44  ;;  %v2757_v52 = vpack.c.bf16 %v529_v47, %v525_v46  ;;  %v524_v53 = vld [vmem:[%s5367_s1 + $0x100] sm:$0xff]  ;;  %v526_v55 = vld [vmem:[%s5367_s1 + $0x110] sm:$0xff]  ;;  %v3013_v56 = vpack.c.bf16 %v531_v49, %v527_v48  ;;  %v533_v58 = vld [vmem:[%s5367_s1 + $0x148] sm:$0xff] }
  0x13   : > { %2752 = vmatpush1.bf16.msra.mxu0 %v2751_v34  ;;  %v528_v54 = vld [vmem:[%s5367_s1 + $0x120] sm:$0xff]  ;;  %v530_v57 = vld [vmem:[%s5367_s1 + $0x130] sm:$0xff]  ;;  %v537_v59 = vld [vmem:[%s5367_s1 + $0x168] sm:$0xff] }
  0x14   : > { %3008 = vmatpush1.bf16.msra.mxu1 %v3007_v38  ;;  %2754 = vmatprep.subr.bf16.mxu0 %v2753_v39  ;;  %v535_v60 = vld [vmem:[%s5367_s1 + $0x158] sm:$0xff]  ;;  %v2759_v62 = vpack.c.bf16 %v528_v54, %v524_v53  ;;  %v3015_v63 = vpack.c.bf16 %v530_v57, %v526_v55  ;;  %v2761_v0 = vpack.c.bf16 %v537_v59, %v533_v58  ;;  %v532_v1 = vld [vmem:[%s5367_s1 + $0x140] sm:$0xff]  ;;  %v534_v3 = vld [vmem:[%s5367_s1 + $0x150] sm:$0xff] }
  0x15   : > { %3010 = vmatprep.subr.bf16.mxu1 %v3009_v43  ;;  %v539_v61 = vld [vmem:[%s5367_s1 + $0x178] sm:$0xff]  ;;  %v536_v2 = vld [vmem:[%s5367_s1 + $0x160] sm:$0xff]  ;;  %v538_v5 = vld [vmem:[%s5367_s1 + $0x170] sm:$0xff] }
  0x16   : > { %v3017_v4 = vpack.c.bf16 %v539_v61, %v535_v60  ;;  %v541_v6 = vld [vmem:[%s5367_s1 + $0x188] sm:$0xff]  ;;  %v543_v8 = vld [vmem:[%s5367_s1 + $0x198] sm:$0xff]  ;;  %v2763_v10 = vpack.c.bf16 %v536_v2, %v532_v1  ;;  %v3019_v11 = vpack.c.bf16 %v538_v5, %v534_v3  ;;  %v540_v13 = vld [vmem:[%s5367_s1 + $0x180] sm:$0xff] }
  0x17   : > { %2756 = vmatpush1.bf16.msra.mxu0 %v2755_v50  ;;  %v545_v7 = vld [vmem:[%s5367_s1 + $0x1a8] sm:$0xff]  ;;  %v547_v9 = vld [vmem:[%s5367_s1 + $0x1b8] sm:$0xff]  ;;  %v544_v14 = vld [vmem:[%s5367_s1 + $0x1a0] sm:$0xff] }
  0x18   : > { %3012 = vmatpush1.bf16.msra.mxu1 %v3011_v51  ;;  %2758 = vmatprep.subr.bf16.mxu0 %v2757_v52  ;;  %v2765_v12 = vpack.c.bf16 %v545_v7, %v541_v6  ;;  %v542_v15 = vld [vmem:[%s5367_s1 + $0x190] sm:$0xff]  ;;  %v3021_v16 = vpack.c.bf16 %v547_v9, %v543_v8  ;;  %v549_v18 = vld [vmem:[%s5367_s1 + $0x1c8] sm:$0xff]  ;;  %v551_v20 = vld [vmem:[%s5367_s1 + $0x1d8] sm:$0xff]  ;;  %v2767_v22 = vpack.c.bf16 %v544_v14, %v540_v13 }
  0x19   : > { %3014 = vmatprep.subr.bf16.mxu1 %v3013_v56  ;;  %v546_v17 = vld [vmem:[%s5367_s1 + $0x1b0] sm:$0xff]  ;;  %v553_v19 = vld [vmem:[%s5367_s1 + $0x1e8] sm:$0xff]  ;;  %v555_v21 = vld [vmem:[%s5367_s1 + $0x1f8] sm:$0xff] }
  0x1a   : > { %v3023_v23 = vpack.c.bf16 %v546_v17, %v542_v15  ;;  %v2769_v24 = vpack.c.bf16 %v553_v19, %v549_v18  ;;  %v548_v25 = vld [vmem:[%s5367_s1 + $0x1c0] sm:$0xff]  ;;  %v550_v27 = vld [vmem:[%s5367_s1 + $0x1d0] sm:$0xff]  ;;  %v3025_v28 = vpack.c.bf16 %v555_v21, %v551_v20  ;;  %v557_v30 = vld [vmem:[%s5367_s1 + $0x208] sm:$0xff] }
  0x1b   : > { %2760 = vmatpush1.bf16.msra.mxu0 %v2759_v62  ;;  %v552_v26 = vld [vmem:[%s5367_s1 + $0x1e0] sm:$0xff]  ;;  %v554_v29 = vld [vmem:[%s5367_s1 + $0x1f0] sm:$0xff]  ;;  %v561_v31 = vld [vmem:[%s5367_s1 + $0x228] sm:$0xff] }
  0x1c   : > { %3016 = vmatpush1.bf16.msra.mxu1 %v3015_v63  ;;  %2762 = vmatprep.subr.bf16.mxu0 %v2761_v0  ;;  %v559_v32 = vld [vmem:[%s5367_s1 + $0x218] sm:$0xff]  ;;  %v2771_v34 = vpack.c.bf16 %v552_v26, %v548_v25  ;;  %v3027_v35 = vpack.c.bf16 %v554_v29, %v550_v27  ;;  %v2773_v36 = vpack.c.bf16 %v561_v31, %v557_v30  ;;  %v556_v37 = vld [vmem:[%s5367_s1 + $0x200] sm:$0xff]  ;;  %v558_v39 = vld [vmem:[%s5367_s1 + $0x210] sm:$0xff] }
  0x1d   : > { %3018 = vmatprep.subr.bf16.mxu1 %v3017_v4  ;;  %v563_v33 = vld [vmem:[%s5367_s1 + $0x238] sm:$0xff]  ;;  %v560_v38 = vld [vmem:[%s5367_s1 + $0x220] sm:$0xff]  ;;  %v562_v41 = vld [vmem:[%s5367_s1 + $0x230] sm:$0xff] }
  0x1e   : > { %v3029_v40 = vpack.c.bf16 %v563_v33, %v559_v32  ;;  %v565_v42 = vld [vmem:[%s5367_s1 + $0x248] sm:$0xff]  ;;  %v567_v44 = vld [vmem:[%s5367_s1 + $0x258] sm:$0xff]  ;;  %v2775_v46 = vpack.c.bf16 %v560_v38, %v556_v37  ;;  %v3031_v47 = vpack.c.bf16 %v562_v41, %v558_v39  ;;  %v564_v49 = vld [vmem:[%s5367_s1 + $0x240] sm:$0xff] }
  0x1f   : > { %2764 = vmatpush1.bf16.msra.mxu0 %v2763_v10  ;;  %v569_v43 = vld [vmem:[%s5367_s1 + $0x268] sm:$0xff]  ;;  %v571_v45 = vld [vmem:[%s5367_s1 + $0x278] sm:$0xff]  ;;  %v568_v50 = vld [vmem:[%s5367_s1 + $0x260] sm:$0xff] }
  0x20   : > { %3020 = vmatpush1.bf16.msra.mxu1 %v3019_v11  ;;  %2766 = vmatprep.subr.bf16.mxu0 %v2765_v12  ;;  %v2777_v48 = vpack.c.bf16 %v569_v43, %v565_v42  ;;  %v566_v51 = vld [vmem:[%s5367_s1 + $0x250] sm:$0xff]  ;;  %v3033_v52 = vpack.c.bf16 %v571_v45, %v567_v44  ;;  %v573_v54 = vld [vmem:[%s5367_s1 + $0x288] sm:$0xff]  ;;  %v575_v56 = vld [vmem:[%s5367_s1 + $0x298] sm:$0xff]  ;;  %v2779_v58 = vpack.c.bf16 %v568_v50, %v564_v49 }
  0x21   : > { %3022 = vmatprep.subr.bf16.mxu1 %v3021_v16  ;;  %v570_v53 = vld [vmem:[%s5367_s1 + $0x270] sm:$0xff]  ;;  %v577_v55 = vld [vmem:[%s5367_s1 + $0x2a8] sm:$0xff]  ;;  %v579_v57 = vld [vmem:[%s5367_s1 + $0x2b8] sm:$0xff] }
  0x22   : > { %v3035_v59 = vpack.c.bf16 %v570_v53, %v566_v51  ;;  %v2781_v60 = vpack.c.bf16 %v577_v55, %v573_v54  ;;  %v572_v61 = vld [vmem:[%s5367_s1 + $0x280] sm:$0xff]  ;;  %v574_v63 = vld [vmem:[%s5367_s1 + $0x290] sm:$0xff]  ;;  %v3037_v0 = vpack.c.bf16 %v579_v57, %v575_v56  ;;  %v581_v2 = vld [vmem:[%s5367_s1 + $0x2c8] sm:$0xff] }
  0x23   : > { %2768 = vmatpush1.bf16.msra.mxu0 %v2767_v22  ;;  %v576_v62 = vld [vmem:[%s5367_s1 + $0x2a0] sm:$0xff]  ;;  %v578_v1 = vld [vmem:[%s5367_s1 + $0x2b0] sm:$0xff]  ;;  %v585_v3 = vld [vmem:[%s5367_s1 + $0x2e8] sm:$0xff] }
  0x24   : > { %3024 = vmatpush1.bf16.msra.mxu1 %v3023_v23  ;;  %2770 = vmatprep.subr.bf16.mxu0 %v2769_v24  ;;  %v583_v4 = vld [vmem:[%s5367_s1 + $0x2d8] sm:$0xff]  ;;  %v2783_v6 = vpack.c.bf16 %v576_v62, %v572_v61  ;;  %v580_v7 = vld [vmem:[%s5367_s1 + $0x2c0] sm:$0xff]  ;;  %v3039_v8 = vpack.c.bf16 %v578_v1, %v574_v63  ;;  %v2785_v9 = vpack.c.bf16 %v585_v3, %v581_v2  ;;  %v582_v11 = vld [vmem:[%s5367_s1 + $0x2d0] sm:$0xff] }
  0x25   : > { %3026 = vmatprep.subr.bf16.mxu1 %v3025_v28  ;;  %v587_v5 = vld [vmem:[%s5367_s1 + $0x2f8] sm:$0xff]  ;;  %v584_v10 = vld [vmem:[%s5367_s1 + $0x2e0] sm:$0xff]  ;;  %v586_v12 = vld [vmem:[%s5367_s1 + $0x2f0] sm:$0xff] }
  0x26   : > { %v3041_v13 = vpack.c.bf16 %v587_v5, %v583_v4  ;;  %v589_v14 = vld [vmem:[%s5367_s1 + $0x308] sm:$0xff]  ;;  %v591_v17 = vld [vmem:[%s5367_s1 + $0x318] sm:$0xff]  ;;  %v2787_v19 = vpack.c.bf16 %v584_v10, %v580_v7  ;;  %v3043_v20 = vpack.c.bf16 %v586_v12, %v582_v11  ;;  %v588_v22 = vld [vmem:[%s5367_s1 + $0x300] sm:$0xff] }
  0x27   : > { %2772 = vmatpush1.bf16.msra.mxu0 %v2771_v34  ;;  %v593_v15 = vld [vmem:[%s5367_s1 + $0x328] sm:$0xff]  ;;  %v595_v18 = vld [vmem:[%s5367_s1 + $0x338] sm:$0xff]  ;;  %v592_v23 = vld [vmem:[%s5367_s1 + $0x320] sm:$0xff] }
  0x28   : > { %3028 = vmatpush1.bf16.msra.mxu1 %v3027_v35  ;;  %2774 = vmatprep.subr.bf16.mxu0 %v2773_v36  ;;  %v365_v16 = vld [vmem:[%s3822_s20 + $0x8] sm:$0xff]  ;;  %v2789_v21 = vpack.c.bf16 %v593_v15, %v589_v14  ;;  %v590_v24 = vld [vmem:[%s5367_s1 + $0x310] sm:$0xff]  ;;  %v3045_v25 = vpack.c.bf16 %v595_v18, %v591_v17  ;;  %v599_v29 = vld [vmem:[%s5367_s1 + $0x358] sm:$0xff]  ;;  %v2791_v31 = vpack.c.bf16 %v592_v23, %v588_v22 }
  0x29   : > { %3030 = vmatprep.subr.bf16.mxu1 %v3029_v40  ;;  %1068 = vmatprep.mubr.f32.mxu0 %v365_v16  ;;  %v594_v26 = vld [vmem:[%s5367_s1 + $0x330] sm:$0xff]  ;;  %v597_v27 = vld [vmem:[%s5367_s1 + $0x348] sm:$0xff]  ;;  %v603_v30 = vld [vmem:[%s5367_s1 + $0x378] sm:$0xff] }
  0x2a   : > { %1712 = vmatprep.mubr.f32.mxu1 %v365_v16  ;;  %v601_v28 = vld [vmem:[%s5367_s1 + $0x368] sm:$0xff]  ;;  %v3047_v32 = vpack.c.bf16 %v594_v26, %v590_v24  ;;  %v596_v34 = vld [vmem:[%s5367_s1 + $0x340] sm:$0xff]  ;;  %v598_v36 = vld [vmem:[%s5367_s1 + $0x350] sm:$0xff]  ;;  %v3049_v37 = vpack.c.bf16 %v603_v30, %v599_v29 }
  0x2b   : > { %2776 = vmatpush1.bf16.msra.mxu0 %v2775_v46  ;;  %v2793_v33 = vpack.c.bf16 %v601_v28, %v597_v27  ;;  %v600_v35 = vld [vmem:[%s5367_s1 + $0x360] sm:$0xff]  ;;  %v602_v38 = vld [vmem:[%s5367_s1 + $0x370] sm:$0xff]  ;;  %v605_v39 = vld [vmem:[%s5367_s1 + $0x388] sm:$0xff] }
  0x2c   : > { %3032 = vmatpush1.bf16.msra.mxu1 %v3031_v47  ;;  %2778 = vmatprep.subr.bf16.mxu0 %v2777_v48  ;;  %v609_v40 = vld [vmem:[%s5367_s1 + $0x3a8] sm:$0xff]  ;;  %v607_v41 = vld [vmem:[%s5367_s1 + $0x398] sm:$0xff]  ;;  %v2795_v43 = vpack.c.bf16 %v600_v35, %v596_v34  ;;  %v3051_v44 = vpack.c.bf16 %v602_v38, %v598_v36  ;;  %v604_v46 = vld [vmem:[%s5367_s1 + $0x380] sm:$0xff] }
  0x2d   : > { %3034 = vmatprep.subr.bf16.mxu1 %v3033_v52  ;;  %v611_v42 = vld [vmem:[%s5367_s1 + $0x3b8] sm:$0xff]  ;;  %v2797_v45 = vpack.c.bf16 %v609_v40, %v605_v39  ;;  %v608_v47 = vld [vmem:[%s5367_s1 + $0x3a0] sm:$0xff]  ;;  %v606_v48 = vld [vmem:[%s5367_s1 + $0x390] sm:$0xff] }
  0x2e   : > { %v3053_v49 = vpack.c.bf16 %v611_v42, %v607_v41  ;;  %v610_v50 = vld [vmem:[%s5367_s1 + $0x3b0] sm:$0xff]  ;;  %v613_v51 = vld [vmem:[%s5367_s1 + $0x3c8] sm:$0xff]  ;;  %v615_v53 = vld [vmem:[%s5367_s1 + $0x3d8] sm:$0xff]  ;;  %v2799_v55 = vpack.c.bf16 %v608_v47, %v604_v46 }
  0x2f   : > { %2780 = vmatpush1.bf16.msra.mxu0 %v2779_v58  ;;  %v617_v52 = vld [vmem:[%s5367_s1 + $0x3e8] sm:$0xff]  ;;  %v619_v54 = vld [vmem:[%s5367_s1 + $0x3f8] sm:$0xff]  ;;  %v3055_v56 = vpack.c.bf16 %v610_v50, %v606_v48  ;;  %v612_v58 = vld [vmem:[%s5367_s1 + $0x3c0] sm:$0xff] }
  0x30   : > { %3036 = vmatpush1.bf16.msra.mxu1 %v3035_v59  ;;  %2782 = vmatprep.subr.bf16.mxu0 %v2781_v60  ;;  %v2801_v57 = vpack.c.bf16 %v617_v52, %v613_v51  ;;  %v616_v59 = vld [vmem:[%s5367_s1 + $0x3e0] sm:$0xff]  ;;  %v614_v60 = vld [vmem:[%s5367_s1 + $0x3d0] sm:$0xff]  ;;  %v3057_v61 = vpack.c.bf16 %v619_v54, %v615_v53  ;;  %v621_v63 = vld [vmem:[%s5367_s1 + $0x408] sm:$0xff] }
  0x31   : > { %3038 = vmatprep.subr.bf16.mxu1 %v3037_v0  ;;  %v618_v62 = vld [vmem:[%s5367_s1 + $0x3f0] sm:$0xff]  ;;  %v625_v0 = vld [vmem:[%s5367_s1 + $0x428] sm:$0xff]  ;;  %v623_v1 = vld [vmem:[%s5367_s1 + $0x418] sm:$0xff]  ;;  %v2803_v3 = vpack.c.bf16 %v616_v59, %v612_v58 }
  0x32   : > { %v627_v2 = vld [vmem:[%s5367_s1 + $0x438] sm:$0xff]  ;;  %v3059_v4 = vpack.c.bf16 %v618_v62, %v614_v60  ;;  %v2805_v5 = vpack.c.bf16 %v625_v0, %v621_v63  ;;  %v624_v7 = vld [vmem:[%s5367_s1 + $0x420] sm:$0xff]  ;;  %v626_v10 = vld [vmem:[%s5367_s1 + $0x430] sm:$0xff] }
  0x33   : > { %2784 = vmatpush1.bf16.msra.mxu0 %v2783_v6  ;;  %v620_v6 = vld [vmem:[%s5367_s1 + $0x400] sm:$0xff]  ;;  %v629_v11 = vld [vmem:[%s5367_s1 + $0x448] sm:$0xff]  ;;  %v631_v15 = vld [vmem:[%s5367_s1 + $0x458] sm:$0xff] }
  0x34   : > { %3040 = vmatpush1.bf16.msra.mxu1 %v3039_v8  ;;  %2786 = vmatprep.subr.bf16.mxu0 %v2785_v9  ;;  %v3061_v8 = vpack.c.bf16 %v627_v2, %v623_v1  ;;  %v622_v9 = vld [vmem:[%s5367_s1 + $0x410] sm:$0xff]  ;;  %v633_v12 = vld [vmem:[%s5367_s1 + $0x468] sm:$0xff]  ;;  %v2807_v14 = vpack.c.bf16 %v624_v7, %v620_v6  ;;  %v635_v16 = vld [vmem:[%s5367_s1 + $0x478] sm:$0xff] }
  0x35   : > { %3042 = vmatprep.subr.bf16.mxu1 %v3041_v13  ;;  %v364_v13 = vld [vmem:[%s3822_s20] sm:$0xff]  ;;  %v3063_v17 = vpack.c.bf16 %v626_v10, %v622_v9  ;;  %v630_v22 = vld [vmem:[%s5367_s1 + $0x450] sm:$0xff]  ;;  %v3065_v24 = vpack.c.bf16 %v635_v16, %v631_v15  ;;  %v641_v26 = vld [vmem:[%s5367_s1 + $0x4a8] sm:$0xff] }
  0x36   : > { %v628_v18 = vld [vmem:[%s5367_s1 + $0x440] sm:$0xff]  ;;  %v634_v23 = vld [vmem:[%s5367_s1 + $0x470] sm:$0xff]  ;;  %v639_v29 = vld [vmem:[%s5367_s1 + $0x498] sm:$0xff] }
  0x37   : > { %2788 = vmatpush1.bf16.msra.mxu0 %v2787_v19  ;;  %v632_v19 = vld [vmem:[%s5367_s1 + $0x460] sm:$0xff]  ;;  %v643_v30 = vld [vmem:[%s5367_s1 + $0x4b8] sm:$0xff]  ;;  %v381_v34 = vld [vmem:[%s3822_s20 + $0x88] sm:$0xff] }
  0x38   : > { %3044 = vmatpush1.bf16.msra.mxu1 %v3043_v20  ;;  %2790 = vmatprep.subr.bf16.mxu0 %v2789_v21  ;;  %v373_v20 = vld [vmem:[%s3822_s20 + $0x48] sm:$0xff]  ;;  %v2809_v21 = vpack.c.bf16 %v633_v12, %v629_v11  ;;  %v372_v27 = vld [vmem:[%s3822_s20 + $0x40] sm:$0xff]  ;;  %v2811_v28 = vpack.c.bf16 %v632_v19, %v628_v18  ;;  %v638_v36 = vld [vmem:[%s5367_s1 + $0x490] sm:$0xff]  ;;  %v3069_v38 = vpack.c.bf16 %v643_v30, %v639_v29 }
  0x39   : > { %3046 = vmatprep.subr.bf16.mxu1 %v3045_v25  ;;  %v637_v25 = vld [vmem:[%s5367_s1 + $0x488] sm:$0xff]  ;;  %v380_v41 = vld [vmem:[%s3822_s20 + $0x80] sm:$0xff]  ;;  %v646_v50 = vld [vmem:[%s5367_s1 + $0x4d0] sm:$0xff] }
  0x3a   : > { %v2813_v35 = vpack.c.bf16 %v641_v26, %v637_v25  ;;  %v645_v39 = vld [vmem:[%s5367_s1 + $0x4c8] sm:$0xff]  ;;  %v644_v46 = vld [vmem:[%s5367_s1 + $0x4c0] sm:$0xff]  ;;  %v650_v51 = vld [vmem:[%s5367_s1 + $0x4f0] sm:$0xff] }
  0x3b   : > { %2792 = vmatpush1.bf16.msra.mxu0 %v2791_v31  ;;  %v3067_v31 = vpack.c.bf16 %v634_v23, %v630_v22  ;;  %v649_v40 = vld [vmem:[%s5367_s1 + $0x4e8] sm:$0xff]  ;;  %v648_v47 = vld [vmem:[%s5367_s1 + $0x4e0] sm:$0xff]  ;;  %v659_v58 = vld [vmem:[%s5367_s1 + $0x538] sm:$0xff]  ;;  %v3075_v59 = vpack.c.bf16 %v650_v51, %v646_v50 }
  0x3c   : > { %3048 = vmatpush1.bf16.msra.mxu1 %v3047_v32  ;;  %2794 = vmatprep.subr.bf16.mxu0 %v2793_v33  ;;  %v636_v32 = vld [vmem:[%s5367_s1 + $0x480] sm:$0xff]  ;;  %v389_v48 = vld [vmem:[%s3822_s20 + $0xc8] sm:$0xff]  ;;  %v654_v0 = vld [vmem:[%s5367_s1 + $0x510] sm:$0xff] }
  0x3d   : > { %3050 = vmatprep.subr.bf16.mxu1 %v3049_v37  ;;  %v640_v33 = vld [vmem:[%s5367_s1 + $0x4a0] sm:$0xff]  ;;  %v642_v37 = vld [vmem:[%s5367_s1 + $0x4b0] sm:$0xff]  ;;  %v653_v53 = vld [vmem:[%s5367_s1 + $0x508] sm:$0xff] }
  0x3e   : > { %v2815_v42 = vpack.c.bf16 %v640_v33, %v636_v32  ;;  %v657_v54 = vld [vmem:[%s5367_s1 + $0x528] sm:$0xff]  ;;  %v652_v60 = vld [vmem:[%s5367_s1 + $0x500] sm:$0xff]  ;;  %v658_v1 = vld [vmem:[%s5367_s1 + $0x530] sm:$0xff] }
  0x3f   : > { %2796 = vmatpush1.bf16.msra.mxu0 %v2795_v43  ;;  %v647_v43 = vld [vmem:[%s5367_s1 + $0x4d8] sm:$0xff]  ;;  %v397_v62 = vld [vmem:[%s3822_s20 + $0x108] sm:$0xff]  ;;  %v2821_v63 = vpack.c.bf16 %v657_v54, %v653_v53  ;;  %v3079_v9 = vpack.c.bf16 %v658_v1, %v654_v0  ;;  %v660_v10 = vld [vmem:[%s5367_s1 + $0x540] sm:$0xff] }
  0x40   : > { %3052 = vmatpush1.bf16.msra.mxu1 %v3051_v44  ;;  %2798 = vmatprep.subr.bf16.mxu0 %v2797_v45  ;;  %v651_v44 = vld [vmem:[%s5367_s1 + $0x4f8] sm:$0xff]  ;;  %v3071_v45 = vpack.c.bf16 %v642_v37, %v638_v36  ;;  %v664_v11 = vld [vmem:[%s5367_s1 + $0x560] sm:$0xff]  ;;  %v405_v12 = vld [vmem:[%s3822_s20 + $0x148] sm:$0xff] }
  0x41   : > { %3054 = vmatprep.subr.bf16.mxu1 %v3053_v49  ;;  %v2817_v49 = vpack.c.bf16 %v649_v40, %v645_v39  ;;  %v3073_v52 = vpack.c.bf16 %v651_v44, %v647_v43  ;;  %v663_v7 = vld [vmem:[%s5367_s1 + $0x558] sm:$0xff]  ;;  %v666_v15 = vld [vmem:[%s5367_s1 + $0x570] sm:$0xff]  ;;  %v673_v18 = vld [vmem:[%s5367_s1 + $0x5a8] sm:$0xff] }
  0x42   : > { %v404_v19 = vld [vmem:[%s3822_s20 + $0x140] sm:$0xff]  ;;  %v675_v22 = vld [vmem:[%s5367_s1 + $0x5b8] sm:$0xff]  ;;  %v413_v26 = vld [vmem:[%s3822_s20 + $0x188] sm:$0xff] }
  0x43   : > { %2800 = vmatpush1.bf16.msra.mxu0 %v2799_v55  ;;  %v388_v55 = vld [vmem:[%s3822_s20 + $0xc0] sm:$0xff]  ;;  %v674_v29 = vld [vmem:[%s5367_s1 + $0x5b0] sm:$0xff]  ;;  %v681_v32 = vld [vmem:[%s5367_s1 + $0x5e8] sm:$0xff] }
  0x44   : > { %3056 = vmatpush1.bf16.msra.mxu1 %v3055_v56  ;;  %2802 = vmatprep.subr.bf16.mxu0 %v2801_v57  ;;  %v2819_v56 = vpack.c.bf16 %v648_v47, %v644_v46  ;;  %v655_v57 = vld [vmem:[%s5367_s1 + $0x518] sm:$0xff]  ;;  %v672_v25 = vld [vmem:[%s5367_s1 + $0x5a0] sm:$0xff]  ;;  %v421_v40 = vld [vmem:[%s3822_s20 + $0x1c8] sm:$0xff] }
  0x45   : > { %3058 = vmatprep.subr.bf16.mxu1 %v3057_v61  ;;  %v656_v61 = vld [vmem:[%s5367_s1 + $0x520] sm:$0xff]  ;;  %v3077_v2 = vpack.c.bf16 %v659_v58, %v655_v57  ;;  %v683_v36 = vld [vmem:[%s5367_s1 + $0x5f8] sm:$0xff]  ;;  %v682_v43 = vld [vmem:[%s5367_s1 + $0x5f0] sm:$0xff] }
  0x46   : > { %v2823_v6 = vpack.c.bf16 %v656_v61, %v652_v60  ;;  %v412_v33 = vld [vmem:[%s3822_s20 + $0x180] sm:$0xff]  ;;  %v689_v46 = vld [vmem:[%s5367_s1 + $0x628] sm:$0xff]  ;;  %v691_v50 = vld [vmem:[%s5367_s1 + $0x638] sm:$0xff] }
  0x47   : > { %2804 = vmatpush1.bf16.msra.mxu0 %v2803_v3  ;;  %v661_v3 = vld [vmem:[%s5367_s1 + $0x548] sm:$0xff]  ;;  %v680_v39 = vld [vmem:[%s5367_s1 + $0x5e0] sm:$0xff]  ;;  %v690_v57 = vld [vmem:[%s5367_s1 + $0x630] sm:$0xff] }
  0x48   : > { %3060 = vmatpush1.bf16.msra.mxu1 %v3059_v4  ;;  %2806 = vmatprep.subr.bf16.mxu0 %v2805_v5  ;;  %v665_v4 = vld [vmem:[%s5367_s1 + $0x568] sm:$0xff]  ;;  %v396_v5 = vld [vmem:[%s3822_s20 + $0x100] sm:$0xff]  ;;  %v699_v0 = vld [vmem:[%s5367_s1 + $0x678] sm:$0xff] }
  0x49   : > { %3062 = vmatprep.subr.bf16.mxu1 %v3061_v8  ;;  %v667_v8 = vld [vmem:[%s5367_s1 + $0x578] sm:$0xff]  ;;  %v420_v47 = vld [vmem:[%s3822_s20 + $0x1c0] sm:$0xff]  ;;  %v429_v54 = vld [vmem:[%s3822_s20 + $0x208] sm:$0xff] }
  0x4a   : > { %1069 = vmatmul.mubr.f32.vlgmr.msra.gmra.mrb[0].mxu0 %v364_v13  ;;  %v3081_v16 = vpack.c.bf16 %v667_v8, %v663_v7  ;;  %v688_v53 = vld [vmem:[%s5367_s1 + $0x620] sm:$0xff]  ;;  %v697_v60 = vld [vmem:[%s5367_s1 + $0x668] sm:$0xff]  ;;  %v698_v7 = vld [vmem:[%s5367_s1 + $0x670] sm:$0xff] }
  0x4b   : > { %1713 = vmatmul.mubr.f32.vlgmr.msra.gmra.mrb[0].mxu1 %v364_v13  ;;  %2808 = vmatpush1.bf16.msra.mxu0 %v2807_v14  ;;  %v2825_v13 = vpack.c.bf16 %v665_v4, %v661_v3  ;;  %v662_v14 = vld [vmem:[%s5367_s1 + $0x550] sm:$0xff]  ;;  %v428_v61 = vld [vmem:[%s3822_s20 + $0x200] sm:$0xff]  ;;  %v437_v4 = vld [vmem:[%s3822_s20 + $0x248] sm:$0xff] }
  0x4c   : > { %3064 = vmatpush1.bf16.msra.mxu1 %v3063_v17  ;;  %1074 = vmatprep.mubr.f32.mxu0 %v373_v20  ;;  %v669_v17 = vld [vmem:[%s5367_s1 + $0x588] sm:$0xff]  ;;  %v3083_v23 = vpack.c.bf16 %v666_v15, %v662_v14  ;;  %v696_v3 = vld [vmem:[%s5367_s1 + $0x660] sm:$0xff]  ;;  %v707_v14 = vld [vmem:[%s5367_s1 + $0x6b8] sm:$0xff] }
  0x4d   : > { %1718 = vmatprep.mubr.f32.mxu1 %v373_v20  ;;  %2810 = vmatprep.subr.bf16.mxu0 %v2809_v21  ;;  %v2827_v20 = vpack.c.bf16 %v664_v11, %v660_v10  ;;  %v671_v21 = vld [vmem:[%s5367_s1 + $0x598] sm:$0xff]  ;;  %v705_v10 = vld [vmem:[%s5367_s1 + $0x6a8] sm:$0xff]  ;;  %v436_v11 = vld [vmem:[%s3822_s20 + $0x240] sm:$0xff] }
  0x4e   : > { %1075 = vmatmul.mubr.f32.gmra.mrb[2].mxu0 %v372_v27  ;;  %3066 = vmatprep.subr.bf16.mxu1 %v3065_v24  ;;  %v668_v24 = vld [vmem:[%s5367_s1 + $0x580] sm:$0xff]  ;;  %v3085_v30 = vpack.c.bf16 %v675_v22, %v671_v21  ;;  %v706_v21 = vld [vmem:[%s5367_s1 + $0x6b0] sm:$0xff] }
  0x4f   : > { %1719 = vmatmul.mubr.f32.gmra.mrb[2].mxu1 %v372_v27  ;;  %2812 = vmatpush1.bf16.msra.mxu0 %v2811_v28  ;;  %v2829_v27 = vpack.c.bf16 %v673_v18, %v669_v17  ;;  %v670_v28 = vld [vmem:[%s5367_s1 + $0x590] sm:$0xff]  ;;  %v704_v17 = vld [vmem:[%s5367_s1 + $0x6a0] sm:$0xff]  ;;  %v445_v18 = vld [vmem:[%s3822_s20 + $0x288] sm:$0xff] }
  0x50   : > { %3068 = vmatpush1.bf16.msra.mxu1 %v3067_v31  ;;  %1080 = vmatprep.mubr.f32.mxu0 %v381_v34  ;;  %v677_v31 = vld [vmem:[%s5367_s1 + $0x5c8] sm:$0xff]  ;;  %v3087_v37 = vpack.c.bf16 %v674_v29, %v670_v28  ;;  %v715_v28 = vld [vmem:[%s5367_s1 + $0x6f8] sm:$0xff] }
  0x51   : > { %1724 = vmatprep.mubr.f32.mxu1 %v381_v34  ;;  %2814 = vmatprep.subr.bf16.mxu0 %v2813_v35  ;;  %v2831_v34 = vpack.c.bf16 %v672_v25, %v668_v24  ;;  %v679_v35 = vld [vmem:[%s5367_s1 + $0x5d8] sm:$0xff]  ;;  %v713_v24 = vld [vmem:[%s5367_s1 + $0x6e8] sm:$0xff]  ;;  %v444_v25 = vld [vmem:[%s3822_s20 + $0x280] sm:$0xff] }
  0x52   : > { %1081 = vmatmul.mubr.f32.gmra.mrb[4].mxu0 %v380_v41  ;;  %3070 = vmatprep.subr.bf16.mxu1 %v3069_v38  ;;  %v676_v38 = vld [vmem:[%s5367_s1 + $0x5c0] sm:$0xff]  ;;  %v3089_v44 = vpack.c.bf16 %v683_v36, %v679_v35  ;;  %v714_v35 = vld [vmem:[%s5367_s1 + $0x6f0] sm:$0xff] }
  0x53   : > { %1725 = vmatmul.mubr.f32.gmra.mrb[4].mxu1 %v380_v41  ;;  %2816 = vmatpush1.bf16.msra.mxu0 %v2815_v42  ;;  %v2833_v41 = vpack.c.bf16 %v681_v32, %v677_v31  ;;  %v678_v42 = vld [vmem:[%s5367_s1 + $0x5d0] sm:$0xff]  ;;  %v712_v31 = vld [vmem:[%s5367_s1 + $0x6e0] sm:$0xff]  ;;  %v453_v32 = vld [vmem:[%s3822_s20 + $0x2c8] sm:$0xff] }
  0x54   : > { %3072 = vmatpush1.bf16.msra.mxu1 %v3071_v45  ;;  %1086 = vmatprep.mubr.f32.mxu0 %v389_v48  ;;  %v685_v45 = vld [vmem:[%s5367_s1 + $0x608] sm:$0xff]  ;;  %v3091_v51 = vpack.c.bf16 %v682_v43, %v678_v42  ;;  %v723_v42 = vld [vmem:[%s5367_s1 + $0x738] sm:$0xff] }
  0x55   : > { %1730 = vmatprep.mubr.f32.mxu1 %v389_v48  ;;  %2818 = vmatprep.subr.bf16.mxu0 %v2817_v49  ;;  %v2835_v48 = vpack.c.bf16 %v680_v39, %v676_v38  ;;  %v687_v49 = vld [vmem:[%s5367_s1 + $0x618] sm:$0xff]  ;;  %v721_v38 = vld [vmem:[%s5367_s1 + $0x728] sm:$0xff]  ;;  %v452_v39 = vld [vmem:[%s3822_s20 + $0x2c0] sm:$0xff] }
  0x56   : > { %1087 = vmatmul.mubr.f32.gmra.mrb[6].mxu0 %v388_v55  ;;  %3074 = vmatprep.subr.bf16.mxu1 %v3073_v52  ;;  %v684_v52 = vld [vmem:[%s5367_s1 + $0x600] sm:$0xff]  ;;  %v3093_v58 = vpack.c.bf16 %v691_v50, %v687_v49  ;;  %v722_v49 = vld [vmem:[%s5367_s1 + $0x730] sm:$0xff] }
  0x57   : > { %1731 = vmatmul.mubr.f32.gmra.mrb[6].mxu1 %v388_v55  ;;  %2820 = vmatpush1.bf16.msra.mxu0 %v2819_v56  ;;  %v2837_v55 = vpack.c.bf16 %v689_v46, %v685_v45  ;;  %v686_v56 = vld [vmem:[%s5367_s1 + $0x610] sm:$0xff]  ;;  %v720_v45 = vld [vmem:[%s5367_s1 + $0x720] sm:$0xff]  ;;  %v461_v46 = vld [vmem:[%s3822_s20 + $0x308] sm:$0xff] }
  0x58   : > { %3076 = vmatpush1.bf16.msra.mxu1 %v3075_v59  ;;  %1092 = vmatprep.mubr.f32.mxu0 %v397_v62  ;;  %v693_v59 = vld [vmem:[%s5367_s1 + $0x648] sm:$0xff]  ;;  %v3095_v1 = vpack.c.bf16 %v690_v57, %v686_v56  ;;  %v731_v56 = vld [vmem:[%s5367_s1 + $0x778] sm:$0xff] }
  0x59   : > { %1736 = vmatprep.mubr.f32.mxu1 %v397_v62  ;;  %2822 = vmatprep.subr.bf16.mxu0 %v2821_v63  ;;  %v2839_v62 = vpack.c.bf16 %v688_v53, %v684_v52  ;;  %v695_v63 = vld [vmem:[%s5367_s1 + $0x658] sm:$0xff]  ;;  %v729_v52 = vld [vmem:[%s5367_s1 + $0x768] sm:$0xff]  ;;  %v460_v53 = vld [vmem:[%s3822_s20 + $0x300] sm:$0xff] }
  0x5a   : > { %1093 = vmatmul.mubr.f32.gmra.mrb[8].mxu0 %v396_v5  ;;  %3078 = vmatprep.subr.bf16.mxu1 %v3077_v2  ;;  %v692_v2 = vld [vmem:[%s5367_s1 + $0x640] sm:$0xff]  ;;  %v3097_v8 = vpack.c.bf16 %v699_v0, %v695_v63  ;;  %v730_v63 = vld [vmem:[%s5367_s1 + $0x770] sm:$0xff] }
  0x5b   : > { %1737 = vmatmul.mubr.f32.gmra.mrb[8].mxu1 %v396_v5  ;;  %2824 = vmatpush1.bf16.msra.mxu0 %v2823_v6  ;;  %v2841_v5 = vpack.c.bf16 %v697_v60, %v693_v59  ;;  %v694_v6 = vld [vmem:[%s5367_s1 + $0x650] sm:$0xff]  ;;  %v728_v59 = vld [vmem:[%s5367_s1 + $0x760] sm:$0xff]  ;;  %v469_v60 = vld [vmem:[%s3822_s20 + $0x348] sm:$0xff] }
  0x5c   : > { %3080 = vmatpush1.bf16.msra.mxu1 %v3079_v9  ;;  %1098 = vmatprep.mubr.f32.mxu0 %v405_v12  ;;  %v701_v9 = vld [vmem:[%s5367_s1 + $0x688] sm:$0xff]  ;;  %v3099_v15 = vpack.c.bf16 %v698_v7, %v694_v6  ;;  %v739_v6 = vld [vmem:[%s5367_s1 + $0x7b8] sm:$0xff] }
  0x5d   : > { %1742 = vmatprep.mubr.f32.mxu1 %v405_v12  ;;  %2826 = vmatprep.subr.bf16.mxu0 %v2825_v13  ;;  %v2843_v12 = vpack.c.bf16 %v696_v3, %v692_v2  ;;  %v703_v13 = vld [vmem:[%s5367_s1 + $0x698] sm:$0xff]  ;;  %v737_v2 = vld [vmem:[%s5367_s1 + $0x7a8] sm:$0xff]  ;;  %v468_v3 = vld [vmem:[%s3822_s20 + $0x340] sm:$0xff] }
  0x5e   : > { %1099 = vmatmul.mubr.f32.gmra.mrb[10].mxu0 %v404_v19  ;;  %3082 = vmatprep.subr.bf16.mxu1 %v3081_v16  ;;  %v700_v16 = vld [vmem:[%s5367_s1 + $0x680] sm:$0xff]  ;;  %v3101_v22 = vpack.c.bf16 %v707_v14, %v703_v13  ;;  %v738_v13 = vld [vmem:[%s5367_s1 + $0x7b0] sm:$0xff] }
  0x5f   : > { %1743 = vmatmul.mubr.f32.gmra.mrb[10].mxu1 %v404_v19  ;;  %2828 = vmatpush1.bf16.msra.mxu0 %v2827_v20  ;;  %v2845_v19 = vpack.c.bf16 %v705_v10, %v701_v9  ;;  %v702_v20 = vld [vmem:[%s5367_s1 + $0x690] sm:$0xff]  ;;  %v736_v9 = vld [vmem:[%s5367_s1 + $0x7a0] sm:$0xff]  ;;  %v477_v10 = vld [vmem:[%s3822_s20 + $0x388] sm:$0xff] }
  0x60   : > { %3084 = vmatpush1.bf16.msra.mxu1 %v3083_v23  ;;  %1104 = vmatprep.mubr.f32.mxu0 %v413_v26  ;;  %v709_v23 = vld [vmem:[%s5367_s1 + $0x6c8] sm:$0xff]  ;;  %v3103_v29 = vpack.c.bf16 %v706_v21, %v702_v20  ;;  %v747_v20 = vld [vmem:[%s5367_s1 + $0x7f8] sm:$0xff] }
  0x61   : > { %1748 = vmatprep.mubr.f32.mxu1 %v413_v26  ;;  %2830 = vmatprep.subr.bf16.mxu0 %v2829_v27  ;;  %v2847_v26 = vpack.c.bf16 %v704_v17, %v700_v16  ;;  %v711_v27 = vld [vmem:[%s5367_s1 + $0x6d8] sm:$0xff]  ;;  %v745_v16 = vld [vmem:[%s5367_s1 + $0x7e8] sm:$0xff]  ;;  %v476_v17 = vld [vmem:[%s3822_s20 + $0x380] sm:$0xff] }
  0x62   : > { %1105 = vmatmul.mubr.f32.gmra.mrb[12].mxu0 %v412_v33  ;;  %3086 = vmatprep.subr.bf16.mxu1 %v3085_v30  ;;  %v708_v30 = vld [vmem:[%s5367_s1 + $0x6c0] sm:$0xff]  ;;  %v3105_v36 = vpack.c.bf16 %v715_v28, %v711_v27  ;;  %v746_v27 = vld [vmem:[%s5367_s1 + $0x7f0] sm:$0xff] }
  0x63   : > { %1749 = vmatmul.mubr.f32.gmra.mrb[12].mxu1 %v412_v33  ;;  %2832 = vmatpush1.bf16.msra.mxu0 %v2831_v34  ;;  %v2849_v33 = vpack.c.bf16 %v713_v24, %v709_v23  ;;  %v710_v34 = vld [vmem:[%s5367_s1 + $0x6d0] sm:$0xff]  ;;  %v744_v23 = vld [vmem:[%s5367_s1 + $0x7e0] sm:$0xff]  ;;  %v485_v24 = vld [vmem:[%s3822_s20 + $0x3c8] sm:$0xff] }
  0x64   : > { %3088 = vmatpush1.bf16.msra.mxu1 %v3087_v37  ;;  %1110 = vmatprep.mubr.f32.mxu0 %v421_v40  ;;  %v717_v37 = vld [vmem:[%s5367_s1 + $0x708] sm:$0xff]  ;;  %v3107_v43 = vpack.c.bf16 %v714_v35, %v710_v34  ;;  %v755_v34 = vld [vmem:[%s5367_s1 + $0x838] sm:$0xff] }
  0x65   : > { %1754 = vmatprep.mubr.f32.mxu1 %v421_v40  ;;  %2834 = vmatprep.subr.bf16.mxu0 %v2833_v41  ;;  %v2851_v40 = vpack.c.bf16 %v712_v31, %v708_v30  ;;  %v719_v41 = vld [vmem:[%s5367_s1 + $0x718] sm:$0xff]  ;;  %v753_v30 = vld [vmem:[%s5367_s1 + $0x828] sm:$0xff]  ;;  %v484_v31 = vld [vmem:[%s3822_s20 + $0x3c0] sm:$0xff] }
  0x66   : > { %1111 = vmatmul.mubr.f32.gmra.mrb[14].mxu0 %v420_v47  ;;  %3090 = vmatprep.subr.bf16.mxu1 %v3089_v44  ;;  %v716_v44 = vld [vmem:[%s5367_s1 + $0x700] sm:$0xff]  ;;  %v3109_v50 = vpack.c.bf16 %v723_v42, %v719_v41  ;;  %v754_v41 = vld [vmem:[%s5367_s1 + $0x830] sm:$0xff] }
  0x67   : > { %1755 = vmatmul.mubr.f32.gmra.mrb[14].mxu1 %v420_v47  ;;  %2836 = vmatpush1.bf16.msra.mxu0 %v2835_v48  ;;  %v2853_v47 = vpack.c.bf16 %v721_v38, %v717_v37  ;;  %v718_v48 = vld [vmem:[%s5367_s1 + $0x710] sm:$0xff]  ;;  %v752_v37 = vld [vmem:[%s5367_s1 + $0x820] sm:$0xff]  ;;  %v367_v38 = vld [vmem:[%s3822_s20 + $0x18] sm:$0xff] }
  0x68   : > { %3092 = vmatpush1.bf16.msra.mxu1 %v3091_v51  ;;  %1116 = vmatprep.mubr.f32.mxu0 %v429_v54  ;;  %v725_v51 = vld [vmem:[%s5367_s1 + $0x748] sm:$0xff]  ;;  %v3111_v57 = vpack.c.bf16 %v722_v49, %v718_v48  ;;  %v763_v48 = vld [vmem:[%s5367_s1 + $0x878] sm:$0xff] }
  0x69   : > { %1760 = vmatprep.mubr.f32.mxu1 %v429_v54  ;;  %2838 = vmatprep.subr.bf16.mxu0 %v2837_v55  ;;  %v2855_v54 = vpack.c.bf16 %v720_v45, %v716_v44  ;;  %v727_v55 = vld [vmem:[%s5367_s1 + $0x758] sm:$0xff]  ;;  %v761_v44 = vld [vmem:[%s5367_s1 + $0x868] sm:$0xff]  ;;  %v366_v45 = vld [vmem:[%s3822_s20 + $0x10] sm:$0xff] }
  0x6a   : > { %1117 = vmatmul.mubr.f32.gmra.mrb[16].mxu0 %v428_v61  ;;  %3094 = vmatprep.subr.bf16.mxu1 %v3093_v58  ;;  %v724_v58 = vld [vmem:[%s5367_s1 + $0x740] sm:$0xff]  ;;  %v3113_v0 = vpack.c.bf16 %v731_v56, %v727_v55  ;;  %v762_v55 = vld [vmem:[%s5367_s1 + $0x870] sm:$0xff] }
  0x6b   : > { %1761 = vmatmul.mubr.f32.gmra.mrb[16].mxu1 %v428_v61  ;;  %2840 = vmatpush1.bf16.msra.mxu0 %v2839_v62  ;;  %v2857_v61 = vpack.c.bf16 %v729_v52, %v725_v51  ;;  %v726_v62 = vld [vmem:[%s5367_s1 + $0x750] sm:$0xff]  ;;  %v760_v51 = vld [vmem:[%s5367_s1 + $0x860] sm:$0xff]  ;;  %v375_v52 = vld [vmem:[%s3822_s20 + $0x58] sm:$0xff] }
  0x6c   : > { %3096 = vmatpush1.bf16.msra.mxu1 %v3095_v1  ;;  %1122 = vmatprep.mubr.f32.mxu0 %v437_v4  ;;  %v733_v1 = vld [vmem:[%s5367_s1 + $0x788] sm:$0xff]  ;;  %v3115_v7 = vpack.c.bf16 %v730_v63, %v726_v62  ;;  %v771_v62 = vld [vmem:[%s5367_s1 + $0x8b8] sm:$0xff] }
  0x6d   : > { %1766 = vmatprep.mubr.f32.mxu1 %v437_v4  ;;  %2842 = vmatprep.subr.bf16.mxu0 %v2841_v5  ;;  %v2859_v4 = vpack.c.bf16 %v728_v59, %v724_v58  ;;  %v735_v5 = vld [vmem:[%s5367_s1 + $0x798] sm:$0xff]  ;;  %v769_v58 = vld [vmem:[%s5367_s1 + $0x8a8] sm:$0xff]  ;;  %v374_v59 = vld [vmem:[%s3822_s20 + $0x50] sm:$0xff] }
  0x6e   : > { %1123 = vmatmul.mubr.f32.gmra.mrb[18].mxu0 %v436_v11  ;;  %3098 = vmatprep.subr.bf16.mxu1 %v3097_v8  ;;  %v732_v8 = vld [vmem:[%s5367_s1 + $0x780] sm:$0xff]  ;;  %v3117_v14 = vpack.c.bf16 %v739_v6, %v735_v5  ;;  %v770_v5 = vld [vmem:[%s5367_s1 + $0x8b0] sm:$0xff] }
  0x6f   : > { %1767 = vmatmul.mubr.f32.gmra.mrb[18].mxu1 %v436_v11  ;;  %2844 = vmatpush1.bf16.msra.mxu0 %v2843_v12  ;;  %v2861_v11 = vpack.c.bf16 %v737_v2, %v733_v1  ;;  %v734_v12 = vld [vmem:[%s5367_s1 + $0x790] sm:$0xff]  ;;  %v768_v1 = vld [vmem:[%s5367_s1 + $0x8a0] sm:$0xff]  ;;  %v383_v2 = vld [vmem:[%s3822_s20 + $0x98] sm:$0xff] }
  0x70   : > { %3100 = vmatpush1.bf16.msra.mxu1 %v3099_v15  ;;  %1128 = vmatprep.mubr.f32.mxu0 %v445_v18  ;;  %v741_v15 = vld [vmem:[%s5367_s1 + $0x7c8] sm:$0xff]  ;;  %v3119_v21 = vpack.c.bf16 %v738_v13, %v734_v12  ;;  %v779_v12 = vld [vmem:[%s5367_s1 + $0x8f8] sm:$0xff] }
  0x71   : > { %1772 = vmatprep.mubr.f32.mxu1 %v445_v18  ;;  %2846 = vmatprep.subr.bf16.mxu0 %v2845_v19  ;;  %v2863_v18 = vpack.c.bf16 %v736_v9, %v732_v8  ;;  %v743_v19 = vld [vmem:[%s5367_s1 + $0x7d8] sm:$0xff]  ;;  %v777_v8 = vld [vmem:[%s5367_s1 + $0x8e8] sm:$0xff]  ;;  %v382_v9 = vld [vmem:[%s3822_s20 + $0x90] sm:$0xff] }
  0x72   : > { %1129 = vmatmul.mubr.f32.gmra.mrb[20].mxu0 %v444_v25  ;;  %3102 = vmatprep.subr.bf16.mxu1 %v3101_v22  ;;  %v740_v22 = vld [vmem:[%s5367_s1 + $0x7c0] sm:$0xff]  ;;  %v3121_v28 = vpack.c.bf16 %v747_v20, %v743_v19  ;;  %v778_v19 = vld [vmem:[%s5367_s1 + $0x8f0] sm:$0xff] }
  0x73   : > { %1773 = vmatmul.mubr.f32.gmra.mrb[20].mxu1 %v444_v25  ;;  %2848 = vmatpush1.bf16.msra.mxu0 %v2847_v26  ;;  %v2865_v25 = vpack.c.bf16 %v745_v16, %v741_v15  ;;  %v742_v26 = vld [vmem:[%s5367_s1 + $0x7d0] sm:$0xff]  ;;  %v776_v15 = vld [vmem:[%s5367_s1 + $0x8e0] sm:$0xff]  ;;  %v391_v16 = vld [vmem:[%s3822_s20 + $0xd8] sm:$0xff] }
  0x74   : > { %3104 = vmatpush1.bf16.msra.mxu1 %v3103_v29  ;;  %1134 = vmatprep.mubr.f32.mxu0 %v453_v32  ;;  %v749_v29 = vld [vmem:[%s5367_s1 + $0x808] sm:$0xff]  ;;  %v3123_v35 = vpack.c.bf16 %v746_v27, %v742_v26  ;;  %v787_v26 = vld [vmem:[%s5367_s1 + $0x938] sm:$0xff] }
  0x75   : > { %1778 = vmatprep.mubr.f32.mxu1 %v453_v32  ;;  %2850 = vmatprep.subr.bf16.mxu0 %v2849_v33  ;;  %v2867_v32 = vpack.c.bf16 %v744_v23, %v740_v22  ;;  %v751_v33 = vld [vmem:[%s5367_s1 + $0x818] sm:$0xff]  ;;  %v785_v22 = vld [vmem:[%s5367_s1 + $0x928] sm:$0xff]  ;;  %v390_v23 = vld [vmem:[%s3822_s20 + $0xd0] sm:$0xff] }
  0x76   : > { %1135 = vmatmul.mubr.f32.gmra.mrb[22].mxu0 %v452_v39  ;;  %3106 = vmatprep.subr.bf16.mxu1 %v3105_v36  ;;  %v748_v36 = vld [vmem:[%s5367_s1 + $0x800] sm:$0xff]  ;;  %v3125_v42 = vpack.c.bf16 %v755_v34, %v751_v33  ;;  %v786_v33 = vld [vmem:[%s5367_s1 + $0x930] sm:$0xff] }
  0x77   : > { %1779 = vmatmul.mubr.f32.gmra.mrb[22].mxu1 %v452_v39  ;;  %2852 = vmatpush1.bf16.msra.mxu0 %v2851_v40  ;;  %v2869_v39 = vpack.c.bf16 %v753_v30, %v749_v29  ;;  %v750_v40 = vld [vmem:[%s5367_s1 + $0x810] sm:$0xff]  ;;  %v784_v29 = vld [vmem:[%s5367_s1 + $0x920] sm:$0xff]  ;;  %v399_v30 = vld [vmem:[%s3822_s20 + $0x118] sm:$0xff] }
  0x78   : > { %3108 = vmatpush1.bf16.msra.mxu1 %v3107_v43  ;;  %1140 = vmatprep.mubr.f32.mxu0 %v461_v46  ;;  %v757_v43 = vld [vmem:[%s5367_s1 + $0x848] sm:$0xff]  ;;  %v3127_v49 = vpack.c.bf16 %v754_v41, %v750_v40  ;;  %v795_v40 = vld [vmem:[%s5367_s1 + $0x978] sm:$0xff] }
  0x79   : > { %1784 = vmatprep.mubr.f32.mxu1 %v461_v46  ;;  %2854 = vmatprep.subr.bf16.mxu0 %v2853_v47  ;;  %v2871_v46 = vpack.c.bf16 %v752_v37, %v748_v36  ;;  %v759_v47 = vld [vmem:[%s5367_s1 + $0x858] sm:$0xff]  ;;  %v793_v36 = vld [vmem:[%s5367_s1 + $0x968] sm:$0xff]  ;;  %v398_v37 = vld [vmem:[%s3822_s20 + $0x110] sm:$0xff] }
  0x7a   : > { %1141 = vmatmul.mubr.f32.gmra.mrb[24].mxu0 %v460_v53  ;;  %3110 = vmatprep.subr.bf16.mxu1 %v3109_v50  ;;  %v756_v50 = vld [vmem:[%s5367_s1 + $0x840] sm:$0xff]  ;;  %v3129_v56 = vpack.c.bf16 %v763_v48, %v759_v47  ;;  %v794_v47 = vld [vmem:[%s5367_s1 + $0x970] sm:$0xff] }
  0x7b   : > { %1785 = vmatmul.mubr.f32.gmra.mrb[24].mxu1 %v460_v53  ;;  %2856 = vmatpush1.bf16.msra.mxu0 %v2855_v54  ;;  %v2873_v53 = vpack.c.bf16 %v761_v44, %v757_v43  ;;  %v758_v54 = vld [vmem:[%s5367_s1 + $0x850] sm:$0xff]  ;;  %v792_v43 = vld [vmem:[%s5367_s1 + $0x960] sm:$0xff]  ;;  %v407_v44 = vld [vmem:[%s3822_s20 + $0x158] sm:$0xff] }
  0x7c   : > { %3112 = vmatpush1.bf16.msra.mxu1 %v3111_v57  ;;  %1146 = vmatprep.mubr.f32.mxu0 %v469_v60  ;;  %v765_v57 = vld [vmem:[%s5367_s1 + $0x888] sm:$0xff]  ;;  %v3131_v63 = vpack.c.bf16 %v762_v55, %v758_v54  ;;  %v803_v54 = vld [vmem:[%s5367_s1 + $0x9b8] sm:$0xff] }
  0x7d   : > { %1790 = vmatprep.mubr.f32.mxu1 %v469_v60  ;;  %2858 = vmatprep.subr.bf16.mxu0 %v2857_v61  ;;  %v2875_v60 = vpack.c.bf16 %v760_v51, %v756_v50  ;;  %v767_v61 = vld [vmem:[%s5367_s1 + $0x898] sm:$0xff]  ;;  %v801_v50 = vld [vmem:[%s5367_s1 + $0x9a8] sm:$0xff]  ;;  %v406_v51 = vld [vmem:[%s3822_s20 + $0x150] sm:$0xff] }
  0x7e   : > { %1147 = vmatmul.mubr.f32.gmra.mrb[26].mxu0 %v468_v3  ;;  %3114 = vmatprep.subr.bf16.mxu1 %v3113_v0  ;;  %v764_v0 = vld [vmem:[%s5367_s1 + $0x880] sm:$0xff]  ;;  %v3133_v6 = vpack.c.bf16 %v771_v62, %v767_v61  ;;  %v802_v61 = vld [vmem:[%s5367_s1 + $0x9b0] sm:$0xff] }
  0x7f   : > { %1791 = vmatmul.mubr.f32.gmra.mrb[26].mxu1 %v468_v3  ;;  %2860 = vmatpush1.bf16.msra.mxu0 %v2859_v4  ;;  %v2877_v3 = vpack.c.bf16 %v769_v58, %v765_v57  ;;  %v766_v4 = vld [vmem:[%s5367_s1 + $0x890] sm:$0xff]  ;;  %v800_v57 = vld [vmem:[%s5367_s1 + $0x9a0] sm:$0xff]  ;;  %v415_v58 = vld [vmem:[%s3822_s20 + $0x198] sm:$0xff] }
  0x80   : > { %3116 = vmatpush1.bf16.msra.mxu1 %v3115_v7  ;;  %1152 = vmatprep.mubr.f32.mxu0 %v477_v10  ;;  %v773_v7 = vld [vmem:[%s5367_s1 + $0x8c8] sm:$0xff]  ;;  %v3135_v13 = vpack.c.bf16 %v770_v5, %v766_v4  ;;  %v811_v4 = vld [vmem:[%s5367_s1 + $0x9f8] sm:$0xff] }
  0x81   : > { %1796 = vmatprep.mubr.f32.mxu1 %v477_v10  ;;  %2862 = vmatprep.subr.bf16.mxu0 %v2861_v11  ;;  %v2879_v10 = vpack.c.bf16 %v768_v1, %v764_v0  ;;  %v775_v11 = vld [vmem:[%s5367_s1 + $0x8d8] sm:$0xff]  ;;  %v809_v0 = vld [vmem:[%s5367_s1 + $0x9e8] sm:$0xff]  ;;  %v414_v1 = vld [vmem:[%s3822_s20 + $0x190] sm:$0xff] }
  0x82   : > { %1153 = vmatmul.mubr.f32.gmra.mrb[28].mxu0 %v476_v17  ;;  %3118 = vmatprep.subr.bf16.mxu1 %v3117_v14  ;;  %v772_v14 = vld [vmem:[%s5367_s1 + $0x8c0] sm:$0xff]  ;;  %v3137_v20 = vpack.c.bf16 %v779_v12, %v775_v11  ;;  %v810_v11 = vld [vmem:[%s5367_s1 + $0x9f0] sm:$0xff] }
  0x83   : > { %1797 = vmatmul.mubr.f32.gmra.mrb[28].mxu1 %v476_v17  ;;  %2864 = vmatpush1.bf16.msra.mxu0 %v2863_v18  ;;  %v2881_v17 = vpack.c.bf16 %v777_v8, %v773_v7  ;;  %v774_v18 = vld [vmem:[%s5367_s1 + $0x8d0] sm:$0xff]  ;;  %v808_v7 = vld [vmem:[%s5367_s1 + $0x9e0] sm:$0xff]  ;;  %v423_v8 = vld [vmem:[%s3822_s20 + $0x1d8] sm:$0xff] }
  0x84   : > { %3120 = vmatpush1.bf16.msra.mxu1 %v3119_v21  ;;  %1158 = vmatprep.mubr.f32.mxu0 %v485_v24  ;;  %v781_v21 = vld [vmem:[%s5367_s1 + $0x908] sm:$0xff]  ;;  %v3139_v27 = vpack.c.bf16 %v778_v19, %v774_v18  ;;  %v819_v18 = vld [vmem:[%s5367_s1 + $0xa38] sm:$0xff] }
  0x85   : > { %1802 = vmatprep.mubr.f32.mxu1 %v485_v24  ;;  %2866 = vmatprep.subr.bf16.mxu0 %v2865_v25  ;;  %v2883_v24 = vpack.c.bf16 %v776_v15, %v772_v14  ;;  %v783_v25 = vld [vmem:[%s5367_s1 + $0x918] sm:$0xff]  ;;  %v817_v14 = vld [vmem:[%s5367_s1 + $0xa28] sm:$0xff]  ;;  %v422_v15 = vld [vmem:[%s3822_s20 + $0x1d0] sm:$0xff] }
  0x86   : > { %1159 = vmatmul.mubr.f32.gmra.mrb[30].mxu0 %v484_v31  ;;  %3122 = vmatprep.subr.bf16.mxu1 %v3121_v28  ;;  %v780_v28 = vld [vmem:[%s5367_s1 + $0x900] sm:$0xff]  ;;  %v3141_v34 = vpack.c.bf16 %v787_v26, %v783_v25  ;;  %v818_v25 = vld [vmem:[%s5367_s1 + $0xa30] sm:$0xff] }
  0x87   : > { %1803 = vmatmul.mubr.f32.gmra.mrb[30].mxu1 %v484_v31  ;;  %2868 = vmatpush1.bf16.msra.mxu0 %v2867_v32  ;;  %v2885_v31 = vpack.c.bf16 %v785_v22, %v781_v21  ;;  %v782_v32 = vld [vmem:[%s5367_s1 + $0x910] sm:$0xff]  ;;  %v816_v21 = vld [vmem:[%s5367_s1 + $0xa20] sm:$0xff]  ;;  %v431_v22 = vld [vmem:[%s3822_s20 + $0x218] sm:$0xff] }
  0x88   : > { %3124 = vmatpush1.bf16.msra.mxu1 %v3123_v35  ;;  %1229 = vmatprep.mubr.f32.mxu0 %v367_v38  ;;  %v789_v35 = vld [vmem:[%s5367_s1 + $0x948] sm:$0xff]  ;;  %v3143_v41 = vpack.c.bf16 %v786_v33, %v782_v32  ;;  %v827_v32 = vld [vmem:[%s5367_s1 + $0xa78] sm:$0xff] }
  0x89   : > { %1873 = vmatprep.mubr.f32.mxu1 %v367_v38  ;;  %2870 = vmatprep.subr.bf16.mxu0 %v2869_v39  ;;  %v2887_v38 = vpack.c.bf16 %v784_v29, %v780_v28  ;;  %v791_v39 = vld [vmem:[%s5367_s1 + $0x958] sm:$0xff]  ;;  %v825_v28 = vld [vmem:[%s5367_s1 + $0xa68] sm:$0xff]  ;;  %v430_v29 = vld [vmem:[%s3822_s20 + $0x210] sm:$0xff] }
  0x8a   : > { %1230 = vmatmul.mubr.f32.vlgmr.msra.gmra.mrb[0].mxu0 %v366_v45  ;;  %3126 = vmatprep.subr.bf16.mxu1 %v3125_v42  ;;  %v788_v42 = vld [vmem:[%s5367_s1 + $0x940] sm:$0xff]  ;;  %v3145_v48 = vpack.c.bf16 %v795_v40, %v791_v39  ;;  %v826_v39 = vld [vmem:[%s5367_s1 + $0xa70] sm:$0xff] }
  0x8b   : > { %1874 = vmatmul.mubr.f32.vlgmr.msra.gmra.mrb[0].mxu1 %v366_v45  ;;  %2872 = vmatpush1.bf16.msra.mxu0 %v2871_v46  ;;  %v2889_v45 = vpack.c.bf16 %v793_v36, %v789_v35  ;;  %v790_v46 = vld [vmem:[%s5367_s1 + $0x950] sm:$0xff]  ;;  %v824_v35 = vld [vmem:[%s5367_s1 + $0xa60] sm:$0xff]  ;;  %v439_v36 = vld [vmem:[%s3822_s20 + $0x258] sm:$0xff] }
  0x8c   : > { %3128 = vmatpush1.bf16.msra.mxu1 %v3127_v49  ;;  %1235 = vmatprep.mubr.f32.mxu0 %v375_v52  ;;  %v797_v49 = vld [vmem:[%s5367_s1 + $0x988] sm:$0xff]  ;;  %v3147_v55 = vpack.c.bf16 %v794_v47, %v790_v46  ;;  %v835_v46 = vld [vmem:[%s5367_s1 + $0xab8] sm:$0xff] }
  0x8d   : > { %1879 = vmatprep.mubr.f32.mxu1 %v375_v52  ;;  %2874 = vmatprep.subr.bf16.mxu0 %v2873_v53  ;;  %v2891_v52 = vpack.c.bf16 %v792_v43, %v788_v42  ;;  %v799_v53 = vld [vmem:[%s5367_s1 + $0x998] sm:$0xff]  ;;  %v833_v42 = vld [vmem:[%s5367_s1 + $0xaa8] sm:$0xff]  ;;  %v438_v43 = vld [vmem:[%s3822_s20 + $0x250] sm:$0xff] }
  0x8e   : > { %1236 = vmatmul.mubr.f32.gmra.mrb[2].mxu0 %v374_v59  ;;  %3130 = vmatprep.subr.bf16.mxu1 %v3129_v56  ;;  %v796_v56 = vld [vmem:[%s5367_s1 + $0x980] sm:$0xff]  ;;  %v3149_v62 = vpack.c.bf16 %v803_v54, %v799_v53  ;;  %v834_v53 = vld [vmem:[%s5367_s1 + $0xab0] sm:$0xff] }
  0x8f   : > { %1880 = vmatmul.mubr.f32.gmra.mrb[2].mxu1 %v374_v59  ;;  %2876 = vmatpush1.bf16.msra.mxu0 %v2875_v60  ;;  %v2893_v59 = vpack.c.bf16 %v801_v50, %v797_v49  ;;  %v798_v60 = vld [vmem:[%s5367_s1 + $0x990] sm:$0xff]  ;;  %v832_v49 = vld [vmem:[%s5367_s1 + $0xaa0] sm:$0xff]  ;;  %v447_v50 = vld [vmem:[%s3822_s20 + $0x298] sm:$0xff] }
  0x90   : > { %3132 = vmatpush1.bf16.msra.mxu1 %v3131_v63  ;;  %1241 = vmatprep.mubr.f32.mxu0 %v383_v2  ;;  %v805_v63 = vld [vmem:[%s5367_s1 + $0x9c8] sm:$0xff]  ;;  %v3151_v5 = vpack.c.bf16 %v802_v61, %v798_v60  ;;  %v843_v60 = vld [vmem:[%s5367_s1 + $0xaf8] sm:$0xff] }
  0x91   : > { %1885 = vmatprep.mubr.f32.mxu1 %v383_v2  ;;  %2878 = vmatprep.subr.bf16.mxu0 %v2877_v3  ;;  %v2895_v2 = vpack.c.bf16 %v800_v57, %v796_v56  ;;  %v807_v3 = vld [vmem:[%s5367_s1 + $0x9d8] sm:$0xff]  ;;  %v841_v56 = vld [vmem:[%s5367_s1 + $0xae8] sm:$0xff]  ;;  %v446_v57 = vld [vmem:[%s3822_s20 + $0x290] sm:$0xff] }
  0x92   : > { %1242 = vmatmul.mubr.f32.gmra.mrb[4].mxu0 %v382_v9  ;;  %3134 = vmatprep.subr.bf16.mxu1 %v3133_v6  ;;  %v804_v6 = vld [vmem:[%s5367_s1 + $0x9c0] sm:$0xff]  ;;  %v3153_v12 = vpack.c.bf16 %v811_v4, %v807_v3  ;;  %v842_v3 = vld [vmem:[%s5367_s1 + $0xaf0] sm:$0xff] }
  0x93   : > { %1886 = vmatmul.mubr.f32.gmra.mrb[4].mxu1 %v382_v9  ;;  %2880 = vmatpush1.bf16.msra.mxu0 %v2879_v10  ;;  %v2897_v9 = vpack.c.bf16 %v809_v0, %v805_v63  ;;  %v806_v10 = vld [vmem:[%s5367_s1 + $0x9d0] sm:$0xff]  ;;  %v840_v63 = vld [vmem:[%s5367_s1 + $0xae0] sm:$0xff]  ;;  %v455_v0 = vld [vmem:[%s3822_s20 + $0x2d8] sm:$0xff] }
  0x94   : > { %3136 = vmatpush1.bf16.msra.mxu1 %v3135_v13  ;;  %1247 = vmatprep.mubr.f32.mxu0 %v391_v16  ;;  %v813_v13 = vld [vmem:[%s5367_s1 + $0xa08] sm:$0xff]  ;;  %v3155_v19 = vpack.c.bf16 %v810_v11, %v806_v10  ;;  %v851_v10 = vld [vmem:[%s5367_s1 + $0xb38] sm:$0xff] }
  0x95   : > { %1891 = vmatprep.mubr.f32.mxu1 %v391_v16  ;;  %2882 = vmatprep.subr.bf16.mxu0 %v2881_v17  ;;  %v2899_v16 = vpack.c.bf16 %v808_v7, %v804_v6  ;;  %v815_v17 = vld [vmem:[%s5367_s1 + $0xa18] sm:$0xff]  ;;  %v849_v6 = vld [vmem:[%s5367_s1 + $0xb28] sm:$0xff]  ;;  %v454_v7 = vld [vmem:[%s3822_s20 + $0x2d0] sm:$0xff] }
  0x96   : > { %1248 = vmatmul.mubr.f32.gmra.mrb[6].mxu0 %v390_v23  ;;  %3138 = vmatprep.subr.bf16.mxu1 %v3137_v20  ;;  %v812_v20 = vld [vmem:[%s5367_s1 + $0xa00] sm:$0xff]  ;;  %v3157_v26 = vpack.c.bf16 %v819_v18, %v815_v17  ;;  %v850_v17 = vld [vmem:[%s5367_s1 + $0xb30] sm:$0xff] }
  0x97   : > { %1892 = vmatmul.mubr.f32.gmra.mrb[6].mxu1 %v390_v23  ;;  %2884 = vmatpush1.bf16.msra.mxu0 %v2883_v24  ;;  %v2901_v23 = vpack.c.bf16 %v817_v14, %v813_v13  ;;  %v814_v24 = vld [vmem:[%s5367_s1 + $0xa10] sm:$0xff]  ;;  %v848_v13 = vld [vmem:[%s5367_s1 + $0xb20] sm:$0xff]  ;;  %v463_v14 = vld [vmem:[%s3822_s20 + $0x318] sm:$0xff] }
  0x98   : > { %3140 = vmatpush1.bf16.msra.mxu1 %v3139_v27  ;;  %1253 = vmatprep.mubr.f32.mxu0 %v399_v30  ;;  %v821_v27 = vld [vmem:[%s5367_s1 + $0xa48] sm:$0xff]  ;;  %v3159_v33 = vpack.c.bf16 %v818_v25, %v814_v24  ;;  %v859_v24 = vld [vmem:[%s5367_s1 + $0xb78] sm:$0xff] }
  0x99   : > { %1897 = vmatprep.mubr.f32.mxu1 %v399_v30  ;;  %2886 = vmatprep.subr.bf16.mxu0 %v2885_v31  ;;  %v2903_v30 = vpack.c.bf16 %v816_v21, %v812_v20  ;;  %v823_v31 = vld [vmem:[%s5367_s1 + $0xa58] sm:$0xff]  ;;  %v857_v20 = vld [vmem:[%s5367_s1 + $0xb68] sm:$0xff]  ;;  %v462_v21 = vld [vmem:[%s3822_s20 + $0x310] sm:$0xff] }
  0x9a   : > { %1254 = vmatmul.mubr.f32.gmra.mrb[8].mxu0 %v398_v37  ;;  %3142 = vmatprep.subr.bf16.mxu1 %v3141_v34  ;;  %v820_v34 = vld [vmem:[%s5367_s1 + $0xa40] sm:$0xff]  ;;  %v3161_v40 = vpack.c.bf16 %v827_v32, %v823_v31  ;;  %v858_v31 = vld [vmem:[%s5367_s1 + $0xb70] sm:$0xff] }
  0x9b   : > { %1898 = vmatmul.mubr.f32.gmra.mrb[8].mxu1 %v398_v37  ;;  %2888 = vmatpush1.bf16.msra.mxu0 %v2887_v38  ;;  %v2905_v37 = vpack.c.bf16 %v825_v28, %v821_v27  ;;  %v822_v38 = vld [vmem:[%s5367_s1 + $0xa50] sm:$0xff]  ;;  %v856_v27 = vld [vmem:[%s5367_s1 + $0xb60] sm:$0xff]  ;;  %v471_v28 = vld [vmem:[%s3822_s20 + $0x358] sm:$0xff] }
  0x9c   : > { %3144 = vmatpush1.bf16.msra.mxu1 %v3143_v41  ;;  %1259 = vmatprep.mubr.f32.mxu0 %v407_v44  ;;  %v829_v41 = vld [vmem:[%s5367_s1 + $0xa88] sm:$0xff]  ;;  %v3163_v47 = vpack.c.bf16 %v826_v39, %v822_v38  ;;  %v867_v38 = vld [vmem:[%s5367_s1 + $0xbb8] sm:$0xff] }
  0x9d   : > { %1903 = vmatprep.mubr.f32.mxu1 %v407_v44  ;;  %2890 = vmatprep.subr.bf16.mxu0 %v2889_v45  ;;  %v2907_v44 = vpack.c.bf16 %v824_v35, %v820_v34  ;;  %v831_v45 = vld [vmem:[%s5367_s1 + $0xa98] sm:$0xff]  ;;  %v865_v34 = vld [vmem:[%s5367_s1 + $0xba8] sm:$0xff]  ;;  %v470_v35 = vld [vmem:[%s3822_s20 + $0x350] sm:$0xff] }
  0x9e   : > { %1260 = vmatmul.mubr.f32.gmra.mrb[10].mxu0 %v406_v51  ;;  %3146 = vmatprep.subr.bf16.mxu1 %v3145_v48  ;;  %v828_v48 = vld [vmem:[%s5367_s1 + $0xa80] sm:$0xff]  ;;  %v3165_v54 = vpack.c.bf16 %v835_v46, %v831_v45  ;;  %v866_v45 = vld [vmem:[%s5367_s1 + $0xbb0] sm:$0xff] }
  0x9f   : > { %1904 = vmatmul.mubr.f32.gmra.mrb[10].mxu1 %v406_v51  ;;  %2892 = vmatpush1.bf16.msra.mxu0 %v2891_v52  ;;  %v2909_v51 = vpack.c.bf16 %v833_v42, %v829_v41  ;;  %v830_v52 = vld [vmem:[%s5367_s1 + $0xa90] sm:$0xff]  ;;  %v864_v41 = vld [vmem:[%s5367_s1 + $0xba0] sm:$0xff]  ;;  %v479_v42 = vld [vmem:[%s3822_s20 + $0x398] sm:$0xff] }
  0xa0   : > { %3148 = vmatpush1.bf16.msra.mxu1 %v3147_v55  ;;  %1265 = vmatprep.mubr.f32.mxu0 %v415_v58  ;;  %v837_v55 = vld [vmem:[%s5367_s1 + $0xac8] sm:$0xff]  ;;  %v3167_v61 = vpack.c.bf16 %v834_v53, %v830_v52  ;;  %v875_v52 = vld [vmem:[%s5367_s1 + $0xbf8] sm:$0xff] }
  0xa1   : > { %1909 = vmatprep.mubr.f32.mxu1 %v415_v58  ;;  %2894 = vmatprep.subr.bf16.mxu0 %v2893_v59  ;;  %v2911_v58 = vpack.c.bf16 %v832_v49, %v828_v48  ;;  %v839_v59 = vld [vmem:[%s5367_s1 + $0xad8] sm:$0xff]  ;;  %v873_v48 = vld [vmem:[%s5367_s1 + $0xbe8] sm:$0xff]  ;;  %v478_v49 = vld [vmem:[%s3822_s20 + $0x390] sm:$0xff] }
  0xa2   : > { %1266 = vmatmul.mubr.f32.gmra.mrb[12].mxu0 %v414_v1  ;;  %3150 = vmatprep.subr.bf16.mxu1 %v3149_v62  ;;  %v836_v62 = vld [vmem:[%s5367_s1 + $0xac0] sm:$0xff]  ;;  %v3169_v4 = vpack.c.bf16 %v843_v60, %v839_v59  ;;  %v874_v59 = vld [vmem:[%s5367_s1 + $0xbf0] sm:$0xff] }
  0xa3   : > { %1910 = vmatmul.mubr.f32.gmra.mrb[12].mxu1 %v414_v1  ;;  %2896 = vmatpush1.bf16.msra.mxu0 %v2895_v2  ;;  %v2913_v1 = vpack.c.bf16 %v841_v56, %v837_v55  ;;  %v838_v2 = vld [vmem:[%s5367_s1 + $0xad0] sm:$0xff]  ;;  %v872_v55 = vld [vmem:[%s5367_s1 + $0xbe0] sm:$0xff]  ;;  %v487_v56 = vld [vmem:[%s3822_s20 + $0x3d8] sm:$0xff] }
  0xa4   : > { %3152 = vmatpush1.bf16.msra.mxu1 %v3151_v5  ;;  %1271 = vmatprep.mubr.f32.mxu0 %v423_v8  ;;  %v845_v5 = vld [vmem:[%s5367_s1 + $0xb08] sm:$0xff]  ;;  %v3171_v11 = vpack.c.bf16 %v842_v3, %v838_v2  ;;  %v883_v2 = vld [vmem:[%s5367_s1 + $0xc38] sm:$0xff] }
  0xa5   : > { %1915 = vmatprep.mubr.f32.mxu1 %v423_v8  ;;  %2898 = vmatprep.subr.bf16.mxu0 %v2897_v9  ;;  %v2915_v8 = vpack.c.bf16 %v840_v63, %v836_v62  ;;  %v847_v9 = vld [vmem:[%s5367_s1 + $0xb18] sm:$0xff]  ;;  %v881_v62 = vld [vmem:[%s5367_s1 + $0xc28] sm:$0xff]  ;;  %v486_v63 = vld [vmem:[%s3822_s20 + $0x3d0] sm:$0xff] }
  0xa6   : > { %1272 = vmatmul.mubr.f32.gmra.mrb[14].mxu0 %v422_v15  ;;  %3154 = vmatprep.subr.bf16.mxu1 %v3153_v12  ;;  %v844_v12 = vld [vmem:[%s5367_s1 + $0xb00] sm:$0xff]  ;;  %v3173_v18 = vpack.c.bf16 %v851_v10, %v847_v9  ;;  %v882_v9 = vld [vmem:[%s5367_s1 + $0xc30] sm:$0xff] }
  0xa7   : > { %1916 = vmatmul.mubr.f32.gmra.mrb[14].mxu1 %v422_v15  ;;  %2900 = vmatpush1.bf16.msra.mxu0 %v2899_v16  ;;  %v2917_v15 = vpack.c.bf16 %v849_v6, %v845_v5  ;;  %v846_v16 = vld [vmem:[%s5367_s1 + $0xb10] sm:$0xff]  ;;  %v880_v5 = vld [vmem:[%s5367_s1 + $0xc20] sm:$0xff]  ;;  %v369_v6 = vld [vmem:[%s3822_s20 + $0x28] sm:$0xff] }
  0xa8   : > { %3156 = vmatpush1.bf16.msra.mxu1 %v3155_v19  ;;  %1277 = vmatprep.mubr.f32.mxu0 %v431_v22  ;;  %v853_v19 = vld [vmem:[%s5367_s1 + $0xb48] sm:$0xff]  ;;  %v3175_v25 = vpack.c.bf16 %v850_v17, %v846_v16  ;;  %v891_v16 = vld [vmem:[%s5367_s1 + $0xc78] sm:$0xff] }
  0xa9   : > { %1921 = vmatprep.mubr.f32.mxu1 %v431_v22  ;;  %2902 = vmatprep.subr.bf16.mxu0 %v2901_v23  ;;  %v2919_v22 = vpack.c.bf16 %v848_v13, %v844_v12  ;;  %v855_v23 = vld [vmem:[%s5367_s1 + $0xb58] sm:$0xff]  ;;  %v889_v12 = vld [vmem:[%s5367_s1 + $0xc68] sm:$0xff]  ;;  %v368_v13 = vld [vmem:[%s3822_s20 + $0x20] sm:$0xff] }
  0xaa   : > { %1278 = vmatmul.mubr.f32.gmra.mrb[16].mxu0 %v430_v29  ;;  %3158 = vmatprep.subr.bf16.mxu1 %v3157_v26  ;;  %v852_v26 = vld [vmem:[%s5367_s1 + $0xb40] sm:$0xff]  ;;  %v3177_v32 = vpack.c.bf16 %v859_v24, %v855_v23  ;;  %v890_v23 = vld [vmem:[%s5367_s1 + $0xc70] sm:$0xff] }
  0xab   : > { %1922 = vmatmul.mubr.f32.gmra.mrb[16].mxu1 %v430_v29  ;;  %2904 = vmatpush1.bf16.msra.mxu0 %v2903_v30  ;;  %v2921_v29 = vpack.c.bf16 %v857_v20, %v853_v19  ;;  %v854_v30 = vld [vmem:[%s5367_s1 + $0xb50] sm:$0xff]  ;;  %v888_v19 = vld [vmem:[%s5367_s1 + $0xc60] sm:$0xff]  ;;  %v377_v20 = vld [vmem:[%s3822_s20 + $0x68] sm:$0xff] }
  0xac   : > { %3160 = vmatpush1.bf16.msra.mxu1 %v3159_v33  ;;  %1283 = vmatprep.mubr.f32.mxu0 %v439_v36  ;;  %v861_v33 = vld [vmem:[%s5367_s1 + $0xb88] sm:$0xff]  ;;  %v3179_v39 = vpack.c.bf16 %v858_v31, %v854_v30  ;;  %v899_v30 = vld [vmem:[%s5367_s1 + $0xcb8] sm:$0xff] }
  0xad   : > { %1927 = vmatprep.mubr.f32.mxu1 %v439_v36  ;;  %2906 = vmatprep.subr.bf16.mxu0 %v2905_v37  ;;  %v2923_v36 = vpack.c.bf16 %v856_v27, %v852_v26  ;;  %v863_v37 = vld [vmem:[%s5367_s1 + $0xb98] sm:$0xff]  ;;  %v897_v26 = vld [vmem:[%s5367_s1 + $0xca8] sm:$0xff]  ;;  %v376_v27 = vld [vmem:[%s3822_s20 + $0x60] sm:$0xff] }
  0xae   : > { %1284 = vmatmul.mubr.f32.gmra.mrb[18].mxu0 %v438_v43  ;;  %3162 = vmatprep.subr.bf16.mxu1 %v3161_v40  ;;  %v860_v40 = vld [vmem:[%s5367_s1 + $0xb80] sm:$0xff]  ;;  %v3181_v46 = vpack.c.bf16 %v867_v38, %v863_v37  ;;  %v898_v37 = vld [vmem:[%s5367_s1 + $0xcb0] sm:$0xff] }
  0xaf   : > { %1928 = vmatmul.mubr.f32.gmra.mrb[18].mxu1 %v438_v43  ;;  %2908 = vmatpush1.bf16.msra.mxu0 %v2907_v44  ;;  %v2925_v43 = vpack.c.bf16 %v865_v34, %v861_v33  ;;  %v862_v44 = vld [vmem:[%s5367_s1 + $0xb90] sm:$0xff]  ;;  %v896_v33 = vld [vmem:[%s5367_s1 + $0xca0] sm:$0xff]  ;;  %v385_v34 = vld [vmem:[%s3822_s20 + $0xa8] sm:$0xff] }
  0xb0   : > { %3164 = vmatpush1.bf16.msra.mxu1 %v3163_v47  ;;  %1289 = vmatprep.mubr.f32.mxu0 %v447_v50  ;;  %v869_v47 = vld [vmem:[%s5367_s1 + $0xbc8] sm:$0xff]  ;;  %v3183_v53 = vpack.c.bf16 %v866_v45, %v862_v44  ;;  %v907_v44 = vld [vmem:[%s5367_s1 + $0xcf8] sm:$0xff] }
  0xb1   : > { %1933 = vmatprep.mubr.f32.mxu1 %v447_v50  ;;  %2910 = vmatprep.subr.bf16.mxu0 %v2909_v51  ;;  %v2927_v50 = vpack.c.bf16 %v864_v41, %v860_v40  ;;  %v871_v51 = vld [vmem:[%s5367_s1 + $0xbd8] sm:$0xff]  ;;  %v905_v40 = vld [vmem:[%s5367_s1 + $0xce8] sm:$0xff]  ;;  %v384_v41 = vld [vmem:[%s3822_s20 + $0xa0] sm:$0xff] }
  0xb2   : > { %1290 = vmatmul.mubr.f32.gmra.mrb[20].mxu0 %v446_v57  ;;  %3166 = vmatprep.subr.bf16.mxu1 %v3165_v54  ;;  %v868_v54 = vld [vmem:[%s5367_s1 + $0xbc0] sm:$0xff]  ;;  %v3185_v60 = vpack.c.bf16 %v875_v52, %v871_v51  ;;  %v906_v51 = vld [vmem:[%s5367_s1 + $0xcf0] sm:$0xff] }
  0xb3   : > { %1934 = vmatmul.mubr.f32.gmra.mrb[20].mxu1 %v446_v57  ;;  %2912 = vmatpush1.bf16.msra.mxu0 %v2911_v58  ;;  %v2929_v57 = vpack.c.bf16 %v873_v48, %v869_v47  ;;  %v870_v58 = vld [vmem:[%s5367_s1 + $0xbd0] sm:$0xff]  ;;  %v904_v47 = vld [vmem:[%s5367_s1 + $0xce0] sm:$0xff]  ;;  %v393_v48 = vld [vmem:[%s3822_s20 + $0xe8] sm:$0xff] }
  0xb4   : > { %3168 = vmatpush1.bf16.msra.mxu1 %v3167_v61  ;;  %1295 = vmatprep.mubr.f32.mxu0 %v455_v0  ;;  %v877_v61 = vld [vmem:[%s5367_s1 + $0xc08] sm:$0xff]  ;;  %v3187_v3 = vpack.c.bf16 %v874_v59, %v870_v58  ;;  %v915_v58 = vld [vmem:[%s5367_s1 + $0xd38] sm:$0xff] }
  0xb5   : > { %1939 = vmatprep.mubr.f32.mxu1 %v455_v0  ;;  %2914 = vmatprep.subr.bf16.mxu0 %v2913_v1  ;;  %v2931_v0 = vpack.c.bf16 %v872_v55, %v868_v54  ;;  %v879_v1 = vld [vmem:[%s5367_s1 + $0xc18] sm:$0xff]  ;;  %v913_v54 = vld [vmem:[%s5367_s1 + $0xd28] sm:$0xff]  ;;  %v392_v55 = vld [vmem:[%s3822_s20 + $0xe0] sm:$0xff] }
  0xb6   : > { %1296 = vmatmul.mubr.f32.gmra.mrb[22].mxu0 %v454_v7  ;;  %3170 = vmatprep.subr.bf16.mxu1 %v3169_v4  ;;  %v876_v4 = vld [vmem:[%s5367_s1 + $0xc00] sm:$0xff]  ;;  %v3189_v10 = vpack.c.bf16 %v883_v2, %v879_v1  ;;  %v914_v1 = vld [vmem:[%s5367_s1 + $0xd30] sm:$0xff] }
  0xb7   : > { %1940 = vmatmul.mubr.f32.gmra.mrb[22].mxu1 %v454_v7  ;;  %2916 = vmatpush1.bf16.msra.mxu0 %v2915_v8  ;;  %v2933_v7 = vpack.c.bf16 %v881_v62, %v877_v61  ;;  %v878_v8 = vld [vmem:[%s5367_s1 + $0xc10] sm:$0xff]  ;;  %v912_v61 = vld [vmem:[%s5367_s1 + $0xd20] sm:$0xff]  ;;  %v401_v62 = vld [vmem:[%s3822_s20 + $0x128] sm:$0xff] }
  0xb8   : > { %3172 = vmatpush1.bf16.msra.mxu1 %v3171_v11  ;;  %1301 = vmatprep.mubr.f32.mxu0 %v463_v14  ;;  %v885_v11 = vld [vmem:[%s5367_s1 + $0xc48] sm:$0xff]  ;;  %v3191_v17 = vpack.c.bf16 %v882_v9, %v878_v8  ;;  %v923_v8 = vld [vmem:[%s5367_s1 + $0xd78] sm:$0xff] }
  0xb9   : > { %1945 = vmatprep.mubr.f32.mxu1 %v463_v14  ;;  %2918 = vmatprep.subr.bf16.mxu0 %v2917_v15  ;;  %v2935_v14 = vpack.c.bf16 %v880_v5, %v876_v4  ;;  %v887_v15 = vld [vmem:[%s5367_s1 + $0xc58] sm:$0xff]  ;;  %v921_v4 = vld [vmem:[%s5367_s1 + $0xd68] sm:$0xff]  ;;  %v400_v5 = vld [vmem:[%s3822_s20 + $0x120] sm:$0xff] }
  0xba   : > { %1302 = vmatmul.mubr.f32.gmra.mrb[24].mxu0 %v462_v21  ;;  %3174 = vmatprep.subr.bf16.mxu1 %v3173_v18  ;;  %v884_v18 = vld [vmem:[%s5367_s1 + $0xc40] sm:$0xff]  ;;  %v3193_v24 = vpack.c.bf16 %v891_v16, %v887_v15  ;;  %v922_v15 = vld [vmem:[%s5367_s1 + $0xd70] sm:$0xff] }
  0xbb   : > { %1946 = vmatmul.mubr.f32.gmra.mrb[24].mxu1 %v462_v21  ;;  %2920 = vmatpush1.bf16.msra.mxu0 %v2919_v22  ;;  %v2937_v21 = vpack.c.bf16 %v889_v12, %v885_v11  ;;  %v886_v22 = vld [vmem:[%s5367_s1 + $0xc50] sm:$0xff]  ;;  %v920_v11 = vld [vmem:[%s5367_s1 + $0xd60] sm:$0xff]  ;;  %v409_v12 = vld [vmem:[%s3822_s20 + $0x168] sm:$0xff] }
  0xbc   : > { %3176 = vmatpush1.bf16.msra.mxu1 %v3175_v25  ;;  %1307 = vmatprep.mubr.f32.mxu0 %v471_v28  ;;  %v893_v25 = vld [vmem:[%s5367_s1 + $0xc88] sm:$0xff]  ;;  %v3195_v31 = vpack.c.bf16 %v890_v23, %v886_v22  ;;  %v931_v22 = vld [vmem:[%s5367_s1 + $0xdb8] sm:$0xff] }
  0xbd   : > { %1951 = vmatprep.mubr.f32.mxu1 %v471_v28  ;;  %2922 = vmatprep.subr.bf16.mxu0 %v2921_v29  ;;  %v2939_v28 = vpack.c.bf16 %v888_v19, %v884_v18  ;;  %v895_v29 = vld [vmem:[%s5367_s1 + $0xc98] sm:$0xff]  ;;  %v929_v18 = vld [vmem:[%s5367_s1 + $0xda8] sm:$0xff]  ;;  %v408_v19 = vld [vmem:[%s3822_s20 + $0x160] sm:$0xff] }
  0xbe   : > { %1308 = vmatmul.mubr.f32.gmra.mrb[26].mxu0 %v470_v35  ;;  %3178 = vmatprep.subr.bf16.mxu1 %v3177_v32  ;;  %v892_v32 = vld [vmem:[%s5367_s1 + $0xc80] sm:$0xff]  ;;  %v3197_v38 = vpack.c.bf16 %v899_v30, %v895_v29  ;;  %v930_v29 = vld [vmem:[%s5367_s1 + $0xdb0] sm:$0xff] }
  0xbf   : > { %1952 = vmatmul.mubr.f32.gmra.mrb[26].mxu1 %v470_v35  ;;  %2924 = vmatpush1.bf16.msra.mxu0 %v2923_v36  ;;  %v2941_v35 = vpack.c.bf16 %v897_v26, %v893_v25  ;;  %v894_v36 = vld [vmem:[%s5367_s1 + $0xc90] sm:$0xff]  ;;  %v928_v25 = vld [vmem:[%s5367_s1 + $0xda0] sm:$0xff]  ;;  %v417_v26 = vld [vmem:[%s3822_s20 + $0x1a8] sm:$0xff] }
  0xc0   : > { %3180 = vmatpush1.bf16.msra.mxu1 %v3179_v39  ;;  %1313 = vmatprep.mubr.f32.mxu0 %v479_v42  ;;  %v901_v39 = vld [vmem:[%s5367_s1 + $0xcc8] sm:$0xff]  ;;  %v3199_v45 = vpack.c.bf16 %v898_v37, %v894_v36  ;;  %v939_v36 = vld [vmem:[%s5367_s1 + $0xdf8] sm:$0xff] }
  0xc1   : > { %1957 = vmatprep.mubr.f32.mxu1 %v479_v42  ;;  %2926 = vmatprep.subr.bf16.mxu0 %v2925_v43  ;;  %v2943_v42 = vpack.c.bf16 %v896_v33, %v892_v32  ;;  %v903_v43 = vld [vmem:[%s5367_s1 + $0xcd8] sm:$0xff]  ;;  %v937_v32 = vld [vmem:[%s5367_s1 + $0xde8] sm:$0xff]  ;;  %v416_v33 = vld [vmem:[%s3822_s20 + $0x1a0] sm:$0xff] }
  0xc2   : > { %1314 = vmatmul.mubr.f32.gmra.mrb[28].mxu0 %v478_v49  ;;  %3182 = vmatprep.subr.bf16.mxu1 %v3181_v46  ;;  %v900_v46 = vld [vmem:[%s5367_s1 + $0xcc0] sm:$0xff]  ;;  %v3201_v52 = vpack.c.bf16 %v907_v44, %v903_v43  ;;  %v938_v43 = vld [vmem:[%s5367_s1 + $0xdf0] sm:$0xff] }
  0xc3   : > { %1958 = vmatmul.mubr.f32.gmra.mrb[28].mxu1 %v478_v49  ;;  %2928 = vmatpush1.bf16.msra.mxu0 %v2927_v50  ;;  %v2945_v49 = vpack.c.bf16 %v905_v40, %v901_v39  ;;  %v902_v50 = vld [vmem:[%s5367_s1 + $0xcd0] sm:$0xff]  ;;  %v936_v39 = vld [vmem:[%s5367_s1 + $0xde0] sm:$0xff]  ;;  %v425_v40 = vld [vmem:[%s3822_s20 + $0x1e8] sm:$0xff] }
  0xc4   : > { %3184 = vmatpush1.bf16.msra.mxu1 %v3183_v53  ;;  %1319 = vmatprep.mubr.f32.mxu0 %v487_v56  ;;  %v909_v53 = vld [vmem:[%s5367_s1 + $0xd08] sm:$0xff]  ;;  %v3203_v59 = vpack.c.bf16 %v906_v51, %v902_v50  ;;  %v947_v50 = vld [vmem:[%s5367_s1 + $0xe38] sm:$0xff] }
  0xc5   : > { %1963 = vmatprep.mubr.f32.mxu1 %v487_v56  ;;  %2930 = vmatprep.subr.bf16.mxu0 %v2929_v57  ;;  %v2947_v56 = vpack.c.bf16 %v904_v47, %v900_v46  ;;  %v911_v57 = vld [vmem:[%s5367_s1 + $0xd18] sm:$0xff]  ;;  %v945_v46 = vld [vmem:[%s5367_s1 + $0xe28] sm:$0xff]  ;;  %v424_v47 = vld [vmem:[%s3822_s20 + $0x1e0] sm:$0xff] }
  0xc6   : > { %1320 = vmatmul.mubr.f32.gmra.mrb[30].mxu0 %v486_v63  ;;  %3186 = vmatprep.subr.bf16.mxu1 %v3185_v60  ;;  %v908_v60 = vld [vmem:[%s5367_s1 + $0xd00] sm:$0xff]  ;;  %v3205_v2 = vpack.c.bf16 %v915_v58, %v911_v57  ;;  %v946_v57 = vld [vmem:[%s5367_s1 + $0xe30] sm:$0xff] }
  0xc7   : > { %1964 = vmatmul.mubr.f32.gmra.mrb[30].mxu1 %v486_v63  ;;  %2932 = vmatpush1.bf16.msra.mxu0 %v2931_v0  ;;  %v2949_v63 = vpack.c.bf16 %v913_v54, %v909_v53  ;;  %v910_v0 = vld [vmem:[%s5367_s1 + $0xd10] sm:$0xff]  ;;  %v944_v53 = vld [vmem:[%s5367_s1 + $0xe20] sm:$0xff]  ;;  %v433_v54 = vld [vmem:[%s3822_s20 + $0x228] sm:$0xff] }
  0xc8   : > { %3188 = vmatpush1.bf16.msra.mxu1 %v3187_v3  ;;  %1390 = vmatprep.mubr.f32.mxu0 %v369_v6  ;;  %v917_v3 = vld [vmem:[%s5367_s1 + $0xd48] sm:$0xff]  ;;  %v3207_v9 = vpack.c.bf16 %v914_v1, %v910_v0  ;;  %v955_v0 = vld [vmem:[%s5367_s1 + $0xe78] sm:$0xff] }
  0xc9   : > { %2034 = vmatprep.mubr.f32.mxu1 %v369_v6  ;;  %2934 = vmatprep.subr.bf16.mxu0 %v2933_v7  ;;  %v2951_v6 = vpack.c.bf16 %v912_v61, %v908_v60  ;;  %v919_v7 = vld [vmem:[%s5367_s1 + $0xd58] sm:$0xff]  ;;  %v953_v60 = vld [vmem:[%s5367_s1 + $0xe68] sm:$0xff]  ;;  %v432_v61 = vld [vmem:[%s3822_s20 + $0x220] sm:$0xff] }
  0xca   : > { %1391 = vmatmul.mubr.f32.vlgmr.msra.gmra.mrb[0].mxu0 %v368_v13  ;;  %3190 = vmatprep.subr.bf16.mxu1 %v3189_v10  ;;  %v916_v10 = vld [vmem:[%s5367_s1 + $0xd40] sm:$0xff]  ;;  %v3209_v16 = vpack.c.bf16 %v923_v8, %v919_v7  ;;  %v954_v7 = vld [vmem:[%s5367_s1 + $0xe70] sm:$0xff] }
  0xcb   : > { %2035 = vmatmul.mubr.f32.vlgmr.msra.gmra.mrb[0].mxu1 %v368_v13  ;;  %2936 = vmatpush1.bf16.msra.mxu0 %v2935_v14  ;;  %v2953_v13 = vpack.c.bf16 %v921_v4, %v917_v3  ;;  %v918_v14 = vld [vmem:[%s5367_s1 + $0xd50] sm:$0xff]  ;;  %v952_v3 = vld [vmem:[%s5367_s1 + $0xe60] sm:$0xff]  ;;  %v441_v4 = vld [vmem:[%s3822_s20 + $0x268] sm:$0xff] }
  0xcc   : > { %3192 = vmatpush1.bf16.msra.mxu1 %v3191_v17  ;;  %1396 = vmatprep.mubr.f32.mxu0 %v377_v20  ;;  %v925_v17 = vld [vmem:[%s5367_s1 + $0xd88] sm:$0xff]  ;;  %v3211_v23 = vpack.c.bf16 %v922_v15, %v918_v14  ;;  %v963_v14 = vld [vmem:[%s5367_s1 + $0xeb8] sm:$0xff] }
  0xcd   : > { %2040 = vmatprep.mubr.f32.mxu1 %v377_v20  ;;  %2938 = vmatprep.subr.bf16.mxu0 %v2937_v21  ;;  %v2955_v20 = vpack.c.bf16 %v920_v11, %v916_v10  ;;  %v927_v21 = vld [vmem:[%s5367_s1 + $0xd98] sm:$0xff]  ;;  %v961_v10 = vld [vmem:[%s5367_s1 + $0xea8] sm:$0xff]  ;;  %v440_v11 = vld [vmem:[%s3822_s20 + $0x260] sm:$0xff] }
  0xce   : > { %1397 = vmatmul.mubr.f32.gmra.mrb[2].mxu0 %v376_v27  ;;  %3194 = vmatprep.subr.bf16.mxu1 %v3193_v24  ;;  %v924_v24 = vld [vmem:[%s5367_s1 + $0xd80] sm:$0xff]  ;;  %v3213_v30 = vpack.c.bf16 %v931_v22, %v927_v21  ;;  %v962_v21 = vld [vmem:[%s5367_s1 + $0xeb0] sm:$0xff] }
  0xcf   : > { %2041 = vmatmul.mubr.f32.gmra.mrb[2].mxu1 %v376_v27  ;;  %2940 = vmatpush1.bf16.msra.mxu0 %v2939_v28  ;;  %v2957_v27 = vpack.c.bf16 %v929_v18, %v925_v17  ;;  %v926_v28 = vld [vmem:[%s5367_s1 + $0xd90] sm:$0xff]  ;;  %v960_v17 = vld [vmem:[%s5367_s1 + $0xea0] sm:$0xff]  ;;  %v449_v18 = vld [vmem:[%s3822_s20 + $0x2a8] sm:$0xff] }
  0xd0   : > { %3196 = vmatpush1.bf16.msra.mxu1 %v3195_v31  ;;  %1402 = vmatprep.mubr.f32.mxu0 %v385_v34  ;;  %v933_v31 = vld [vmem:[%s5367_s1 + $0xdc8] sm:$0xff]  ;;  %v3215_v37 = vpack.c.bf16 %v930_v29, %v926_v28  ;;  %v971_v28 = vld [vmem:[%s5367_s1 + $0xef8] sm:$0xff] }
  0xd1   : > { %2046 = vmatprep.mubr.f32.mxu1 %v385_v34  ;;  %2942 = vmatprep.subr.bf16.mxu0 %v2941_v35  ;;  %v2959_v34 = vpack.c.bf16 %v928_v25, %v924_v24  ;;  %v935_v35 = vld [vmem:[%s5367_s1 + $0xdd8] sm:$0xff]  ;;  %v969_v24 = vld [vmem:[%s5367_s1 + $0xee8] sm:$0xff]  ;;  %v448_v25 = vld [vmem:[%s3822_s20 + $0x2a0] sm:$0xff] }
  0xd2   : > { %1403 = vmatmul.mubr.f32.gmra.mrb[4].mxu0 %v384_v41  ;;  %3198 = vmatprep.subr.bf16.mxu1 %v3197_v38  ;;  %v932_v38 = vld [vmem:[%s5367_s1 + $0xdc0] sm:$0xff]  ;;  %v3217_v44 = vpack.c.bf16 %v939_v36, %v935_v35  ;;  %v970_v35 = vld [vmem:[%s5367_s1 + $0xef0] sm:$0xff] }
  0xd3   : > { %2047 = vmatmul.mubr.f32.gmra.mrb[4].mxu1 %v384_v41  ;;  %2944 = vmatpush1.bf16.msra.mxu0 %v2943_v42  ;;  %v2961_v41 = vpack.c.bf16 %v937_v32, %v933_v31  ;;  %v934_v42 = vld [vmem:[%s5367_s1 + $0xdd0] sm:$0xff]  ;;  %v968_v31 = vld [vmem:[%s5367_s1 + $0xee0] sm:$0xff]  ;;  %v457_v32 = vld [vmem:[%s3822_s20 + $0x2e8] sm:$0xff] }
  0xd4   : > { %3200 = vmatpush1.bf16.msra.mxu1 %v3199_v45  ;;  %1408 = vmatprep.mubr.f32.mxu0 %v393_v48  ;;  %v941_v45 = vld [vmem:[%s5367_s1 + $0xe08] sm:$0xff]  ;;  %v3219_v51 = vpack.c.bf16 %v938_v43, %v934_v42  ;;  %v979_v42 = vld [vmem:[%s5367_s1 + $0xf38] sm:$0xff] }
  0xd5   : > { %2052 = vmatprep.mubr.f32.mxu1 %v393_v48  ;;  %2946 = vmatprep.subr.bf16.mxu0 %v2945_v49  ;;  %v2963_v48 = vpack.c.bf16 %v936_v39, %v932_v38  ;;  %v943_v49 = vld [vmem:[%s5367_s1 + $0xe18] sm:$0xff]  ;;  %v977_v38 = vld [vmem:[%s5367_s1 + $0xf28] sm:$0xff]  ;;  %v456_v39 = vld [vmem:[%s3822_s20 + $0x2e0] sm:$0xff] }
  0xd6   : > { %1409 = vmatmul.mubr.f32.gmra.mrb[6].mxu0 %v392_v55  ;;  %3202 = vmatprep.subr.bf16.mxu1 %v3201_v52  ;;  %v940_v52 = vld [vmem:[%s5367_s1 + $0xe00] sm:$0xff]  ;;  %v3221_v58 = vpack.c.bf16 %v947_v50, %v943_v49  ;;  %v978_v49 = vld [vmem:[%s5367_s1 + $0xf30] sm:$0xff] }
  0xd7   : > { %2053 = vmatmul.mubr.f32.gmra.mrb[6].mxu1 %v392_v55  ;;  %2948 = vmatpush1.bf16.msra.mxu0 %v2947_v56  ;;  %v2965_v55 = vpack.c.bf16 %v945_v46, %v941_v45  ;;  %v942_v56 = vld [vmem:[%s5367_s1 + $0xe10] sm:$0xff]  ;;  %v976_v45 = vld [vmem:[%s5367_s1 + $0xf20] sm:$0xff]  ;;  %v465_v46 = vld [vmem:[%s3822_s20 + $0x328] sm:$0xff] }
  0xd8   : > { %3204 = vmatpush1.bf16.msra.mxu1 %v3203_v59  ;;  %1414 = vmatprep.mubr.f32.mxu0 %v401_v62  ;;  %v949_v59 = vld [vmem:[%s5367_s1 + $0xe48] sm:$0xff]  ;;  %v3223_v1 = vpack.c.bf16 %v946_v57, %v942_v56  ;;  %v987_v56 = vld [vmem:[%s5367_s1 + $0xf78] sm:$0xff] }
  0xd9   : > { %2058 = vmatprep.mubr.f32.mxu1 %v401_v62  ;;  %2950 = vmatprep.subr.bf16.mxu0 %v2949_v63  ;;  %v2967_v62 = vpack.c.bf16 %v944_v53, %v940_v52  ;;  %v951_v63 = vld [vmem:[%s5367_s1 + $0xe58] sm:$0xff]  ;;  %v985_v52 = vld [vmem:[%s5367_s1 + $0xf68] sm:$0xff]  ;;  %v464_v53 = vld [vmem:[%s3822_s20 + $0x320] sm:$0xff] }
  0xda   : > { %1415 = vmatmul.mubr.f32.gmra.mrb[8].mxu0 %v400_v5  ;;  %3206 = vmatprep.subr.bf16.mxu1 %v3205_v2  ;;  %v948_v2 = vld [vmem:[%s5367_s1 + $0xe40] sm:$0xff]  ;;  %v3225_v8 = vpack.c.bf16 %v955_v0, %v951_v63  ;;  %v986_v63 = vld [vmem:[%s5367_s1 + $0xf70] sm:$0xff] }
  0xdb   : > { %2059 = vmatmul.mubr.f32.gmra.mrb[8].mxu1 %v400_v5  ;;  %2952 = vmatpush1.bf16.msra.mxu0 %v2951_v6  ;;  %v2969_v5 = vpack.c.bf16 %v953_v60, %v949_v59  ;;  %v950_v6 = vld [vmem:[%s5367_s1 + $0xe50] sm:$0xff]  ;;  %v984_v59 = vld [vmem:[%s5367_s1 + $0xf60] sm:$0xff]  ;;  %v473_v60 = vld [vmem:[%s3822_s20 + $0x368] sm:$0xff] }
  0xdc   : > { %3208 = vmatpush1.bf16.msra.mxu1 %v3207_v9  ;;  %1420 = vmatprep.mubr.f32.mxu0 %v409_v12  ;;  %v957_v9 = vld [vmem:[%s5367_s1 + $0xe88] sm:$0xff]  ;;  %v3227_v15 = vpack.c.bf16 %v954_v7, %v950_v6  ;;  %v995_v6 = vld [vmem:[%s5367_s1 + $0xfb8] sm:$0xff] }
  0xdd   : > { %2064 = vmatprep.mubr.f32.mxu1 %v409_v12  ;;  %2954 = vmatprep.subr.bf16.mxu0 %v2953_v13  ;;  %v2971_v12 = vpack.c.bf16 %v952_v3, %v948_v2  ;;  %v959_v13 = vld [vmem:[%s5367_s1 + $0xe98] sm:$0xff]  ;;  %v993_v2 = vld [vmem:[%s5367_s1 + $0xfa8] sm:$0xff]  ;;  %v472_v3 = vld [vmem:[%s3822_s20 + $0x360] sm:$0xff] }
  0xde   : > { %1421 = vmatmul.mubr.f32.gmra.mrb[10].mxu0 %v408_v19  ;;  %3210 = vmatprep.subr.bf16.mxu1 %v3209_v16  ;;  %v956_v16 = vld [vmem:[%s5367_s1 + $0xe80] sm:$0xff]  ;;  %v3229_v22 = vpack.c.bf16 %v963_v14, %v959_v13  ;;  %v994_v13 = vld [vmem:[%s5367_s1 + $0xfb0] sm:$0xff] }
  0xdf   : > { %2065 = vmatmul.mubr.f32.gmra.mrb[10].mxu1 %v408_v19  ;;  %2956 = vmatpush1.bf16.msra.mxu0 %v2955_v20  ;;  %v2973_v19 = vpack.c.bf16 %v961_v10, %v957_v9  ;;  %v958_v20 = vld [vmem:[%s5367_s1 + $0xe90] sm:$0xff]  ;;  %v992_v9 = vld [vmem:[%s5367_s1 + $0xfa0] sm:$0xff]  ;;  %v481_v10 = vld [vmem:[%s3822_s20 + $0x3a8] sm:$0xff] }
  0xe0   : > { %3212 = vmatpush1.bf16.msra.mxu1 %v3211_v23  ;;  %1426 = vmatprep.mubr.f32.mxu0 %v417_v26  ;;  %v965_v23 = vld [vmem:[%s5367_s1 + $0xec8] sm:$0xff]  ;;  %v3231_v29 = vpack.c.bf16 %v962_v21, %v958_v20  ;;  %v1003_v20 = vld [vmem:[%s5367_s1 + $0xff8] sm:$0xff] }
  0xe1   : > { %2070 = vmatprep.mubr.f32.mxu1 %v417_v26  ;;  %2958 = vmatprep.subr.bf16.mxu0 %v2957_v27  ;;  %v2975_v26 = vpack.c.bf16 %v960_v17, %v956_v16  ;;  %v967_v27 = vld [vmem:[%s5367_s1 + $0xed8] sm:$0xff]  ;;  %v1001_v16 = vld [vmem:[%s5367_s1 + $0xfe8] sm:$0xff]  ;;  %v480_v17 = vld [vmem:[%s3822_s20 + $0x3a0] sm:$0xff] }
  0xe2   : > { %1427 = vmatmul.mubr.f32.gmra.mrb[12].mxu0 %v416_v33  ;;  %3214 = vmatprep.subr.bf16.mxu1 %v3213_v30  ;;  %v964_v30 = vld [vmem:[%s5367_s1 + $0xec0] sm:$0xff]  ;;  %v3233_v36 = vpack.c.bf16 %v971_v28, %v967_v27  ;;  %v1002_v27 = vld [vmem:[%s5367_s1 + $0xff0] sm:$0xff] }
  0xe3   : > { %2071 = vmatmul.mubr.f32.gmra.mrb[12].mxu1 %v416_v33  ;;  %2960 = vmatpush1.bf16.msra.mxu0 %v2959_v34  ;;  %v2977_v33 = vpack.c.bf16 %v969_v24, %v965_v23  ;;  %v966_v34 = vld [vmem:[%s5367_s1 + $0xed0] sm:$0xff]  ;;  %v1000_v23 = vld [vmem:[%s5367_s1 + $0xfe0] sm:$0xff]  ;;  %v489_v24 = vld [vmem:[%s3822_s20 + $0x3e8] sm:$0xff] }
  0xe4   : > { %3216 = vmatpush1.bf16.msra.mxu1 %v3215_v37  ;;  %1432 = vmatprep.mubr.f32.mxu0 %v425_v40  ;;  %v973_v37 = vld [vmem:[%s5367_s1 + $0xf08] sm:$0xff]  ;;  %v3235_v43 = vpack.c.bf16 %v970_v35, %v966_v34  ;;  %v379_v34 = vld [vmem:[%s3822_s20 + $0x78] sm:$0xff]  ;;  %v378_v35 = vld [vmem:[%s3822_s20 + $0x70] sm:$0xff] }
  0xe5   : > { %2076 = vmatprep.mubr.f32.mxu1 %v425_v40  ;;  %2962 = vmatprep.subr.bf16.mxu0 %v2961_v41  ;;  %v2979_v40 = vpack.c.bf16 %v968_v31, %v964_v30  ;;  %v975_v41 = vld [vmem:[%s5367_s1 + $0xf18] sm:$0xff] }
  0xe6   : > { %1433 = vmatmul.mubr.f32.gmra.mrb[14].mxu0 %v424_v47  ;;  %3218 = vmatprep.subr.bf16.mxu1 %v3217_v44  ;;  %v972_v44 = vld [vmem:[%s5367_s1 + $0xf00] sm:$0xff]  ;;  %v3237_v50 = vpack.c.bf16 %v979_v42, %v975_v41  ;;  %v402_v41 = vld [vmem:[%s3822_s20 + $0x130] sm:$0xff]  ;;  %v411_v42 = vld [vmem:[%s3822_s20 + $0x178] sm:$0xff] }
  0xe7   : > { %2077 = vmatmul.mubr.f32.gmra.mrb[14].mxu1 %v424_v47  ;;  %2964 = vmatpush1.bf16.msra.mxu0 %v2963_v48  ;;  %v2981_v47 = vpack.c.bf16 %v977_v38, %v973_v37  ;;  %v974_v48 = vld [vmem:[%s5367_s1 + $0xf10] sm:$0xff]  ;;  %v395_v38 = vld [vmem:[%s3822_s20 + $0xf8] sm:$0xff] }
  0xe8   : > { %3220 = vmatpush1.bf16.msra.mxu1 %v3219_v51  ;;  %1438 = vmatprep.mubr.f32.mxu0 %v433_v54  ;;  %v981_v51 = vld [vmem:[%s5367_s1 + $0xf48] sm:$0xff]  ;;  %v3239_v57 = vpack.c.bf16 %v978_v49, %v974_v48  ;;  %v386_v37 = vld [vmem:[%s3822_s20 + $0xb0] sm:$0xff]  ;;  %v435_v48 = vld [vmem:[%s3822_s20 + $0x238] sm:$0xff] }
  0xe9   : > { %2082 = vmatprep.mubr.f32.mxu1 %v433_v54  ;;  %2966 = vmatprep.subr.bf16.mxu0 %v2965_v55  ;;  %v2983_v54 = vpack.c.bf16 %v976_v45, %v972_v44  ;;  %v983_v55 = vld [vmem:[%s5367_s1 + $0xf58] sm:$0xff]  ;;  %v418_v45 = vld [vmem:[%s3822_s20 + $0x1b0] sm:$0xff] }
  0xea   : > { %1439 = vmatmul.mubr.f32.gmra.mrb[16].mxu0 %v432_v61  ;;  %3222 = vmatprep.subr.bf16.mxu1 %v3221_v58  ;;  %v980_v58 = vld [vmem:[%s5367_s1 + $0xf40] sm:$0xff]  ;;  %v3241_v0 = vpack.c.bf16 %v987_v56, %v983_v55  ;;  %v419_v44 = vld [vmem:[%s3822_s20 + $0x1b8] sm:$0xff]  ;;  %v434_v49 = vld [vmem:[%s3822_s20 + $0x230] sm:$0xff] }
  0xeb   : > { %2083 = vmatmul.mubr.f32.gmra.mrb[16].mxu1 %v432_v61  ;;  %2968 = vmatpush1.bf16.msra.mxu0 %v2967_v62  ;;  %v2985_v61 = vpack.c.bf16 %v985_v52, %v981_v51  ;;  %v982_v62 = vld [vmem:[%s5367_s1 + $0xf50] sm:$0xff]  ;;  %v451_v52 = vld [vmem:[%s3822_s20 + $0x2b8] sm:$0xff] }
  0xec   : > { %3224 = vmatpush1.bf16.msra.mxu1 %v3223_v1  ;;  %1444 = vmatprep.mubr.f32.mxu0 %v441_v4  ;;  %v989_v1 = vld [vmem:[%s5367_s1 + $0xf88] sm:$0xff]  ;;  %v3243_v7 = vpack.c.bf16 %v986_v63, %v982_v62  ;;  %v442_v51 = vld [vmem:[%s3822_s20 + $0x270] sm:$0xff]  ;;  %v467_v56 = vld [vmem:[%s3822_s20 + $0x338] sm:$0xff] }
  0xed   : > { %2088 = vmatprep.mubr.f32.mxu1 %v441_v4  ;;  %2970 = vmatprep.subr.bf16.mxu0 %v2969_v5  ;;  %v2987_v4 = vpack.c.bf16 %v984_v59, %v980_v58  ;;  %v991_v5 = vld [vmem:[%s5367_s1 + $0xf98] sm:$0xff]  ;;  %v458_v55 = vld [vmem:[%s3822_s20 + $0x2f0] sm:$0xff] }
  0xee   : > { %1445 = vmatmul.mubr.f32.gmra.mrb[18].mxu0 %v440_v11  ;;  %3226 = vmatprep.subr.bf16.mxu1 %v3225_v8  ;;  %v988_v8 = vld [vmem:[%s5367_s1 + $0xf80] sm:$0xff]  ;;  %v3245_v14 = vpack.c.bf16 %v995_v6, %v991_v5  ;;  %v475_v58 = vld [vmem:[%s3822_s20 + $0x378] sm:$0xff]  ;;  %v474_v59 = vld [vmem:[%s3822_s20 + $0x370] sm:$0xff] }
  0xef   : > { %2089 = vmatmul.mubr.f32.gmra.mrb[18].mxu1 %v440_v11  ;;  %2972 = vmatpush1.bf16.msra.mxu0 %v2971_v12  ;;  %v2989_v11 = vpack.c.bf16 %v993_v2, %v989_v1  ;;  %v990_v12 = vld [vmem:[%s5367_s1 + $0xf90] sm:$0xff]  ;;  %v491_v62 = vld [vmem:[%s3822_s20 + $0x3f8] sm:$0xff] }
  0xf0   : > { %3228 = vmatpush1.bf16.msra.mxu1 %v3227_v15  ;;  %1450 = vmatprep.mubr.f32.mxu0 %v449_v18  ;;  %v997_v15 = vld [vmem:[%s5367_s1 + $0xfc8] sm:$0xff]  ;;  %v3247_v21 = vpack.c.bf16 %v994_v13, %v990_v12  ;;  %v490_v63 = vld [vmem:[%s3822_s20 + $0x3f0] sm:$0xff] }
  0xf1   : > { %2094 = vmatprep.mubr.f32.mxu1 %v449_v18  ;;  %2974 = vmatprep.subr.bf16.mxu0 %v2973_v19  ;;  %v2991_v18 = vpack.c.bf16 %v992_v9, %v988_v8  ;;  %v999_v19 = vld [vmem:[%s5367_s1 + $0xfd8] sm:$0xff] }
  0xf2   : > { %1451 = vmatmul.mubr.f32.gmra.mrb[20].mxu0 %v448_v25  ;;  %3230 = vmatprep.subr.bf16.mxu1 %v3229_v22  ;;  %v996_v22 = vld [vmem:[%s5367_s1 + $0xfc0] sm:$0xff]  ;;  %v3249_v28 = vpack.c.bf16 %v1003_v20, %v999_v19 }
  0xf3   : > { %2095 = vmatmul.mubr.f32.gmra.mrb[20].mxu1 %v448_v25  ;;  %2976 = vmatpush1.bf16.msra.mxu0 %v2975_v26  ;;  %v2993_v25 = vpack.c.bf16 %v1001_v16, %v997_v15  ;;  %v998_v26 = vld [vmem:[%s5367_s1 + $0xfd0] sm:$0xff]  ;;  %v2995_v30 = vpack.c.bf16 %v1000_v23, %v996_v22 }
  0xf4   : > { %3232 = vmatpush1.bf16.msra.mxu1 %v3231_v29  ;;  %1456 = vmatprep.mubr.f32.mxu0 %v457_v32  ;;  %v488_v29 = vld [vmem:[%s3822_s20 + $0x3e0] sm:$0xff]  ;;  %v3251_v31 = vpack.c.bf16 %v1002_v27, %v998_v26 }
  0xf5   : > { %2100 = vmatprep.mubr.f32.mxu1 %v457_v32  ;;  %2978 = vmatprep.subr.bf16.mxu0 %v2977_v33  ;;  %v371_v32 = vld [vmem:[%s3822_s20 + $0x38] sm:$0xff]  ;;  %v370_v33 = vld [vmem:[%s3822_s20 + $0x30] sm:$0xff] }
  0xf6   : > { %1457 = vmatmul.mubr.f32.gmra.mrb[22].mxu0 %v456_v39  ;;  %3234 = vmatprep.subr.bf16.mxu1 %v3233_v36  ;;  %v387_v36 = vld [vmem:[%s3822_s20 + $0xb8] sm:$0xff] }
  0xf7   : > { %2101 = vmatmul.mubr.f32.gmra.mrb[22].mxu1 %v456_v39  ;;  %2980 = vmatpush1.bf16.msra.mxu0 %v2979_v40  ;;  %v394_v39 = vld [vmem:[%s3822_s20 + $0xf0] sm:$0xff]  ;;  %v403_v40 = vld [vmem:[%s3822_s20 + $0x138] sm:$0xff] }
  0xf8   : > { %3236 = vmatpush1.bf16.msra.mxu1 %v3235_v43  ;;  %1462 = vmatprep.mubr.f32.mxu0 %v465_v46  ;;  %v410_v43 = vld [vmem:[%s3822_s20 + $0x170] sm:$0xff] }
  0xf9   : > { %2106 = vmatprep.mubr.f32.mxu1 %v465_v46  ;;  %2982 = vmatprep.subr.bf16.mxu0 %v2981_v47  ;;  %v427_v46 = vld [vmem:[%s3822_s20 + $0x1f8] sm:$0xff]  ;;  %v426_v47 = vld [vmem:[%s3822_s20 + $0x1f0] sm:$0xff] }
  0xfa   : > { %1463 = vmatmul.mubr.f32.gmra.mrb[24].mxu0 %v464_v53  ;;  %3238 = vmatprep.subr.bf16.mxu1 %v3237_v50  ;;  %v443_v50 = vld [vmem:[%s3822_s20 + $0x278] sm:$0xff] }
  0xfb   : > { %2107 = vmatmul.mubr.f32.gmra.mrb[24].mxu1 %v464_v53  ;;  %2984 = vmatpush1.bf16.msra.mxu0 %v2983_v54  ;;  %v450_v53 = vld [vmem:[%s3822_s20 + $0x2b0] sm:$0xff]  ;;  %v459_v54 = vld [vmem:[%s3822_s20 + $0x2f8] sm:$0xff] }
  0xfc   : > { %3240 = vmatpush1.bf16.msra.mxu1 %v3239_v57  ;;  %1468 = vmatprep.mubr.f32.mxu0 %v473_v60  ;;  %v466_v57 = vld [vmem:[%s3822_s20 + $0x330] sm:$0xff] }
  0xfd   : > { %2112 = vmatprep.mubr.f32.mxu1 %v473_v60  ;;  %2986 = vmatprep.subr.bf16.mxu0 %v2985_v61  ;;  %v483_v60 = vld [vmem:[%s3822_s20 + $0x3b8] sm:$0xff]  ;;  %v482_v61 = vld [vmem:[%s3822_s20 + $0x3b0] sm:$0xff] }
  0xfe   : > { %1469 = vmatmul.mubr.f32.gmra.mrb[26].mxu0 %v472_v3  ;;  %3242 = vmatprep.subr.bf16.mxu1 %v3241_v0  ;;  %v2489_v0 = vlaneseq }
  0xff   : > { %2113 = vmatmul.mubr.f32.gmra.mrb[26].mxu1 %v472_v3  ;;  %2988 = vmatpush1.bf16.msra.mxu0 %v2987_v4  ;;  %v2487_v3 = vld [vmem:[%s5368_s2] sm:$0xf] }
 0x100   : > { %3244 = vmatpush1.bf16.msra.mxu1 %v3243_v7  ;;  %1474 = vmatprep.mubr.f32.mxu0 %v481_v10  ;;  %v2490_v1 = vshrl.u32 %v2489_v0, 7 }
 0x101   : > { %2118 = vmatprep.mubr.f32.mxu1 %v481_v10  ;;  %2990 = vmatprep.subr.bf16.mxu0 %v2989_v11 }
 0x102   : > { %1475 = vmatmul.mubr.f32.gmra.mrb[28].mxu0 %v480_v17  ;;  %3246 = vmatprep.subr.bf16.mxu1 %v3245_v14  ;;  %v2491_v2 = vsub.s32 0, %v2490_v1  ;;  %v2499_v4 = vsub.s32 2, %v2490_v1  ;;  %v2495_v5 = vsub.s32 1, %v2490_v1  ;;  %v2503_v6 = vsub.s32 3, %v2490_v1 }
 0x103   : > { %2119 = vmatmul.mubr.f32.gmra.mrb[28].mxu1 %v480_v17  ;;  %2992 = vmatpush1.bf16.msra.mxu0 %v2991_v18 }
 0x104   : > { %3248 = vmatpush1.bf16.msra.mxu1 %v3247_v21  ;;  %1480 = vmatprep.mubr.f32.mxu0 %v489_v24  ;;  %v5216_v7 = vrot.slane %v2487_v3, %v2491_v2  ;;  %v5218_v8 = vrot.slane %v2487_v3, %v2499_v4  ;;  %v5220_v9 = vrot.slane %v2487_v3, %v2495_v5 }
 0x105   : > { %2124 = vmatprep.mubr.f32.mxu1 %v489_v24  ;;  %2994 = vmatprep.subr.bf16.mxu0 %v2993_v25  ;;  %v5222_v10 = vrot.slane %v2487_v3, %v2503_v6 }
 0x106   : > { %1481 = vmatmul.mubr.f32.gmra.mrb[30].mxu0 %v488_v29  ;;  %3250 = vmatprep.subr.bf16.mxu1 %v3249_v28 }
 0x107   : > { %2125 = vmatmul.mubr.f32.gmra.mrb[30].mxu1 %v488_v29  ;;  %2996 = vmatpush1.bf16.msra.mxu0 %v2995_v30 }
 0x108   : > { %3252 = vmatpush1.bf16.msra.mxu1 %v3251_v31  ;;  %1551 = vmatprep.mubr.f32.mxu0 %v371_v32 }
 0x109   : > { %2195 = vmatprep.mubr.f32.mxu1 %v371_v32 }
 0x10a   : > { %1552 = vmatmul.mubr.f32.vlgmr.msra.gmra.mrb[0].mxu0 %v370_v33 }
 0x10b   : > { %2196 = vmatmul.mubr.f32.vlgmr.msra.gmra.mrb[0].mxu1 %v370_v33  ;;  %1557 = vmatprep.mubr.f32.mxu0 %v379_v34 }
 0x10c   : > { %2201 = vmatprep.mubr.f32.mxu1 %v379_v34 }
 0x10e   : > { %1558 = vmatmul.mubr.f32.gmra.mrb[2].mxu0 %v378_v35 }
 0x10f   : > { %2202 = vmatmul.mubr.f32.gmra.mrb[2].mxu1 %v378_v35  ;;  %1563 = vmatprep.mubr.f32.mxu0 %v387_v36 }
 0x110   : > { %2207 = vmatprep.mubr.f32.mxu1 %v387_v36 }
 0x112   : > { %1564 = vmatmul.mubr.f32.gmra.mrb[4].mxu0 %v386_v37 }
 0x113   : > { %2208 = vmatmul.mubr.f32.gmra.mrb[4].mxu1 %v386_v37  ;;  %1569 = vmatprep.mubr.f32.mxu0 %v395_v38 }
 0x114   : > { %2213 = vmatprep.mubr.f32.mxu1 %v395_v38 }
 0x116   : > { %1570 = vmatmul.mubr.f32.gmra.mrb[6].mxu0 %v394_v39 }
 0x117   : > { %2214 = vmatmul.mubr.f32.gmra.mrb[6].mxu1 %v394_v39  ;;  %1575 = vmatprep.mubr.f32.mxu0 %v403_v40 }
 0x118   : > { %2219 = vmatprep.mubr.f32.mxu1 %v403_v40 }
 0x11a   : > { %1576 = vmatmul.mubr.f32.gmra.mrb[8].mxu0 %v402_v41 }
 0x11b   : > { %2220 = vmatmul.mubr.f32.gmra.mrb[8].mxu1 %v402_v41  ;;  %1581 = vmatprep.mubr.f32.mxu0 %v411_v42 }
 0x11c   : > { %2225 = vmatprep.mubr.f32.mxu1 %v411_v42 }
 0x11e   : > { %1582 = vmatmul.mubr.f32.gmra.mrb[10].mxu0 %v410_v43 }
 0x11f   : > { %2226 = vmatmul.mubr.f32.gmra.mrb[10].mxu1 %v410_v43  ;;  %1587 = vmatprep.mubr.f32.mxu0 %v419_v44 }
 0x120   : > { %2231 = vmatprep.mubr.f32.mxu1 %v419_v44 }
 0x122   : > { %1588 = vmatmul.mubr.f32.gmra.mrb[12].mxu0 %v418_v45 }
 0x123   : > { %2232 = vmatmul.mubr.f32.gmra.mrb[12].mxu1 %v418_v45  ;;  %1593 = vmatprep.mubr.f32.mxu0 %v427_v46 }
 0x124   : > { %2237 = vmatprep.mubr.f32.mxu1 %v427_v46 }
 0x126   : > { %1594 = vmatmul.mubr.f32.gmra.mrb[14].mxu0 %v426_v47 }
 0x127   : > { %2238 = vmatmul.mubr.f32.gmra.mrb[14].mxu1 %v426_v47  ;;  %1599 = vmatprep.mubr.f32.mxu0 %v435_v48 }
 0x128   : > { %2243 = vmatprep.mubr.f32.mxu1 %v435_v48 }
 0x12a   : > { %1600 = vmatmul.mubr.f32.gmra.mrb[16].mxu0 %v434_v49 }
 0x12b   : > { %2244 = vmatmul.mubr.f32.gmra.mrb[16].mxu1 %v434_v49  ;;  %1605 = vmatprep.mubr.f32.mxu0 %v443_v50 }
 0x12c   : > { %2249 = vmatprep.mubr.f32.mxu1 %v443_v50 }
 0x12e   : > { %1606 = vmatmul.mubr.f32.gmra.mrb[18].mxu0 %v442_v51 }
 0x12f   : > { %2250 = vmatmul.mubr.f32.gmra.mrb[18].mxu1 %v442_v51  ;;  %1611 = vmatprep.mubr.f32.mxu0 %v451_v52 }
 0x130   : > { %2255 = vmatprep.mubr.f32.mxu1 %v451_v52 }
 0x132   : > { %1612 = vmatmul.mubr.f32.gmra.mrb[20].mxu0 %v450_v53 }
 0x133   : > { %2256 = vmatmul.mubr.f32.gmra.mrb[20].mxu1 %v450_v53  ;;  %1617 = vmatprep.mubr.f32.mxu0 %v459_v54 }
 0x134   : > { %2261 = vmatprep.mubr.f32.mxu1 %v459_v54 }
 0x136   : > { %1618 = vmatmul.mubr.f32.gmra.mrb[22].mxu0 %v458_v55 }
 0x137   : > { %2262 = vmatmul.mubr.f32.gmra.mrb[22].mxu1 %v458_v55  ;;  %1623 = vmatprep.mubr.f32.mxu0 %v467_v56 }
 0x138   : > { %2267 = vmatprep.mubr.f32.mxu1 %v467_v56 }
 0x13a   : > { %1624 = vmatmul.mubr.f32.gmra.mrb[24].mxu0 %v466_v57 }
 0x13b   : > { %2268 = vmatmul.mubr.f32.gmra.mrb[24].mxu1 %v466_v57  ;;  %1629 = vmatprep.mubr.f32.mxu0 %v475_v58 }
 0x13c   : > { %2273 = vmatprep.mubr.f32.mxu1 %v475_v58 }
 0x13e   : > { %1630 = vmatmul.mubr.f32.gmra.mrb[26].mxu0 %v474_v59 }
 0x13f   : > { %2274 = vmatmul.mubr.f32.gmra.mrb[26].mxu1 %v474_v59  ;;  %1635 = vmatprep.mubr.f32.mxu0 %v483_v60 }
 0x140   : > { %2279 = vmatprep.mubr.f32.mxu1 %v483_v60 }
 0x142   : > { %1636 = vmatmul.mubr.f32.gmra.mrb[28].mxu0 %v482_v61 }
 0x143   : > { %2280 = vmatmul.mubr.f32.gmra.mrb[28].mxu1 %v482_v61  ;;  %1641 = vmatprep.mubr.f32.mxu0 %v491_v62 }
 0x144   : > { %2285 = vmatprep.mubr.f32.mxu1 %v491_v62 }
 0x146   : > { %1642 = vmatmul.mubr.f32.gmra.mrb[30].mxu0 %v490_v63 }
 0x147   : > { %2286 = vmatmul.mubr.f32.gmra.mrb[30].mxu1 %v490_v63 }
 0x1dd   : > { %v1553_v11 = vpop.f32.mrb[0].mxu0 }
 0x1de   : > { %v2509_v12 = vadd.f32 %v5216_v7, %v1553_v11  ;;  %v2197_v13 = vpop.f32.mrb[0].mxu1  ;;  %v1555_v14 = vpop.f32.mrb[1].mxu0 }
 0x1df   : > { %v2511_v15 = vadd.f32 %v5218_v8, %v2197_v13  ;;  %v2510_v16 = vadd.f32 %v5220_v9, %v1555_v14  ;;  %v2199_v17 = vpop.f32.mrb[1].mxu1 }
 0x1e0   : > { %2573 = vst [vmem:[%s5227_s30] sm:$0xff] %v2509_v12  ;;  %v2512_v18 = vadd.f32 %v5222_v10, %v2199_v17 }
 0x1e1   : > { %2575 = vst [vmem:[%s5227_s30 + $0x10] sm:$0xff] %v2511_v15  ;;  %2574 = vst [vmem:[%s5227_s30 + $0x8] sm:$0xff] %v2510_v16  ;;  %v1559_v19 = vpop.f32.mrb[2].mxu0 }
 0x1e2   : > { %2576 = vst [vmem:[%s5227_s30 + $0x18] sm:$0xff] %v2512_v18  ;;  %v2513_v20 = vadd.f32 %v5216_v7, %v1559_v19  ;;  %v2203_v21 = vpop.f32.mrb[2].mxu1  ;;  %v1561_v22 = vpop.f32.mrb[3].mxu0 }
 0x1e3   : > { %v2515_v23 = vadd.f32 %v5218_v8, %v2203_v21  ;;  %v2514_v24 = vadd.f32 %v5220_v9, %v1561_v22  ;;  %v2205_v25 = vpop.f32.mrb[3].mxu1 }
 0x1e4   : > { %2577 = vst [vmem:[%s5227_s30 + $0x20] sm:$0xff] %v2513_v20  ;;  %v2516_v26 = vadd.f32 %v5222_v10, %v2205_v25 }
 0x1e5   : > { %2579 = vst [vmem:[%s5227_s30 + $0x30] sm:$0xff] %v2515_v23  ;;  %2578 = vst [vmem:[%s5227_s30 + $0x28] sm:$0xff] %v2514_v24  ;;  %v1565_v27 = vpop.f32.mrb[4].mxu0 }
 0x1e6   : > { %2580 = vst [vmem:[%s5227_s30 + $0x38] sm:$0xff] %v2516_v26  ;;  %v2517_v28 = vadd.f32 %v5216_v7, %v1565_v27  ;;  %v2209_v29 = vpop.f32.mrb[4].mxu1  ;;  %v1567_v30 = vpop.f32.mrb[5].mxu0 }
 0x1e7   : > { %v2519_v31 = vadd.f32 %v5218_v8, %v2209_v29  ;;  %v2518_v32 = vadd.f32 %v5220_v9, %v1567_v30  ;;  %v2211_v33 = vpop.f32.mrb[5].mxu1 }
 0x1e8   : > { %2581 = vst [vmem:[%s5227_s30 + $0x40] sm:$0xff] %v2517_v28  ;;  %v2520_v34 = vadd.f32 %v5222_v10, %v2211_v33 }
 0x1e9   : > { %2583 = vst [vmem:[%s5227_s30 + $0x50] sm:$0xff] %v2519_v31  ;;  %2582 = vst [vmem:[%s5227_s30 + $0x48] sm:$0xff] %v2518_v32  ;;  %v1571_v35 = vpop.f32.mrb[6].mxu0 }
 0x1ea   : > { %2584 = vst [vmem:[%s5227_s30 + $0x58] sm:$0xff] %v2520_v34  ;;  %v2521_v36 = vadd.f32 %v5216_v7, %v1571_v35  ;;  %v2215_v37 = vpop.f32.mrb[6].mxu1  ;;  %v1573_v38 = vpop.f32.mrb[7].mxu0 }
 0x1eb   : > { %v2523_v39 = vadd.f32 %v5218_v8, %v2215_v37  ;;  %v2522_v40 = vadd.f32 %v5220_v9, %v1573_v38  ;;  %v2217_v41 = vpop.f32.mrb[7].mxu1 }
 0x1ec   : > { %2585 = vst [vmem:[%s5227_s30 + $0x60] sm:$0xff] %v2521_v36  ;;  %v2524_v42 = vadd.f32 %v5222_v10, %v2217_v41 }
 0x1ed   : > { %2587 = vst [vmem:[%s5227_s30 + $0x70] sm:$0xff] %v2523_v39  ;;  %2586 = vst [vmem:[%s5227_s30 + $0x68] sm:$0xff] %v2522_v40  ;;  %v1577_v43 = vpop.f32.mrb[8].mxu0 }
 0x1ee   : > { %2588 = vst [vmem:[%s5227_s30 + $0x78] sm:$0xff] %v2524_v42  ;;  %v2525_v44 = vadd.f32 %v5216_v7, %v1577_v43  ;;  %v2221_v45 = vpop.f32.mrb[8].mxu1  ;;  %v1579_v46 = vpop.f32.mrb[9].mxu0 }
 0x1ef   : > { %v2527_v47 = vadd.f32 %v5218_v8, %v2221_v45  ;;  %v2526_v48 = vadd.f32 %v5220_v9, %v1579_v46  ;;  %v2223_v49 = vpop.f32.mrb[9].mxu1 }
 0x1f0   : > { %2589 = vst [vmem:[%s5227_s30 + $0x80] sm:$0xff] %v2525_v44  ;;  %v2528_v50 = vadd.f32 %v5222_v10, %v2223_v49 }
 0x1f1   : > { %2591 = vst [vmem:[%s5227_s30 + $0x90] sm:$0xff] %v2527_v47  ;;  %2590 = vst [vmem:[%s5227_s30 + $0x88] sm:$0xff] %v2526_v48  ;;  %v1583_v51 = vpop.f32.mrb[10].mxu0 }
 0x1f2   : > { %2592 = vst [vmem:[%s5227_s30 + $0x98] sm:$0xff] %v2528_v50  ;;  %v2529_v52 = vadd.f32 %v5216_v7, %v1583_v51  ;;  %v2227_v53 = vpop.f32.mrb[10].mxu1  ;;  %v1585_v54 = vpop.f32.mrb[11].mxu0 }
 0x1f3   : > { %v2531_v55 = vadd.f32 %v5218_v8, %v2227_v53  ;;  %v2530_v56 = vadd.f32 %v5220_v9, %v1585_v54  ;;  %v2229_v57 = vpop.f32.mrb[11].mxu1 }
 0x1f4   : > { %2593 = vst [vmem:[%s5227_s30 + $0xa0] sm:$0xff] %v2529_v52  ;;  %v2532_v58 = vadd.f32 %v5222_v10, %v2229_v57 }
 0x1f5   : > { %2595 = vst [vmem:[%s5227_s30 + $0xb0] sm:$0xff] %v2531_v55  ;;  %2594 = vst [vmem:[%s5227_s30 + $0xa8] sm:$0xff] %v2530_v56  ;;  %v1589_v59 = vpop.f32.mrb[12].mxu0 }
 0x1f6   : > { %2596 = vst [vmem:[%s5227_s30 + $0xb8] sm:$0xff] %v2532_v58  ;;  %v2533_v60 = vadd.f32 %v5216_v7, %v1589_v59  ;;  %v2233_v61 = vpop.f32.mrb[12].mxu1  ;;  %v1591_v62 = vpop.f32.mrb[13].mxu0 }
 0x1f7   : > { %v2535_v63 = vadd.f32 %v5218_v8, %v2233_v61  ;;  %v2534_v0 = vadd.f32 %v5220_v9, %v1591_v62  ;;  %v2235_v1 = vpop.f32.mrb[13].mxu1 }
 0x1f8   : > { %2597 = vst [vmem:[%s5227_s30 + $0xc0] sm:$0xff] %v2533_v60  ;;  %v2536_v2 = vadd.f32 %v5222_v10, %v2235_v1 }
 0x1f9   : > { %2599 = vst [vmem:[%s5227_s30 + $0xd0] sm:$0xff] %v2535_v63  ;;  %2598 = vst [vmem:[%s5227_s30 + $0xc8] sm:$0xff] %v2534_v0  ;;  %v1595_v3 = vpop.f32.mrb[14].mxu0 }
 0x1fa   : > { %2600 = vst [vmem:[%s5227_s30 + $0xd8] sm:$0xff] %v2536_v2  ;;  %v2537_v4 = vadd.f32 %v5216_v7, %v1595_v3  ;;  %v2239_v5 = vpop.f32.mrb[14].mxu1  ;;  %v1597_v6 = vpop.f32.mrb[15].mxu0 }
 0x1fb   : > { %v2539_v11 = vadd.f32 %v5218_v8, %v2239_v5  ;;  %v2538_v12 = vadd.f32 %v5220_v9, %v1597_v6  ;;  %v2241_v13 = vpop.f32.mrb[15].mxu1 }
 0x1fc   : > { %2601 = vst [vmem:[%s5227_s30 + $0xe0] sm:$0xff] %v2537_v4  ;;  %v2540_v14 = vadd.f32 %v5222_v10, %v2241_v13 }
 0x1fd   : > { %2603 = vst [vmem:[%s5227_s30 + $0xf0] sm:$0xff] %v2539_v11  ;;  %2602 = vst [vmem:[%s5227_s30 + $0xe8] sm:$0xff] %v2538_v12  ;;  %v1601_v15 = vpop.f32.mrb[16].mxu0 }
 0x1fe   : > { %2604 = vst [vmem:[%s5227_s30 + $0xf8] sm:$0xff] %v2540_v14  ;;  %v2541_v16 = vadd.f32 %v5216_v7, %v1601_v15  ;;  %v2245_v17 = vpop.f32.mrb[16].mxu1  ;;  %v1603_v18 = vpop.f32.mrb[17].mxu0 }
 0x1ff   : > { %v2543_v19 = vadd.f32 %v5218_v8, %v2245_v17  ;;  %v2542_v20 = vadd.f32 %v5220_v9, %v1603_v18  ;;  %v2247_v21 = vpop.f32.mrb[17].mxu1 }
 0x200   : > { %2605 = vst [vmem:[%s5227_s30 + $0x100] sm:$0xff] %v2541_v16  ;;  %v2544_v22 = vadd.f32 %v5222_v10, %v2247_v21 }
 0x201   : > { %2607 = vst [vmem:[%s5227_s30 + $0x110] sm:$0xff] %v2543_v19  ;;  %2606 = vst [vmem:[%s5227_s30 + $0x108] sm:$0xff] %v2542_v20  ;;  %v1607_v23 = vpop.f32.mrb[18].mxu0 }
 0x202   : > { %2608 = vst [vmem:[%s5227_s30 + $0x118] sm:$0xff] %v2544_v22  ;;  %v2545_v24 = vadd.f32 %v5216_v7, %v1607_v23  ;;  %v2251_v25 = vpop.f32.mrb[18].mxu1  ;;  %v1609_v26 = vpop.f32.mrb[19].mxu0 }
 0x203   : > { %v2547_v27 = vadd.f32 %v5218_v8, %v2251_v25  ;;  %v2546_v28 = vadd.f32 %v5220_v9, %v1609_v26  ;;  %v2253_v29 = vpop.f32.mrb[19].mxu1 }
 0x204   : > { %2609 = vst [vmem:[%s5227_s30 + $0x120] sm:$0xff] %v2545_v24  ;;  %v2548_v30 = vadd.f32 %v5222_v10, %v2253_v29 }
 0x205   : > { %2611 = vst [vmem:[%s5227_s30 + $0x130] sm:$0xff] %v2547_v27  ;;  %2610 = vst [vmem:[%s5227_s30 + $0x128] sm:$0xff] %v2546_v28  ;;  %v1613_v31 = vpop.f32.mrb[20].mxu0 }
 0x206   : > { %2612 = vst [vmem:[%s5227_s30 + $0x138] sm:$0xff] %v2548_v30  ;;  %v2549_v32 = vadd.f32 %v5216_v7, %v1613_v31  ;;  %v2257_v33 = vpop.f32.mrb[20].mxu1  ;;  %v1615_v34 = vpop.f32.mrb[21].mxu0 }
 0x207   : > { %v2551_v35 = vadd.f32 %v5218_v8, %v2257_v33  ;;  %v2550_v36 = vadd.f32 %v5220_v9, %v1615_v34  ;;  %v2259_v37 = vpop.f32.mrb[21].mxu1 }
 0x208   : > { %2613 = vst [vmem:[%s5227_s30 + $0x140] sm:$0xff] %v2549_v32  ;;  %v2552_v38 = vadd.f32 %v5222_v10, %v2259_v37 }
 0x209   : > { %2615 = vst [vmem:[%s5227_s30 + $0x150] sm:$0xff] %v2551_v35  ;;  %2614 = vst [vmem:[%s5227_s30 + $0x148] sm:$0xff] %v2550_v36  ;;  %v1619_v39 = vpop.f32.mrb[22].mxu0 }
 0x20a   : > { %2616 = vst [vmem:[%s5227_s30 + $0x158] sm:$0xff] %v2552_v38  ;;  %v2553_v40 = vadd.f32 %v5216_v7, %v1619_v39  ;;  %v2263_v41 = vpop.f32.mrb[22].mxu1  ;;  %v1621_v42 = vpop.f32.mrb[23].mxu0 }
 0x20b   : > { %v2555_v43 = vadd.f32 %v5218_v8, %v2263_v41  ;;  %v2554_v44 = vadd.f32 %v5220_v9, %v1621_v42  ;;  %v2265_v45 = vpop.f32.mrb[23].mxu1 }
 0x20c   : > { %2617 = vst [vmem:[%s5227_s30 + $0x160] sm:$0xff] %v2553_v40  ;;  %v2556_v46 = vadd.f32 %v5222_v10, %v2265_v45 }
 0x20d   : > { %2619 = vst [vmem:[%s5227_s30 + $0x170] sm:$0xff] %v2555_v43  ;;  %2618 = vst [vmem:[%s5227_s30 + $0x168] sm:$0xff] %v2554_v44  ;;  %v1625_v47 = vpop.f32.mrb[24].mxu0 }
 0x20e   : > { %2620 = vst [vmem:[%s5227_s30 + $0x178] sm:$0xff] %v2556_v46  ;;  %v2557_v48 = vadd.f32 %v5216_v7, %v1625_v47  ;;  %v2269_v49 = vpop.f32.mrb[24].mxu1  ;;  %v1627_v50 = vpop.f32.mrb[25].mxu0 }
 0x20f   : > { %v2559_v51 = vadd.f32 %v5218_v8, %v2269_v49  ;;  %v2558_v52 = vadd.f32 %v5220_v9, %v1627_v50  ;;  %v2271_v53 = vpop.f32.mrb[25].mxu1 }
 0x210   : > { %2621 = vst [vmem:[%s5227_s30 + $0x180] sm:$0xff] %v2557_v48  ;;  %v2560_v54 = vadd.f32 %v5222_v10, %v2271_v53 }
 0x211   : > { %2623 = vst [vmem:[%s5227_s30 + $0x190] sm:$0xff] %v2559_v51  ;;  %2622 = vst [vmem:[%s5227_s30 + $0x188] sm:$0xff] %v2558_v52  ;;  %v1631_v55 = vpop.f32.mrb[26].mxu0 }
 0x212   : > { %2624 = vst [vmem:[%s5227_s30 + $0x198] sm:$0xff] %v2560_v54  ;;  %v2561_v56 = vadd.f32 %v5216_v7, %v1631_v55  ;;  %v2275_v57 = vpop.f32.mrb[26].mxu1  ;;  %v1633_v58 = vpop.f32.mrb[27].mxu0 }
 0x213   : > { %v2563_v59 = vadd.f32 %v5218_v8, %v2275_v57  ;;  %v2562_v60 = vadd.f32 %v5220_v9, %v1633_v58  ;;  %v2277_v61 = vpop.f32.mrb[27].mxu1 }
 0x214   : > { %2625 = vst [vmem:[%s5227_s30 + $0x1a0] sm:$0xff] %v2561_v56  ;;  %v2564_v62 = vadd.f32 %v5222_v10, %v2277_v61 }
 0x215   : > { %2627 = vst [vmem:[%s5227_s30 + $0x1b0] sm:$0xff] %v2563_v59  ;;  %2626 = vst [vmem:[%s5227_s30 + $0x1a8] sm:$0xff] %v2562_v60  ;;  %v1637_v63 = vpop.f32.mrb[28].mxu0 }
 0x216   : > { %2628 = vst [vmem:[%s5227_s30 + $0x1b8] sm:$0xff] %v2564_v62  ;;  %v2565_v0 = vadd.f32 %v5216_v7, %v1637_v63  ;;  %v2281_v1 = vpop.f32.mrb[28].mxu1  ;;  %v1639_v2 = vpop.f32.mrb[29].mxu0 }
 0x217   : > { %v2567_v3 = vadd.f32 %v5218_v8, %v2281_v1  ;;  %v2566_v4 = vadd.f32 %v5220_v9, %v1639_v2  ;;  %v2283_v5 = vpop.f32.mrb[29].mxu1 }
 0x218   : > { %2629 = vst [vmem:[%s5227_s30 + $0x1c0] sm:$0xff] %v2565_v0  ;;  %v2568_v6 = vadd.f32 %v5222_v10, %v2283_v5 }
 0x219   : > { %2631 = vst [vmem:[%s5227_s30 + $0x1d0] sm:$0xff] %v2567_v3  ;;  %2630 = vst [vmem:[%s5227_s30 + $0x1c8] sm:$0xff] %v2566_v4  ;;  %v1643_v11 = vpop.f32.mrb[30].mxu0 }
 0x21a   : > { %2632 = vst [vmem:[%s5227_s30 + $0x1d8] sm:$0xff] %v2568_v6  ;;  %v2569_v12 = vadd.f32 %v5216_v7, %v1643_v11  ;;  %v2287_v13 = vpop.f32.mrb[30].mxu1  ;;  %v1645_v14 = vpop.f32.mrb[31].mxu0 }
 0x21b   : > { %v2571_v15 = vadd.f32 %v5218_v8, %v2287_v13  ;;  %v2570_v16 = vadd.f32 %v5220_v9, %v1645_v14  ;;  %v2289_v17 = vpop.f32.mrb[31].mxu1 }
 0x21c   : > { %2633 = vst [vmem:[%s5227_s30 + $0x1e0] sm:$0xff] %v2569_v12  ;;  %v2572_v18 = vadd.f32 %v5222_v10, %v2289_v17 }
 0x21d   : > { %2635 = vst [vmem:[%s5227_s30 + $0x1f0] sm:$0xff] %v2571_v15  ;;  %2634 = vst [vmem:[%s5227_s30 + $0x1e8] sm:$0xff] %v2570_v16 }
 0x21e   : > { %2636 = vst [vmem:[%s5227_s30 + $0x1f8] sm:$0xff] %v2572_v18 }
 0x21f PF: > { %s13_s14 = sadd.s32 1, %s3491_s14   ;;  %s5371_s12 = smov %s3487_s13 }
 0x220   : > { %p10_p5 = scmp.ge.s32.totalorder %s13_s14, 6   ;;  %s5372_s13 = smov %s5374_s15 }
 0x222   :  { %12 = sbr.rel (!%p10_p5) target bundleno = 2 (0x2), region = 73 }

</bundles_post_ra>
